<compile_context>
chip_gen: v5e
topology: v5e:2x2
jax: 0.10.0
libtpu: 0.0.40
codegen_flags: <defaults>
</compile_context>

<pallas_src>
import functools

import jax
import jax.numpy as jnp
from jax.experimental import pallas as pl
from jax.experimental.pallas import tpu as pltpu

# ----------------------------- config ---------------------------------------
N_POINTS = 2000     # number of gaussians (not a multiple of TN on purpose)
TN = 1024           # lane tile (points per step); keeps >=2 grid steps at N=2000
W = 64              # args.net_width
POSEBASE_PE = 4     # args.posebase_pe
SH_DIM = 16 * 3     # shs flattened per-point feature size

NUM_HEADS = 5
HEAD_OUT = [3, 3, 4, 1, SH_DIM]        # pos, scales, rotations, opacity, shs

# fused slab layout (feature axis, height SLAB):
#   [0:3]  xyz    [3:4] time   [4:7] scaling   [7:11] rotation
#   [11:12] opacity   [12:60] shs (16*3)   [60:64] zero pad
SLAB = 64
COL_XYZ, COL_T, COL_SCL, COL_ROT, COL_OPA, COL_SHS = 0, 3, 4, 7, 11, 12
HEAD_COL_OFF = [COL_XYZ, COL_SCL, COL_ROT, COL_OPA, COL_SHS]


# --------------------------- glue (pure JAX) ---------------------------------
def poc_fre(x, poc_buf):
    """Positional encoding, identical semantics to the PyTorch poc_fre."""
    emb = (x[..., None] * poc_buf).reshape(x.shape[:-1] + (-1,))
    return jnp.concatenate([x, jnp.sin(emb), jnp.cos(emb)], axis=-1)


# ------------------------------ kernel ---------------------------------------
def deform_kernel(
    slab_ref,                                     # (SLAB, TN) fused input (feature-major)
    w0t_ref, b0_ref, w1t_ref, b1_ref,             # trunk, transposed; w0t zero-padded cols
    wat_ref, bat_ref,                             # fused head hidden: (5W, W), (5W, 1)
    wbt_ref, bbt_ref,                             # fused head output: (SLAB, 5W), (SLAB, 1)
    out_ref,                                      # (SLAB, TN) fused output
):
    slab = slab_ref[...]                                              # [64, TN]

    # feature_out trunk: Linear(4->W) (padded to 64->W) -> ReLU -> Linear(W, W)
    h = jnp.dot(w0t_ref[...], slab, preferred_element_type=jnp.float32) + b0_ref[...]
    h = jnp.maximum(h, 0.0)
    h = jnp.dot(w1t_ref[...], h, preferred_element_type=jnp.float32) + b1_ref[...]

    # heads (fused): ReLU -> Linear(W, 5W) -> ReLU -> block-diag Linear(5W, SLAB)
    hr = jnp.maximum(h, 0.0)
    a = jnp.dot(wat_ref[...], hr, preferred_element_type=jnp.float32) + bat_ref[...]
    a = jnp.maximum(a, 0.0)                                            # [320, TN]
    delta = jnp.dot(wbt_ref[...], a, preferred_element_type=jnp.float32) + bbt_ref[...]

    # residual add; delta is zero on the time / pad rows, so they pass through
    out_ref[...] = slab + delta


# ------------------------------ wrapper ---------------------------------------
@functools.partial(jax.jit, static_argnames=())
def deformation_forward(xyz, scaling, rotation, opacity, shs, times_sel, fused):
    """Replicates Deformation.forward (no_grid=True path)."""
    n = xyz.shape[0]
    shs_flat = shs.reshape(n, SH_DIM)

    # Pack one feature-major, lane-dense slab (SLAB, N).  NOTE: on the no_grid
    # path poc_fre(xyz)[:, :3] is exactly xyz, so the PE is skipped entirely.
    slab = jnp.concatenate(
        [xyz.T, times_sel[:, :1].T, scaling.T, rotation.T, opacity.T, shs_flat.T,
         jnp.zeros((SLAB - (4 + 3 + 4 + 1 + SH_DIM), n), jnp.float32)],
        axis=0)                                                        # [64, N]

    n_pad = pl.cdiv(n, TN) * TN
    if n_pad != n:
        slab = jnp.pad(slab, ((0, 0), (0, n_pad - n)))

    param_in = (fused["w0t"], fused["b0"], fused["w1t"], fused["b1"],
                fused["wat"], fused["bat"], fused["wbt"], fused["bbt"])
    param_specs = [pl.BlockSpec(p.shape, lambda i: (0, 0)) for p in param_in]

    out = pl.pallas_call(
        deform_kernel,
        out_shape=jax.ShapeDtypeStruct((SLAB, n_pad), jnp.float32),
        grid_spec=pltpu.PrefetchScalarGridSpec(
            num_scalar_prefetch=0,
            grid=(n_pad // TN,),
            in_specs=[pl.BlockSpec((SLAB, TN), lambda i: (0, i))] + param_specs,
            out_specs=pl.BlockSpec((SLAB, TN), lambda i: (0, i)),
        ),
        compiler_params=pltpu.CompilerParams(
            dimension_semantics=("parallel",)),
        input_output_aliases={0: 0},   # output slab reuses input slab's HBM buffer
    )(slab, *param_in)

    out = out[:, :n]
    xyz_new = out[COL_XYZ:COL_XYZ + 3].T
    scaling_new = out[COL_SCL:COL_SCL + 3].T
    rotation_new = out[COL_ROT:COL_ROT + 4].T
    opacity_new = out[COL_OPA:COL_OPA + 1].T
    shs_new = out[COL_SHS:COL_SHS + SH_DIM].T.reshape(n, 16, 3)
    return xyz_new, scaling_new, rotation_new, opacity_new, shs_new


# --------------------------- parameter init -----------------------------------
def init_params(key):
    """Deterministic xavier-uniform-like init (synthetic; not a checkpoint)."""
    def linear(k, fan_in, fan_out):
        kw, kb = jax.random.split(k)
        limit = (6.0 / (fan_in + fan_out)) ** 0.5
        w = jax.random.uniform(kw, (fan_in, fan_out), jnp.float32, -limit, limit)
        blim = 1.0 / (fan_in ** 0.5)
        b = jax.random.uniform(kb, (1, fan_out), jnp.float32, -blim, blim)
        return w, b

    keys = jax.random.split(key, 2 + 2 * NUM_HEADS)
    p = {}
    p["pos_poc"] = jnp.asarray([2.0 ** i for i in range(POSEBASE_PE)], jnp.float32)
    # trunk: Linear(4, W), ReLU, Linear(W, W)   (defor_depth D = 2)
    p["w0"], p["b0"] = linear(keys[0], 4, W)
    p["w1"], p["b1"] = linear(keys[1], W, W)
    # head hidden layers Linear(W, W), stacked over the 5 heads
    wA, bA = [], []
    for h in range(NUM_HEADS):
        w, b = linear(keys[2 + h], W, W)
        wA.append(w)
        bA.append(b)
    p["wA"] = jnp.stack(wA)                 # [5, W, W]
    p["bA"] = jnp.stack(bA)                 # [5, 1, W]
    # head output layers Linear(W, out)
    names = ["p", "s", "r", "o", "sh"]
    for h, (nm, out) in enumerate(zip(names, HEAD_OUT)):
        w, b = linear(keys[2 + NUM_HEADS + h], W, out)
        p["w" + nm], p["b" + nm] = w, b
    return p


def fuse_params(p):
    """Build the kernel's fused, feature-major (pre-transposed) parameter forms."""
    f = {}
    # trunk layer 0 transposed: (W, SLAB); cols 0..3 read the xyz/time slab rows
    f["w0t"] = jnp.zeros((W, SLAB), jnp.float32).at[:, 0:4].set(p["w0"].T)
    f["b0"] = p["b0"].T                                   # (W, 1)
    f["w1t"] = p["w1"].T                                  # (W, W)
    f["b1"] = p["b1"].T                                   # (W, 1)
    # fused head hidden layers: (5W, W), (5W, 1); head h occupies rows [h*W:(h+1)*W]
    f["wat"] = jnp.transpose(p["wA"], (0, 2, 1)).reshape(NUM_HEADS * W, W)
    f["bat"] = p["bA"].reshape(NUM_HEADS * W, 1)
    # fused block-diagonal head output layers: (SLAB, 5W), (SLAB, 1)
    wbt = jnp.zeros((SLAB, NUM_HEADS * W), jnp.float32)
    bbt = jnp.zeros((SLAB, 1), jnp.float32)
    names = ["p", "s", "r", "o", "sh"]
    for h, (nm, out, off) in enumerate(zip(names, HEAD_OUT, HEAD_COL_OFF)):
        wbt = wbt.at[off:off + out, h * W:(h + 1) * W].set(p["w" + nm].T)
        bbt = bbt.at[off:off + out, :].set(p["b" + nm].T)
    f["wbt"], f["bbt"] = wbt, bbt

    # Guard (review concern): pass-through rows (time col, pad cols) must be
    # exactly zero in wbt/bbt so `slab + delta` leaves them unchanged.
    head_rows = set()
    for out, off in zip(HEAD_OUT, HEAD_COL_OFF):
        head_rows |= set(range(off, off + out))
    passthrough = sorted(set(range(SLAB)) - head_rows)
    assert passthrough == [COL_T] + list(range(60, SLAB)), "slab layout changed"
    pt = jnp.asarray(passthrough)
    assert not bool(jnp.any(f["wbt"][pt] != 0.0)), "wbt pass-through rows nonzero"
    assert not bool(jnp.any(f["bbt"][pt] != 0.0)), "bbt pass-through rows nonzero"
    return f


# ------------------------------ reference -------------------------------------
def reference_forward(xyz, scaling, rotation, opacity, shs, times_sel, params):
    xyz_emb = poc_fre(xyz, params["pos_poc"])
    x_in = jnp.concatenate([xyz_emb[:, :3], times_sel[:, :1]], axis=-1)
    h = x_in @ params["w0"] + params["b0"]
    h = jnp.maximum(h, 0.0) @ params["w1"] + params["b1"]
    hr = jnp.maximum(h, 0.0)

    def head(i, w, b):
        a = jnp.maximum(hr @ params["wA"][i] + params["bA"][i], 0.0)
        return a @ w + b

    dx = head(0, params["wp"], params["bp"])
    ds = head(1, params["ws"], params["bs"])
    dr = head(2, params["wr"], params["br"])
    do = head(3, params["wo"], params["bo"])
    dsh = head(4, params["wsh"], params["bsh"]).reshape(shs.shape[0], 16, 3)
    return (xyz + dx, scaling + ds, rotation + dr, opacity + do, shs + dsh)


# --------------------------------- main ----------------------------------------
if __name__ == "__main__":
    key = jax.random.PRNGKey(0)
    k_param, k_xyz, k_scl, k_rot, k_opa, k_shs, k_t = jax.random.split(key, 7)

    params = init_params(k_param)
    fused = fuse_params(params)

    xyz = jax.random.normal(k_xyz, (N_POINTS, 3), jnp.float32)
    scaling = jax.random.normal(k_scl, (N_POINTS, 3), jnp.float32)
    rotation = jax.random.normal(k_rot, (N_POINTS, 4), jnp.float32)
    opacity = jax.random.normal(k_opa, (N_POINTS, 1), jnp.float32)
    shs = jax.random.normal(k_shs, (N_POINTS, 16, 3), jnp.float32)
    times_sel = jax.random.uniform(k_t, (N_POINTS, 1), jnp.float32)

    outs = deformation_forward(xyz, scaling, rotation, opacity, shs, times_sel, fused)
    outs = jax.block_until_ready(outs)

    refs = reference_forward(xyz, scaling, rotation, opacity, shs, times_sel, params)
    for o, r in zip(outs, refs):
        assert o.shape == r.shape and o.dtype == r.dtype
        assert jnp.allclose(o, r, atol=1e-4, rtol=1e-4), "mismatch vs reference"

    print("KERNEL_OK")
</pallas_src>

<mosaic_0001>
module attributes {stable_mosaic.version = 11 : i64} {
  func.func @deform_kernel(%arg0: i32, %arg1: memref<64x1024xf32, #tpu.memory_space<vmem>>, %arg2: memref<64x64xf32, #tpu.memory_space<vmem>>, %arg3: memref<64x1xf32, #tpu.memory_space<vmem>>, %arg4: memref<64x64xf32, #tpu.memory_space<vmem>>, %arg5: memref<64x1xf32, #tpu.memory_space<vmem>>, %arg6: memref<320x64xf32, #tpu.memory_space<vmem>>, %arg7: memref<320x1xf32, #tpu.memory_space<vmem>>, %arg8: memref<64x320xf32, #tpu.memory_space<vmem>>, %arg9: memref<64x1xf32, #tpu.memory_space<vmem>>, %arg10: memref<64x1024xf32, #tpu.memory_space<vmem>>) attributes {dimension_semantics = [#tpu.dimension_semantics<parallel>], iteration_bounds = array<i64: 2>, scalar_prefetch = 0 : i64, scratch_operands = 0 : i64, tpu.core_type = #tpu.core_type<tc>, window_params = [{transform_indices = @transform_0, window_bounds = array<i64: 64, 1024>}, {pipeline_mode = #tpu.pipeline_mode<synchronous>, transform_indices = @transform_1, window_bounds = array<i64: 64, 64>}, {pipeline_mode = #tpu.pipeline_mode<synchronous>, transform_indices = @transform_2, window_bounds = array<i64: 64, 1>}, {pipeline_mode = #tpu.pipeline_mode<synchronous>, transform_indices = @transform_3, window_bounds = array<i64: 64, 64>}, {pipeline_mode = #tpu.pipeline_mode<synchronous>, transform_indices = @transform_4, window_bounds = array<i64: 64, 1>}, {pipeline_mode = #tpu.pipeline_mode<synchronous>, transform_indices = @transform_5, window_bounds = array<i64: 320, 64>}, {pipeline_mode = #tpu.pipeline_mode<synchronous>, transform_indices = @transform_6, window_bounds = array<i64: 320, 1>}, {pipeline_mode = #tpu.pipeline_mode<synchronous>, transform_indices = @transform_7, window_bounds = array<i64: 64, 320>}, {pipeline_mode = #tpu.pipeline_mode<synchronous>, transform_indices = @transform_8, window_bounds = array<i64: 64, 1>}, {transform_indices = @transform_9, window_bounds = array<i64: 64, 1024>}]} {
    %c0 = arith.constant 0 : index
    %c0_0 = arith.constant 0 : index
    %0 = vector.load %arg1[%c0, %c0_0] : memref<64x1024xf32, #tpu.memory_space<vmem>>, vector<64x1024xf32>
    %c0_1 = arith.constant 0 : index
    %c0_2 = arith.constant 0 : index
    %1 = vector.load %arg2[%c0_1, %c0_2] : memref<64x64xf32, #tpu.memory_space<vmem>>, vector<64x64xf32>
    %cst = arith.constant dense<0.000000e+00> : vector<64x1024xf32>
    %2 = tpu.matmul %1, %0, %cst {dimension_numbers = #tpu.dot_dimension_numbers<[1], [0], [0], [1], [0, 0, 1, 1], [], []>} : vector<64x64xf32>, vector<64x1024xf32>, vector<64x1024xf32> -> vector<64x1024xf32>
    %c0_3 = arith.constant 0 : index
    %c0_4 = arith.constant 0 : index
    %3 = vector.load %arg3[%c0_3, %c0_4] : memref<64x1xf32, #tpu.memory_space<vmem>>, vector<64x1xf32>
    %4 = vector.broadcast %3 : vector<64x1xf32> to vector<64x1024xf32>
    %5 = arith.addf %2, %4 : vector<64x1024xf32>
    %cst_5 = arith.constant 0.000000e+00 : f32
    %6 = vector.broadcast %cst_5 : f32 to vector<64x1024xf32>
    %7 = arith.maximumf %5, %6 : vector<64x1024xf32>
    %c0_6 = arith.constant 0 : index
    %c0_7 = arith.constant 0 : index
    %8 = vector.load %arg4[%c0_6, %c0_7] : memref<64x64xf32, #tpu.memory_space<vmem>>, vector<64x64xf32>
    %cst_8 = arith.constant dense<0.000000e+00> : vector<64x1024xf32>
    %9 = tpu.matmul %8, %7, %cst_8 {dimension_numbers = #tpu.dot_dimension_numbers<[1], [0], [0], [1], [0, 0, 1, 1], [], []>} : vector<64x64xf32>, vector<64x1024xf32>, vector<64x1024xf32> -> vector<64x1024xf32>
    %c0_9 = arith.constant 0 : index
    %c0_10 = arith.constant 0 : index
    %10 = vector.load %arg5[%c0_9, %c0_10] : memref<64x1xf32, #tpu.memory_space<vmem>>, vector<64x1xf32>
    %11 = vector.broadcast %10 : vector<64x1xf32> to vector<64x1024xf32>
    %12 = arith.addf %9, %11 : vector<64x1024xf32>
    %cst_11 = arith.constant 0.000000e+00 : f32
    %13 = vector.broadcast %cst_11 : f32 to vector<64x1024xf32>
    %14 = arith.maximumf %12, %13 : vector<64x1024xf32>
    %c0_12 = arith.constant 0 : index
    %c0_13 = arith.constant 0 : index
    %15 = vector.load %arg6[%c0_12, %c0_13] : memref<320x64xf32, #tpu.memory_space<vmem>>, vector<320x64xf32>
    %cst_14 = arith.constant dense<0.000000e+00> : vector<320x1024xf32>
    %16 = tpu.matmul %15, %14, %cst_14 {dimension_numbers = #tpu.dot_dimension_numbers<[1], [0], [0], [1], [0, 0, 1, 1], [], []>} : vector<320x64xf32>, vector<64x1024xf32>, vector<320x1024xf32> -> vector<320x1024xf32>
    %c0_15 = arith.constant 0 : index
    %c0_16 = arith.constant 0 : index
    %17 = vector.load %arg7[%c0_15, %c0_16] : memref<320x1xf32, #tpu.memory_space<vmem>>, vector<320x1xf32>
    %18 = vector.broadcast %17 : vector<320x1xf32> to vector<320x1024xf32>
    %19 = arith.addf %16, %18 : vector<320x1024xf32>
    %cst_17 = arith.constant 0.000000e+00 : f32
    %20 = vector.broadcast %cst_17 : f32 to vector<320x1024xf32>
    %21 = arith.maximumf %19, %20 : vector<320x1024xf32>
    %c0_18 = arith.constant 0 : index
    %c0_19 = arith.constant 0 : index
    %22 = vector.load %arg8[%c0_18, %c0_19] : memref<64x320xf32, #tpu.memory_space<vmem>>, vector<64x320xf32>
    %cst_20 = arith.constant dense<0.000000e+00> : vector<64x1024xf32>
    %23 = tpu.matmul %22, %21, %cst_20 {dimension_numbers = #tpu.dot_dimension_numbers<[1], [0], [0], [1], [0, 0, 1, 1], [], []>} : vector<64x320xf32>, vector<320x1024xf32>, vector<64x1024xf32> -> vector<64x1024xf32>
    %c0_21 = arith.constant 0 : index
    %c0_22 = arith.constant 0 : index
    %24 = vector.load %arg9[%c0_21, %c0_22] : memref<64x1xf32, #tpu.memory_space<vmem>>, vector<64x1xf32>
    %25 = vector.broadcast %24 : vector<64x1xf32> to vector<64x1024xf32>
    %26 = arith.addf %23, %25 : vector<64x1024xf32>
    %27 = arith.addf %0, %26 : vector<64x1024xf32>
    %c0_23 = arith.constant 0 : index
    %c0_24 = arith.constant 0 : index
    %28 = vector.load %arg10[%c0_23, %c0_24] : memref<64x1024xf32, #tpu.memory_space<vmem>>, vector<64x1024xf32>
    tpu.vector_store %arg10[%c0_23, %c0_24], %27 {strides = array<i32>} : memref<64x1024xf32, #tpu.memory_space<vmem>>, vector<64x1024xf32>,
    return
  }
  func.func @transform_0(%arg0: i32) -> (i32, i32) {
    %c0_i32 = arith.constant 0 : i32
    %c0_i32_0 = arith.constant 0 : i32
    return %c0_i32, %arg0 : i32, i32
  }
  func.func @transform_1(%arg0: i32) -> (i32, i32) {
    %c0_i32 = arith.constant 0 : i32
    %c0_i32_0 = arith.constant 0 : i32
    %c0_i32_1 = arith.constant 0 : i32
    return %c0_i32, %c0_i32_0 : i32, i32
  }
  func.func @transform_2(%arg0: i32) -> (i32, i32) {
    %c0_i32 = arith.constant 0 : i32
    %c0_i32_0 = arith.constant 0 : i32
    %c0_i32_1 = arith.constant 0 : i32
    return %c0_i32, %c0_i32_0 : i32, i32
  }
  func.func @transform_3(%arg0: i32) -> (i32, i32) {
    %c0_i32 = arith.constant 0 : i32
    %c0_i32_0 = arith.constant 0 : i32
    %c0_i32_1 = arith.constant 0 : i32
    return %c0_i32, %c0_i32_0 : i32, i32
  }
  func.func @transform_4(%arg0: i32) -> (i32, i32) {
    %c0_i32 = arith.constant 0 : i32
    %c0_i32_0 = arith.constant 0 : i32
    %c0_i32_1 = arith.constant 0 : i32
    return %c0_i32, %c0_i32_0 : i32, i32
  }
  func.func @transform_5(%arg0: i32) -> (i32, i32) {
    %c0_i32 = arith.constant 0 : i32
    %c0_i32_0 = arith.constant 0 : i32
    %c0_i32_1 = arith.constant 0 : i32
    return %c0_i32, %c0_i32_0 : i32, i32
  }
  func.func @transform_6(%arg0: i32) -> (i32, i32) {
    %c0_i32 = arith.constant 0 : i32
    %c0_i32_0 = arith.constant 0 : i32
    %c0_i32_1 = arith.constant 0 : i32
    return %c0_i32, %c0_i32_0 : i32, i32
  }
  func.func @transform_7(%arg0: i32) -> (i32, i32) {
    %c0_i32 = arith.constant 0 : i32
    %c0_i32_0 = arith.constant 0 : i32
    %c0_i32_1 = arith.constant 0 : i32
    return %c0_i32, %c0_i32_0 : i32, i32
  }
  func.func @transform_8(%arg0: i32) -> (i32, i32) {
    %c0_i32 = arith.constant 0 : i32
    %c0_i32_0 = arith.constant 0 : i32
    %c0_i32_1 = arith.constant 0 : i32
    return %c0_i32, %c0_i32_0 : i32, i32
  }
  func.func @transform_9(%arg0: i32) -> (i32, i32) {
    %c0_i32 = arith.constant 0 : i32
    %c0_i32_0 = arith.constant 0 : i32
    return %c0_i32, %arg0 : i32, i32
  }
}

</mosaic_0001>

<bundles_post_ra>
// kernel: deformation_forward.1
= control target key start
LH: loop header
LB: loop body
LE: loop exit
PB: predicated region body
PF: predicated region fallthrough
CT: control target
= control target key end

     0   :  { %s5481_s30 = smov 0   ;;  %s5483_s10 = smov 0   ;;  %s9447_s0 = inlined_call_operand.vmem [shape: f32[64,2048], index: 0, kind: input, shape index: {}, may-alias: {0,9}]   ;;  %s9448_s1 = inlined_call_operand.vmem [shape: f32[64,64], index: 1, kind: input, shape index: {}]   ;;  %s9449_s2 = inlined_call_operand.vmem [shape: f32[64,1], index: 2, kind: input, shape index: {}]   ;;  %s9450_s3 = inlined_call_operand.vmem [shape: f32[64,64], index: 3, kind: input, shape index: {}]   ;;  %s9451_s4 = inlined_call_operand.vmem [shape: f32[64,1], index: 4, kind: input, shape index: {}]   ;;  %s9452_s5 = inlined_call_operand.vmem [shape: f32[320,64], index: 5, kind: input, shape index: {}]   ;;  %s9453_s6 = inlined_call_operand.vmem [shape: f32[320,1], index: 6, kind: input, shape index: {}]   ;;  %s9454_s7 = inlined_call_operand.vmem [shape: f32[64,320], index: 7, kind: input, shape index: {}]   ;;  %s9455_s8 = inlined_call_operand.vmem [shape: f32[64,1], index: 8, kind: input, shape index: {}]   ;;  %s9456_s9 = inlined_call_operand.vmem [shape: f32[64,2048], index: 9, kind: output, shape index: {}, may-alias: {0,9}]  }
   0x1   :  { %s5485_s11 = smov 0  }
   0x2 LB: > { %s4717_s12 = sadd.s32 4294967295, %s5428_s11   ;;  %s5498_s13 = sadd.s32 1, %s5428_s11   ;;  %s5428_s11 = sphi %s5485_s11, %s10126_s11   ;;  %s5424_s10 = sphi %s5483_s10, %s10125_s10   ;;  %s5420_s30 = sphi %s5481_s30, %s10124_s30  }
   0x3   : > { %s23_s14 = ssub.s32 %s5428_s11, %s5498_s13  ;;  %s26_s15 = sadd.s32 1, %s5424_s10 }
   0x4   : > { %p24_p0 = scmp.eq.s32.totalorder %s23_s14, 0  ;;  %p33_p1 = scmp.ne.s32.totalorder %s5424_s10, %s5420_s30 }
   0x5   : > { %p34_p2 = scmp.eq.s32.totalorder %s5428_s11, 0  ;;  %p231_p3 = scmp.eq.s32.totalorder %s4717_s12, 1 }
   0x6   : > { %s5509_s16 = scalar_select %p24_p0, %s5424_s10, %s26_s15  }
   0x7   : > { %p35_p4 = por %p34_p2, %p33_p1  ;;  %p5511_p5 = por %p231_p3, %p33_p1 }
   0x8   : > { %p4720_p6 = scmp.ge.s32.totalorder %s5428_s11, 2 }
   0xa   : > { %277 = sbr.rel (%p4720_p6) target bundleno = 83 (0x53), region = 48 }
   0xf   : > { %280 = sbr.rel (!%p35_p4) target bundleno = 83 (0x53), region = 52  ;;  %s282_s18 = sand.u32 (%p35_p4), 1, %s5424_s10  }
  0x10   : > { %s5244_s19 = sshll.u32 (%p35_p4), %s5428_s11, 6  ;;  %s4721_s20 = sshll.u32 (%p35_p4), %s282_s18, 9 }
  0x11   : > { %s5521_s23 = scalar_lea.vmem (%p35_p4), %s9447_s0, %s5244_s19  ;;  %s5526_s24 = scalar_lea.vmem (%p35_p4), [#allocation2], %s4721_s20 }
  0x12   : > { %v300_v0 = vld [vmem:[%s5521_s23] sm:$0xff] (%p35_p4)  ;;  %v302_v1 = vld [vmem:[%s5521_s23 + $0x8] sm:$0xff] (%p35_p4)  ;;  %v304_v2 = vld [vmem:[%s5521_s23 + $0x10] sm:$0xff] (%p35_p4) }
  0x13   : > { %301 = vst [vmem:[%s5526_s24] sm:$0xff] (%p35_p4), %v300_v0  ;;  %v306_v3 = vld [vmem:[%s5521_s23 + $0x18] sm:$0xff] (%p35_p4)  ;;  %v308_v4 = vld [vmem:[%s5521_s23 + $0x20] sm:$0xff] (%p35_p4)  ;;  %v310_v5 = vld [vmem:[%s5521_s23 + $0x28] sm:$0xff] (%p35_p4) }
  0x14   : > { %303 = vst [vmem:[%s5526_s24 + $0x8] sm:$0xff] %v302_v1  ;;  %v312_v6 = vld [vmem:[%s5521_s23 + $0x30] sm:$0xff]  ;;  %v314_v7 = vld [vmem:[%s5521_s23 + $0x38] sm:$0xff]  ;;  %v316_v8 = vld [vmem:[%s5521_s23 + $0x80] sm:$0xff] }
  0x15   : > { %305 = vst [vmem:[%s5526_s24 + $0x10] sm:$0xff] %v304_v2  ;;  %v318_v9 = vld [vmem:[%s5521_s23 + $0x88] sm:$0xff]  ;;  %v320_v10 = vld [vmem:[%s5521_s23 + $0x90] sm:$0xff]  ;;  %v322_v11 = vld [vmem:[%s5521_s23 + $0x98] sm:$0xff] }
  0x16   : > { %307 = vst [vmem:[%s5526_s24 + $0x18] sm:$0xff] %v306_v3  ;;  %v324_v12 = vld [vmem:[%s5521_s23 + $0xa0] sm:$0xff]  ;;  %v326_v13 = vld [vmem:[%s5521_s23 + $0xa8] sm:$0xff]  ;;  %v328_v14 = vld [vmem:[%s5521_s23 + $0xb0] sm:$0xff] }
  0x17   : > { %309 = vst [vmem:[%s5526_s24 + $0x20] sm:$0xff] %v308_v4  ;;  %v330_v15 = vld [vmem:[%s5521_s23 + $0xb8] sm:$0xff]  ;;  %v332_v16 = vld [vmem:[%s5521_s23 + $0x100] sm:$0xff]  ;;  %v334_v17 = vld [vmem:[%s5521_s23 + $0x108] sm:$0xff] }
  0x18   : > { %311 = vst [vmem:[%s5526_s24 + $0x28] sm:$0xff] %v310_v5  ;;  %v336_v18 = vld [vmem:[%s5521_s23 + $0x110] sm:$0xff]  ;;  %v338_v19 = vld [vmem:[%s5521_s23 + $0x118] sm:$0xff]  ;;  %v340_v20 = vld [vmem:[%s5521_s23 + $0x120] sm:$0xff] }
  0x19   : > { %313 = vst [vmem:[%s5526_s24 + $0x30] sm:$0xff] %v312_v6  ;;  %v342_v21 = vld [vmem:[%s5521_s23 + $0x128] sm:$0xff]  ;;  %v344_v22 = vld [vmem:[%s5521_s23 + $0x130] sm:$0xff]  ;;  %v346_v23 = vld [vmem:[%s5521_s23 + $0x138] sm:$0xff] }
  0x1a   : > { %315 = vst [vmem:[%s5526_s24 + $0x38] sm:$0xff] %v314_v7  ;;  %v348_v24 = vld [vmem:[%s5521_s23 + $0x180] sm:$0xff]  ;;  %v350_v25 = vld [vmem:[%s5521_s23 + $0x188] sm:$0xff]  ;;  %v352_v26 = vld [vmem:[%s5521_s23 + $0x190] sm:$0xff] }
  0x1b   : > { %317 = vst [vmem:[%s5526_s24 + $0x40] sm:$0xff] %v316_v8  ;;  %v354_v27 = vld [vmem:[%s5521_s23 + $0x198] sm:$0xff]  ;;  %v356_v28 = vld [vmem:[%s5521_s23 + $0x1a0] sm:$0xff]  ;;  %v358_v29 = vld [vmem:[%s5521_s23 + $0x1a8] sm:$0xff] }
  0x1c   : > { %319 = vst [vmem:[%s5526_s24 + $0x48] sm:$0xff] %v318_v9  ;;  %v360_v30 = vld [vmem:[%s5521_s23 + $0x1b0] sm:$0xff]  ;;  %v362_v31 = vld [vmem:[%s5521_s23 + $0x1b8] sm:$0xff]  ;;  %v364_v32 = vld [vmem:[%s5521_s23 + $0x200] sm:$0xff] }
  0x1d   : > { %321 = vst [vmem:[%s5526_s24 + $0x50] sm:$0xff] %v320_v10  ;;  %v366_v33 = vld [vmem:[%s5521_s23 + $0x208] sm:$0xff]  ;;  %v368_v34 = vld [vmem:[%s5521_s23 + $0x210] sm:$0xff]  ;;  %v370_v35 = vld [vmem:[%s5521_s23 + $0x218] sm:$0xff] }
  0x1e   : > { %323 = vst [vmem:[%s5526_s24 + $0x58] sm:$0xff] %v322_v11  ;;  %v372_v36 = vld [vmem:[%s5521_s23 + $0x220] sm:$0xff]  ;;  %v374_v37 = vld [vmem:[%s5521_s23 + $0x228] sm:$0xff]  ;;  %v376_v38 = vld [vmem:[%s5521_s23 + $0x230] sm:$0xff] }
  0x1f   : > { %325 = vst [vmem:[%s5526_s24 + $0x60] sm:$0xff] %v324_v12  ;;  %v378_v39 = vld [vmem:[%s5521_s23 + $0x238] sm:$0xff]  ;;  %v380_v40 = vld [vmem:[%s5521_s23 + $0x280] sm:$0xff]  ;;  %v382_v41 = vld [vmem:[%s5521_s23 + $0x288] sm:$0xff] }
  0x20   : > { %327 = vst [vmem:[%s5526_s24 + $0x68] sm:$0xff] %v326_v13  ;;  %v384_v42 = vld [vmem:[%s5521_s23 + $0x290] sm:$0xff]  ;;  %v386_v43 = vld [vmem:[%s5521_s23 + $0x298] sm:$0xff]  ;;  %v388_v44 = vld [vmem:[%s5521_s23 + $0x2a0] sm:$0xff] }
  0x21   : > { %329 = vst [vmem:[%s5526_s24 + $0x70] sm:$0xff] %v328_v14  ;;  %v390_v45 = vld [vmem:[%s5521_s23 + $0x2a8] sm:$0xff]  ;;  %v392_v46 = vld [vmem:[%s5521_s23 + $0x2b0] sm:$0xff]  ;;  %v394_v47 = vld [vmem:[%s5521_s23 + $0x2b8] sm:$0xff] }
  0x22   : > { %331 = vst [vmem:[%s5526_s24 + $0x78] sm:$0xff] %v330_v15  ;;  %v396_v48 = vld [vmem:[%s5521_s23 + $0x300] sm:$0xff]  ;;  %v398_v49 = vld [vmem:[%s5521_s23 + $0x308] sm:$0xff]  ;;  %v400_v50 = vld [vmem:[%s5521_s23 + $0x310] sm:$0xff] }
  0x23   : > { %333 = vst [vmem:[%s5526_s24 + $0x80] sm:$0xff] %v332_v16  ;;  %v402_v51 = vld [vmem:[%s5521_s23 + $0x318] sm:$0xff]  ;;  %v404_v52 = vld [vmem:[%s5521_s23 + $0x320] sm:$0xff]  ;;  %v406_v53 = vld [vmem:[%s5521_s23 + $0x328] sm:$0xff] }
  0x24   : > { %335 = vst [vmem:[%s5526_s24 + $0x88] sm:$0xff] %v334_v17  ;;  %v408_v54 = vld [vmem:[%s5521_s23 + $0x330] sm:$0xff]  ;;  %v410_v55 = vld [vmem:[%s5521_s23 + $0x338] sm:$0xff]  ;;  %v412_v56 = vld [vmem:[%s5521_s23 + $0x380] sm:$0xff] }
  0x25   : > { %337 = vst [vmem:[%s5526_s24 + $0x90] sm:$0xff] %v336_v18  ;;  %v414_v57 = vld [vmem:[%s5521_s23 + $0x388] sm:$0xff]  ;;  %v416_v58 = vld [vmem:[%s5521_s23 + $0x390] sm:$0xff]  ;;  %v418_v59 = vld [vmem:[%s5521_s23 + $0x398] sm:$0xff] }
  0x26   : > { %339 = vst [vmem:[%s5526_s24 + $0x98] sm:$0xff] %v338_v19  ;;  %v420_v60 = vld [vmem:[%s5521_s23 + $0x3a0] sm:$0xff]  ;;  %v422_v61 = vld [vmem:[%s5521_s23 + $0x3a8] sm:$0xff]  ;;  %v424_v62 = vld [vmem:[%s5521_s23 + $0x3b0] sm:$0xff] }
  0x27   : > { %341 = vst [vmem:[%s5526_s24 + $0xa0] sm:$0xff] %v340_v20  ;;  %v426_v63 = vld [vmem:[%s5521_s23 + $0x3b8] sm:$0xff] }
  0x28   : > { %343 = vst [vmem:[%s5526_s24 + $0xa8] sm:$0xff] %v342_v21 }
  0x29   : > { %345 = vst [vmem:[%s5526_s24 + $0xb0] sm:$0xff] %v344_v22 }
  0x2a   : > { %347 = vst [vmem:[%s5526_s24 + $0xb8] sm:$0xff] %v346_v23 }
  0x2b   : > { %349 = vst [vmem:[%s5526_s24 + $0xc0] sm:$0xff] %v348_v24 }
  0x2c   : > { %351 = vst [vmem:[%s5526_s24 + $0xc8] sm:$0xff] %v350_v25 }
  0x2d   : > { %353 = vst [vmem:[%s5526_s24 + $0xd0] sm:$0xff] %v352_v26 }
  0x2e   : > { %355 = vst [vmem:[%s5526_s24 + $0xd8] sm:$0xff] %v354_v27 }
  0x2f   : > { %357 = vst [vmem:[%s5526_s24 + $0xe0] sm:$0xff] %v356_v28 }
  0x30   : > { %359 = vst [vmem:[%s5526_s24 + $0xe8] sm:$0xff] %v358_v29 }
  0x31   : > { %361 = vst [vmem:[%s5526_s24 + $0xf0] sm:$0xff] %v360_v30 }
  0x32   : > { %363 = vst [vmem:[%s5526_s24 + $0xf8] sm:$0xff] %v362_v31 }
  0x33   : > { %365 = vst [vmem:[%s5526_s24 + $0x100] sm:$0xff] %v364_v32 }
  0x34   : > { %367 = vst [vmem:[%s5526_s24 + $0x108] sm:$0xff] %v366_v33 }
  0x35   : > { %369 = vst [vmem:[%s5526_s24 + $0x110] sm:$0xff] %v368_v34 }
  0x36   : > { %371 = vst [vmem:[%s5526_s24 + $0x118] sm:$0xff] %v370_v35 }
  0x37   : > { %373 = vst [vmem:[%s5526_s24 + $0x120] sm:$0xff] %v372_v36 }
  0x38   : > { %375 = vst [vmem:[%s5526_s24 + $0x128] sm:$0xff] %v374_v37 }
  0x39   : > { %377 = vst [vmem:[%s5526_s24 + $0x130] sm:$0xff] %v376_v38 }
  0x3a   : > { %379 = vst [vmem:[%s5526_s24 + $0x138] sm:$0xff] %v378_v39 }
  0x3b   : > { %381 = vst [vmem:[%s5526_s24 + $0x140] sm:$0xff] %v380_v40 }
  0x3c   : > { %383 = vst [vmem:[%s5526_s24 + $0x148] sm:$0xff] %v382_v41 }
  0x3d   : > { %385 = vst [vmem:[%s5526_s24 + $0x150] sm:$0xff] %v384_v42 }
  0x3e   : > { %387 = vst [vmem:[%s5526_s24 + $0x158] sm:$0xff] %v386_v43 }
  0x3f   : > { %389 = vst [vmem:[%s5526_s24 + $0x160] sm:$0xff] %v388_v44 }
  0x40   : > { %391 = vst [vmem:[%s5526_s24 + $0x168] sm:$0xff] %v390_v45 }
  0x41   : > { %393 = vst [vmem:[%s5526_s24 + $0x170] sm:$0xff] %v392_v46 }
  0x42   : > { %395 = vst [vmem:[%s5526_s24 + $0x178] sm:$0xff] %v394_v47 }
  0x43   : > { %397 = vst [vmem:[%s5526_s24 + $0x180] sm:$0xff] %v396_v48 }
  0x44   : > { %399 = vst [vmem:[%s5526_s24 + $0x188] sm:$0xff] %v398_v49 }
  0x45   : > { %401 = vst [vmem:[%s5526_s24 + $0x190] sm:$0xff] %v400_v50 }
  0x46   : > { %403 = vst [vmem:[%s5526_s24 + $0x198] sm:$0xff] %v402_v51 }
  0x47   : > { %405 = vst [vmem:[%s5526_s24 + $0x1a0] sm:$0xff] %v404_v52 }
  0x48   : > { %407 = vst [vmem:[%s5526_s24 + $0x1a8] sm:$0xff] %v406_v53 }
  0x49   : > { %409 = vst [vmem:[%s5526_s24 + $0x1b0] sm:$0xff] %v408_v54 }
  0x4a   : > { %411 = vst [vmem:[%s5526_s24 + $0x1b8] sm:$0xff] %v410_v55 }
  0x4b   : > { %413 = vst [vmem:[%s5526_s24 + $0x1c0] sm:$0xff] %v412_v56 }
  0x4c   : > { %415 = vst [vmem:[%s5526_s24 + $0x1c8] sm:$0xff] %v414_v57 }
  0x4d   : > { %417 = vst [vmem:[%s5526_s24 + $0x1d0] sm:$0xff] %v416_v58 }
  0x4e   : > { %419 = vst [vmem:[%s5526_s24 + $0x1d8] sm:$0xff] %v418_v59 }
  0x4f   : > { %421 = vst [vmem:[%s5526_s24 + $0x1e0] sm:$0xff] %v420_v60 }
  0x50   : > { %423 = vst [vmem:[%s5526_s24 + $0x1e8] sm:$0xff] %v422_v61 }
  0x51   : > { %425 = vst [vmem:[%s5526_s24 + $0x1f0] sm:$0xff] %v424_v62 }
  0x52   : > { %427 = vst [vmem:[%s5526_s24 + $0x1f8] sm:$0xff] %v426_v63 }
  0x53 PF: > { %p4724_p7 = scmp.ge.s32.totalorder %s5428_s11, 1  ;;  %p432_p8 = scmp.lt.s32.totalorder %s5428_s11, 3 }
  0x55   : > { %p433_p9 = pnand %p4724_p7, %p432_p8 }
  0x57   : > { %436 = sbr.rel (%p433_p9) target bundleno = 1727 (0x6bf), region = 75 }
  0x5c   : > { %v554_v0 = vld [vmem:[%s9449_s2 + $0x38] sm:$0xff]  ;;  %v552_v1 = vld [vmem:[%s9449_s2 + $0x28] sm:$0xff]  ;;  %s439_s15 = sand.u32 1, %s5420_s30   ;;  %v5430_v3 = vmov 0   ;;  %v551_v16 = vld [vmem:[%s9449_s2 + $0x20] sm:$0xff]  ;;  %vm595_vm0 = vcmask 523264  }
  0x5d   : > { %v550_v2 = vld [vmem:[%s9449_s2 + $0x18] sm:$0xff]  ;;  %5273 = vset.pattern.permute.xlu2 %v5430_v3  ;;  %5272 = vset.pattern.permute.xlu1 %v5430_v3  ;;  %s5665_s18 = sshll.u32 %s439_s15, 9  ;;  %v553_v18 = vld [vmem:[%s9449_s2 + $0x30] sm:$0xff]  ;;  %v548_v36 = vld [vmem:[%s9449_s2 + $0x8] sm:$0xff]  ;;  %s5245_s21 = sshll.u32 (%p5511_p5), %s4717_s12, 6 }
  0x5e   : > { %5271 = vset.pattern.permute.xlu0 %v5430_v3  ;;  %582 = vperm.xlu1 %5272, %v552_v1   ;;  %s5668_s19 = scalar_lea.vmem [#allocation2], %s5665_s18  ;;  %v549_v19 = vld [vmem:[%s9449_s2 + $0x10] sm:$0xff]  ;;  %v1027_v35 = vld [vmem:[%s9451_s4 + $0x38] sm:$0xff]  ;;  %v547_v37 = vld [vmem:[%s9449_s2] sm:$0xff]  ;;  %s8524_s30 = scalar_lea.vmem [#allocation3], %s5665_s18 }
  0x5f   : > { %592 = vperm.xlu0 %5271, %v554_v0   ;;  %572 = vperm.xlu2 %5273, %v550_v2   ;;  %v531_v4 = vld [vmem:[%s5668_s19 + $0x1c0] sm:$0xff]  ;;  %v532_v5 = vld [vmem:[%s5668_s19 + $0x1c8] sm:$0xff]  ;;  %v533_v6 = vld [vmem:[%s5668_s19 + $0x1d0] sm:$0xff]  ;;  %s9309_s17 = scalar_lea.vmem (%p5511_p5), %s9456_s9, %s5245_s21 }
  0x60   : > { %628 = vmatpush.msra.mxu0 %v531_v4  ;;  %669 = vmatpush.msra.mxu1 %v532_v5  ;;  %v534_v7 = vld [vmem:[%s5668_s19 + $0x1d8] sm:$0xff]  ;;  %v523_v8 = vld [vmem:[%s5668_s19 + $0x180] sm:$0xff]  ;;  %v524_v9 = vld [vmem:[%s5668_s19 + $0x188] sm:$0xff] }
  0x61   : > { %710 = vmatpush.msra.mxu2 %v533_v6  ;;  %751 = vmatpush.msra.mxu3 %v534_v7  ;;  %v525_v10 = vld [vmem:[%s5668_s19 + $0x190] sm:$0xff]  ;;  %v526_v11 = vld [vmem:[%s5668_s19 + $0x198] sm:$0xff]  ;;  %v515_v12 = vld [vmem:[%s5668_s19 + $0x140] sm:$0xff] }
  0x62   : > { %629 = vmatpush.msra.mxu0 %v523_v8  ;;  %670 = vmatpush.msra.mxu1 %v524_v9  ;;  %v516_v13 = vld [vmem:[%s5668_s19 + $0x148] sm:$0xff]  ;;  %v517_v14 = vld [vmem:[%s5668_s19 + $0x150] sm:$0xff]  ;;  %v518_v15 = vld [vmem:[%s5668_s19 + $0x158] sm:$0xff] }
  0x63   : > { %711 = vmatpush.msra.mxu2 %v525_v10  ;;  %752 = vmatpush.msra.mxu3 %v526_v11  ;;  %v507_v17 = vld [vmem:[%s5668_s19 + $0x100] sm:$0xff]  ;;  %v508_v20 = vld [vmem:[%s5668_s19 + $0x108] sm:$0xff]  ;;  %v509_v21 = vld [vmem:[%s5668_s19 + $0x110] sm:$0xff] }
  0x64   : > { %630 = vmatpush.msra.mxu0 %v515_v12  ;;  %671 = vmatpush.msra.mxu1 %v516_v13  ;;  %v510_v22 = vld [vmem:[%s5668_s19 + $0x118] sm:$0xff]  ;;  %v499_v23 = vld [vmem:[%s5668_s19 + $0xc0] sm:$0xff]  ;;  %v500_v24 = vld [vmem:[%s5668_s19 + $0xc8] sm:$0xff] }
  0x65   : > { %712 = vmatpush.msra.mxu2 %v517_v14  ;;  %753 = vmatpush.msra.mxu3 %v518_v15  ;;  %v501_v25 = vld [vmem:[%s5668_s19 + $0xd0] sm:$0xff]  ;;  %v502_v26 = vld [vmem:[%s5668_s19 + $0xd8] sm:$0xff]  ;;  %v491_v27 = vld [vmem:[%s5668_s19 + $0x80] sm:$0xff] }
  0x66   : > { %577 = vperm.xlu1 %5272, %v551_v16   ;;  %631 = vmatpush.msra.mxu0 %v507_v17  ;;  %v492_v28 = vld [vmem:[%s5668_s19 + $0x88] sm:$0xff]  ;;  %v493_v29 = vld [vmem:[%s5668_s19 + $0x90] sm:$0xff]  ;;  %v494_v30 = vld [vmem:[%s5668_s19 + $0x98] sm:$0xff] }
  0x67   : > { %587 = vperm.xlu0 %5271, %v553_v18   ;;  %567 = vperm.xlu2 %5273, %v549_v19   ;;  %v483_v31 = vld [vmem:[%s5668_s19 + $0x40] sm:$0xff]  ;;  %v484_v32 = vld [vmem:[%s5668_s19 + $0x48] sm:$0xff]  ;;  %v485_v33 = vld [vmem:[%s5668_s19 + $0x50] sm:$0xff] }
  0x68   : > { %672 = vmatpush.msra.mxu1 %v508_v20  ;;  %713 = vmatpush.msra.mxu2 %v509_v21  ;;  %v486_v34 = vld [vmem:[%s5668_s19 + $0x58] sm:$0xff]  ;;  %v475_v38 = vld [vmem:[%s5668_s19] sm:$0xff]  ;;  %v476_v39 = vld [vmem:[%s5668_s19 + $0x8] sm:$0xff] }
  0x69   : > { %754 = vmatpush.msra.mxu3 %v510_v22  ;;  %632 = vmatpush.msra.mxu0 %v499_v23  ;;  %v477_v40 = vld [vmem:[%s5668_s19 + $0x10] sm:$0xff]  ;;  %v478_v41 = vld [vmem:[%s5668_s19 + $0x18] sm:$0xff]  ;;  %v5723_v42 = vld [vmem:[%s9448_s1] sm:$0xff] }
  0x6a   : > { %673 = vmatpush.msra.mxu1 %v500_v24  ;;  %714 = vmatpush.msra.mxu2 %v501_v25  ;;  %v1024_v43 = vld [vmem:[%s9451_s4 + $0x20] sm:$0xff]  ;;  %v1026_v44 = vld [vmem:[%s9451_s4 + $0x30] sm:$0xff]  ;;  %v1025_v45 = vld [vmem:[%s9451_s4 + $0x28] sm:$0xff] }
  0x6b   : > { %755 = vmatpush.msra.mxu3 %v502_v26  ;;  %633 = vmatpush.msra.mxu0 %v491_v27  ;;  %v5745_v46 = vld [vmem:[%s9448_s1 + $0x8] sm:$0xff]  ;;  %v1023_v48 = vld [vmem:[%s9451_s4 + $0x18] sm:$0xff]  ;;  %v1022_v49 = vld [vmem:[%s9451_s4 + $0x10] sm:$0xff] }
  0x6c   : > { %674 = vmatpush.msra.mxu1 %v492_v28  ;;  %715 = vmatpush.msra.mxu2 %v493_v29  ;;  %v1021_v47 = vld [vmem:[%s9451_s4 + $0x8] sm:$0xff]  ;;  %v5767_v50 = vld [vmem:[%s9448_s1 + $0x10] sm:$0xff]  ;;  %v1020_v52 = vld [vmem:[%s9451_s4] sm:$0xff] }
  0x6d   : > { %756 = vmatpush.msra.mxu3 %v494_v30  ;;  %634 = vmatpush.msra.mxu0 %v483_v31  ;;  %v1538_v51 = vld [vmem:[%s9453_s6 + $0x70] sm:$0xff]  ;;  %v535_v53 = vld [vmem:[%s5668_s19 + $0x1e0] sm:$0xff]  ;;  %v536_v54 = vld [vmem:[%s5668_s19 + $0x1e8] sm:$0xff] }
  0x6e   : > { %675 = vmatpush.msra.mxu1 %v484_v32  ;;  %716 = vmatpush.msra.mxu2 %v485_v33  ;;  %v537_v55 = vld [vmem:[%s5668_s19 + $0x1f0] sm:$0xff]  ;;  %v1539_v56 = vld [vmem:[%s9453_s6 + $0x78] sm:$0xff]  ;;  %v527_v58 = vld [vmem:[%s5668_s19 + $0x1a0] sm:$0xff] }
  0x6f   : > { %757 = vmatpush.msra.mxu3 %v486_v34  ;;  %1065 = vperm.xlu2 %5273, %v1027_v35   ;;  %v538_v57 = vld [vmem:[%s5668_s19 + $0x1f8] sm:$0xff]  ;;  %v528_v59 = vld [vmem:[%s5668_s19 + $0x1a8] sm:$0xff]  ;;  %v529_v60 = vld [vmem:[%s5668_s19 + $0x1b0] sm:$0xff] }
  0x70   : > { %562 = vperm.xlu0 %5271, %v548_v36   ;;  %557 = vperm.xlu1 %5272, %v547_v37   ;;  %v530_v61 = vld [vmem:[%s5668_s19 + $0x1b8] sm:$0xff]  ;;  %v519_v62 = vld [vmem:[%s5668_s19 + $0x160] sm:$0xff]  ;;  %v520_v0 = vld [vmem:[%s5668_s19 + $0x168] sm:$0xff] }
  0x71   : > { %635 = vmatpush.msra.mxu0 %v475_v38  ;;  %676 = vmatpush.msra.mxu1 %v476_v39  ;;  %v5798_v63 = vld [vmem:[%s9448_s1 + $0x18] sm:$0xff]  ;;  %v521_v1 = vld [vmem:[%s5668_s19 + $0x170] sm:$0xff]  ;;  %v511_v3 = vld [vmem:[%s5668_s19 + $0x120] sm:$0xff] }
  0x72   : > { %717 = vmatpush.msra.mxu2 %v477_v40  ;;  %758 = vmatpush.msra.mxu3 %v478_v41  ;;  %v522_v2 = vld [vmem:[%s5668_s19 + $0x178] sm:$0xff]  ;;  %v1554_v4 = vld [vmem:[%s9453_s6 + $0xf0] sm:$0xff]  ;;  %v512_v5 = vld [vmem:[%s5668_s19 + $0x128] sm:$0xff] }
  0x73   : > { %4727 = vmatmul.msk.f32.vlgmr.msra.gmra.mxu0 %vm595_vm0, %v5723_v42  ;;  %4735 = vmatmul.msk.f32.vlgmr.msra.gmra.mxu1 %vm595_vm0, %v5723_v42  ;;  %v1555_v6 = vld [vmem:[%s9453_s6 + $0xf8] sm:$0xff]  ;;  %v1537_v7 = vld [vmem:[%s9453_s6 + $0x68] sm:$0xff]  ;;  %v513_v8 = vld [vmem:[%s5668_s19 + $0x130] sm:$0xff] }
  0x74   : > { %4743 = vmatmul.msk.f32.vlgmr.msra.gmra.mxu2 %vm595_vm0, %v5723_v42  ;;  %4751 = vmatmul.msk.f32.vlgmr.msra.gmra.mxu3 %vm595_vm0, %v5723_v42  ;;  %v514_v9 = vld [vmem:[%s5668_s19 + $0x138] sm:$0xff]  ;;  %v503_v10 = vld [vmem:[%s5668_s19 + $0xe0] sm:$0xff]  ;;  %v504_v11 = vld [vmem:[%s5668_s19 + $0xe8] sm:$0xff] }
  0x75   : > { %792 = vmatpush.msrb.mxu0 %v535_v53  ;;  %833 = vmatpush.msrb.mxu1 %v536_v54  ;;  %v5829_v12 = vld [vmem:[%s9448_s1 + $0x20] sm:$0xff]  ;;  %v505_v13 = vld [vmem:[%s5668_s19 + $0xf0] sm:$0xff]  ;;  %v506_v14 = vld [vmem:[%s5668_s19 + $0xf8] sm:$0xff] }
  0x76   : > { %874 = vmatpush.msrb.mxu2 %v537_v55  ;;  %915 = vmatpush.msrb.mxu3 %v538_v57  ;;  %v495_v15 = vld [vmem:[%s5668_s19 + $0xa0] sm:$0xff]  ;;  %v496_v16 = vld [vmem:[%s5668_s19 + $0xa8] sm:$0xff]  ;;  %v1535_v17 = vld [vmem:[%s9453_s6 + $0x58] sm:$0xff] }
  0x77   : > { %1050 = vperm.xlu2 %5273, %v1024_v43   ;;  %793 = vmatpush.msrb.mxu0 %v527_v58  ;;  %v497_v18 = vld [vmem:[%s5668_s19 + $0xb0] sm:$0xff]  ;;  %v1536_v19 = vld [vmem:[%s9453_s6 + $0x60] sm:$0xff]  ;;  %v1553_v20 = vld [vmem:[%s9453_s6 + $0xe8] sm:$0xff] }
  0x78   : > { %1060 = vperm.xlu0 %5271, %v1026_v44   ;;  %1055 = vperm.xlu1 %5272, %v1025_v45   ;;  %v498_v21 = vld [vmem:[%s5668_s19 + $0xb8] sm:$0xff]  ;;  %v487_v22 = vld [vmem:[%s5668_s19 + $0x60] sm:$0xff]  ;;  %v488_v23 = vld [vmem:[%s5668_s19 + $0x68] sm:$0xff] }
  0x79   : > { %834 = vmatpush.msrb.mxu1 %v528_v59  ;;  %875 = vmatpush.msrb.mxu2 %v529_v60  ;;  %v489_v24 = vld [vmem:[%s5668_s19 + $0x70] sm:$0xff]  ;;  %v5860_v25 = vld [vmem:[%s9448_s1 + $0x28] sm:$0xff]  ;;  %v490_v26 = vld [vmem:[%s5668_s19 + $0x78] sm:$0xff] }
  0x7a   : > { %916 = vmatpush.msrb.mxu3 %v530_v61  ;;  %794 = vmatpush.msrb.mxu0 %v519_v62  ;;  %v479_v27 = vld [vmem:[%s5668_s19 + $0x20] sm:$0xff]  ;;  %v480_v28 = vld [vmem:[%s5668_s19 + $0x28] sm:$0xff]  ;;  %v481_v29 = vld [vmem:[%s5668_s19 + $0x30] sm:$0xff] }
  0x7b   : > { %4728 = vmatmul.msk.f32.gmra.mxu0 %vm595_vm0, %v5745_v46  ;;  %4736 = vmatmul.msk.f32.gmra.mxu1 %vm595_vm0, %v5745_v46  ;;  %v1551_v30 = vld [vmem:[%s9453_s6 + $0xd8] sm:$0xff]  ;;  %v1552_v32 = vld [vmem:[%s9453_s6 + $0xe0] sm:$0xff]  ;;  %v1534_v33 = vld [vmem:[%s9453_s6 + $0x50] sm:$0xff] }
  0x7c   : > { %4744 = vmatmul.msk.f32.gmra.mxu2 %vm595_vm0, %v5745_v46  ;;  %4752 = vmatmul.msk.f32.gmra.mxu3 %vm595_vm0, %v5745_v46  ;;  %v482_v31 = vld [vmem:[%s5668_s19 + $0x38] sm:$0xff]  ;;  %v5887_v34 = vld [vmem:[%s9448_s1 + $0x30] sm:$0xff]  ;;  %v1532_v35 = vld [vmem:[%s9453_s6 + $0x40] sm:$0xff] }
  0x7d   : > { %835 = vmatpush.msrb.mxu1 %v520_v0  ;;  %876 = vmatpush.msrb.mxu2 %v521_v1  ;;  %v1533_v36 = vld [vmem:[%s9453_s6 + $0x48] sm:$0xff]  ;;  %v1550_v37 = vld [vmem:[%s9453_s6 + $0xd0] sm:$0xff]  ;;  %v5909_v38 = vld [vmem:[%s9448_s1 + $0x38] sm:$0xff] }
  0x7e   : > { %917 = vmatpush.msrb.mxu3 %v522_v2  ;;  %795 = vmatpush.msrb.mxu0 %v511_v3  ;;  %v1531_v39 = vld [vmem:[%s9453_s6 + $0x38] sm:$0xff]  ;;  %v1549_v40 = vld [vmem:[%s9453_s6 + $0xc8] sm:$0xff]  ;;  %v1530_v43 = vld [vmem:[%s9453_s6 + $0x30] sm:$0xff] }
  0x7f   : > { %1035 = vperm.xlu2 %5273, %v1021_v47   ;;  %836 = vmatpush.msrb.mxu1 %v512_v5  ;;  %v1563_v41 = vld [vmem:[%s9453_s6 + $0x138] sm:$0xff]  ;;  %v1548_v44 = vld [vmem:[%s9453_s6 + $0xc0] sm:$0xff]  ;;  %v1562_v45 = vld [vmem:[%s9453_s6 + $0x130] sm:$0xff] }
  0x80   : > { %1045 = vperm.xlu0 %5271, %v1023_v48   ;;  %1040 = vperm.xlu1 %5272, %v1022_v49   ;;  %v1547_v47 = vld [vmem:[%s9453_s6 + $0xb8] sm:$0xff]  ;;  %v1561_v48 = vld [vmem:[%s9453_s6 + $0x128] sm:$0xff]  ;;  %v1546_v49 = vld [vmem:[%s9453_s6 + $0xb0] sm:$0xff] }
  0x81   : > { %877 = vmatpush.msrb.mxu2 %v513_v8  ;;  %918 = vmatpush.msrb.mxu3 %v514_v9  ;;  %v1559_v53 = vld [vmem:[%s9453_s6 + $0x118] sm:$0xff]  ;;  %v1526_v54 = vld [vmem:[%s9453_s6 + $0x10] sm:$0xff]  ;;  %v1544_v55 = vld [vmem:[%s9453_s6 + $0xa0] sm:$0xff] }
  0x82   : > { %796 = vmatpush.msrb.mxu0 %v503_v10  ;;  %837 = vmatpush.msrb.mxu1 %v504_v11  ;;  %v1525_v57 = vld [vmem:[%s9453_s6 + $0x8] sm:$0xff]  ;;  %v1543_v58 = vld [vmem:[%s9453_s6 + $0x98] sm:$0xff]  ;;  %v1524_v60 = vld [vmem:[%s9453_s6] sm:$0xff] }
  0x83   : > { %4729 = vmatmul.msk.f32.gmra.mxu0 %vm595_vm0, %v5767_v50  ;;  %4737 = vmatmul.msk.f32.gmra.mxu1 %vm595_vm0, %v5767_v50  ;;  %v1557_v59 = vld [vmem:[%s9453_s6 + $0x108] sm:$0xff]  ;;  %v1542_v61 = vld [vmem:[%s9453_s6 + $0x90] sm:$0xff]  ;;  %v1556_v62 = vld [vmem:[%s9453_s6 + $0x100] sm:$0xff] }
  0x84   : > { %4745 = vmatmul.msk.f32.gmra.mxu2 %vm595_vm0, %v5767_v50  ;;  %4753 = vmatmul.msk.f32.gmra.mxu3 %vm595_vm0, %v5767_v50  ;;  %v1541_v0 = vld [vmem:[%s9453_s6 + $0x88] sm:$0xff]  ;;  %v1540_v1 = vld [vmem:[%s9453_s6 + $0x80] sm:$0xff]  ;;  %v3330_v11 = vld [vmem:[%s9455_s8 + $0x30] sm:$0xff] }
  0x85   : > { %878 = vmatpush.msrb.mxu2 %v505_v13  ;;  %919 = vmatpush.msrb.mxu3 %v506_v14  ;;  %v3325_v5 = vld [vmem:[%s9455_s8 + $0x8] sm:$0xff] }
  0x86   : > { %797 = vmatpush.msrb.mxu0 %v495_v15  ;;  %838 = vmatpush.msrb.mxu1 %v496_v16  ;;  %v3329_v13 = vld [vmem:[%s9455_s8 + $0x28] sm:$0xff] }
  0x87   : > { %1636 = vperm.xlu2 %5273, %v1538_v51   ;;  %879 = vmatpush.msrb.mxu2 %v497_v18  ;;  %v1560_v51 = vld [vmem:[%s9453_s6 + $0x120] sm:$0xff]  ;;  %v3331_v18 = vld [vmem:[%s9455_s8 + $0x38] sm:$0xff] }
  0x88   : > { %1030 = vperm.xlu0 %5271, %v1020_v52   ;;  %1641 = vperm.xlu1 %5272, %v1539_v56   ;;  %v1545_v52 = vld [vmem:[%s9453_s6 + $0xa8] sm:$0xff]  ;;  %v1558_v56 = vld [vmem:[%s9453_s6 + $0x110] sm:$0xff] }
  0x89   : > { %920 = vmatpush.msrb.mxu3 %v498_v21  ;;  %798 = vmatpush.msrb.mxu0 %v487_v22 }
  0x8a   : > { %839 = vmatpush.msrb.mxu1 %v488_v23  ;;  %880 = vmatpush.msrb.mxu2 %v489_v24 }
  0x8b   : > { %4730 = vmatmul.msk.f32.gmra.mxu0 %vm595_vm0, %v5798_v63  ;;  %4738 = vmatmul.msk.f32.gmra.mxu1 %vm595_vm0, %v5798_v63 }
  0x8c   : > { %4746 = vmatmul.msk.f32.gmra.mxu2 %vm595_vm0, %v5798_v63  ;;  %4754 = vmatmul.msk.f32.gmra.mxu3 %vm595_vm0, %v5798_v63 }
  0x8d   : > { %921 = vmatpush.msrb.mxu3 %v490_v26  ;;  %799 = vmatpush.msrb.mxu0 %v479_v27 }
  0x8e   : > { %840 = vmatpush.msrb.mxu1 %v480_v28  ;;  %881 = vmatpush.msrb.mxu2 %v481_v29 }
  0x8f   : > { %1716 = vperm.xlu2 %5273, %v1554_v4   ;;  %922 = vmatpush.msrb.mxu3 %v482_v31  ;;  %v3327_v4 = vld [vmem:[%s9455_s8 + $0x18] sm:$0xff] }
  0x90   : > { %1721 = vperm.xlu0 %5271, %v1555_v6   ;;  %1631 = vperm.xlu1 %5272, %v1537_v7   ;;  %v3326_v6 = vld [vmem:[%s9455_s8 + $0x10] sm:$0xff] }
  0x93   : > { %4731 = vmatmul.msk.f32.gmra.mxu0 %vm595_vm0, %v5829_v12  ;;  %4739 = vmatmul.msk.f32.gmra.mxu1 %vm595_vm0, %v5829_v12 }
  0x94   : > { %4747 = vmatmul.msk.f32.gmra.mxu2 %vm595_vm0, %v5829_v12  ;;  %4755 = vmatmul.msk.f32.gmra.mxu3 %vm595_vm0, %v5829_v12 }
  0x97   : > { %1621 = vperm.xlu2 %5273, %v1535_v17  }
  0x98   : > { %1626 = vperm.xlu0 %5271, %v1536_v19   ;;  %1711 = vperm.xlu1 %5272, %v1553_v20  }
  0x9b   : > { %4732 = vmatmul.msk.f32.gmra.mxu0 %vm595_vm0, %v5860_v25  ;;  %4740 = vmatmul.msk.f32.gmra.mxu1 %vm595_vm0, %v5860_v25 }
  0x9c   : > { %4748 = vmatmul.msk.f32.gmra.mxu2 %vm595_vm0, %v5860_v25  ;;  %4756 = vmatmul.msk.f32.gmra.mxu3 %vm595_vm0, %v5860_v25 }
  0x9f   : > { %1701 = vperm.xlu2 %5273, %v1551_v30  }
  0xa0   : > { %1706 = vperm.xlu0 %5271, %v1552_v32   ;;  %1616 = vperm.xlu1 %5272, %v1534_v33  }
  0xa3   : > { %4733 = vmatmul.msk.f32.gmra.mxu0 %vm595_vm0, %v5887_v34  ;;  %4741 = vmatmul.msk.f32.gmra.mxu1 %vm595_vm0, %v5887_v34 }
  0xa4   : > { %4749 = vmatmul.msk.f32.gmra.mxu2 %vm595_vm0, %v5887_v34  ;;  %4757 = vmatmul.msk.f32.gmra.mxu3 %vm595_vm0, %v5887_v34 }
  0xa7   : > { %1606 = vperm.xlu2 %5273, %v1532_v35  }
  0xa8   : > { %1611 = vperm.xlu0 %5271, %v1533_v36   ;;  %1696 = vperm.xlu1 %5272, %v1550_v37  }
  0xab   : > { %4734 = vmatmul.msk.f32.gmra.mxu0 %vm595_vm0, %v5909_v38  ;;  %4742 = vmatmul.msk.f32.gmra.mxu1 %vm595_vm0, %v5909_v38 }
  0xac   : > { %4750 = vmatmul.msk.f32.gmra.mxu2 %vm595_vm0, %v5909_v38  ;;  %4758 = vmatmul.msk.f32.gmra.mxu3 %vm595_vm0, %v5909_v38 }
  0xaf   : > { %1601 = vperm.xlu2 %5273, %v1531_v39  }
  0xb0   : > { %1691 = vperm.xlu0 %5271, %v1549_v40   ;;  %1761 = vperm.xlu1 %5272, %v1563_v41  }
  0xb3   : > { %4759 = vmatmul.msk.f32.vlgmr.msrb.gmra.mxu0 %vm595_vm0, %v5723_v42  ;;  %4767 = vmatmul.msk.f32.vlgmr.msrb.gmra.mxu1 %vm595_vm0, %v5723_v42 }
  0xb4   : > { %4775 = vmatmul.msk.f32.vlgmr.msrb.gmra.mxu2 %vm595_vm0, %v5723_v42  ;;  %4783 = vmatmul.msk.f32.vlgmr.msrb.gmra.mxu3 %vm595_vm0, %v5723_v42  ;;  %v1529_v42 = vld [vmem:[%s9453_s6 + $0x28] sm:$0xff] }
  0xb7   : > { %1596 = vperm.xlu2 %5273, %v1530_v43  }
  0xb8   : > { %1686 = vperm.xlu0 %5271, %v1548_v44   ;;  %1756 = vperm.xlu1 %5272, %v1562_v45  }
  0xb9   : > { %v6117_v37 = vpop.permute.xlu2 %572 }
  0xbb   : > { %4760 = vmatmul.msk.f32.gmra.mxu0 %vm595_vm0, %v5745_v46  ;;  %4768 = vmatmul.msk.f32.gmra.mxu1 %vm595_vm0, %v5745_v46 }
  0xbc   : > { %4776 = vmatmul.msk.f32.gmra.mxu2 %vm595_vm0, %v5745_v46  ;;  %4784 = vmatmul.msk.f32.gmra.mxu3 %vm595_vm0, %v5745_v46  ;;  %v1528_v46 = vld [vmem:[%s9453_s6 + $0x20] sm:$0xff] }
  0xbf   : > { %1591 = vperm.xlu2 %5273, %v1529_v42  }
  0xc0   : > { %1681 = vperm.xlu0 %5271, %v1547_v47   ;;  %1751 = vperm.xlu1 %5272, %v1561_v48  }
  0xc3   : > { %4761 = vmatmul.msk.f32.gmra.mxu0 %vm595_vm0, %v5767_v50  ;;  %4769 = vmatmul.msk.f32.gmra.mxu1 %vm595_vm0, %v5767_v50 }
  0xc4   : > { %4777 = vmatmul.msk.f32.gmra.mxu2 %vm595_vm0, %v5767_v50  ;;  %4785 = vmatmul.msk.f32.gmra.mxu3 %vm595_vm0, %v5767_v50  ;;  %v1527_v50 = vld [vmem:[%s9453_s6 + $0x18] sm:$0xff] }
  0xc7   : > { %1586 = vperm.xlu2 %5273, %v1528_v46  }
  0xc8   : > { %1676 = vperm.xlu0 %5271, %v1546_v49   ;;  %1746 = vperm.xlu1 %5272, %v1560_v51  }
  0xcb   : > { %4762 = vmatmul.msk.f32.gmra.mxu0 %vm595_vm0, %v5798_v63  ;;  %4770 = vmatmul.msk.f32.gmra.mxu1 %vm595_vm0, %v5798_v63 }
  0xcc   : > { %4778 = vmatmul.msk.f32.gmra.mxu2 %vm595_vm0, %v5798_v63  ;;  %4786 = vmatmul.msk.f32.gmra.mxu3 %vm595_vm0, %v5798_v63  ;;  %v3324_v63 = vld [vmem:[%s9455_s8] sm:$0xff] }
  0xcf   : > { %1581 = vperm.xlu2 %5273, %v1527_v50  }
  0xd0   : > { %1671 = vperm.xlu0 %5271, %v1545_v52   ;;  %1741 = vperm.xlu1 %5272, %v1559_v53   ;;  %v6115_v32 = vpop.permute.xlu1 %582 }
  0xd1   : > { %v6113_v31 = vpop.permute.xlu0 %592 }
  0xd3   : > { %4763 = vmatmul.msk.f32.gmra.mxu0 %vm595_vm0, %v5829_v12  ;;  %4771 = vmatmul.msk.f32.gmra.mxu1 %vm595_vm0, %v5829_v12 }
  0xd4   : > { %4779 = vmatmul.msk.f32.gmra.mxu2 %vm595_vm0, %v5829_v12  ;;  %4787 = vmatmul.msk.f32.gmra.mxu3 %vm595_vm0, %v5829_v12  ;;  %v3328_v12 = vld [vmem:[%s9455_s8 + $0x20] sm:$0xff] }
  0xd7   : > { %1576 = vperm.xlu2 %5273, %v1526_v54  }
  0xd8   : > { %1666 = vperm.xlu0 %5271, %v1544_v55   ;;  %1736 = vperm.xlu1 %5272, %v1558_v56   ;;  %v6126_v46 = vpop.permute.xlu1 %577 }
  0xdb   : > { %4764 = vmatmul.msk.f32.gmra.mxu0 %vm595_vm0, %v5860_v25  ;;  %4772 = vmatmul.msk.f32.gmra.mxu1 %vm595_vm0, %v5860_v25 }
  0xdc   : > { %4780 = vmatmul.msk.f32.gmra.mxu2 %vm595_vm0, %v5860_v25  ;;  %4788 = vmatmul.msk.f32.gmra.mxu3 %vm595_vm0, %v5860_v25 }
  0xdf   : > { %1571 = vperm.xlu2 %5273, %v1525_v57   ;;  %v6131_v57 = vpop.permute.xlu2 %567 }
  0xe0   : > { %1661 = vperm.xlu0 %5271, %v1543_v58   ;;  %1731 = vperm.xlu1 %5272, %v1557_v59  }
  0xe3   : > { %4765 = vmatmul.msk.f32.gmra.mxu0 %vm595_vm0, %v5887_v34  ;;  %4773 = vmatmul.msk.f32.gmra.mxu1 %vm595_vm0, %v5887_v34 }
  0xe4   : > { %4781 = vmatmul.msk.f32.gmra.mxu2 %vm595_vm0, %v5887_v34  ;;  %4789 = vmatmul.msk.f32.gmra.mxu3 %vm595_vm0, %v5887_v34 }
  0xe7   : > { %1566 = vperm.xlu2 %5273, %v1524_v60  }
  0xe8   : > { %1656 = vperm.xlu0 %5271, %v1542_v61   ;;  %1726 = vperm.xlu1 %5272, %v1556_v62  }
  0xeb   : > { %4766 = vmatmul.msk.f32.gmra.mxu0 %vm595_vm0, %v5909_v38  ;;  %4774 = vmatmul.msk.f32.gmra.mxu1 %vm595_vm0, %v5909_v38 }
  0xec   : > { %4782 = vmatmul.msk.f32.gmra.mxu2 %vm595_vm0, %v5909_v38  ;;  %4790 = vmatmul.msk.f32.gmra.mxu3 %vm595_vm0, %v5909_v38  ;;  %v6119_v38 = vpop.permute.xlu0 %587 }
  0xef   : > { %3334 = vperm.xlu2 %5273, %v3324_v63  }
  0xf0   : > { %v6064_v2 = vpop.f32.mrf.mxu0  ;;  %v6066_v3 = vpop.f32.mrf.mxu1  ;;  %1651 = vperm.xlu0 %5271, %v1541_v0   ;;  %1646 = vperm.xlu1 %5272, %v1540_v1  }
  0xf7   : > { %v6077_v7 = vpop.f32.mrf.mxu2  ;;  %v6079_v8 = vpop.f32.mrf.mxu3  ;;  %3349 = vperm.xlu2 %5273, %v3327_v4  }
  0xf8   : > { %v6081_v9 = vpop.f32.mrf.mxu0  ;;  %v6083_v10 = vpop.f32.mrf.mxu1  ;;  %3339 = vperm.xlu0 %5271, %v3325_v5   ;;  %3344 = vperm.xlu1 %5272, %v3326_v6  }
  0xff   : > { %v6094_v14 = vpop.f32.mrf.mxu2  ;;  %v6096_v15 = vpop.f32.mrf.mxu3  ;;  %3364 = vperm.xlu2 %5273, %v3330_v11  }
 0x100   : > { %v643_v16 = vpop.f32.mrf.mxu0  ;;  %v684_v17 = vpop.f32.mrf.mxu1  ;;  %3354 = vperm.xlu0 %5271, %v3328_v12   ;;  %3359 = vperm.xlu1 %5272, %v3329_v13  }
 0x101   : > { %v644_v11 = vadd.f32 %v643_v16, %v6131_v57  ;;  %v685_v12 = vadd.f32 %v684_v17, %v6131_v57 }
 0x107   : > { %v6101_v19 = vpop.f32.mrf.mxu2  ;;  %v6103_v20 = vpop.f32.mrf.mxu3 }
 0x108   : > { %v646_v21 = vpop.f32.mrf.mxu0  ;;  %v687_v22 = vpop.f32.mrf.mxu1  ;;  %3369 = vperm.xlu0 %5271, %v3331_v18  }
 0x109   : > { %v647_v58 = vadd.f32 %v646_v21, %v6117_v37  ;;  %v688_v59 = vadd.f32 %v687_v22, %v6117_v37  ;;  %v6145_v21 = vpop.permute.xlu0 %562 }
 0x10a   : > { %v682_v16 = vadd.f32 %v6083_v10, %v6145_v21 }
 0x10b   : > { %v973_v17 = vmax.f32 %v688_v59, 0.0 }
 0x10f   : > { %v6105_v23 = vpop.f32.mrf.mxu2  ;;  %v6107_v24 = vpop.f32.mrf.mxu3 }
 0x110   : > { %v649_v25 = vpop.f32.mrf.mxu0  ;;  %v690_v26 = vpop.f32.mrf.mxu1 }
 0x111   : > { %v650_v52 = vadd.f32 %v649_v25, %v6126_v46  ;;  %v691_v53 = vadd.f32 %v690_v26, %v6126_v46 }
 0x113   : > { %v980_v13 = vmax.f32 %v650_v52, 0.0  ;;  %v981_v18 = vmax.f32 %v691_v53, 0.0 }
 0x117   : > { %v6109_v27 = vpop.f32.mrf.mxu2  ;;  %v6111_v28 = vpop.f32.mrf.mxu3 }
 0x118   : > { %v652_v29 = vpop.f32.mrf.mxu0  ;;  %v693_v30 = vpop.f32.mrf.mxu1 }
 0x119   : > { %v653_v41 = vadd.f32 %v652_v29, %v6115_v32  ;;  %v694_v49 = vadd.f32 %v693_v30, %v6115_v32  ;;  %v641_v30 = vadd.f32 %v6081_v9, %v6145_v21 }
 0x11b   : > { %v988_v54 = vmax.f32 %v653_v41, 0.0  ;;  %v989_v60 = vmax.f32 %v694_v49, 0.0  ;;  %v964_v41 = vmax.f32 %v644_v11, 0.0 }
 0x11f   : > { %v734_v33 = vpop.f32.mrf.mxu2  ;;  %v775_v34 = vpop.f32.mrf.mxu3 }
 0x120   : > { %v655_v35 = vpop.f32.mrf.mxu0  ;;  %v696_v36 = vpop.f32.mrf.mxu1  ;;  %v735_v22 = vadd.f32 %v734_v33, %v6115_v32  ;;  %v776_v25 = vadd.f32 %v775_v34, %v6115_v32  ;;  %v773_v33 = vadd.f32 %v6111_v28, %v6126_v46  ;;  %v770_v28 = vadd.f32 %v6107_v24, %v6117_v37 }
 0x121   : > { %v656_v45 = vadd.f32 %v655_v35, %v6119_v38  ;;  %v697_v42 = vadd.f32 %v696_v36, %v6119_v38  ;;  %v972_v35 = vmax.f32 %v647_v58, 0.0  ;;  %v6153_v36 = vpop.permute.xlu1 %557 }
 0x122   : > { %v638_v9 = vadd.f32 %v6064_v2, %v6153_v36  ;;  %v679_v10 = vadd.f32 %v6066_v3, %v6153_v36  ;;  %v726_v3 = vadd.f32 %v6101_v19, %v6131_v57  ;;  %v983_v24 = vmax.f32 %v773_v33, 0.0 }
 0x123   : > { %v996_v55 = vmax.f32 %v656_v45, 0.0  ;;  %v997_v56 = vmax.f32 %v697_v42, 0.0  ;;  %v991_v45 = vmax.f32 %v776_v25, 0.0  ;;  %v956_v42 = vmax.f32 %v641_v30, 0.0 }
 0x124   : > { %v948_v52 = vmax.f32 %v638_v9, 0.0  ;;  %v949_v53 = vmax.f32 %v679_v10, 0.0  ;;  %v764_v19 = vadd.f32 %v6096_v15, %v6145_v21  ;;  %v720_v58 = vadd.f32 %v6077_v7, %v6153_v36 }
 0x125   : > { %v966_v59 = vmax.f32 %v726_v3, 0.0 }
 0x127   : > { %v737_v39 = vpop.f32.mrf.mxu2  ;;  %v778_v40 = vpop.f32.mrf.mxu3 }
 0x128   : > { %v658_v43 = vpop.f32.mrf.mxu0  ;;  %v699_v44 = vpop.f32.mrf.mxu1  ;;  %v738_v63 = vadd.f32 %v737_v39, %v6119_v38  ;;  %v779_v0 = vadd.f32 %v778_v40, %v6119_v38  ;;  %v732_v39 = vadd.f32 %v6109_v27, %v6126_v46  ;;  %v729_v27 = vadd.f32 %v6105_v23, %v6117_v37 }
 0x129   : > { %v659_v47 = vadd.f32 %v658_v43, %v6113_v31  ;;  %v700_v48 = vadd.f32 %v699_v44, %v6113_v31  ;;  %v965_v43 = vmax.f32 %v685_v12, 0.0  ;;  %v990_v44 = vmax.f32 %v735_v22, 0.0  ;;  %v6228_v22 = vld [vmem:[%s9450_s3 + $0x10] sm:$0xff] }
 0x12a   : > { %v998_v34 = vmax.f32 %v738_v63, 0.0  ;;  %v999_v40 = vmax.f32 %v779_v0, 0.0  ;;  %v767_v23 = vadd.f32 %v6103_v20, %v6131_v57  ;;  %v982_v49 = vmax.f32 %v732_v39, 0.0 }
 0x12b   : > { %v1004_v51 = vmax.f32 %v659_v47, 0.0  ;;  %v1005_v50 = vmax.f32 %v700_v48, 0.0  ;;  %v957_v47 = vmax.f32 %v682_v16, 0.0  ;;  %v975_v20 = vmax.f32 %v770_v28, 0.0  ;;  %v6245_v16 = vld [vmem:[%s9450_s3 + $0x18] sm:$0xff] }
 0x12c   : > { %v950_v63 = vmax.f32 %v720_v58, 0.0 }
 0x12d   : > { %1100 = vmatpush.msra.mxu0 %v1004_v51  ;;  %1141 = vmatpush.msra.mxu1 %v1005_v50 }
 0x12f   : > { %v740_v61 = vpop.f32.mrf.mxu2  ;;  %v781_v62 = vpop.f32.mrf.mxu3  ;;  %1101 = vmatpush.msra.mxu0 %v996_v55  ;;  %1142 = vmatpush.msra.mxu1 %v997_v56  ;;  %v974_v55 = vmax.f32 %v729_v27, 0.0  ;;  %v6186_v56 = vld [vmem:[%s9450_s3] sm:$0xff] }
 0x130   : > { %v741_v1 = vadd.f32 %v740_v61, %v6113_v31  ;;  %v782_v4 = vadd.f32 %v781_v62, %v6113_v31  ;;  %v6139_v5 = vpop.f32.mrf.mxu0  ;;  %v6141_v6 = vpop.f32.mrf.mxu1  ;;  %v959_v61 = vmax.f32 %v764_v19, 0.0 }
 0x131   : > { %1102 = vmatpush.msra.mxu0 %v988_v54  ;;  %1143 = vmatpush.msra.mxu1 %v989_v60  ;;  %v723_v54 = vadd.f32 %v6094_v14, %v6145_v21  ;;  %v761_v14 = vadd.f32 %v6079_v8, %v6153_v36  ;;  %v967_v60 = vmax.f32 %v767_v23, 0.0 }
 0x132   : > { %v1006_v26 = vmax.f32 %v741_v1, 0.0  ;;  %v1007_v29 = vmax.f32 %v782_v4, 0.0  ;;  %v6207_v4 = vld [vmem:[%s9450_s3 + $0x8] sm:$0xff] }
 0x133   : > { %1103 = vmatpush.msra.mxu0 %v980_v13  ;;  %1144 = vmatpush.msra.mxu1 %v981_v18  ;;  %v958_v15 = vmax.f32 %v723_v54, 0.0  ;;  %v951_v8 = vmax.f32 %v761_v14, 0.0 }
 0x134   : > { %1182 = vmatpush.msra.mxu2 %v1006_v26  ;;  %1223 = vmatpush.msra.mxu3 %v1007_v29 }
 0x135   : > { %1104 = vmatpush.msra.mxu0 %v972_v35  ;;  %1145 = vmatpush.msra.mxu1 %v973_v17 }
 0x136   : > { %1183 = vmatpush.msra.mxu2 %v998_v34  ;;  %1224 = vmatpush.msra.mxu3 %v999_v40  ;;  %v6262_v34 = vld [vmem:[%s9450_s3 + $0x20] sm:$0xff] }
 0x137   : > { %v6167_v2 = vpop.f32.mrf.mxu2  ;;  %v6169_v48 = vpop.f32.mrf.mxu3  ;;  %1105 = vmatpush.msra.mxu0 %v964_v41  ;;  %1146 = vmatpush.msra.mxu1 %v965_v43  ;;  %v6275_v43 = vld [vmem:[%s9450_s3 + $0x28] sm:$0xff] }
 0x138   : > { %1184 = vmatpush.msra.mxu2 %v990_v44  ;;  %1225 = vmatpush.msra.mxu3 %v991_v45  ;;  %v6175_v51 = vpop.f32.mrf.mxu0  ;;  %v6177_v50 = vpop.f32.mrf.mxu1 }
 0x139   : > { %1106 = vmatpush.msra.mxu0 %v956_v42  ;;  %1147 = vmatpush.msra.mxu1 %v957_v47 }
 0x13a   : > { %1185 = vmatpush.msra.mxu2 %v982_v49  ;;  %1226 = vmatpush.msra.mxu3 %v983_v24  ;;  %v6292_v49 = vld [vmem:[%s9450_s3 + $0x30] sm:$0xff] }
 0x13b   : > { %1107 = vmatpush.msra.mxu0 %v948_v52  ;;  %1148 = vmatpush.msra.mxu1 %v949_v53 }
 0x13c   : > { %1186 = vmatpush.msra.mxu2 %v974_v55  ;;  %1227 = vmatpush.msra.mxu3 %v975_v20 }
 0x13d   : > { %4791 = vmatmul.msk.f32.vlgmr.msra.gmra.mxu0 %vm595_vm0, %v6186_v56  ;;  %4799 = vmatmul.msk.f32.vlgmr.msra.gmra.mxu1 %vm595_vm0, %v6186_v56 }
 0x13e   : > { %1187 = vmatpush.msra.mxu2 %v966_v59  ;;  %1228 = vmatpush.msra.mxu3 %v967_v60 }
 0x13f   : > { %v6196_v62 = vpop.f32.mrf.mxu2  ;;  %v6198_v7 = vpop.f32.mrf.mxu3 }
 0x140   : > { %1188 = vmatpush.msra.mxu2 %v958_v15  ;;  %1229 = vmatpush.msra.mxu3 %v959_v61  ;;  %v6200_v0 = vpop.f32.mrf.mxu0  ;;  %v6202_v1 = vpop.f32.mrf.mxu1 }
 0x142   : > { %1189 = vmatpush.msra.mxu2 %v950_v63  ;;  %1230 = vmatpush.msra.mxu3 %v951_v8 }
 0x143   : > { %4807 = vmatmul.msk.f32.vlgmr.msra.gmra.mxu2 %vm595_vm0, %v6186_v56  ;;  %4815 = vmatmul.msk.f32.vlgmr.msra.gmra.mxu3 %vm595_vm0, %v6186_v56 }
 0x145   : > { %4792 = vmatmul.msk.f32.gmra.mxu0 %vm595_vm0, %v6207_v4  ;;  %4800 = vmatmul.msk.f32.gmra.mxu1 %vm595_vm0, %v6207_v4 }
 0x147   : > { %v6217_v11 = vpop.f32.mrf.mxu2  ;;  %v6219_v12 = vpop.f32.mrf.mxu3 }
 0x148   : > { %v6221_v13 = vpop.f32.mrf.mxu0  ;;  %v6223_v18 = vpop.f32.mrf.mxu1 }
 0x149   : > { %v811_v8 = vadd.f32 %v6221_v13, %v6117_v37 }
 0x14b   : > { %4808 = vmatmul.msk.f32.gmra.mxu2 %vm595_vm0, %v6207_v4  ;;  %4816 = vmatmul.msk.f32.gmra.mxu3 %vm595_vm0, %v6207_v4 }
 0x14d   : > { %4793 = vmatmul.msk.f32.gmra.mxu0 %vm595_vm0, %v6228_v22  ;;  %4801 = vmatmul.msk.f32.gmra.mxu1 %vm595_vm0, %v6228_v22 }
 0x14f   : > { %v6238_v25 = vpop.f32.mrf.mxu2  ;;  %v6240_v26 = vpop.f32.mrf.mxu3 }
 0x150   : > { %v813_v29 = vpop.f32.mrf.mxu0  ;;  %v854_v30 = vpop.f32.mrf.mxu1 }
 0x151   : > { %v814_v19 = vadd.f32 %v813_v29, %v6126_v46  ;;  %v855_v55 = vadd.f32 %v854_v30, %v6126_v46  ;;  %v852_v29 = vadd.f32 %v6223_v18, %v6117_v37 }
 0x153   : > { %4809 = vmatmul.msk.f32.gmra.mxu2 %vm595_vm0, %v6228_v22  ;;  %4817 = vmatmul.msk.f32.gmra.mxu3 %vm595_vm0, %v6228_v22  ;;  %v984_v30 = vmax.f32 %v814_v19, 0.0 }
 0x155   : > { %4794 = vmatmul.msk.f32.gmra.mxu0 %vm595_vm0, %v6245_v16  ;;  %4802 = vmatmul.msk.f32.gmra.mxu1 %vm595_vm0, %v6245_v16 }
 0x157   : > { %v6255_v35 = vpop.f32.mrf.mxu2  ;;  %v6257_v17 = vpop.f32.mrf.mxu3 }
 0x158   : > { %v816_v39 = vpop.f32.mrf.mxu0  ;;  %v857_v33 = vpop.f32.mrf.mxu1 }
 0x159   : > { %v817_v53 = vadd.f32 %v816_v39, %v6115_v32  ;;  %v858_v54 = vadd.f32 %v857_v33, %v6115_v32  ;;  %v985_v39 = vmax.f32 %v855_v55, 0.0 }
 0x15b   : > { %4810 = vmatmul.msk.f32.gmra.mxu2 %vm595_vm0, %v6245_v16  ;;  %4818 = vmatmul.msk.f32.gmra.mxu3 %vm595_vm0, %v6245_v16  ;;  %v992_v60 = vmax.f32 %v817_v53, 0.0  ;;  %v993_v15 = vmax.f32 %v858_v54, 0.0 }
 0x15d   : > { %4795 = vmatmul.msk.f32.gmra.mxu0 %vm595_vm0, %v6262_v34  ;;  %4803 = vmatmul.msk.f32.gmra.mxu1 %vm595_vm0, %v6262_v34 }
 0x15f   : > { %v898_v40 = vpop.f32.mrf.mxu2  ;;  %v939_v9 = vpop.f32.mrf.mxu3 }
 0x160   : > { %v819_v10 = vpop.f32.mrf.mxu0  ;;  %v860_v41 = vpop.f32.mrf.mxu1  ;;  %v899_v13 = vadd.f32 %v898_v40, %v6115_v32  ;;  %v940_v18 = vadd.f32 %v939_v9, %v6115_v32  ;;  %v937_v40 = vadd.f32 %v6257_v17, %v6126_v46  ;;  %v802_v9 = vadd.f32 %v6139_v5, %v6153_v36 }
 0x161   : > { %v820_v3 = vadd.f32 %v819_v10, %v6119_v38  ;;  %v861_v23 = vadd.f32 %v860_v41, %v6119_v38  ;;  %v890_v5 = vadd.f32 %v6217_v11, %v6131_v57  ;;  %v925_v11 = vadd.f32 %v6169_v48, %v6153_v36 }
 0x162   : > { %v987_v54 = vmax.f32 %v937_v40, 0.0  ;;  %v952_v19 = vmax.f32 %v802_v9, 0.0 }
 0x163   : > { %4811 = vmatmul.msk.f32.gmra.mxu2 %vm595_vm0, %v6262_v34  ;;  %4819 = vmatmul.msk.f32.gmra.mxu3 %vm595_vm0, %v6262_v34  ;;  %v1000_v20 = vmax.f32 %v820_v3, 0.0  ;;  %v1001_v58 = vmax.f32 %v861_v23, 0.0  ;;  %v994_v3 = vmax.f32 %v899_v13, 0.0 }
 0x165   : > { %4796 = vmatmul.msk.f32.gmra.mxu0 %vm595_vm0, %v6275_v43  ;;  %4804 = vmatmul.msk.f32.gmra.mxu1 %vm595_vm0, %v6275_v43 }
 0x167   : > { %v901_v27 = vpop.f32.mrf.mxu2  ;;  %v942_v28 = vpop.f32.mrf.mxu3 }
 0x168   : > { %v822_v44 = vpop.f32.mrf.mxu0  ;;  %v863_v45 = vpop.f32.mrf.mxu1  ;;  %v902_v33 = vadd.f32 %v901_v27, %v6119_v38  ;;  %v943_v10 = vadd.f32 %v942_v28, %v6119_v38  ;;  %v6325_v38 = vld [vmem:[%s9450_s3 + $0x38] sm:$0xff]  ;;  %v976_v27 = vmax.f32 %v811_v8, 0.0  ;;  %v977_v28 = vmax.f32 %v852_v29, 0.0 }
 0x169   : > { %v823_v42 = vadd.f32 %v822_v44, %v6113_v31  ;;  %v864_v47 = vadd.f32 %v863_v45, %v6113_v31  ;;  %v849_v45 = vadd.f32 %v6202_v1, %v6131_v57  ;;  %v846_v1 = vadd.f32 %v6177_v50, %v6145_v21 }
 0x16a   : > { %v1003_v32 = vmax.f32 %v943_v10, 0.0 }
 0x16b   : > { %v1008_v24 = vmax.f32 %v823_v42, 0.0  ;;  %v1009_v52 = vmax.f32 %v864_v47, 0.0  ;;  %4812 = vmatmul.msk.f32.gmra.mxu2 %vm595_vm0, %v6275_v43  ;;  %4820 = vmatmul.msk.f32.gmra.mxu3 %vm595_vm0, %v6275_v43  ;;  %v896_v42 = vadd.f32 %v6255_v35, %v6126_v46  ;;  %v1002_v47 = vmax.f32 %v902_v33, 0.0 }
 0x16c   : > { %v969_v50 = vmax.f32 %v849_v45, 0.0  ;;  %v843_v35 = vadd.f32 %v6141_v6, %v6153_v36  ;;  %v995_v46 = vmax.f32 %v940_v18, 0.0  ;;  %v961_v23 = vmax.f32 %v846_v1, 0.0 }
 0x16d   : > { %4797 = vmatmul.msk.f32.gmra.mxu0 %vm595_vm0, %v6292_v49  ;;  %4805 = vmatmul.msk.f32.gmra.mxu1 %vm595_vm0, %v6292_v49  ;;  %v986_v53 = vmax.f32 %v896_v42, 0.0  ;;  %v931_v6 = vadd.f32 %v6219_v12, %v6131_v57 }
 0x16e   : > { %1264 = vmatpush.msrb.mxu0 %v1008_v24  ;;  %1305 = vmatpush.msrb.mxu1 %v1009_v52  ;;  %v893_v24 = vadd.f32 %v6238_v25, %v6117_v37  ;;  %v934_v52 = vadd.f32 %v6240_v26, %v6117_v37  ;;  %v953_v55 = vmax.f32 %v843_v35, 0.0  ;;  %v887_v37 = vadd.f32 %v6196_v62, %v6145_v21 }
 0x16f   : > { %v904_v14 = vpop.f32.mrf.mxu2  ;;  %v945_v59 = vpop.f32.mrf.mxu3  ;;  %v928_v25 = vadd.f32 %v6198_v7, %v6145_v21  ;;  %v970_v62 = vmax.f32 %v890_v5, 0.0  ;;  %v971_v12 = vmax.f32 %v931_v6, 0.0 }
 0x170   : > { %v905_v61 = vadd.f32 %v904_v14, %v6113_v31  ;;  %v946_v63 = vadd.f32 %v945_v59, %v6113_v31  ;;  %1265 = vmatpush.msrb.mxu0 %v1000_v20  ;;  %1306 = vmatpush.msrb.mxu1 %v1001_v58  ;;  %v808_v31 = vadd.f32 %v6200_v0, %v6131_v57  ;;  %v978_v26 = vmax.f32 %v893_v24, 0.0 }
 0x171   : > { %v805_v0 = vadd.f32 %v6175_v51, %v6145_v21  ;;  %v979_v20 = vmax.f32 %v934_v52, 0.0  ;;  %v884_v57 = vadd.f32 %v6167_v2, %v6153_v36  ;;  %v962_v21 = vmax.f32 %v887_v37, 0.0 }
 0x172   : > { %v1010_v41 = vmax.f32 %v905_v61, 0.0  ;;  %v1011_v44 = vmax.f32 %v946_v63, 0.0  ;;  %1266 = vmatpush.msrb.mxu0 %v992_v60  ;;  %1307 = vmatpush.msrb.mxu1 %v993_v15  ;;  %v968_v51 = vmax.f32 %v808_v31, 0.0  ;;  %v963_v7 = vmax.f32 %v928_v25, 0.0 }
 0x173   : > { %4813 = vmatmul.msk.f32.gmra.mxu2 %vm595_vm0, %v6292_v49  ;;  %4821 = vmatmul.msk.f32.gmra.mxu3 %vm595_vm0, %v6292_v49  ;;  %v960_v17 = vmax.f32 %v805_v0, 0.0  ;;  %v954_v58 = vmax.f32 %v884_v57, 0.0  ;;  %v955_v14 = vmax.f32 %v925_v11, 0.0  ;;  %v6461_v0 = vpop.permute.xlu1 %1055 }
 0x174   : > { %1267 = vmatpush.msrb.mxu0 %v984_v30  ;;  %1308 = vmatpush.msrb.mxu1 %v985_v39 }
 0x175   : > { %1346 = vmatpush.msrb.mxu2 %v1010_v41  ;;  %1387 = vmatpush.msrb.mxu3 %v1011_v44  ;;  %v6457_v44 = vpop.permute.xlu2 %1065 }
 0x176   : > { %4798 = vmatmul.msk.f32.gmra.mxu0 %vm595_vm0, %v6325_v38  ;;  %4806 = vmatmul.msk.f32.gmra.mxu1 %vm595_vm0, %v6325_v38 }
 0x177   : > { %1268 = vmatpush.msrb.mxu0 %v976_v27  ;;  %1309 = vmatpush.msrb.mxu1 %v977_v28 }
 0x178   : > { %1347 = vmatpush.msrb.mxu2 %v1002_v47  ;;  %1388 = vmatpush.msrb.mxu3 %v1003_v32 }
 0x179   : > { %1269 = vmatpush.msrb.mxu0 %v968_v51  ;;  %1310 = vmatpush.msrb.mxu1 %v969_v50 }
 0x17a   : > { %1348 = vmatpush.msrb.mxu2 %v994_v3  ;;  %1389 = vmatpush.msrb.mxu3 %v995_v46 }
 0x17b   : > { %1270 = vmatpush.msrb.mxu0 %v960_v17  ;;  %1311 = vmatpush.msrb.mxu1 %v961_v23 }
 0x17c   : > { %1349 = vmatpush.msrb.mxu2 %v986_v53  ;;  %1390 = vmatpush.msrb.mxu3 %v987_v54 }
 0x17d   : > { %4814 = vmatmul.msk.f32.gmra.mxu2 %vm595_vm0, %v6325_v38  ;;  %4822 = vmatmul.msk.f32.gmra.mxu3 %vm595_vm0, %v6325_v38  ;;  %v6463_v1 = vpop.permute.xlu2 %1050 }
 0x17e   : > { %1271 = vmatpush.msrb.mxu0 %v952_v19  ;;  %1312 = vmatpush.msrb.mxu1 %v953_v55  ;;  %v6477_v55 = vpop.permute.xlu1 %1040 }
 0x17f   : > { %1350 = vmatpush.msrb.mxu2 %v978_v26  ;;  %1391 = vmatpush.msrb.mxu3 %v979_v20 }
 0x180   : > { %4823 = vmatmul.msk.f32.vlgmr.msrb.gmra.mxu0 %vm595_vm0, %v6186_v56  ;;  %4831 = vmatmul.msk.f32.vlgmr.msrb.gmra.mxu1 %vm595_vm0, %v6186_v56 }
 0x181   : > { %1351 = vmatpush.msrb.mxu2 %v970_v62  ;;  %1392 = vmatpush.msrb.mxu3 %v971_v12 }
 0x183   : > { %1352 = vmatpush.msrb.mxu2 %v962_v21  ;;  %1393 = vmatpush.msrb.mxu3 %v963_v7 }
 0x185   : > { %1353 = vmatpush.msrb.mxu2 %v954_v58  ;;  %1394 = vmatpush.msrb.mxu3 %v955_v14  ;;  %v6479_v37 = vpop.permute.xlu2 %1035 }
 0x186   : > { %4839 = vmatmul.msk.f32.vlgmr.msrb.gmra.mxu2 %vm595_vm0, %v6186_v56  ;;  %4847 = vmatmul.msk.f32.vlgmr.msrb.gmra.mxu3 %vm595_vm0, %v6186_v56 }
 0x188   : > { %4824 = vmatmul.msk.f32.gmra.mxu0 %vm595_vm0, %v6207_v4  ;;  %4832 = vmatmul.msk.f32.gmra.mxu1 %vm595_vm0, %v6207_v4 }
 0x18e   : > { %4840 = vmatmul.msk.f32.gmra.mxu2 %vm595_vm0, %v6207_v4  ;;  %4848 = vmatmul.msk.f32.gmra.mxu3 %vm595_vm0, %v6207_v4 }
 0x190   : > { %4825 = vmatmul.msk.f32.gmra.mxu0 %vm595_vm0, %v6228_v22  ;;  %4833 = vmatmul.msk.f32.gmra.mxu1 %vm595_vm0, %v6228_v22 }
 0x196   : > { %4841 = vmatmul.msk.f32.gmra.mxu2 %vm595_vm0, %v6228_v22  ;;  %4849 = vmatmul.msk.f32.gmra.mxu3 %vm595_vm0, %v6228_v22 }
 0x198   : > { %4826 = vmatmul.msk.f32.gmra.mxu0 %vm595_vm0, %v6245_v16  ;;  %4834 = vmatmul.msk.f32.gmra.mxu1 %vm595_vm0, %v6245_v16 }
 0x19e   : > { %4842 = vmatmul.msk.f32.gmra.mxu2 %vm595_vm0, %v6245_v16  ;;  %4850 = vmatmul.msk.f32.gmra.mxu3 %vm595_vm0, %v6245_v16 }
 0x1a0   : > { %4827 = vmatmul.msk.f32.gmra.mxu0 %vm595_vm0, %v6262_v34  ;;  %4835 = vmatmul.msk.f32.gmra.mxu1 %vm595_vm0, %v6262_v34 }
 0x1a6   : > { %4843 = vmatmul.msk.f32.gmra.mxu2 %vm595_vm0, %v6262_v34  ;;  %4851 = vmatmul.msk.f32.gmra.mxu3 %vm595_vm0, %v6262_v34 }
 0x1a8   : > { %4828 = vmatmul.msk.f32.gmra.mxu0 %vm595_vm0, %v6275_v43  ;;  %4836 = vmatmul.msk.f32.gmra.mxu1 %vm595_vm0, %v6275_v43 }
 0x1ae   : > { %4844 = vmatmul.msk.f32.gmra.mxu2 %vm595_vm0, %v6275_v43  ;;  %4852 = vmatmul.msk.f32.gmra.mxu3 %vm595_vm0, %v6275_v43 }
 0x1b0   : > { %4829 = vmatmul.msk.f32.gmra.mxu0 %vm595_vm0, %v6292_v49  ;;  %4837 = vmatmul.msk.f32.gmra.mxu1 %vm595_vm0, %v6292_v49 }
 0x1b6   : > { %4845 = vmatmul.msk.f32.gmra.mxu2 %vm595_vm0, %v6292_v49  ;;  %4853 = vmatmul.msk.f32.gmra.mxu3 %vm595_vm0, %v6292_v49 }
 0x1b8   : > { %4830 = vmatmul.msk.f32.gmra.mxu0 %vm595_vm0, %v6325_v38  ;;  %4838 = vmatmul.msk.f32.gmra.mxu1 %vm595_vm0, %v6325_v38 }
 0x1ba   : > { %v6425_v36 = vpop.f32.mrf.mxu0  ;;  %v6427_v2 = vpop.f32.mrf.mxu1 }
 0x1be   : > { %4846 = vmatmul.msk.f32.gmra.mxu2 %vm595_vm0, %v6325_v38  ;;  %4854 = vmatmul.msk.f32.gmra.mxu3 %vm595_vm0, %v6325_v38  ;;  %v6459_v38 = vpop.permute.xlu0 %1060 }
 0x1c2   : > { %v6433_v48 = vpop.f32.mrf.mxu0  ;;  %v6435_v56 = vpop.f32.mrf.mxu1 }
 0x1c3   : > { %v1113_v12 = vadd.f32 %v6433_v48, %v6479_v37  ;;  %v1154_v21 = vadd.f32 %v6435_v56, %v6479_v37 }
 0x1c6   : > { %v6437_v4 = vpop.f32.mrf.mxu2  ;;  %v6439_v22 = vpop.f32.mrf.mxu3 }
 0x1c7   : > { %v6469_v51 = vpop.permute.xlu0 %1045 }
 0x1ca   : > { %v1115_v16 = vpop.f32.mrf.mxu0  ;;  %v1156_v34 = vpop.f32.mrf.mxu1 }
 0x1cb   : > { %v1116_v25 = vadd.f32 %v1115_v16, %v6477_v55  ;;  %v1157_v26 = vadd.f32 %v1156_v34, %v6477_v55 }
 0x1ce   : > { %v6441_v43 = vpop.f32.mrf.mxu2  ;;  %v6443_v49 = vpop.f32.mrf.mxu3 }
 0x1cf   : > { %v6491_v14 = vpop.permute.xlu0 %1030 }
 0x1d0   : > { %v1110_v16 = vadd.f32 %v6425_v36, %v6491_v14  ;;  %v1151_v34 = vadd.f32 %v6427_v2, %v6491_v14 }
 0x1d2   : > { %v1118_v59 = vpop.f32.mrf.mxu0  ;;  %v1159_v60 = vpop.f32.mrf.mxu1 }
 0x1d3   : > { %v1119_v54 = vadd.f32 %v1118_v59, %v6469_v51  ;;  %v1160_v5 = vadd.f32 %v1159_v60, %v6469_v51  ;;  %v1436_v59 = vmax.f32 %v1116_v25, 0.0  ;;  %v1437_v60 = vmax.f32 %v1157_v26, 0.0 }
 0x1d5   : > { %v1444_v7 = vmax.f32 %v1119_v54, 0.0  ;;  %v1445_v58 = vmax.f32 %v1160_v5, 0.0  ;;  %v1236_v54 = vadd.f32 %v6443_v49, %v6479_v37 }
 0x1d6   : > { %v6445_v15 = vpop.f32.mrf.mxu2  ;;  %v6447_v61 = vpop.f32.mrf.mxu3 }
 0x1da   : > { %v1121_v63 = vpop.f32.mrf.mxu0  ;;  %v1162_v8 = vpop.f32.mrf.mxu1 }
 0x1db   : > { %v1122_v23 = vadd.f32 %v1121_v63, %v6463_v1  ;;  %v1163_v24 = vadd.f32 %v1162_v8, %v6463_v1 }
 0x1dd   : > { %v1452_v20 = vmax.f32 %v1122_v23, 0.0  ;;  %v1453_v57 = vmax.f32 %v1163_v24, 0.0  ;;  %v1239_v23 = vadd.f32 %v6447_v61, %v6477_v55  ;;  %v1233_v61 = vadd.f32 %v6439_v22, %v6491_v14 }
 0x1de   : > { %v6449_v29 = vpop.f32.mrf.mxu2  ;;  %v6451_v30 = vpop.f32.mrf.mxu3 }
 0x1df   : > { %v1439_v25 = vmax.f32 %v1239_v23, 0.0  ;;  %v1423_v22 = vmax.f32 %v1233_v61, 0.0 }
 0x1e2   : > { %v1124_v39 = vpop.f32.mrf.mxu0  ;;  %v1165_v33 = vpop.f32.mrf.mxu1 }
 0x1e3   : > { %v1125_v50 = vadd.f32 %v1124_v39, %v6461_v0  ;;  %v1166_v9 = vadd.f32 %v1165_v33, %v6461_v0 }
 0x1e5   : > { %v1460_v6 = vmax.f32 %v1125_v50, 0.0  ;;  %v1461_v19 = vmax.f32 %v1166_v9, 0.0 }
 0x1e6   : > { %v6453_v10 = vpop.f32.mrf.mxu2  ;;  %v6455_v41 = vpop.f32.mrf.mxu3 }
 0x1ea   : > { %v1127_v31 = vpop.f32.mrf.mxu0  ;;  %v1168_v45 = vpop.f32.mrf.mxu1 }
 0x1eb   : > { %v1128_v42 = vadd.f32 %v1127_v31, %v6459_v38  ;;  %v1169_v40 = vadd.f32 %v1168_v45, %v6459_v38  ;;  %v1428_v31 = vmax.f32 %v1113_v12, 0.0  ;;  %v1429_v45 = vmax.f32 %v1154_v21, 0.0 }
 0x1ed   : > { %v1468_v52 = vmax.f32 %v1128_v42, 0.0  ;;  %v1469_v53 = vmax.f32 %v1169_v40, 0.0  ;;  %v1420_v42 = vmax.f32 %v1110_v16, 0.0  ;;  %v1421_v40 = vmax.f32 %v1151_v34, 0.0  ;;  %v1486_v16 = vld [vmem:[%s9452_s5 + $0x10] sm:$0xff] }
 0x1ee   : > { %v1206_v13 = vpop.f32.mrf.mxu2  ;;  %v1247_v18 = vpop.f32.mrf.mxu3 }
 0x1ef   : > { %v1207_v36 = vadd.f32 %v1206_v13, %v6461_v0  ;;  %v1248_v2 = vadd.f32 %v1247_v18, %v6461_v0  ;;  %v1484_v13 = vld [vmem:[%s9452_s5] sm:$0xff] }
 0x1f1   : > { %v1462_v18 = vmax.f32 %v1207_v36, 0.0 }
 0x1f3   : > { %v1130_v27 = vpop.f32.mrf.mxu0  ;;  %v1171_v28 = vpop.f32.mrf.mxu1 }
 0x1f4   : > { %v1131_v47 = vadd.f32 %v1130_v27, %v6457_v44  ;;  %v1172_v32 = vadd.f32 %v1171_v28, %v6457_v44 }
 0x1f6   : > { %v1476_v35 = vmax.f32 %v1131_v47, 0.0  ;;  %v1477_v3 = vmax.f32 %v1172_v32, 0.0  ;;  %v1209_v46 = vpop.f32.mrf.mxu2  ;;  %v1250_v17 = vpop.f32.mrf.mxu3  ;;  %v1204_v47 = vadd.f32 %v6453_v10, %v6463_v1  ;;  %v1245_v32 = vadd.f32 %v6455_v41, %v6463_v1 }
 0x1f7   : > { %v1210_v48 = vadd.f32 %v1209_v46, %v6459_v38  ;;  %v1251_v56 = vadd.f32 %v1250_v17, %v6459_v38  ;;  %v1201_v10 = vadd.f32 %v6449_v29, %v6469_v51  ;;  %v1242_v41 = vadd.f32 %v6451_v30, %v6469_v51 }
 0x1f8   : > { %1892 = vmatpush.msra.mxu0 %v1476_v35  ;;  %2029 = vmatpush.msra.mxu1 %v1477_v3  ;;  %v1463_v46 = vmax.f32 %v1248_v2, 0.0  ;;  %v1198_v17 = vadd.f32 %v6445_v15, %v6477_v55  ;;  %v1454_v24 = vmax.f32 %v1204_v47, 0.0  ;;  %v1195_v30 = vadd.f32 %v6441_v43, %v6479_v37  ;;  %v1485_v43 = vld [vmem:[%s9452_s5 + $0x8] sm:$0xff] }
 0x1f9   : > { %v1470_v50 = vmax.f32 %v1210_v48, 0.0  ;;  %v1471_v9 = vmax.f32 %v1251_v56, 0.0  ;;  %v1446_v5 = vmax.f32 %v1201_v10, 0.0  ;;  %v1192_v15 = vadd.f32 %v6437_v4, %v6491_v14 }
 0x1fa   : > { %1893 = vmatpush.msra.mxu0 %v1468_v52  ;;  %2030 = vmatpush.msra.mxu1 %v1469_v53  ;;  %v1455_v52 = vmax.f32 %v1245_v32, 0.0  ;;  %v1430_v49 = vmax.f32 %v1195_v30, 0.0 }
 0x1fb   : > { %v1422_v4 = vmax.f32 %v1192_v15, 0.0 }
 0x1fc   : > { %1894 = vmatpush.msra.mxu0 %v1460_v6  ;;  %2031 = vmatpush.msra.mxu1 %v1461_v19  ;;  %v1447_v6 = vmax.f32 %v1242_v41, 0.0  ;;  %v1438_v19 = vmax.f32 %v1198_v17, 0.0 }
 0x1fd   : > { %v6483_v11 = vpop.f32.mrf.mxu0  ;;  %v6485_v62 = vpop.f32.mrf.mxu1 }
 0x1fe   : > { %1895 = vmatpush.msra.mxu0 %v1452_v20  ;;  %2032 = vmatpush.msra.mxu1 %v1453_v57  ;;  %v1431_v57 = vmax.f32 %v1236_v54, 0.0 }
 0x200   : > { %v1212_v63 = vpop.f32.mrf.mxu2  ;;  %v1253_v8 = vpop.f32.mrf.mxu3  ;;  %1896 = vmatpush.msra.mxu0 %v1444_v7  ;;  %2033 = vmatpush.msra.mxu1 %v1445_v58 }
 0x201   : > { %v1213_v39 = vadd.f32 %v1212_v63, %v6457_v44  ;;  %v1254_v33 = vadd.f32 %v1253_v8, %v6457_v44  ;;  %v1487_v8 = vld [vmem:[%s9452_s5 + $0x18] sm:$0xff] }
 0x202   : > { %1897 = vmatpush.msra.mxu0 %v1436_v59  ;;  %2034 = vmatpush.msra.mxu1 %v1437_v60 }
 0x203   : > { %v1478_v27 = vmax.f32 %v1213_v39, 0.0  ;;  %v1479_v28 = vmax.f32 %v1254_v33, 0.0 }
 0x204   : > { %1898 = vmatpush.msra.mxu0 %v1428_v31  ;;  %2035 = vmatpush.msra.mxu1 %v1429_v45  ;;  %v1488_v31 = vld [vmem:[%s9452_s5 + $0x20] sm:$0xff] }
 0x205   : > { %v6507_v35 = vpop.f32.mrf.mxu0  ;;  %v6509_v3 = vpop.f32.mrf.mxu1  ;;  %2166 = vmatpush.msra.mxu2 %v1478_v27  ;;  %2303 = vmatpush.msra.mxu3 %v1479_v28  ;;  %v1489_v28 = vld [vmem:[%s9452_s5 + $0x28] sm:$0xff] }
 0x206   : > { %1899 = vmatpush.msra.mxu0 %v1420_v42  ;;  %2036 = vmatpush.msra.mxu1 %v1421_v40 }
 0x207   : > { %2167 = vmatpush.msra.mxu2 %v1470_v50  ;;  %2304 = vmatpush.msra.mxu3 %v1471_v9  ;;  %v6598_v50 = vld [vmem:[%s9452_s5 + $0x30] sm:$0xff] }
 0x208   : > { %4855 = vmatmul.msk.f32.vlgmr.msra.gmra.mxu0 %vm595_vm0, %v1484_v13  ;;  %4895 = vmatmul.msk.f32.vlgmr.msra.gmra.mxu1 %vm595_vm0, %v1484_v13 }
 0x209   : > { %v6524_v29 = vpop.f32.mrf.mxu2  ;;  %v6526_v53 = vpop.f32.mrf.mxu3  ;;  %2168 = vmatpush.msra.mxu2 %v1462_v18  ;;  %2305 = vmatpush.msra.mxu3 %v1463_v46 }
 0x20b   : > { %2169 = vmatpush.msra.mxu2 %v1454_v24  ;;  %2306 = vmatpush.msra.mxu3 %v1455_v52 }
 0x20d   : > { %v6536_v26 = vpop.f32.mrf.mxu0  ;;  %v6538_v20 = vpop.f32.mrf.mxu1  ;;  %2170 = vmatpush.msra.mxu2 %v1446_v5  ;;  %2307 = vmatpush.msra.mxu3 %v1447_v6 }
 0x20f   : > { %2171 = vmatpush.msra.mxu2 %v1438_v19  ;;  %2308 = vmatpush.msra.mxu3 %v1439_v25 }
 0x210   : > { %4856 = vmatmul.msk.f32.gmra.mxu0 %vm595_vm0, %v1485_v43  ;;  %4896 = vmatmul.msk.f32.gmra.mxu1 %vm595_vm0, %v1485_v43 }
 0x211   : > { %v6545_v12 = vpop.f32.mrf.mxu2  ;;  %v6547_v21 = vpop.f32.mrf.mxu3  ;;  %2172 = vmatpush.msra.mxu2 %v1430_v49  ;;  %2309 = vmatpush.msra.mxu3 %v1431_v57  ;;  %v1321_v49 = vadd.f32 %v6538_v20, %v6477_v55  ;;  %v1274_v20 = vadd.f32 %v6483_v11, %v6491_v14 }
 0x213   : > { %2173 = vmatpush.msra.mxu2 %v1422_v4  ;;  %2310 = vmatpush.msra.mxu3 %v1423_v22  ;;  %v6623_v22 = vld [vmem:[%s9452_s5 + $0x38] sm:$0xff] }
 0x214   : > { %4935 = vmatmul.msk.f32.vlgmr.msra.gmra.mxu2 %vm595_vm0, %v1484_v13  ;;  %4975 = vmatmul.msk.f32.vlgmr.msra.gmra.mxu3 %vm595_vm0, %v1484_v13 }
 0x215   : > { %v1282_v7 = vpop.f32.mrf.mxu0  ;;  %v1323_v58 = vpop.f32.mrf.mxu1 }
 0x216   : > { %v1283_v15 = vadd.f32 %v1282_v7, %v6469_v51  ;;  %v1324_v61 = vadd.f32 %v1323_v58, %v6469_v51  ;;  %v1277_v7 = vadd.f32 %v6507_v35, %v6479_v37  ;;  %v1318_v58 = vadd.f32 %v6509_v3, %v6479_v37 }
 0x217   : > { %v1441_v3 = vmax.f32 %v1321_v49, 0.0 }
 0x218   : > { %4857 = vmatmul.msk.f32.gmra.mxu0 %vm595_vm0, %v1486_v16  ;;  %4897 = vmatmul.msk.f32.gmra.mxu1 %vm595_vm0, %v1486_v16 }
 0x219   : > { %v6556_v34 = vpop.f32.mrf.mxu2  ;;  %v6558_v59 = vpop.f32.mrf.mxu3 }
 0x21c   : > { %4936 = vmatmul.msk.f32.gmra.mxu2 %vm595_vm0, %v1485_v43  ;;  %4976 = vmatmul.msk.f32.gmra.mxu3 %vm595_vm0, %v1485_v43  ;;  %v1280_v43 = vadd.f32 %v6536_v26, %v6477_v55  ;;  %v1449_v26 = vmax.f32 %v1324_v61, 0.0  ;;  %v1500_v61 = vld [vmem:[%s9452_s5 + $0x80] sm:$0xff] }
 0x21d   : > { %v1285_v60 = vpop.f32.mrf.mxu0  ;;  %v1326_v63 = vpop.f32.mrf.mxu1 }
 0x21e   : > { %v1286_v30 = vadd.f32 %v1285_v60, %v6463_v1  ;;  %v1327_v54 = vadd.f32 %v1326_v63, %v6463_v1  ;;  %v1315_v60 = vadd.f32 %v6485_v62, %v6491_v14  ;;  %v1440_v35 = vmax.f32 %v1280_v43, 0.0  ;;  %v1501_v43 = vld [vmem:[%s9452_s5 + $0x88] sm:$0xff] }
 0x220   : > { %4858 = vmatmul.msk.f32.gmra.mxu0 %vm595_vm0, %v1487_v8  ;;  %4898 = vmatmul.msk.f32.gmra.mxu1 %vm595_vm0, %v1487_v8  ;;  %v1456_v57 = vmax.f32 %v1286_v30, 0.0  ;;  %v1457_v4 = vmax.f32 %v1327_v54, 0.0  ;;  %v1497_v30 = vld [vmem:[%s9452_s5 + $0x68] sm:$0xff]  ;;  %v1498_v54 = vld [vmem:[%s9452_s5 + $0x70] sm:$0xff] }
 0x221   : > { %v6567_v48 = vpop.f32.mrf.mxu2  ;;  %v6569_v56 = vpop.f32.mrf.mxu3 }
 0x224   : > { %4937 = vmatmul.msk.f32.gmra.mxu2 %vm595_vm0, %v1486_v16  ;;  %4977 = vmatmul.msk.f32.gmra.mxu3 %vm595_vm0, %v1486_v16  ;;  %v1448_v16 = vmax.f32 %v1283_v15, 0.0 }
 0x225   : > { %v1288_v39 = vpop.f32.mrf.mxu0  ;;  %v1329_v33 = vpop.f32.mrf.mxu1 }
 0x226   : > { %v1289_v18 = vadd.f32 %v1288_v39, %v6461_v0  ;;  %v1330_v46 = vadd.f32 %v1329_v33, %v6461_v0 }
 0x228   : > { %4859 = vmatmul.msk.f32.gmra.mxu0 %vm595_vm0, %v1488_v31  ;;  %4899 = vmatmul.msk.f32.gmra.mxu1 %vm595_vm0, %v1488_v31  ;;  %v1464_v19 = vmax.f32 %v1289_v18, 0.0  ;;  %v1465_v25 = vmax.f32 %v1330_v46, 0.0 }
 0x229   : > { %v6578_v45 = vpop.f32.mrf.mxu2  ;;  %v6580_v36 = vpop.f32.mrf.mxu3 }
 0x22c   : > { %4938 = vmatmul.msk.f32.gmra.mxu2 %vm595_vm0, %v1487_v8  ;;  %4978 = vmatmul.msk.f32.gmra.mxu3 %vm595_vm0, %v1487_v8 }
 0x22d   : > { %v1291_v2 = vpop.f32.mrf.mxu0  ;;  %v1332_v27 = vpop.f32.mrf.mxu1 }
 0x22e   : > { %v1292_v9 = vadd.f32 %v1291_v2, %v6459_v38  ;;  %v1333_v13 = vadd.f32 %v1332_v27, %v6459_v38  ;;  %v1433_v2 = vmax.f32 %v1318_v58, 0.0 }
 0x230   : > { %4860 = vmatmul.msk.f32.gmra.mxu0 %vm595_vm0, %v1489_v28  ;;  %4900 = vmatmul.msk.f32.gmra.mxu1 %vm595_vm0, %v1489_v28  ;;  %v1472_v5 = vmax.f32 %v1292_v9, 0.0  ;;  %v1473_v6 = vmax.f32 %v1333_v13, 0.0  ;;  %v1368_v9 = vadd.f32 %v6578_v45, %v6463_v1  ;;  %v1409_v13 = vadd.f32 %v6580_v36, %v6463_v1 }
 0x231   : > { %v6589_v42 = vpop.f32.mrf.mxu2  ;;  %v6591_v40 = vpop.f32.mrf.mxu3  ;;  %v1362_v1 = vadd.f32 %v6556_v34, %v6477_v55  ;;  %v1403_v36 = vadd.f32 %v6558_v59, %v6477_v55  ;;  %v1356_v55 = vadd.f32 %v6524_v29, %v6491_v14  ;;  %v1397_v34 = vadd.f32 %v6526_v53, %v6491_v14  ;;  %v1494_v14 = vld [vmem:[%s9452_s5 + $0x50] sm:$0xff]  ;;  %v1495_v53 = vld [vmem:[%s9452_s5 + $0x58] sm:$0xff] }
 0x232   : > { %v1458_v18 = vmax.f32 %v1368_v9, 0.0  ;;  %v1459_v46 = vmax.f32 %v1409_v13, 0.0  ;;  %v1506_v9 = vld [vmem:[%s9452_s5 + $0xb0] sm:$0xff] }
 0x233   : > { %v1443_v59 = vmax.f32 %v1403_v36, 0.0  ;;  %v1426_v29 = vmax.f32 %v1356_v55, 0.0  ;;  %v1508_v36 = vld [vmem:[%s9452_s5 + $0xc0] sm:$0xff] }
 0x234   : > { %4939 = vmatmul.msk.f32.gmra.mxu2 %vm595_vm0, %v1488_v31  ;;  %4979 = vmatmul.msk.f32.gmra.mxu3 %vm595_vm0, %v1488_v31  ;;  %v1432_v31 = vmax.f32 %v1277_v7, 0.0  ;;  %v1502_v7 = vld [vmem:[%s9452_s5 + $0x90] sm:$0xff] }
 0x235   : > { %v1294_v47 = vpop.f32.mrf.mxu0  ;;  %v1335_v32 = vpop.f32.mrf.mxu1 }
 0x236   : > { %v1295_v10 = vadd.f32 %v1294_v47, %v6457_v44  ;;  %v1336_v41 = vadd.f32 %v1335_v32, %v6457_v44  ;;  %v1371_v47 = vadd.f32 %v6589_v42, %v6461_v0  ;;  %v1412_v32 = vadd.f32 %v6591_v40, %v6461_v0  ;;  %v1492_v0 = vld [vmem:[%s9452_s5 + $0x40] sm:$0xff] }
 0x237   : > { %v1365_v40 = vadd.f32 %v6567_v48, %v6469_v51  ;;  %v1400_v48 = vadd.f32 %v6547_v21, %v6479_v37 }
 0x238   : > { %v1480_v17 = vmax.f32 %v1295_v10, 0.0  ;;  %v1481_v23 = vmax.f32 %v1336_v41, 0.0  ;;  %4861 = vmatmul.msk.f32.gmra.mxu0 %vm595_vm0, %v6598_v50  ;;  %4901 = vmatmul.msk.f32.gmra.mxu1 %vm595_vm0, %v6598_v50  ;;  %v1466_v45 = vmax.f32 %v1371_v47, 0.0  ;;  %v1467_v41 = vmax.f32 %v1412_v32, 0.0 }
 0x239   : > { %v1373_v24 = vpop.f32.mrf.mxu2  ;;  %v1414_v52 = vpop.f32.mrf.mxu3 }
 0x23a   : > { %2440 = vmatpush.msrb.mxu0 %v1480_v17  ;;  %2577 = vmatpush.msrb.mxu1 %v1481_v23  ;;  %v1374_v11 = vadd.f32 %v1373_v24, %v6459_v38  ;;  %v1415_v62 = vadd.f32 %v1414_v52, %v6459_v38  ;;  %v1425_v38 = vmax.f32 %v1315_v60, 0.0  ;;  %v1435_v23 = vmax.f32 %v1400_v48, 0.0  ;;  %v1496_v52 = vld [vmem:[%s9452_s5 + $0x60] sm:$0xff]  ;;  %v1503_v60 = vld [vmem:[%s9452_s5 + $0x98] sm:$0xff] }
 0x23b   : > { %v1427_v24 = vmax.f32 %v1397_v34, 0.0 }
 0x23c   : > { %2441 = vmatpush.msrb.mxu0 %v1472_v5  ;;  %2578 = vmatpush.msrb.mxu1 %v1473_v6  ;;  %v1474_v42 = vmax.f32 %v1374_v11, 0.0  ;;  %v1475_v10 = vmax.f32 %v1415_v62, 0.0  ;;  %v1499_v5 = vld [vmem:[%s9452_s5 + $0x78] sm:$0xff] }
 0x23d   : > { %4940 = vmatmul.msk.f32.gmra.mxu2 %vm595_vm0, %v1489_v28  ;;  %4980 = vmatmul.msk.f32.gmra.mxu3 %vm595_vm0, %v1489_v28 }
 0x23e   : > { %2442 = vmatpush.msrb.mxu0 %v1464_v19  ;;  %2579 = vmatpush.msrb.mxu1 %v1465_v25 }
 0x240   : > { %2443 = vmatpush.msrb.mxu0 %v1456_v57  ;;  %2580 = vmatpush.msrb.mxu1 %v1457_v4 }
 0x241   : > { %v1376_v63 = vpop.f32.mrf.mxu2  ;;  %v1417_v8 = vpop.f32.mrf.mxu3  ;;  %4862 = vmatmul.msk.f32.gmra.mxu0 %vm595_vm0, %v6623_v22  ;;  %4902 = vmatmul.msk.f32.gmra.mxu1 %vm595_vm0, %v6623_v22 }
 0x242   : > { %v1377_v39 = vadd.f32 %v1376_v63, %v6457_v44  ;;  %v1418_v33 = vadd.f32 %v1417_v8, %v6457_v44  ;;  %2444 = vmatpush.msrb.mxu0 %v1448_v16  ;;  %2581 = vmatpush.msrb.mxu1 %v1449_v26  ;;  %v1424_v44 = vmax.f32 %v1274_v20, 0.0  ;;  %v6777_v63 = vpop.permute.xlu2 %1636 }
 0x243   : > { %9597 = vst [vmem:[#allocation8_spill] sm:$0xff] %v6777_v63 }
 0x244   : > { %v1482_v27 = vmax.f32 %v1377_v39, 0.0  ;;  %v1483_v28 = vmax.f32 %v1418_v33, 0.0  ;;  %2445 = vmatpush.msrb.mxu0 %v1440_v35  ;;  %2582 = vmatpush.msrb.mxu1 %v1441_v3  ;;  %v1504_v33 = vld [vmem:[%s9452_s5 + $0xa0] sm:$0xff] }
 0x245   : > { %4941 = vmatmul.msk.f32.gmra.mxu2 %vm595_vm0, %v6598_v50  ;;  %4981 = vmatmul.msk.f32.gmra.mxu3 %vm595_vm0, %v6598_v50  ;;  %v1406_v50 = vadd.f32 %v6569_v56, %v6469_v51  ;;  %v1359_v51 = vadd.f32 %v6545_v12, %v6479_v37  ;;  %v1450_v56 = vmax.f32 %v1365_v40, 0.0  ;;  %v1442_v12 = vmax.f32 %v1362_v1, 0.0  ;;  %v1493_v37 = vld [vmem:[%s9452_s5 + $0x48] sm:$0xff] }
 0x246   : > { %2446 = vmatpush.msrb.mxu0 %v1432_v31  ;;  %2583 = vmatpush.msrb.mxu1 %v1433_v2 }
 0x247   : > { %2714 = vmatpush.msrb.mxu2 %v1482_v27  ;;  %2851 = vmatpush.msrb.mxu3 %v1483_v28  ;;  %v1451_v17 = vmax.f32 %v1406_v50, 0.0  ;;  %v1434_v21 = vmax.f32 %v1359_v51, 0.0  ;;  %v1505_v28 = vld [vmem:[%s9452_s5 + $0xa8] sm:$0xff] }
 0x248   : > { %2447 = vmatpush.msrb.mxu0 %v1424_v44  ;;  %2584 = vmatpush.msrb.mxu1 %v1425_v38 }
 0x249   : > { %2715 = vmatpush.msrb.mxu2 %v1474_v42  ;;  %2852 = vmatpush.msrb.mxu3 %v1475_v10 }
 0x24a   : > { %4863 = vmatmul.msk.f32.gmra.mxu0 %vm595_vm0, %v1492_v0  ;;  %4903 = vmatmul.msk.f32.gmra.mxu1 %vm595_vm0, %v1492_v0  ;;  %v6798_v31 = vpop.permute.xlu2 %1716 }
 0x24b   : > { %2716 = vmatpush.msrb.mxu2 %v1466_v45  ;;  %2853 = vmatpush.msrb.mxu3 %v1467_v41  ;;  %9600 = vst [vmem:[#allocation11_spill] sm:$0xff] %v6798_v31 }
 0x24d   : > { %2717 = vmatpush.msrb.mxu2 %v1458_v18  ;;  %2854 = vmatpush.msrb.mxu3 %v1459_v46 }
 0x24e   : > { %4942 = vmatmul.msk.f32.gmra.mxu2 %vm595_vm0, %v6623_v22  ;;  %4982 = vmatmul.msk.f32.gmra.mxu3 %vm595_vm0, %v6623_v22 }
 0x24f   : > { %2718 = vmatpush.msrb.mxu2 %v1450_v56  ;;  %2855 = vmatpush.msrb.mxu3 %v1451_v17  ;;  %v1509_v17 = vld [vmem:[%s9452_s5 + $0xc8] sm:$0xff] }
 0x251   : > { %2719 = vmatpush.msrb.mxu2 %v1442_v12  ;;  %2856 = vmatpush.msrb.mxu3 %v1443_v59 }
 0x252   : > { %4864 = vmatmul.msk.f32.gmra.mxu0 %vm595_vm0, %v1493_v37  ;;  %4904 = vmatmul.msk.f32.gmra.mxu1 %vm595_vm0, %v1493_v37  ;;  %v6824_v13 = vpop.permute.xlu2 %1621 }
 0x253   : > { %2720 = vmatpush.msrb.mxu2 %v1434_v21  ;;  %2857 = vmatpush.msrb.mxu3 %v1435_v23  ;;  %9605 = vst [vmem:[#allocation16_spill] sm:$0xff] %v6824_v13  ;;  %v1510_v21 = vld [vmem:[%s9452_s5 + $0xd0] sm:$0xff] }
 0x255   : > { %2721 = vmatpush.msrb.mxu2 %v1426_v29  ;;  %2858 = vmatpush.msrb.mxu3 %v1427_v24 }
 0x256   : > { %4943 = vmatmul.msk.f32.gmra.mxu2 %vm595_vm0, %v1492_v0  ;;  %4983 = vmatmul.msk.f32.gmra.mxu3 %vm595_vm0, %v1492_v0  ;;  %v1507_v0 = vld [vmem:[%s9452_s5 + $0xb8] sm:$0xff] }
 0x25a   : > { %4865 = vmatmul.msk.f32.gmra.mxu0 %vm595_vm0, %v1494_v14  ;;  %4905 = vmatmul.msk.f32.gmra.mxu1 %vm595_vm0, %v1494_v14  ;;  %v6841_v45 = vpop.permute.xlu2 %1701 }
 0x25e   : > { %4944 = vmatmul.msk.f32.gmra.mxu2 %vm595_vm0, %v1493_v37  ;;  %4984 = vmatmul.msk.f32.gmra.mxu3 %vm595_vm0, %v1493_v37 }
 0x262   : > { %4866 = vmatmul.msk.f32.gmra.mxu0 %vm595_vm0, %v1495_v53  ;;  %4906 = vmatmul.msk.f32.gmra.mxu1 %vm595_vm0, %v1495_v53  ;;  %v6860_v51 = vpop.permute.xlu2 %1606 }
 0x263   : > { %9610 = vst [vmem:[#allocation21_spill] sm:$0xff] %v6860_v51 }
 0x266   : > { %4945 = vmatmul.msk.f32.gmra.mxu2 %vm595_vm0, %v1494_v14  ;;  %4985 = vmatmul.msk.f32.gmra.mxu3 %vm595_vm0, %v1494_v14 }
 0x26a   : > { %4867 = vmatmul.msk.f32.gmra.mxu0 %vm595_vm0, %v1496_v52  ;;  %4907 = vmatmul.msk.f32.gmra.mxu1 %vm595_vm0, %v1496_v52  ;;  %v6877_v12 = vpop.permute.xlu2 %1601 }
 0x26b   : > { %9613 = vst [vmem:[#allocation24_spill] sm:$0xff] %v6877_v12 }
 0x26e   : > { %4946 = vmatmul.msk.f32.gmra.mxu2 %vm595_vm0, %v1495_v53  ;;  %4986 = vmatmul.msk.f32.gmra.mxu3 %vm595_vm0, %v1495_v53  ;;  %v1511_v53 = vld [vmem:[%s9452_s5 + $0xd8] sm:$0xff] }
 0x272   : > { %4868 = vmatmul.msk.f32.gmra.mxu0 %vm595_vm0, %v1497_v30  ;;  %4908 = vmatmul.msk.f32.gmra.mxu1 %vm595_vm0, %v1497_v30 }
 0x276   : > { %4947 = vmatmul.msk.f32.gmra.mxu2 %vm595_vm0, %v1496_v52  ;;  %4987 = vmatmul.msk.f32.gmra.mxu3 %vm595_vm0, %v1496_v52  ;;  %v6903_v52 = vpop.permute.xlu2 %1596 }
 0x277   : > { %9616 = vst [vmem:[#allocation27_spill] sm:$0xff] %v6903_v52 }
 0x27a   : > { %4869 = vmatmul.msk.f32.gmra.mxu0 %vm595_vm0, %v1498_v54  ;;  %4909 = vmatmul.msk.f32.gmra.mxu1 %vm595_vm0, %v1498_v54 }
 0x27e   : > { %4948 = vmatmul.msk.f32.gmra.mxu2 %vm595_vm0, %v1497_v30  ;;  %4988 = vmatmul.msk.f32.gmra.mxu3 %vm595_vm0, %v1497_v30 }
 0x282   : > { %4870 = vmatmul.msk.f32.gmra.mxu0 %vm595_vm0, %v1499_v5  ;;  %4910 = vmatmul.msk.f32.gmra.mxu1 %vm595_vm0, %v1499_v5 }
 0x285   : > { %v6725_v6 = vpop.f32.mrf.mxu0  ;;  %v6727_v15 = vpop.f32.mrf.mxu1 }
 0x286   : > { %4949 = vmatmul.msk.f32.gmra.mxu2 %vm595_vm0, %v1498_v54  ;;  %4989 = vmatmul.msk.f32.gmra.mxu3 %vm595_vm0, %v1498_v54 }
 0x28a   : > { %4871 = vmatmul.msk.f32.gmra.mxu0 %vm595_vm0, %v1500_v61  ;;  %4911 = vmatmul.msk.f32.gmra.mxu1 %vm595_vm0, %v1500_v61 }
 0x28d   : > { %v6736_v19 = vpop.f32.mrf.mxu0  ;;  %v6738_v25 = vpop.f32.mrf.mxu1 }
 0x28e   : > { %4950 = vmatmul.msk.f32.gmra.mxu2 %vm595_vm0, %v1499_v5  ;;  %4990 = vmatmul.msk.f32.gmra.mxu3 %vm595_vm0, %v1499_v5 }
 0x292   : > { %4872 = vmatmul.msk.f32.gmra.mxu0 %vm595_vm0, %v1501_v43  ;;  %4912 = vmatmul.msk.f32.gmra.mxu1 %vm595_vm0, %v1501_v43 }
 0x295   : > { %v6747_v49 = vpop.f32.mrf.mxu0  ;;  %v6749_v57 = vpop.f32.mrf.mxu1 }
 0x296   : > { %4951 = vmatmul.msk.f32.gmra.mxu2 %vm595_vm0, %v1500_v61  ;;  %4991 = vmatmul.msk.f32.gmra.mxu3 %vm595_vm0, %v1500_v61 }
 0x297   : > { %v6753_v4 = vpop.f32.mrf.mxu2  ;;  %v6755_v22 = vpop.f32.mrf.mxu3 }
 0x298   : > { %9593 = vst [vmem:[#allocation4_spill] sm:$0xff] %v6753_v4 }
 0x299   : > { %9594 = vst [vmem:[#allocation5_spill] sm:$0xff] %v6755_v22 }
 0x29a   : > { %4873 = vmatmul.msk.f32.gmra.mxu0 %vm595_vm0, %v1502_v7  ;;  %4913 = vmatmul.msk.f32.gmra.mxu1 %vm595_vm0, %v1502_v7 }
 0x29d   : > { %v6762_v58 = vpop.f32.mrf.mxu0  ;;  %v6764_v16 = vpop.f32.mrf.mxu1 }
 0x29e   : > { %4952 = vmatmul.msk.f32.gmra.mxu2 %vm595_vm0, %v1501_v43  ;;  %4992 = vmatmul.msk.f32.gmra.mxu3 %vm595_vm0, %v1501_v43  ;;  %v1512_v43 = vld [vmem:[%s9452_s5 + $0xe0] sm:$0xff] }
 0x29f   : > { %v6768_v26 = vpop.f32.mrf.mxu2  ;;  %v6770_v20 = vpop.f32.mrf.mxu3 }
 0x2a0   : > { %9595 = vst [vmem:[#allocation6_spill] sm:$0xff] %v6768_v26 }
 0x2a1   : > { %9596 = vst [vmem:[#allocation7_spill] sm:$0xff] %v6770_v20 }
 0x2a2   : > { %4874 = vmatmul.msk.f32.gmra.mxu0 %vm595_vm0, %v1503_v60  ;;  %4914 = vmatmul.msk.f32.gmra.mxu1 %vm595_vm0, %v1503_v60 }
 0x2a5   : > { %v6779_v8 = vpop.f32.mrf.mxu0  ;;  %v6781_v35 = vpop.f32.mrf.mxu1 }
 0x2a6   : > { %4953 = vmatmul.msk.f32.gmra.mxu2 %vm595_vm0, %v1502_v7  ;;  %4993 = vmatmul.msk.f32.gmra.mxu3 %vm595_vm0, %v1502_v7 }
 0x2a7   : > { %v6785_v3 = vpop.f32.mrf.mxu2  ;;  %v6787_v39 = vpop.f32.mrf.mxu3 }
 0x2a8   : > { %9598 = vst [vmem:[#allocation9_spill] sm:$0xff] %v6785_v3 }
 0x2a9   : > { %9599 = vst [vmem:[#allocation10_spill] sm:$0xff] %v6787_v39 }
 0x2aa   : > { %4875 = vmatmul.msk.f32.gmra.mxu0 %vm595_vm0, %v1504_v33  ;;  %4915 = vmatmul.msk.f32.gmra.mxu1 %vm595_vm0, %v1504_v33 }
 0x2ad   : > { %v6794_v11 = vpop.f32.mrf.mxu0  ;;  %v6796_v62 = vpop.f32.mrf.mxu1 }
 0x2ae   : > { %4954 = vmatmul.msk.f32.gmra.mxu2 %vm595_vm0, %v1503_v60  ;;  %4994 = vmatmul.msk.f32.gmra.mxu3 %vm595_vm0, %v1503_v60 }
 0x2af   : > { %v6802_v2 = vpop.f32.mrf.mxu2  ;;  %v6804_v27 = vpop.f32.mrf.mxu3 }
 0x2b0   : > { %9601 = vst [vmem:[#allocation12_spill] sm:$0xff] %v6802_v2 }
 0x2b1   : > { %9602 = vst [vmem:[#allocation13_spill] sm:$0xff] %v6804_v27 }
 0x2b2   : > { %4876 = vmatmul.msk.f32.gmra.mxu0 %vm595_vm0, %v1505_v28  ;;  %4916 = vmatmul.msk.f32.gmra.mxu1 %vm595_vm0, %v1505_v28 }
 0x2b5   : > { %v6811_v47 = vpop.f32.mrf.mxu0  ;;  %v6813_v32 = vpop.f32.mrf.mxu1 }
 0x2b6   : > { %4955 = vmatmul.msk.f32.gmra.mxu2 %vm595_vm0, %v1504_v33  ;;  %4995 = vmatmul.msk.f32.gmra.mxu3 %vm595_vm0, %v1504_v33  ;;  %v6920_v33 = vpop.permute.xlu1 %1641 }
 0x2b7   : > { %v6817_v44 = vpop.f32.mrf.mxu2  ;;  %v6819_v38 = vpop.f32.mrf.mxu3  ;;  %9621 = vst [vmem:[#allocation32_spill] sm:$0xff] %v6920_v33 }
 0x2b8   : > { %9603 = vst [vmem:[#allocation14_spill] sm:$0xff] %v6817_v44 }
 0x2b9   : > { %9604 = vst [vmem:[#allocation15_spill] sm:$0xff] %v6819_v38 }
 0x2ba   : > { %4877 = vmatmul.msk.f32.gmra.mxu0 %vm595_vm0, %v1506_v9  ;;  %4917 = vmatmul.msk.f32.gmra.mxu1 %vm595_vm0, %v1506_v9 }
 0x2be   : > { %4956 = vmatmul.msk.f32.gmra.mxu2 %vm595_vm0, %v1505_v28  ;;  %4996 = vmatmul.msk.f32.gmra.mxu3 %vm595_vm0, %v1505_v28  ;;  %v6830_v42 = vpop.f32.mrf.mxu0  ;;  %v6832_v10 = vpop.f32.mrf.mxu1 }
 0x2bf   : > { %v6922_v28 = vpop.permute.xlu2 %1591  ;;  %v6939_v20 = vpop.permute.xlu1 %1631 }
 0x2c0   : > { %v6837_v40 = vpop.f32.mrf.mxu2  ;;  %v6839_v50 = vpop.f32.mrf.mxu3  ;;  %9622 = vst [vmem:[#allocation33_spill] sm:$0xff] %v6922_v28 }
 0x2c1   : > { %9606 = vst [vmem:[#allocation17_spill] sm:$0xff] %v6837_v40 }
 0x2c2   : > { %9607 = vst [vmem:[#allocation18_spill] sm:$0xff] %v6839_v50  ;;  %4878 = vmatmul.msk.f32.gmra.mxu0 %vm595_vm0, %v1507_v0  ;;  %4918 = vmatmul.msk.f32.gmra.mxu1 %vm595_vm0, %v1507_v0  ;;  %v1514_v50 = vld [vmem:[%s9452_s5 + $0xf0] sm:$0xff] }
 0x2c3   : > { %9626 = vst [vmem:[#allocation37_spill] sm:$0xff] %v6939_v20 }
 0x2c6   : > { %4957 = vmatmul.msk.f32.gmra.mxu2 %vm595_vm0, %v1506_v9  ;;  %4997 = vmatmul.msk.f32.gmra.mxu3 %vm595_vm0, %v1506_v9  ;;  %v6926_v9 = vpop.permute.xlu0 %1721 }
 0x2c7   : > { %v6847_v41 = vpop.f32.mrf.mxu0  ;;  %v6849_v1 = vpop.f32.mrf.mxu1  ;;  %9623 = vst [vmem:[#allocation34_spill] sm:$0xff] %v6926_v9 }
 0x2c8   : > { %v6854_v18 = vpop.f32.mrf.mxu2  ;;  %v6856_v46 = vpop.f32.mrf.mxu3 }
 0x2c9   : > { %9608 = vst [vmem:[#allocation19_spill] sm:$0xff] %v6854_v18  ;;  %v6941_v39 = vpop.permute.xlu2 %1586 }
 0x2ca   : > { %9609 = vst [vmem:[#allocation20_spill] sm:$0xff] %v6856_v46  ;;  %4879 = vmatmul.msk.f32.gmra.mxu0 %vm595_vm0, %v1508_v36  ;;  %4919 = vmatmul.msk.f32.gmra.mxu1 %vm595_vm0, %v1508_v36 }
 0x2cb   : > { %9627 = vst [vmem:[#allocation38_spill] sm:$0xff] %v6941_v39 }
 0x2ce   : > { %4958 = vmatmul.msk.f32.gmra.mxu2 %vm595_vm0, %v1507_v0  ;;  %4998 = vmatmul.msk.f32.gmra.mxu3 %vm595_vm0, %v1507_v0  ;;  %v6943_v27 = vpop.permute.xlu0 %1626 }
 0x2cf   : > { %v6864_v48 = vpop.f32.mrf.mxu0  ;;  %v6866_v56 = vpop.f32.mrf.mxu1  ;;  %9628 = vst [vmem:[#allocation39_spill] sm:$0xff] %v6943_v27 }
 0x2d1   : > { %v6871_v55 = vpop.f32.mrf.mxu2  ;;  %v6873_v34 = vpop.f32.mrf.mxu3 }
 0x2d2   : > { %9611 = vst [vmem:[#allocation22_spill] sm:$0xff] %v6871_v55  ;;  %4880 = vmatmul.msk.f32.gmra.mxu0 %vm595_vm0, %v1509_v17  ;;  %4920 = vmatmul.msk.f32.gmra.mxu1 %vm595_vm0, %v1509_v17 }
 0x2d3   : > { %9612 = vst [vmem:[#allocation23_spill] sm:$0xff] %v6873_v34 }
 0x2d6   : > { %4959 = vmatmul.msk.f32.gmra.mxu2 %vm595_vm0, %v1508_v36  ;;  %4999 = vmatmul.msk.f32.gmra.mxu3 %vm595_vm0, %v1508_v36  ;;  %v6965_v4 = vpop.permute.xlu0 %1706 }
 0x2d7   : > { %v6881_v59 = vpop.f32.mrf.mxu0  ;;  %v6883_v37 = vpop.f32.mrf.mxu1 }
 0x2d9   : > { %v6888_v23 = vpop.f32.mrf.mxu2  ;;  %v6890_v29 = vpop.f32.mrf.mxu3 }
 0x2da   : > { %9614 = vst [vmem:[#allocation25_spill] sm:$0xff] %v6888_v23  ;;  %4881 = vmatmul.msk.f32.gmra.mxu0 %vm595_vm0, %v1510_v21  ;;  %4921 = vmatmul.msk.f32.gmra.mxu1 %vm595_vm0, %v1510_v21 }
 0x2db   : > { %9615 = vst [vmem:[#allocation26_spill] sm:$0xff] %v6890_v29  ;;  %v6956_v29 = vpop.permute.xlu1 %1711 }
 0x2de   : > { %4960 = vmatmul.msk.f32.gmra.mxu2 %vm595_vm0, %v1509_v17  ;;  %5000 = vmatmul.msk.f32.gmra.mxu3 %vm595_vm0, %v1509_v17  ;;  %v1513_v17 = vld [vmem:[%s9452_s5 + $0xe8] sm:$0xff] }
 0x2df   : > { %v6896_v24 = vpop.f32.mrf.mxu0  ;;  %v6898_v14 = vpop.f32.mrf.mxu1 }
 0x2e1   : > { %v6905_v30 = vpop.f32.mrf.mxu2  ;;  %v6907_v54 = vpop.f32.mrf.mxu3 }
 0x2e2   : > { %9617 = vst [vmem:[#allocation28_spill] sm:$0xff] %v6905_v30  ;;  %4882 = vmatmul.msk.f32.gmra.mxu0 %vm595_vm0, %v1511_v53  ;;  %4922 = vmatmul.msk.f32.gmra.mxu1 %vm595_vm0, %v1511_v53 }
 0x2e3   : > { %9618 = vst [vmem:[#allocation29_spill] sm:$0xff] %v6907_v54  ;;  %v6958_v54 = vpop.permute.xlu2 %1581 }
 0x2e4   : > { %9631 = vst [vmem:[#allocation42_spill] sm:$0xff] %v6958_v54 }
 0x2e6   : > { %4961 = vmatmul.msk.f32.gmra.mxu2 %vm595_vm0, %v1510_v21  ;;  %5001 = vmatmul.msk.f32.gmra.mxu3 %vm595_vm0, %v1510_v21 }
 0x2e7   : > { %v1937_v5 = vpop.f32.mrf.mxu0  ;;  %v2074_v61 = vpop.f32.mrf.mxu1 }
 0x2e9   : > { %v6916_v7 = vpop.f32.mrf.mxu2  ;;  %v6918_v60 = vpop.f32.mrf.mxu3 }
 0x2ea   : > { %9619 = vst [vmem:[#allocation30_spill] sm:$0xff] %v6916_v7  ;;  %4883 = vmatmul.msk.f32.gmra.mxu0 %vm595_vm0, %v1512_v43  ;;  %4923 = vmatmul.msk.f32.gmra.mxu1 %vm595_vm0, %v1512_v43 }
 0x2eb   : > { %9620 = vst [vmem:[#allocation31_spill] sm:$0xff] %v6918_v60 }
 0x2ee   : > { %4962 = vmatmul.msk.f32.gmra.mxu2 %vm595_vm0, %v1511_v53  ;;  %5002 = vmatmul.msk.f32.gmra.mxu3 %vm595_vm0, %v1511_v53 }
 0x2ef   : > { %v1940_v0 = vpop.f32.mrf.mxu0  ;;  %v2077_v36 = vpop.f32.mrf.mxu1 }
 0x2f0   : > { %v1941_v55 = vadd.f32 %v1940_v0, %v6939_v20 }
 0x2f1   : > { %v6933_v21 = vpop.f32.mrf.mxu2  ;;  %v6935_v22 = vpop.f32.mrf.mxu3 }
 0x2f2   : > { %9624 = vst [vmem:[#allocation35_spill] sm:$0xff] %v6933_v21  ;;  %4884 = vmatmul.msk.f32.gmra.mxu0 %vm595_vm0, %v1513_v17  ;;  %4924 = vmatmul.msk.f32.gmra.mxu1 %vm595_vm0, %v1513_v17  ;;  %v3084_v0 = vmax.f32 %v1941_v55, 0.0  ;;  %v5278_v21 = vld [vmem:[%s9452_s5 + $0x20] sm:$0xff] }
 0x2f3   : > { %9625 = vst [vmem:[#allocation36_spill] sm:$0xff] %v6935_v22  ;;  %v1515_v22 = vld [vmem:[%s9452_s5 + $0xf8] sm:$0xff] }
 0x2f6   : > { %4963 = vmatmul.msk.f32.gmra.mxu2 %vm595_vm0, %v1512_v43  ;;  %5003 = vmatmul.msk.f32.gmra.mxu3 %vm595_vm0, %v1512_v43 }
 0x2f7   : > { %v1943_v53 = vpop.f32.mrf.mxu0  ;;  %v2080_v38 = vpop.f32.mrf.mxu1 }
 0x2f8   : > { %v1944_v3 = vadd.f32 %v1943_v53, %v6777_v63  ;;  %v2081_v2 = vadd.f32 %v2080_v38, %v6777_v63  ;;  %v2075_v38 = vadd.f32 %v2074_v61, %v6943_v27 }
 0x2f9   : > { %v6950_v46 = vpop.f32.mrf.mxu2  ;;  %v6952_v34 = vpop.f32.mrf.mxu3 }
 0x2fa   : > { %9629 = vst [vmem:[#allocation40_spill] sm:$0xff] %v6950_v46  ;;  %4885 = vmatmul.msk.f32.gmra.mxu0 %vm595_vm0, %v1514_v50  ;;  %4925 = vmatmul.msk.f32.gmra.mxu1 %vm595_vm0, %v1514_v50  ;;  %v3092_v53 = vmax.f32 %v1944_v3, 0.0  ;;  %v3093_v23 = vmax.f32 %v2081_v2, 0.0  ;;  %v1516_v3 = vld [vmem:[%s9452_s5 + $0x100] sm:$0xff]  ;;  %v6994_v2 = vpop.permute.xlu1 %1616 }
 0x2fb   : > { %9630 = vst [vmem:[#allocation41_spill] sm:$0xff] %v6952_v34  ;;  %v2069_v55 = vadd.f32 %v6883_v37, %v6994_v2 }
 0x2fc   : > { %9634 = vst [vmem:[#allocation45_spill] sm:$0xff] %v6994_v2 }
 0x2fe   : > { %4964 = vmatmul.msk.f32.gmra.mxu2 %vm595_vm0, %v1513_v17  ;;  %5004 = vmatmul.msk.f32.gmra.mxu3 %vm595_vm0, %v1513_v17 }
 0x2ff   : > { %v1946_v43 = vpop.f32.mrf.mxu0  ;;  %v2083_v60 = vpop.f32.mrf.mxu1 }
 0x300   : > { %v1947_v34 = vadd.f32 %v1946_v43, %v6920_v33  ;;  %v2084_v26 = vadd.f32 %v2083_v60, %v6920_v33  ;;  %v2078_v43 = vadd.f32 %v2077_v36, %v6939_v20  ;;  %v1938_v60 = vadd.f32 %v1937_v5, %v6943_v27 }
 0x301   : > { %v6971_v44 = vpop.f32.mrf.mxu2  ;;  %v6973_v40 = vpop.f32.mrf.mxu3 }
 0x302   : > { %9632 = vst [vmem:[#allocation43_spill] sm:$0xff] %v6971_v44  ;;  %v3100_v17 = vmax.f32 %v1947_v34, 0.0  ;;  %v3101_v18 = vmax.f32 %v2084_v26, 0.0  ;;  %4886 = vmatmul.msk.f32.gmra.mxu0 %vm595_vm0, %v1515_v22  ;;  %4926 = vmatmul.msk.f32.gmra.mxu1 %vm595_vm0, %v1515_v22  ;;  %v1935_v26 = vadd.f32 %v6896_v24, %v6824_v13  ;;  %v2072_v34 = vadd.f32 %v6898_v14, %v6824_v13  ;;  %v5279_v44 = vld [vmem:[%s9452_s5 + $0x28] sm:$0xff] }
 0x303   : > { %9633 = vst [vmem:[#allocation44_spill] sm:$0xff] %v6973_v40  ;;  %v3085_v36 = vmax.f32 %v2078_v43, 0.0  ;;  %v1932_v24 = vadd.f32 %v6881_v59, %v6994_v2  ;;  %v3076_v14 = vmax.f32 %v1938_v60, 0.0  ;;  %v7006_v43 = vpop.permute.xlu0 %1611  ;;  %v3061_v40 = vmax.f32 %v2069_v55, 0.0 }
 0x304   : > { %3396 = vmatpush.msra.mxu0 %v3100_v17  ;;  %3519 = vmatpush.msra.mxu3 %v3101_v18  ;;  %9638 = vst [vmem:[#allocation49_spill] sm:$0xff] %v7006_v43  ;;  %v1929_v59 = vadd.f32 %v6864_v48, %v7006_v43  ;;  %v2066_v37 = vadd.f32 %v6866_v56, %v7006_v43  ;;  %v3068_v60 = vmax.f32 %v1935_v26, 0.0 }
 0x305   : > { %v1923_v48 = vadd.f32 %v6830_v42, %v6877_v12  ;;  %v2060_v56 = vadd.f32 %v6832_v10, %v6877_v12  ;;  %v2057_v42 = vadd.f32 %v6813_v32, %v6903_v52  ;;  %v2054_v32 = vadd.f32 %v6796_v62, %v6922_v28 }
 0x306   : > { %4965 = vmatmul.msk.f32.gmra.mxu2 %vm595_vm0, %v1514_v50  ;;  %5005 = vmatmul.msk.f32.gmra.mxu3 %vm595_vm0, %v1514_v50  ;;  %v6996_v50 = vpop.permute.xlu2 %1576  ;;  %v3052_v26 = vmax.f32 %v1929_v59, 0.0  ;;  %v2048_v62 = vadd.f32 %v6764_v16, %v6958_v54 }
 0x307   : > { %3397 = vmatpush.msra.mxu0 %v3092_v53  ;;  %3520 = vmatpush.msra.mxu3 %v3093_v23  ;;  %v6987_v18 = vpop.f32.mrf.mxu0  ;;  %v6989_v5 = vpop.f32.mrf.mxu1  ;;  %9635 = vst [vmem:[#allocation46_spill] sm:$0xff] %v6996_v50  ;;  %v3077_v23 = vmax.f32 %v2075_v38, 0.0  ;;  %v3069_v38 = vmax.f32 %v2072_v34, 0.0  ;;  %v1926_v53 = vadd.f32 %v6847_v41, %v6860_v51  ;;  %v3053_v34 = vmax.f32 %v2066_v37, 0.0 }
 0x308   : > { %v3036_v59 = vmax.f32 %v1923_v48, 0.0  ;;  %v3037_v37 = vmax.f32 %v2060_v56, 0.0  ;;  %v3021_v48 = vmax.f32 %v2054_v32, 0.0  ;;  %v1518_v56 = vld [vmem:[%s9452_s5 + $0x110] sm:$0xff] }
 0x309   : > { %3398 = vmatpush.msra.mxu0 %v3084_v0  ;;  %3521 = vmatpush.msra.mxu3 %v3085_v36  ;;  %v7002_v61 = vpop.f32.mrf.mxu2  ;;  %v7004_v17 = vpop.f32.mrf.mxu3  ;;  %v2063_v0 = vadd.f32 %v6849_v1, %v6860_v51  ;;  %v3060_v36 = vmax.f32 %v1932_v24, 0.0  ;;  %v1517_v24 = vld [vmem:[%s9452_s5 + $0x108] sm:$0xff]  ;;  %v3044_v55 = vmax.f32 %v1926_v53, 0.0  ;;  %v5277_v51 = vld [vmem:[%s9452_s5 + $0x18] sm:$0xff] }
 0x30a   : > { %9636 = vst [vmem:[#allocation47_spill] sm:$0xff] %v7002_v61  ;;  %4887 = vmatmul.msk.f32.gmra.mxu0 %vm595_vm0, %v1516_v3  ;;  %4927 = vmatmul.msk.f32.gmra.mxu1 %vm595_vm0, %v1516_v3 }
 0x30b   : > { %9637 = vst [vmem:[#allocation48_spill] sm:$0xff] %v7004_v17  ;;  %3399 = vmatpush.msra.mxu0 %v3076_v14  ;;  %3522 = vmatpush.msra.mxu3 %v3077_v23  ;;  %v3045_v10 = vmax.f32 %v2063_v0, 0.0  ;;  %v3029_v0 = vmax.f32 %v2057_v42, 0.0  ;;  %v5275_v17 = vld [vmem:[%s9452_s5 + $0x8] sm:$0xff] }
 0x30d   : > { %3400 = vmatpush.msra.mxu0 %v3068_v60  ;;  %3523 = vmatpush.msra.mxu3 %v3069_v38  ;;  %v1914_v60 = vadd.f32 %v6779_v8, %v6941_v39  ;;  %v2051_v38 = vadd.f32 %v6781_v35, %v6941_v39 }
 0x30e   : > { %4966 = vmatmul.msk.f32.gmra.mxu2 %vm595_vm0, %v1515_v22  ;;  %5006 = vmatmul.msk.f32.gmra.mxu3 %vm595_vm0, %v1515_v22  ;;  %v1920_v22 = vadd.f32 %v6811_v47, %v6903_v52  ;;  %v7039_v23 = vpop.permute.xlu2 %1571  ;;  %v1917_v47 = vadd.f32 %v6794_v11, %v6922_v28  ;;  %v1911_v11 = vadd.f32 %v6762_v58, %v6958_v54  ;;  %v5276_v54 = vld [vmem:[%s9452_s5 + $0x10] sm:$0xff] }
 0x30f   : > { %3401 = vmatpush.msra.mxu0 %v3060_v36  ;;  %3524 = vmatpush.msra.mxu3 %v3061_v40  ;;  %v7024_v41 = vpop.f32.mrf.mxu0  ;;  %v7026_v1 = vpop.f32.mrf.mxu1  ;;  %9641 = vst [vmem:[#allocation52_spill] sm:$0xff] %v7039_v23  ;;  %v2045_v58 = vadd.f32 %v6749_v57, %v6996_v50  ;;  %v3013_v16 = vmax.f32 %v2051_v38, 0.0  ;;  %v1905_v42 = vadd.f32 %v6736_v19, %v7039_v23  ;;  %v3005_v57 = vmax.f32 %v2048_v62, 0.0 }
 0x310   : > { %v3028_v53 = vmax.f32 %v1920_v22, 0.0  ;;  %v3020_v36 = vmax.f32 %v1917_v47, 0.0 }
 0x311   : > { %3402 = vmatpush.msra.mxu0 %v3052_v26  ;;  %3525 = vmatpush.msra.mxu3 %v3053_v34  ;;  %v7035_v14 = vpop.f32.mrf.mxu2  ;;  %v7037_v40 = vpop.f32.mrf.mxu3  ;;  %v3012_v26 = vmax.f32 %v1914_v60, 0.0  ;;  %v2988_v19 = vmax.f32 %v1905_v42, 0.0 }
 0x312   : > { %9639 = vst [vmem:[#allocation50_spill] sm:$0xff] %v7035_v14  ;;  %4888 = vmatmul.msk.f32.gmra.mxu0 %vm595_vm0, %v1517_v24  ;;  %4928 = vmatmul.msk.f32.gmra.mxu1 %vm595_vm0, %v1517_v24  ;;  %v5280_v14 = vld [vmem:[%s9452_s5 + $0x30] sm:$0xff] }
 0x313   : > { %9640 = vst [vmem:[#allocation51_spill] sm:$0xff] %v7037_v40  ;;  %3403 = vmatpush.msra.mxu0 %v3044_v55  ;;  %3526 = vmatpush.msra.mxu3 %v3045_v10  ;;  %v3004_v55 = vmax.f32 %v1911_v11, 0.0 }
 0x315   : > { %3404 = vmatpush.msra.mxu0 %v3036_v59  ;;  %3527 = vmatpush.msra.mxu3 %v3037_v37  ;;  %v2997_v37 = vmax.f32 %v2045_v58, 0.0 }
 0x316   : > { %4967 = vmatmul.msk.f32.gmra.mxu2 %vm595_vm0, %v1516_v3  ;;  %5007 = vmatmul.msk.f32.gmra.mxu3 %vm595_vm0, %v1516_v3  ;;  %v1908_v3 = vadd.f32 %v6747_v49, %v6996_v50  ;;  %v2042_v49 = vadd.f32 %v6738_v25, %v7039_v23  ;;  %v7078_v10 = vpop.permute.xlu2 %1566 }
 0x317   : > { %3405 = vmatpush.msra.mxu0 %v3028_v53  ;;  %3528 = vmatpush.msra.mxu3 %v3029_v0  ;;  %v7057_v8 = vpop.f32.mrf.mxu0  ;;  %v7059_v35 = vpop.f32.mrf.mxu1  ;;  %9644 = vst [vmem:[#allocation55_spill] sm:$0xff] %v7078_v10  ;;  %v1902_v47 = vadd.f32 %v6725_v6, %v7078_v10  ;;  %v2039_v32 = vadd.f32 %v6727_v15, %v7078_v10  ;;  %v1519_v6 = vld [vmem:[%s9452_s5 + $0x118] sm:$0xff] }
 0x318   : > { %v2996_v59 = vmax.f32 %v1908_v3, 0.0  ;;  %v2989_v25 = vmax.f32 %v2042_v49, 0.0 }
 0x319   : > { %3406 = vmatpush.msra.mxu0 %v3020_v36  ;;  %3529 = vmatpush.msra.mxu3 %v3021_v48  ;;  %v7068_v34 = vpop.f32.mrf.mxu2  ;;  %v7070_v22 = vpop.f32.mrf.mxu3  ;;  %v2980_v15 = vmax.f32 %v1902_v47, 0.0  ;;  %v2981_v53 = vmax.f32 %v2039_v32, 0.0  ;;  %v1520_v36 = vld [vmem:[%s9452_s5 + $0x120] sm:$0xff] }
 0x31a   : > { %9642 = vst [vmem:[#allocation53_spill] sm:$0xff] %v7068_v34  ;;  %4889 = vmatmul.msk.f32.gmra.mxu0 %vm595_vm0, %v1518_v56  ;;  %4929 = vmatmul.msk.f32.gmra.mxu1 %vm595_vm0, %v1518_v56 }
 0x31b   : > { %9643 = vst [vmem:[#allocation54_spill] sm:$0xff] %v7070_v22  ;;  %3407 = vmatpush.msra.mxu0 %v3012_v26  ;;  %3530 = vmatpush.msra.mxu3 %v3013_v16  ;;  %v1521_v26 = vld [vmem:[%s9452_s5 + $0x128] sm:$0xff] }
 0x31d   : > { %3408 = vmatpush.msra.mxu0 %v3004_v55  ;;  %3531 = vmatpush.msra.mxu3 %v3005_v57  ;;  %v1522_v57 = vld [vmem:[%s9452_s5 + $0x130] sm:$0xff] }
 0x31e   : > { %4968 = vmatmul.msk.f32.gmra.mxu2 %vm595_vm0, %v1517_v24  ;;  %5008 = vmatmul.msk.f32.gmra.mxu3 %vm595_vm0, %v1517_v24 }
 0x31f   : > { %3409 = vmatpush.msra.mxu0 %v2996_v59  ;;  %3532 = vmatpush.msra.mxu3 %v2997_v37  ;;  %v7086_v60 = vpop.f32.mrf.mxu0  ;;  %v7088_v38 = vpop.f32.mrf.mxu1 }
 0x321   : > { %3410 = vmatpush.msra.mxu0 %v2988_v19  ;;  %3533 = vmatpush.msra.mxu3 %v2989_v25  ;;  %v7093_v0 = vpop.f32.mrf.mxu2  ;;  %v7095_v11 = vpop.f32.mrf.mxu3  ;;  %v1523_v19 = vld [vmem:[%s9452_s5 + $0x138] sm:$0xff] }
 0x322   : > { %9645 = vst [vmem:[#allocation56_spill] sm:$0xff] %v7093_v0  ;;  %4890 = vmatmul.msk.f32.gmra.mxu0 %vm595_vm0, %v1519_v6  ;;  %4930 = vmatmul.msk.f32.gmra.mxu1 %vm595_vm0, %v1519_v6 }
 0x323   : > { %9646 = vst [vmem:[#allocation57_spill] sm:$0xff] %v7095_v11  ;;  %3411 = vmatpush.msra.mxu0 %v2980_v15  ;;  %3534 = vmatpush.msra.mxu3 %v2981_v53  ;;  %v7157_v15 = vpop.permute.xlu1 %1696  ;;  %v7171_v11 = vpop.permute.xlu0 %1691 }
 0x324   : > { %9653 = vst [vmem:[#allocation64_spill] sm:$0xff] %v7157_v15 }
 0x325   : > { %9655 = vst [vmem:[#allocation66_spill] sm:$0xff] %v7171_v11 }
 0x326   : > { %4969 = vmatmul.msk.f32.gmra.mxu2 %vm595_vm0, %v1518_v56  ;;  %5009 = vmatmul.msk.f32.gmra.mxu3 %vm595_vm0, %v1518_v56 }
 0x327   : > { %v7101_v24 = vpop.f32.mrf.mxu0  ;;  %v7103_v62 = vpop.f32.mrf.mxu1 }
 0x329   : > { %v7108_v48 = vpop.f32.mrf.mxu2  ;;  %v7110_v3 = vpop.f32.mrf.mxu3 }
 0x32a   : > { %9647 = vst [vmem:[#allocation58_spill] sm:$0xff] %v7108_v48  ;;  %4891 = vmatmul.msk.f32.gmra.mxu0 %vm595_vm0, %v1520_v36  ;;  %4931 = vmatmul.msk.f32.gmra.mxu1 %vm595_vm0, %v1520_v36 }
 0x32b   : > { %9648 = vst [vmem:[#allocation59_spill] sm:$0xff] %v7110_v3  ;;  %v5274_v3 = vld [vmem:[%s9452_s5] sm:$0xff]  ;;  %v7195_v40 = vpop.permute.xlu0 %1686 }
 0x32e   : > { %4970 = vmatmul.msk.f32.gmra.mxu2 %vm595_vm0, %v1519_v6  ;;  %5010 = vmatmul.msk.f32.gmra.mxu3 %vm595_vm0, %v1519_v6 }
 0x32f   : > { %v7116_v56 = vpop.f32.mrf.mxu0  ;;  %v7118_v58 = vpop.f32.mrf.mxu1 }
 0x331   : > { %v7123_v16 = vpop.f32.mrf.mxu2  ;;  %v7125_v42 = vpop.f32.mrf.mxu3 }
 0x332   : > { %9649 = vst [vmem:[#allocation60_spill] sm:$0xff] %v7123_v16  ;;  %4892 = vmatmul.msk.f32.gmra.mxu0 %vm595_vm0, %v1521_v26  ;;  %4932 = vmatmul.msk.f32.gmra.mxu1 %vm595_vm0, %v1521_v26 }
 0x333   : > { %9650 = vst [vmem:[#allocation61_spill] sm:$0xff] %v7125_v42  ;;  %v7178_v42 = vpop.permute.xlu1 %1761  ;;  %v7214_v39 = vpop.permute.xlu0 %1681 }
 0x334   : > { %9656 = vst [vmem:[#allocation67_spill] sm:$0xff] %v7178_v42 }
 0x335   : > { %9660 = vst [vmem:[#allocation71_spill] sm:$0xff] %v7214_v39 }
 0x336   : > { %4971 = vmatmul.msk.f32.gmra.mxu2 %vm595_vm0, %v1520_v36  ;;  %5011 = vmatmul.msk.f32.gmra.mxu3 %vm595_vm0, %v1520_v36 }
 0x337   : > { %v7131_v49 = vpop.f32.mrf.mxu0  ;;  %v7133_v55 = vpop.f32.mrf.mxu1 }
 0x339   : > { %v7138_v47 = vpop.f32.mrf.mxu2  ;;  %v7140_v32 = vpop.f32.mrf.mxu3 }
 0x33a   : > { %9651 = vst [vmem:[#allocation62_spill] sm:$0xff] %v7140_v32  ;;  %4893 = vmatmul.msk.f32.gmra.mxu0 %vm595_vm0, %v1522_v57  ;;  %4933 = vmatmul.msk.f32.gmra.mxu1 %vm595_vm0, %v1522_v57 }
 0x33b   : > { %v7197_v10 = vpop.permute.xlu1 %1756  ;;  %v7235_v43 = vpop.permute.xlu0 %1676 }
 0x33c   : > { %9658 = vst [vmem:[#allocation69_spill] sm:$0xff] %v7197_v10 }
 0x33d   : > { %9663 = vst [vmem:[#allocation74_spill] sm:$0xff] %v7235_v43 }
 0x33e   : > { %4972 = vmatmul.msk.f32.gmra.mxu2 %vm595_vm0, %v1521_v26  ;;  %5012 = vmatmul.msk.f32.gmra.mxu3 %vm595_vm0, %v1521_v26 }
 0x33f   : > { %v7146_v59 = vpop.f32.mrf.mxu0  ;;  %v7148_v37 = vpop.f32.mrf.mxu1 }
 0x341   : > { %v7153_v25 = vpop.f32.mrf.mxu2  ;;  %v7155_v6 = vpop.f32.mrf.mxu3 }
 0x342   : > { %9652 = vst [vmem:[#allocation63_spill] sm:$0xff] %v7155_v6  ;;  %4894 = vmatmul.msk.f32.gmra.mxu0 %vm595_vm0, %v1523_v19  ;;  %4934 = vmatmul.msk.f32.gmra.mxu1 %vm595_vm0, %v1523_v19 }
 0x343   : > { %v7222_v52 = vpop.permute.xlu1 %1751 }
 0x344   : > { %9661 = vst [vmem:[#allocation72_spill] sm:$0xff] %v7222_v52 }
 0x346   : > { %4973 = vmatmul.msk.f32.gmra.mxu2 %vm595_vm0, %v1522_v57  ;;  %5013 = vmatmul.msk.f32.gmra.mxu3 %vm595_vm0, %v1522_v57 }
 0x347   : > { %v7163_v53 = vpop.f32.mrf.mxu0  ;;  %v7165_v36 = vpop.f32.mrf.mxu1 }
 0x349   : > { %v7167_v26 = vpop.f32.mrf.mxu2  ;;  %v7169_v22 = vpop.f32.mrf.mxu3 }
 0x34a   : > { %9654 = vst [vmem:[#allocation65_spill] sm:$0xff] %v7169_v22  ;;  %5015 = vmatmul.msk.f32.vlgmr.msrb.gmra.mxu0 %vm595_vm0, %v5274_v3  ;;  %5055 = vmatmul.msk.f32.vlgmr.msrb.gmra.mxu1 %vm595_vm0, %v5274_v3 }
 0x34e   : > { %4974 = vmatmul.msk.f32.gmra.mxu2 %vm595_vm0, %v1523_v19  ;;  %5014 = vmatmul.msk.f32.gmra.mxu3 %vm595_vm0, %v1523_v19 }
 0x34f   : > { %v7182_v57 = vpop.f32.mrf.mxu0  ;;  %v7184_v32 = vpop.f32.mrf.mxu1 }
 0x351   : > { %v7186_v6 = vpop.f32.mrf.mxu2  ;;  %v7188_v22 = vpop.f32.mrf.mxu3 }
 0x352   : > { %9657 = vst [vmem:[#allocation68_spill] sm:$0xff] %v7188_v22  ;;  %5016 = vmatmul.msk.f32.gmra.mxu0 %vm595_vm0, %v5275_v17  ;;  %5056 = vmatmul.msk.f32.gmra.mxu1 %vm595_vm0, %v5275_v17 }
 0x356   : > { %5095 = vmatmul.msk.f32.vlgmr.msrb.gmra.mxu2 %vm595_vm0, %v5274_v3  ;;  %5135 = vmatmul.msk.f32.vlgmr.msrb.gmra.mxu3 %vm595_vm0, %v5274_v3 }
 0x357   : > { %v7201_v19 = vpop.f32.mrf.mxu0  ;;  %v7203_v23 = vpop.f32.mrf.mxu1 }
 0x359   : > { %v7205_v22 = vpop.f32.mrf.mxu2  ;;  %v7207_v50 = vpop.f32.mrf.mxu3 }
 0x35a   : > { %9659 = vst [vmem:[#allocation70_spill] sm:$0xff] %v7207_v50  ;;  %5017 = vmatmul.msk.f32.gmra.mxu0 %vm595_vm0, %v5276_v54  ;;  %5057 = vmatmul.msk.f32.gmra.mxu1 %vm595_vm0, %v5276_v54 }
 0x35e   : > { %5096 = vmatmul.msk.f32.gmra.mxu2 %vm595_vm0, %v5275_v17  ;;  %5136 = vmatmul.msk.f32.gmra.mxu3 %vm595_vm0, %v5275_v17 }
 0x35f   : > { %v7218_v3 = vpop.f32.mrf.mxu0  ;;  %v7220_v28 = vpop.f32.mrf.mxu1 }
 0x360   : > { %v1983_v16 = vadd.f32 %v7218_v3, %v6841_v45 }
 0x361   : > { %v7224_v50 = vpop.f32.mrf.mxu2  ;;  %v7226_v12 = vpop.f32.mrf.mxu3 }
 0x362   : > { %9662 = vst [vmem:[#allocation73_spill] sm:$0xff] %v7226_v12  ;;  %5018 = vmatmul.msk.f32.gmra.mxu0 %vm595_vm0, %v5277_v51  ;;  %5058 = vmatmul.msk.f32.gmra.mxu1 %vm595_vm0, %v5277_v51  ;;  %v7241_v12 = vpop.permute.xlu1 %1746 }
 0x363   : > { %9665 = vst [vmem:[#allocation76_spill] sm:$0xff] %v7241_v12 }
 0x366   : > { %5097 = vmatmul.msk.f32.gmra.mxu2 %vm595_vm0, %v5276_v54  ;;  %5137 = vmatmul.msk.f32.gmra.mxu3 %vm595_vm0, %v5276_v54 }
 0x367   : > { %v1985_v17 = vpop.f32.mrf.mxu0  ;;  %v2122_v30 = vpop.f32.mrf.mxu1 }
 0x369   : > { %v7237_v7 = vpop.f32.mrf.mxu2  ;;  %v7239_v2 = vpop.f32.mrf.mxu3 }
 0x36a   : > { %9664 = vst [vmem:[#allocation75_spill] sm:$0xff] %v7239_v2  ;;  %5019 = vmatmul.msk.f32.gmra.mxu0 %vm595_vm0, %v5278_v21  ;;  %5059 = vmatmul.msk.f32.gmra.mxu1 %vm595_vm0, %v5278_v21  ;;  %v7254_v2 = vpop.permute.xlu0 %1671  ;;  %v7261_v20 = vpop.permute.xlu1 %1741 }
 0x36b   : > { %9667 = vst [vmem:[#allocation78_spill] sm:$0xff] %v7254_v2 }
 0x36c   : > { %9668 = vst [vmem:[#allocation79_spill] sm:$0xff] %v7261_v20 }
 0x36e   : > { %5098 = vmatmul.msk.f32.gmra.mxu2 %vm595_vm0, %v5277_v51  ;;  %5138 = vmatmul.msk.f32.gmra.mxu3 %vm595_vm0, %v5277_v51 }
 0x36f   : > { %v1988_v54 = vpop.f32.mrf.mxu0  ;;  %v2125_v13 = vpop.f32.mrf.mxu1 }
 0x371   : > { %v7250_v46 = vpop.f32.mrf.mxu2  ;;  %v7252_v27 = vpop.f32.mrf.mxu3 }
 0x372   : > { %9666 = vst [vmem:[#allocation77_spill] sm:$0xff] %v7252_v27  ;;  %5020 = vmatmul.msk.f32.gmra.mxu0 %vm595_vm0, %v5279_v44  ;;  %5060 = vmatmul.msk.f32.gmra.mxu1 %vm595_vm0, %v5279_v44  ;;  %v7274_v33 = vpop.permute.xlu0 %1666  ;;  %v7276_v20 = vpop.permute.xlu1 %1736 }
 0x373   : > { %9670 = vst [vmem:[#allocation81_spill] sm:$0xff] %v7274_v33 }
 0x374   : > { %9671 = vst [vmem:[#allocation82_spill] sm:$0xff] %v7276_v20 }
 0x376   : > { %5099 = vmatmul.msk.f32.gmra.mxu2 %vm595_vm0, %v5278_v21  ;;  %5139 = vmatmul.msk.f32.gmra.mxu3 %vm595_vm0, %v5278_v21 }
 0x377   : > { %v1991_v51 = vpop.f32.mrf.mxu0  ;;  %v2128_v61 = vpop.f32.mrf.mxu1 }
 0x378   : > { %v1992_v42 = vadd.f32 %v1991_v51, %v6798_v31  ;;  %v2129_v10 = vadd.f32 %v2128_v61, %v6798_v31  ;;  %v2126_v51 = vadd.f32 %v2125_v13, %v6956_v29  ;;  %v1986_v61 = vadd.f32 %v1985_v17, %v6965_v4 }
 0x379   : > { %v7265_v63 = vpop.f32.mrf.mxu2  ;;  %v7267_v27 = vpop.f32.mrf.mxu3  ;;  %v2120_v13 = vadd.f32 %v7220_v28, %v6841_v45 }
 0x37a   : > { %9669 = vst [vmem:[#allocation80_spill] sm:$0xff] %v7267_v27  ;;  %5021 = vmatmul.msk.f32.gmra.mxu0 %vm595_vm0, %v5280_v14  ;;  %5061 = vmatmul.msk.f32.gmra.mxu1 %vm595_vm0, %v5280_v14  ;;  %v3204_v3 = vmax.f32 %v1986_v61, 0.0  ;;  %v3196_v61 = vmax.f32 %v1983_v16, 0.0  ;;  %v1971_v16 = vadd.f32 %v7146_v59, %v7214_v39 }
 0x37e   : > { %5100 = vmatmul.msk.f32.gmra.mxu2 %vm595_vm0, %v5279_v44  ;;  %5140 = vmatmul.msk.f32.gmra.mxu3 %vm595_vm0, %v5279_v44  ;;  %v5281_v44 = vld [vmem:[%s9452_s5 + $0x38] sm:$0xff] }
 0x37f   : > { %v1994_v21 = vpop.f32.mrf.mxu0  ;;  %v2131_v12 = vpop.f32.mrf.mxu1 }
 0x380   : > { %v1995_v27 = vadd.f32 %v1994_v21, %v6926_v9  ;;  %v2132_v52 = vadd.f32 %v2131_v12, %v6926_v9  ;;  %v1989_v12 = vadd.f32 %v1988_v54, %v6956_v29  ;;  %v2123_v21 = vadd.f32 %v2122_v30, %v6965_v4 }
 0x381   : > { %v7284_v34 = vpop.f32.mrf.mxu2  ;;  %v7286_v0 = vpop.f32.mrf.mxu3 }
 0x382   : > { %9672 = vst [vmem:[#allocation83_spill] sm:$0xff] %v7286_v0  ;;  %v3228_v48 = vmax.f32 %v1995_v27, 0.0  ;;  %v3229_v20 = vmax.f32 %v2132_v52, 0.0  ;;  %5022 = vmatmul.msk.f32.gmra.mxu0 %vm595_vm0, %v5281_v44  ;;  %5062 = vmatmul.msk.f32.gmra.mxu1 %vm595_vm0, %v5281_v44  ;;  %v3220_v27 = vmax.f32 %v1992_v42, 0.0  ;;  %v3221_v52 = vmax.f32 %v2129_v10, 0.0  ;;  %v7297_v0 = vpop.permute.xlu0 %1661  ;;  %v7309_v10 = vpop.permute.xlu1 %1731 }
 0x383   : > { %9673 = vst [vmem:[#allocation84_spill] sm:$0xff] %v7297_v0  ;;  %v1980_v42 = vadd.f32 %v7201_v19, %v7157_v15  ;;  %v3205_v54 = vmax.f32 %v2123_v21, 0.0  ;;  %v1977_v19 = vadd.f32 %v7182_v57, %v7171_v11  ;;  %v3197_v21 = vmax.f32 %v2120_v13, 0.0 }
 0x384   : > { %3437 = vmatpush.msra.mxu1 %v3228_v48  ;;  %3560 = vmatpush.msrb.mxu0 %v3229_v20  ;;  %v3212_v48 = vmax.f32 %v1989_v12, 0.0  ;;  %v3213_v20 = vmax.f32 %v2126_v51, 0.0  ;;  %9674 = vst [vmem:[#allocation85_spill] sm:$0xff] %v7309_v10  ;;  %v5282_v51 = vld [vmem:[%s9452_s5 + $0x40] sm:$0xff] }
 0x385   : > { %v3180_v57 = vmax.f32 %v1977_v19, 0.0 }
 0x386   : > { %5101 = vmatmul.msk.f32.gmra.mxu2 %vm595_vm0, %v5280_v14  ;;  %5141 = vmatmul.msk.f32.gmra.mxu3 %vm595_vm0, %v5280_v14  ;;  %v2117_v14 = vadd.f32 %v7203_v23, %v7157_v15  ;;  %v2114_v23 = vadd.f32 %v7184_v32, %v7171_v11  ;;  %v2108_v32 = vadd.f32 %v7148_v37, %v7214_v39 }
 0x387   : > { %3438 = vmatpush.msra.mxu1 %v3220_v27  ;;  %3561 = vmatpush.msrb.mxu0 %v3221_v52  ;;  %v7305_v17 = vpop.f32.mrf.mxu0  ;;  %v7307_v30 = vpop.f32.mrf.mxu1  ;;  %v1974_v27 = vadd.f32 %v7163_v53, %v7195_v40  ;;  %v2111_v52 = vadd.f32 %v7165_v36, %v7195_v40 }
 0x388   : > { %v3181_v13 = vmax.f32 %v2114_v23, 0.0  ;;  %v7352_v23 = vld [vmem:[%s9452_s5 + $0x48] sm:$0xff] }
 0x389   : > { %3439 = vmatpush.msra.mxu1 %v3212_v48  ;;  %3562 = vmatpush.msrb.mxu0 %v3213_v20  ;;  %v2265_v28 = vpop.f32.mrf.mxu2  ;;  %v7315_v12 = vpop.f32.mrf.mxu3  ;;  %v3188_v48 = vmax.f32 %v1980_v42, 0.0  ;;  %v3189_v20 = vmax.f32 %v2117_v14, 0.0  ;;  %v1968_v14 = vadd.f32 %v7131_v49, %v7235_v43  ;;  %v3172_v59 = vmax.f32 %v1974_v27, 0.0 }
 0x38a   : > { %5023 = vmatmul.msk.f32.gmra.mxu0 %vm595_vm0, %v5282_v51  ;;  %5063 = vmatmul.msk.f32.gmra.mxu1 %vm595_vm0, %v5282_v51  ;;  %v7340_v42 = vpop.permute.xlu0 %1656  ;;  %v7358_v49 = vpop.permute.xlu1 %1726  ;;  %v3165_v27 = vmax.f32 %v2108_v32, 0.0 }
 0x38b   : > { %3440 = vmatpush.msra.mxu1 %v3204_v3  ;;  %3563 = vmatpush.msrb.mxu0 %v3205_v54  ;;  %9675 = vst [vmem:[#allocation86_spill] sm:$0xff] %v7340_v42  ;;  %v3173_v3 = vmax.f32 %v2111_v52, 0.0  ;;  %v2266_v52 = vadd.f32 %v2265_v28, %v6798_v31  ;;  %v2096_v28 = vadd.f32 %v7088_v38, %v7297_v0 }
 0x38c   : > { %9676 = vst [vmem:[#allocation87_spill] sm:$0xff] %v7358_v49 }
 0x38d   : > { %3441 = vmatpush.msra.mxu1 %v3196_v61  ;;  %3564 = vmatpush.msrb.mxu0 %v3197_v21  ;;  %v2102_v61 = vadd.f32 %v7118_v58, %v7254_v2  ;;  %v3164_v21 = vmax.f32 %v1971_v16, 0.0  ;;  %v2263_v58 = vadd.f32 %v7284_v34, %v6956_v29  ;;  %v2260_v34 = vadd.f32 %v7265_v63, %v6965_v4  ;;  %v5284_v63 = vld [vmem:[%s9452_s5 + $0x50] sm:$0xff] }
 0x38e   : > { %5102 = vmatmul.msk.f32.gmra.mxu2 %vm595_vm0, %v5281_v44  ;;  %5142 = vmatmul.msk.f32.gmra.mxu3 %vm595_vm0, %v5281_v44  ;;  %v2105_v44 = vadd.f32 %v7133_v55, %v7235_v43  ;;  %v1965_v55 = vadd.f32 %v7116_v56, %v7254_v2  ;;  %v1962_v56 = vadd.f32 %v7101_v24, %v7274_v33 }
 0x38f   : > { %3442 = vmatpush.msra.mxu1 %v3188_v48  ;;  %3565 = vmatpush.msrb.mxu0 %v3189_v20  ;;  %v7336_v53 = vpop.f32.mrf.mxu0  ;;  %v7338_v36 = vpop.f32.mrf.mxu1  ;;  %v2099_v20 = vadd.f32 %v7103_v62, %v7274_v33  ;;  %v3149_v32 = vmax.f32 %v2102_v61, 0.0  ;;  %v1959_v24 = vadd.f32 %v7086_v60, %v7297_v0  ;;  %v3214_v60 = vmax.f32 %v2263_v58, 0.0 }
 0x390   : > { %v3148_v16 = vmax.f32 %v1965_v55, 0.0  ;;  %v3133_v61 = vmax.f32 %v2096_v28, 0.0 }
 0x391   : > { %3443 = vmatpush.msra.mxu1 %v3180_v57  ;;  %3566 = vmatpush.msrb.mxu0 %v3181_v13  ;;  %v2268_v37 = vpop.f32.mrf.mxu2  ;;  %v7346_v54 = vpop.f32.mrf.mxu3  ;;  %v3156_v57 = vmax.f32 %v1968_v14, 0.0  ;;  %v3157_v13 = vmax.f32 %v2105_v44, 0.0  ;;  %v3222_v44 = vmax.f32 %v2266_v52, 0.0  ;;  %v3206_v52 = vmax.f32 %v2260_v34, 0.0 }
 0x392   : > { %v2269_v19 = vadd.f32 %v2268_v37, %v6926_v9  ;;  %5024 = vmatmul.msk.f32.gmra.mxu0 %vm595_vm0, %v7352_v23  ;;  %5064 = vmatmul.msk.f32.gmra.mxu1 %vm595_vm0, %v7352_v23  ;;  %v2093_v37 = vadd.f32 %v7059_v35, %v7340_v42  ;;  %v7395_v55 = vpop.permute.xlu0 %1651  ;;  %v2245_v34 = vadd.f32 %v7186_v6, %v7214_v39 }
 0x393   : > { %3444 = vmatpush.msra.mxu1 %v3172_v59  ;;  %3567 = vmatpush.msrb.mxu0 %v3173_v3  ;;  %v1956_v3 = vadd.f32 %v7057_v8, %v7340_v42  ;;  %9677 = vst [vmem:[#allocation88_spill] sm:$0xff] %v7395_v55  ;;  %v1953_v8 = vadd.f32 %v7024_v41, %v7395_v55 }
 0x394   : > { %v3230_v48 = vmax.f32 %v2269_v19, 0.0  ;;  %v3140_v19 = vmax.f32 %v1962_v56, 0.0  ;;  %v2090_v35 = vadd.f32 %v7026_v1, %v7395_v55  ;;  %v2251_v1 = vadd.f32 %v7224_v50, %v7171_v11 }
 0x395   : > { %3445 = vmatpush.msra.mxu1 %v3164_v21  ;;  %3568 = vmatpush.msrb.mxu0 %v3165_v27  ;;  %v2257_v21 = vadd.f32 %v7250_v46, %v6841_v45  ;;  %v3132_v27 = vmax.f32 %v1959_v24, 0.0  ;;  %v3116_v58 = vmax.f32 %v1953_v8, 0.0  ;;  %v2239_v6 = vadd.f32 %v7153_v25, %v7254_v2  ;;  %v9679_v25 = vld [vmem:[#allocation60_spill] sm:$0xff]  ;;  %v9730_v2 = vld [vmem:[#allocation9_spill] sm:$0xff] }
 0x396   : > { %5103 = vmatmul.msk.f32.gmra.mxu2 %vm595_vm0, %v5282_v51  ;;  %5143 = vmatmul.msk.f32.gmra.mxu3 %vm595_vm0, %v5282_v51  ;;  %v3141_v51 = vmax.f32 %v2099_v20, 0.0  ;;  %v2254_v20 = vadd.f32 %v7237_v7, %v7157_v15  ;;  %v3117_v28 = vmax.f32 %v2090_v35, 0.0  ;;  %v2233_v35 = vadd.f32 %v9679_v25, %v7297_v0 }
 0x397   : > { %3446 = vmatpush.msra.mxu1 %v3156_v57  ;;  %3569 = vmatpush.msrb.mxu0 %v3157_v13  ;;  %v7375_v62 = vpop.f32.mrf.mxu0  ;;  %v7377_v14 = vpop.f32.mrf.mxu1  ;;  %v3124_v57 = vmax.f32 %v1956_v3, 0.0  ;;  %v3125_v13 = vmax.f32 %v2093_v37, 0.0  ;;  %v3198_v56 = vmax.f32 %v2257_v21, 0.0  ;;  %v3166_v37 = vmax.f32 %v2245_v34, 0.0 }
 0x398   : > { %3683 = vmatpush.msrb.mxu3 %v3230_v48  ;;  %v7404_v48 = vpop.permute.xlu1 %1646 }
 0x399   : > { %3447 = vmatpush.msra.mxu1 %v3148_v16  ;;  %3570 = vmatpush.msrb.mxu0 %v3149_v32  ;;  %v7383_v38 = vpop.f32.mrf.mxu2  ;;  %v7385_v59 = vpop.f32.mrf.mxu3  ;;  %9678 = vst [vmem:[#allocation89_spill] sm:$0xff] %v7404_v48  ;;  %v2087_v46 = vadd.f32 %v6989_v5, %v7404_v48  ;;  %v1950_v41 = vadd.f32 %v6987_v18, %v7404_v48  ;;  %v3190_v16 = vmax.f32 %v2254_v20, 0.0 }
 0x39a   : > { %3684 = vmatpush.msrb.mxu3 %v3222_v44  ;;  %5025 = vmatmul.msk.f32.gmra.mxu0 %vm595_vm0, %v5284_v63  ;;  %v2248_v18 = vadd.f32 %v7205_v22, %v7195_v40  ;;  %v3182_v44 = vmax.f32 %v2251_v1, 0.0  ;;  %v2242_v22 = vadd.f32 %v7167_v26, %v7235_v43 }
 0x39b   : > { %5065 = vmatmul.msk.f32.gmra.mxu1 %vm595_vm0, %v5284_v63  ;;  %3571 = vmatpush.msrb.mxu0 %v3141_v51  ;;  %v3109_v24 = vmax.f32 %v2087_v46, 0.0  ;;  %v5285_v51 = vld [vmem:[%s9452_s5 + $0x58] sm:$0xff]  ;;  %v9681_v46 = vld [vmem:[#allocation56_spill] sm:$0xff] }
 0x39c   : > { %3448 = vmatpush.msra.mxu1 %v3140_v19  ;;  %3685 = vmatpush.msrb.mxu3 %v3214_v60  ;;  %v3174_v3 = vmax.f32 %v2248_v18, 0.0  ;;  %v3158_v21 = vmax.f32 %v2242_v22, 0.0 }
 0x39d   : > { %3572 = vmatpush.msrb.mxu0 %v3133_v61  ;;  %v2236_v61 = vadd.f32 %v7138_v47, %v7274_v33  ;;  %v9680_v47 = vld [vmem:[#allocation58_spill] sm:$0xff] }
 0x39e   : > { %3449 = vmatpush.msra.mxu1 %v3132_v27  ;;  %3686 = vmatpush.msrb.mxu3 %v3206_v52  ;;  %v3150_v27 = vmax.f32 %v2239_v6, 0.0  ;;  %v5286_v52 = vld [vmem:[%s9452_s5 + $0x60] sm:$0xff]  ;;  %v5288_v6 = vld [vmem:[%s9452_s5 + $0x70] sm:$0xff] }
 0x39f   : > { %5104 = vmatmul.msk.f32.gmra.mxu2 %vm595_vm0, %v7352_v23  ;;  %5144 = vmatmul.msk.f32.gmra.mxu3 %vm595_vm0, %v7352_v23  ;;  %v7418_v7 = vpop.f32.mrf.mxu0  ;;  %v7420_v5 = vpop.f32.mrf.mxu1  ;;  %v3108_v23 = vmax.f32 %v1950_v41, 0.0  ;;  %v3142_v20 = vmax.f32 %v2236_v61, 0.0 }
 0x3a0   : > { %3450 = vmatpush.msra.mxu1 %v3124_v57  ;;  %3573 = vmatpush.msrb.mxu0 %v3125_v13  ;;  %v2227_v57 = vadd.f32 %v9681_v46, %v7395_v55  ;;  %v3134_v13 = vmax.f32 %v2233_v35, 0.0  ;;  %v9684_v35 = vld [vmem:[#allocation67_spill] sm:$0xff]  ;;  %v9685_v46 = vld [vmem:[#allocation72_spill] sm:$0xff] }
 0x3a1   : > { %3687 = vmatpush.msrb.mxu3 %v3198_v56  ;;  %v7424_v50 = vpop.f32.mrf.mxu2  ;;  %v7426_v32 = vpop.f32.mrf.mxu3  ;;  %v9682_v56 = vld [vmem:[#allocation53_spill] sm:$0xff]  ;;  %v9718_v55 = vld [vmem:[#allocation19_spill] sm:$0xff] }
 0x3a2   : > { %3451 = vmatpush.msra.mxu1 %v3116_v58  ;;  %3574 = vmatpush.msrb.mxu0 %v3117_v28  ;;  %v2224_v58 = vadd.f32 %v9682_v56, %v7404_v48 }
 0x3a3   : > { %3688 = vmatpush.msrb.mxu3 %v3190_v16  ;;  %5026 = vmatmul.msk.f32.gmra.mxu0 %vm595_vm0, %v5285_v51 }
 0x3a4   : > { %5066 = vmatmul.msk.f32.gmra.mxu1 %vm595_vm0, %v5285_v51  ;;  %3575 = vmatpush.msrb.mxu0 %v3109_v24  ;;  %v3118_v24 = vmax.f32 %v2227_v57, 0.0  ;;  %v3110_v34 = vmax.f32 %v2224_v58, 0.0 }
 0x3a5   : > { %3452 = vmatpush.msra.mxu1 %v3108_v23  ;;  %3689 = vmatpush.msrb.mxu3 %v3182_v44  ;;  %v5287_v23 = vld [vmem:[%s9452_s5 + $0x68] sm:$0xff] }
 0x3a7   : > { %3690 = vmatpush.msrb.mxu3 %v3174_v3  ;;  %5105 = vmatmul.msk.f32.gmra.mxu2 %vm595_vm0, %v5284_v63  ;;  %v2009_v19 = vpop.f32.mrf.mxu0  ;;  %v7440_v60 = vpop.f32.mrf.mxu1 }
 0x3a8   : > { %5145 = vmatmul.msk.f32.gmra.mxu3 %vm595_vm0, %v5284_v63  ;;  %v2230_v63 = vadd.f32 %v9680_v47, %v7340_v42 }
 0x3a9   : > { %3691 = vmatpush.msrb.mxu3 %v3166_v37  ;;  %v7445_v26 = vpop.f32.mrf.mxu2  ;;  %v7447_v8 = vpop.f32.mrf.mxu3 }
 0x3aa   : > { %v3126_v28 = vmax.f32 %v2230_v63, 0.0 }
 0x3ab   : > { %3692 = vmatpush.msrb.mxu3 %v3158_v21  ;;  %5027 = vmatmul.msk.f32.gmra.mxu0 %vm595_vm0, %v5286_v52  ;;  %v9683_v21 = vld [vmem:[#allocation69_spill] sm:$0xff] }
 0x3ac   : > { %5067 = vmatmul.msk.f32.gmra.mxu1 %vm595_vm0, %v5286_v52 }
 0x3ad   : > { %3693 = vmatpush.msrb.mxu3 %v3150_v27 }
 0x3af   : > { %3694 = vmatpush.msrb.mxu3 %v3142_v20  ;;  %5106 = vmatmul.msk.f32.gmra.mxu2 %vm595_vm0, %v5285_v51  ;;  %v2012_v41 = vpop.f32.mrf.mxu0  ;;  %v2149_v1 = vpop.f32.mrf.mxu1 }
 0x3b0   : > { %5146 = vmatmul.msk.f32.gmra.mxu3 %vm595_vm0, %v5285_v51  ;;  %v2013_v57 = vadd.f32 %v2012_v41, %v9685_v46  ;;  %v2150_v58 = vadd.f32 %v2149_v1, %v9685_v46 }
 0x3b1   : > { %3695 = vmatpush.msrb.mxu3 %v3134_v13  ;;  %v7464_v18 = vpop.f32.mrf.mxu2  ;;  %v7466_v16 = vpop.f32.mrf.mxu3 }
 0x3b3   : > { %3696 = vmatpush.msrb.mxu3 %v3126_v28  ;;  %5028 = vmatmul.msk.f32.gmra.mxu0 %vm595_vm0, %v5287_v23  ;;  %v5289_v28 = vld [vmem:[%s9452_s5 + $0x78] sm:$0xff] }
 0x3b4   : > { %5068 = vmatmul.msk.f32.gmra.mxu1 %vm595_vm0, %v5287_v23 }
 0x3b5   : > { %3697 = vmatpush.msrb.mxu3 %v3118_v24  ;;  %v9686_v24 = vld [vmem:[#allocation76_spill] sm:$0xff] }
 0x3b7   : > { %3698 = vmatpush.msrb.mxu3 %v3110_v34  ;;  %5107 = vmatmul.msk.f32.gmra.mxu2 %vm595_vm0, %v5286_v52  ;;  %v2015_v44 = vpop.f32.mrf.mxu0  ;;  %v2152_v51 = vpop.f32.mrf.mxu1 }
 0x3b8   : > { %5147 = vmatmul.msk.f32.gmra.mxu3 %vm595_vm0, %v5286_v52  ;;  %v2016_v25 = vadd.f32 %v2015_v44, %v9683_v21  ;;  %v2153_v47 = vadd.f32 %v2152_v51, %v9683_v21  ;;  %v2147_v44 = vadd.f32 %v7440_v60, %v9686_v24  ;;  %v9687_v51 = vld [vmem:[#allocation79_spill] sm:$0xff] }
 0x3b9   : > { %v7475_v22 = vpop.f32.mrf.mxu2  ;;  %v7477_v3 = vpop.f32.mrf.mxu3  ;;  %v2007_v1 = vadd.f32 %v7418_v7, %v9687_v51 }
 0x3ba   : > { %v3284_v34 = vmax.f32 %v2016_v25, 0.0  ;;  %v3285_v41 = vmax.f32 %v2153_v47, 0.0 }
 0x3bb   : > { %5029 = vmatmul.msk.f32.gmra.mxu0 %vm595_vm0, %v5288_v6 }
 0x3bc   : > { %5069 = vmatmul.msk.f32.gmra.mxu1 %vm595_vm0, %v5288_v6 }
 0x3bf   : > { %5108 = vmatmul.msk.f32.gmra.mxu2 %vm595_vm0, %v5287_v23  ;;  %v2018_v37 = vpop.f32.mrf.mxu0  ;;  %v2155_v61 = vpop.f32.mrf.mxu1 }
 0x3c0   : > { %5148 = vmatmul.msk.f32.gmra.mxu3 %vm595_vm0, %v5287_v23  ;;  %v2019_v27 = vadd.f32 %v2018_v37, %v9684_v35  ;;  %v2156_v52 = vadd.f32 %v2155_v61, %v9684_v35  ;;  %v2010_v23 = vadd.f32 %v2009_v19, %v9686_v24  ;;  %v3276_v37 = vmax.f32 %v2013_v57, 0.0 }
 0x3c1   : > { %v7490_v63 = vpop.f32.mrf.mxu2  ;;  %v7492_v20 = vpop.f32.mrf.mxu3  ;;  %v2144_v61 = vadd.f32 %v7420_v5, %v9687_v51  ;;  %v3269_v57 = vmax.f32 %v2147_v44, 0.0 }
 0x3c2   : > { %v3292_v13 = vmax.f32 %v2019_v27, 0.0  ;;  %v3293_v56 = vmax.f32 %v2156_v52, 0.0  ;;  %v3277_v27 = vmax.f32 %v2150_v58, 0.0  ;;  %v9690_v52 = vld [vmem:[#allocation82_spill] sm:$0xff]  ;;  %v3268_v47 = vmax.f32 %v2010_v23, 0.0 }
 0x3c3   : > { %5030 = vmatmul.msk.f32.gmra.mxu0 %vm595_vm0, %v5289_v28  ;;  %v2004_v60 = vadd.f32 %v7375_v62, %v9690_v52  ;;  %v2141_v7 = vadd.f32 %v7377_v14, %v9690_v52  ;;  %v3260_v58 = vmax.f32 %v2007_v1, 0.0  ;;  %v2138_v62 = vadd.f32 %v7338_v36, %v7309_v10  ;;  %v9691_v36 = vld [vmem:[#allocation32_spill] sm:$0xff] }
 0x3c4   : > { %5070 = vmatmul.msk.f32.gmra.mxu1 %vm595_vm0, %v5289_v28  ;;  %3486 = vmatpush.msra.mxu2 %v3292_v13  ;;  %v3261_v23 = vmax.f32 %v2144_v61, 0.0  ;;  %v1998_v14 = vadd.f32 %v7305_v17, %v7358_v49 }
 0x3c5   : > { %3609 = vmatpush.msrb.mxu1 %v3293_v56  ;;  %v2001_v56 = vadd.f32 %v7336_v53, %v7309_v10  ;;  %v2135_v53 = vadd.f32 %v7307_v30, %v7358_v49  ;;  %v3253_v44 = vmax.f32 %v2141_v7, 0.0  ;;  %v3245_v61 = vmax.f32 %v2138_v62, 0.0  ;;  %v9697_v62 = vld [vmem:[#allocation37_spill] sm:$0xff] }
 0x3c6   : > { %3487 = vmatpush.msra.mxu2 %v3284_v34  ;;  %v3252_v34 = vmax.f32 %v2004_v60, 0.0  ;;  %v9695_v60 = vld [vmem:[#allocation8_spill] sm:$0xff] }
 0x3c7   : > { %5109 = vmatmul.msk.f32.gmra.mxu2 %vm595_vm0, %v5288_v6  ;;  %3610 = vmatpush.msrb.mxu1 %v3285_v41  ;;  %v7509_v19 = vpop.f32.mrf.mxu0  ;;  %v7511_v25 = vpop.f32.mrf.mxu1  ;;  %v9692_v41 = vld [vmem:[#allocation50_spill] sm:$0xff]  ;;  %v3237_v30 = vmax.f32 %v2135_v53, 0.0 }
 0x3c8   : > { %9688 = vst [vmem:[#allocation60_spill] sm:$0xff] %v7509_v19  ;;  %5149 = vmatmul.msk.f32.gmra.mxu3 %vm595_vm0, %v5288_v6  ;;  %3488 = vmatpush.msra.mxu2 %v3276_v37  ;;  %v5290_v6 = vld [vmem:[%s9452_s5 + $0x80] sm:$0xff]  ;;  %v2221_v1 = vadd.f32 %v9692_v41, %v9691_v36  ;;  %v3244_v37 = vmax.f32 %v2001_v56, 0.0  ;;  %v5291_v41 = vld [vmem:[%s9452_s5 + $0x88] sm:$0xff] }
 0x3c9   : > { %9689 = vst [vmem:[#allocation58_spill] sm:$0xff] %v7511_v25  ;;  %3611 = vmatpush.msrb.mxu1 %v3277_v27  ;;  %v7518_v5 = vpop.f32.mrf.mxu2  ;;  %v7520_v13 = vpop.f32.mrf.mxu3 }
 0x3ca   : > { %3489 = vmatpush.msra.mxu2 %v3268_v47  ;;  %v9696_v47 = vld [vmem:[#allocation47_spill] sm:$0xff] }
 0x3cb   : > { %5031 = vmatmul.msk.f32.gmra.mxu0 %vm595_vm0, %v5290_v6  ;;  %3612 = vmatpush.msrb.mxu1 %v3269_v57  ;;  %v2218_v57 = vadd.f32 %v9696_v47, %v9695_v60  ;;  %v9702_v47 = vld [vmem:[#allocation35_spill] sm:$0xff] }
 0x3cc   : > { %5071 = vmatmul.msk.f32.gmra.mxu1 %vm595_vm0, %v5290_v6  ;;  %3490 = vmatpush.msra.mxu2 %v3260_v58  ;;  %v3236_v58 = vmax.f32 %v1998_v14, 0.0  ;;  %v9700_v14 = vld [vmem:[#allocation40_spill] sm:$0xff] }
 0x3cd   : > { %3613 = vmatpush.msrb.mxu1 %v3261_v23  ;;  %v9698_v23 = vld [vmem:[#allocation43_spill] sm:$0xff] }
 0x3ce   : > { %3491 = vmatpush.msra.mxu2 %v3252_v34  ;;  %v2215_v34 = vadd.f32 %v9698_v23, %v9697_v62 }
 0x3cf   : > { %5110 = vmatmul.msk.f32.gmra.mxu2 %vm595_vm0, %v5289_v28  ;;  %3614 = vmatpush.msrb.mxu1 %v3253_v44  ;;  %v7538_v27 = vpop.f32.mrf.mxu0  ;;  %v7540_v17 = vpop.f32.mrf.mxu1  ;;  %v3102_v44 = vmax.f32 %v2221_v1, 0.0 }
 0x3d0   : > { %9693 = vst [vmem:[#allocation56_spill] sm:$0xff] %v7538_v27  ;;  %5150 = vmatmul.msk.f32.gmra.mxu3 %vm595_vm0, %v5289_v28  ;;  %3492 = vmatpush.msra.mxu2 %v3244_v37  ;;  %v9699_v28 = vld [vmem:[#allocation39_spill] sm:$0xff]  ;;  %v3094_v37 = vmax.f32 %v2218_v57, 0.0  ;;  %v3086_v23 = vmax.f32 %v2215_v34, 0.0  ;;  %v9710_v34 = vld [vmem:[#allocation28_spill] sm:$0xff] }
 0x3d1   : > { %9694 = vst [vmem:[#allocation53_spill] sm:$0xff] %v7540_v17  ;;  %3615 = vmatpush.msrb.mxu1 %v3245_v61  ;;  %v7545_v7 = vpop.f32.mrf.mxu2  ;;  %v7547_v56 = vpop.f32.mrf.mxu3  ;;  %v2212_v53 = vadd.f32 %v9700_v14, %v9699_v28  ;;  %v9701_v61 = vld [vmem:[#allocation16_spill] sm:$0xff]  ;;  %v9705_v17 = vld [vmem:[#allocation45_spill] sm:$0xff] }
 0x3d2   : > { %3493 = vmatpush.msra.mxu2 %v3236_v58  ;;  %v2209_v25 = vadd.f32 %v9702_v47, %v9701_v61  ;;  %v9709_v14 = vld [vmem:[#allocation49_spill] sm:$0xff] }
 0x3d3   : > { %5032 = vmatmul.msk.f32.gmra.mxu0 %vm595_vm0, %v5291_v41  ;;  %3616 = vmatpush.msrb.mxu1 %v3237_v30  ;;  %v9706_v30 = vld [vmem:[#allocation30_spill] sm:$0xff]  ;;  %v3078_v27 = vmax.f32 %v2212_v53, 0.0  ;;  %v9712_v53 = vld [vmem:[#allocation25_spill] sm:$0xff] }
 0x3d4   : > { %5072 = vmatmul.msk.f32.gmra.mxu1 %vm595_vm0, %v5291_v41  ;;  %3642 = vmatpush.msrb.mxu2 %v3102_v44  ;;  %v2206_v19 = vadd.f32 %v9706_v30, %v9705_v17  ;;  %v3070_v47 = vmax.f32 %v2209_v25, 0.0  ;;  %v9711_v30 = vld [vmem:[#allocation21_spill] sm:$0xff] }
 0x3d6   : > { %3643 = vmatpush.msrb.mxu2 %v3094_v37  ;;  %v2203_v37 = vadd.f32 %v9710_v34, %v9709_v14  ;;  %v9717_v34 = vld [vmem:[#allocation27_spill] sm:$0xff] }
 0x3d7   : > { %5111 = vmatmul.msk.f32.gmra.mxu2 %vm595_vm0, %v5290_v6  ;;  %v7561_v1 = vpop.f32.mrf.mxu0  ;;  %v7563_v58 = vpop.f32.mrf.mxu1  ;;  %v2194_v42 = vadd.f32 %v9718_v55, %v9717_v34  ;;  %v9723_v55 = vld [vmem:[#allocation38_spill] sm:$0xff] }
 0x3d8   : > { %9703 = vst [vmem:[#allocation32_spill] sm:$0xff] %v7561_v1  ;;  %5151 = vmatmul.msk.f32.gmra.mxu3 %vm595_vm0, %v5290_v6  ;;  %3644 = vmatpush.msrb.mxu2 %v3086_v23  ;;  %v2200_v1 = vadd.f32 %v9712_v53, %v9711_v30  ;;  %v3062_v6 = vmax.f32 %v2206_v19, 0.0  ;;  %v9713_v23 = vld [vmem:[#allocation24_spill] sm:$0xff]  ;;  %v3054_v48 = vmax.f32 %v2203_v37, 0.0  ;;  %v9722_v37 = vld [vmem:[#allocation17_spill] sm:$0xff] }
 0x3d9   : > { %9704 = vst [vmem:[#allocation50_spill] sm:$0xff] %v7563_v58  ;;  %v7568_v57 = vpop.f32.mrf.mxu2  ;;  %v7570_v44 = vpop.f32.mrf.mxu3  ;;  %v5292_v58 = vld [vmem:[%s9452_s5 + $0x90] sm:$0xff] }
 0x3da   : > { %9707 = vst [vmem:[#allocation47_spill] sm:$0xff] %v7568_v57  ;;  %3645 = vmatpush.msrb.mxu2 %v3078_v27  ;;  %v3046_v0 = vmax.f32 %v2200_v1, 0.0  ;;  %v9724_v1 = vld [vmem:[#allocation14_spill] sm:$0xff] }
 0x3db   : > { %9708 = vst [vmem:[#allocation43_spill] sm:$0xff] %v7570_v44  ;;  %5033 = vmatmul.msk.f32.gmra.mxu0 %vm595_vm0, %v5292_v58  ;;  %v9714_v44 = vld [vmem:[#allocation22_spill] sm:$0xff] }
 0x3dc   : > { %5073 = vmatmul.msk.f32.gmra.mxu1 %vm595_vm0, %v5292_v58  ;;  %3646 = vmatpush.msrb.mxu2 %v3070_v47  ;;  %v2197_v57 = vadd.f32 %v9714_v44, %v9713_v23  ;;  %v9721_v44 = vld [vmem:[#allocation33_spill] sm:$0xff] }
 0x3dd   : > { %v2191_v53 = vadd.f32 %v9722_v37, %v9721_v44  ;;  %v9729_v37 = vld [vmem:[#allocation46_spill] sm:$0xff] }
 0x3de   : > { %3647 = vmatpush.msrb.mxu2 %v3062_v6  ;;  %v3038_v6 = vmax.f32 %v2197_v57, 0.0  ;;  %v2182_v43 = vadd.f32 %v9730_v2, %v9729_v37  ;;  %v9735_v2 = vld [vmem:[#allocation55_spill] sm:$0xff] }
 0x3df   : > { %5112 = vmatmul.msk.f32.gmra.mxu2 %vm595_vm0, %v5291_v41  ;;  %v7584_v25 = vpop.f32.mrf.mxu0  ;;  %v7586_v27 = vpop.f32.mrf.mxu1  ;;  %v3022_v33 = vmax.f32 %v2191_v53, 0.0  ;;  %v9734_v53 = vld [vmem:[#allocation6_spill] sm:$0xff] }
 0x3e0   : > { %9715 = vst [vmem:[#allocation39_spill] sm:$0xff] %v7584_v25  ;;  %5152 = vmatmul.msk.f32.gmra.mxu3 %vm595_vm0, %v5291_v41  ;;  %3648 = vmatpush.msrb.mxu2 %v3054_v48  ;;  %v2188_v25 = vadd.f32 %v9724_v1, %v9723_v55  ;;  %v3030_v41 = vmax.f32 %v2194_v42, 0.0  ;;  %v9725_v48 = vld [vmem:[#allocation42_spill] sm:$0xff] }
 0x3e1   : > { %9716 = vst [vmem:[#allocation40_spill] sm:$0xff] %v7586_v27  ;;  %v7591_v19 = vpop.f32.mrf.mxu2  ;;  %v7593_v47 = vpop.f32.mrf.mxu3  ;;  %v5293_v27 = vld [vmem:[%s9452_s5 + $0x98] sm:$0xff] }
 0x3e2   : > { %9719 = vst [vmem:[#allocation16_spill] sm:$0xff] %v7591_v19  ;;  %3649 = vmatpush.msrb.mxu2 %v3046_v0  ;;  %v3014_v39 = vmax.f32 %v2188_v25, 0.0  ;;  %v9736_v25 = vld [vmem:[#allocation4_spill] sm:$0xff] }
 0x3e3   : > { %9720 = vst [vmem:[#allocation35_spill] sm:$0xff] %v7593_v47  ;;  %5034 = vmatmul.msk.f32.gmra.mxu0 %vm595_vm0, %v5293_v27  ;;  %v9726_v47 = vld [vmem:[#allocation12_spill] sm:$0xff] }
 0x3e4   : > { %5074 = vmatmul.msk.f32.gmra.mxu1 %vm595_vm0, %v5293_v27  ;;  %3650 = vmatpush.msrb.mxu2 %v3038_v6  ;;  %v2185_v19 = vadd.f32 %v9726_v47, %v9725_v48  ;;  %v9733_v47 = vld [vmem:[#allocation52_spill] sm:$0xff] }
 0x3e5   : > { %v2179_v1 = vadd.f32 %v9734_v53, %v9733_v47 }
 0x3e6   : > { %3651 = vmatpush.msrb.mxu2 %v3030_v41  ;;  %v3006_v41 = vmax.f32 %v2185_v19, 0.0 }
 0x3e7   : > { %5113 = vmatmul.msk.f32.gmra.mxu2 %vm595_vm0, %v5292_v58  ;;  %v7607_v0 = vpop.f32.mrf.mxu0  ;;  %v7609_v57 = vpop.f32.mrf.mxu1 }
 0x3e8   : > { %9727 = vst [vmem:[#allocation45_spill] sm:$0xff] %v7607_v0  ;;  %5153 = vmatmul.msk.f32.gmra.mxu3 %vm595_vm0, %v5292_v58  ;;  %3652 = vmatpush.msrb.mxu2 %v3022_v33  ;;  %v2176_v0 = vadd.f32 %v9736_v25, %v9735_v2  ;;  %v2998_v58 = vmax.f32 %v2182_v43, 0.0  ;;  %v2990_v33 = vmax.f32 %v2179_v1, 0.0  ;;  %v5295_v43 = vld [vmem:[%s9452_s5 + $0xa8] sm:$0xff]  ;;  %v5296_v25 = vld [vmem:[%s9452_s5 + $0xb0] sm:$0xff] }
 0x3e9   : > { %9728 = vst [vmem:[#allocation30_spill] sm:$0xff] %v7609_v57  ;;  %v7614_v42 = vpop.f32.mrf.mxu2  ;;  %v7616_v6 = vpop.f32.mrf.mxu3  ;;  %v5294_v57 = vld [vmem:[%s9452_s5 + $0xa0] sm:$0xff] }
 0x3ea   : > { %9731 = vst [vmem:[#allocation49_spill] sm:$0xff] %v7614_v42  ;;  %3653 = vmatpush.msrb.mxu2 %v3014_v39  ;;  %v2982_v19 = vmax.f32 %v2176_v0, 0.0 }
 0x3eb   : > { %9732 = vst [vmem:[#allocation28_spill] sm:$0xff] %v7616_v6  ;;  %5035 = vmatmul.msk.f32.gmra.mxu0 %vm595_vm0, %v5294_v57 }
 0x3ec   : > { %5075 = vmatmul.msk.f32.gmra.mxu1 %vm595_vm0, %v5294_v57  ;;  %3654 = vmatpush.msrb.mxu2 %v3006_v41 }
 0x3ee   : > { %3655 = vmatpush.msrb.mxu2 %v2998_v58 }
 0x3ef   : > { %5114 = vmatmul.msk.f32.gmra.mxu2 %vm595_vm0, %v5293_v27  ;;  %v7628_v53 = vpop.f32.mrf.mxu0  ;;  %v7630_v39 = vpop.f32.mrf.mxu1 }
 0x3f0   : > { %9737 = vst [vmem:[#allocation21_spill] sm:$0xff] %v7628_v53  ;;  %5154 = vmatmul.msk.f32.gmra.mxu3 %vm595_vm0, %v5293_v27  ;;  %3656 = vmatpush.msrb.mxu2 %v2990_v33 }
 0x3f1   : > { %9738 = vst [vmem:[#allocation25_spill] sm:$0xff] %v7630_v39  ;;  %v7633_v6 = vpop.f32.mrf.mxu2  ;;  %v7635_v42 = vpop.f32.mrf.mxu3 }
 0x3f2   : > { %9739 = vst [vmem:[#allocation24_spill] sm:$0xff] %v7633_v6  ;;  %3657 = vmatpush.msrb.mxu2 %v2982_v19 }
 0x3f3   : > { %9740 = vst [vmem:[#allocation22_spill] sm:$0xff] %v7635_v42  ;;  %5036 = vmatmul.msk.f32.gmra.mxu0 %vm595_vm0, %v5295_v43  ;;  %v5297_v42 = vld [vmem:[%s9452_s5 + $0xb8] sm:$0xff] }
 0x3f4   : > { %5076 = vmatmul.msk.f32.gmra.mxu1 %vm595_vm0, %v5295_v43 }
 0x3f7   : > { %5115 = vmatmul.msk.f32.gmra.mxu2 %vm595_vm0, %v5294_v57  ;;  %v7643_v1 = vpop.f32.mrf.mxu0  ;;  %v7645_v0 = vpop.f32.mrf.mxu1 }
 0x3f8   : > { %9741 = vst [vmem:[#allocation27_spill] sm:$0xff] %v7643_v1  ;;  %5155 = vmatmul.msk.f32.gmra.mxu3 %vm595_vm0, %v5294_v57 }
 0x3f9   : > { %9742 = vst [vmem:[#allocation19_spill] sm:$0xff] %v7645_v0  ;;  %v7648_v27 = vpop.f32.mrf.mxu2  ;;  %v7650_v41 = vpop.f32.mrf.mxu3 }
 0x3fa   : > { %9743 = vst [vmem:[#allocation33_spill] sm:$0xff] %v7648_v27 }
 0x3fb   : > { %9744 = vst [vmem:[#allocation17_spill] sm:$0xff] %v7650_v41  ;;  %5037 = vmatmul.msk.f32.gmra.mxu0 %vm595_vm0, %v5296_v25 }
 0x3fc   : > { %5077 = vmatmul.msk.f32.gmra.mxu1 %vm595_vm0, %v5296_v25 }
 0x3ff   : > { %5116 = vmatmul.msk.f32.gmra.mxu2 %vm595_vm0, %v5295_v43  ;;  %v7658_v58 = vpop.f32.mrf.mxu0  ;;  %v7660_v33 = vpop.f32.mrf.mxu1 }
 0x400   : > { %9745 = vst [vmem:[#allocation38_spill] sm:$0xff] %v7658_v58  ;;  %5156 = vmatmul.msk.f32.gmra.mxu3 %vm595_vm0, %v5295_v43 }
 0x401   : > { %9746 = vst [vmem:[#allocation14_spill] sm:$0xff] %v7660_v33  ;;  %v7663_v57 = vpop.f32.mrf.mxu2  ;;  %v7665_v19 = vpop.f32.mrf.mxu3 }
 0x402   : > { %9747 = vst [vmem:[#allocation42_spill] sm:$0xff] %v7663_v57 }
 0x403   : > { %9748 = vst [vmem:[#allocation12_spill] sm:$0xff] %v7665_v19  ;;  %5038 = vmatmul.msk.f32.gmra.mxu0 %vm595_vm0, %v5297_v42  ;;  %v5298_v19 = vld [vmem:[%s9452_s5 + $0xc0] sm:$0xff] }
 0x404   : > { %5078 = vmatmul.msk.f32.gmra.mxu1 %vm595_vm0, %v5297_v42 }
 0x407   : > { %5117 = vmatmul.msk.f32.gmra.mxu2 %vm595_vm0, %v5296_v25  ;;  %v7673_v41 = vpop.f32.mrf.mxu0  ;;  %v7675_v6 = vpop.f32.mrf.mxu1 }
 0x408   : > { %9749 = vst [vmem:[#allocation9_spill] sm:$0xff] %v7673_v41  ;;  %5157 = vmatmul.msk.f32.gmra.mxu3 %vm595_vm0, %v5296_v25 }
 0x409   : > { %9750 = vst [vmem:[#allocation6_spill] sm:$0xff] %v7675_v6  ;;  %v7678_v43 = vpop.f32.mrf.mxu2  ;;  %v7680_v27 = vpop.f32.mrf.mxu3 }
 0x40a   : > { %9751 = vst [vmem:[#allocation4_spill] sm:$0xff] %v7678_v43 }
 0x40b   : > { %9752 = vst [vmem:[#allocation90_spill] sm:$0xff] %v7680_v27  ;;  %5039 = vmatmul.msk.f32.gmra.mxu0 %vm595_vm0, %v5298_v19  ;;  %v5299_v27 = vld [vmem:[%s9452_s5 + $0xc8] sm:$0xff] }
 0x40c   : > { %5079 = vmatmul.msk.f32.gmra.mxu1 %vm595_vm0, %v5298_v19 }
 0x40f   : > { %5118 = vmatmul.msk.f32.gmra.mxu2 %vm595_vm0, %v5297_v42  ;;  %v7688_v57 = vpop.f32.mrf.mxu0  ;;  %v7690_v39 = vpop.f32.mrf.mxu1 }
 0x410   : > { %9753 = vst [vmem:[#allocation91_spill] sm:$0xff] %v7688_v57  ;;  %5158 = vmatmul.msk.f32.gmra.mxu3 %vm595_vm0, %v5297_v42  ;;  %v2293_v57 = vadd.f32 %v7545_v7, %v9684_v35 }
 0x411   : > { %9754 = vst [vmem:[#allocation92_spill] sm:$0xff] %v7690_v39  ;;  %v7693_v25 = vpop.f32.mrf.mxu2  ;;  %v7695_v43 = vpop.f32.mrf.mxu3 }
 0x412   : > { %9755 = vst [vmem:[#allocation93_spill] sm:$0xff] %v7693_v25 }
 0x413   : > { %9756 = vst [vmem:[#allocation94_spill] sm:$0xff] %v7695_v43  ;;  %5040 = vmatmul.msk.f32.gmra.mxu0 %vm595_vm0, %v5299_v27  ;;  %v5300_v43 = vld [vmem:[%s9452_s5 + $0xd0] sm:$0xff] }
 0x414   : > { %5080 = vmatmul.msk.f32.gmra.mxu1 %vm595_vm0, %v5299_v27 }
 0x417   : > { %5119 = vmatmul.msk.f32.gmra.mxu2 %vm595_vm0, %v5298_v19  ;;  %v7703_v0 = vpop.f32.mrf.mxu0 }
 0x418   : > { %9757 = vst [vmem:[#allocation95_spill] sm:$0xff] %v7703_v0  ;;  %5159 = vmatmul.msk.f32.gmra.mxu3 %vm595_vm0, %v5298_v19  ;;  %v7706_v33 = vpop.f32.mrf.mxu1  ;;  %v9815_v0 = vld [vmem:[#allocation48_spill] sm:$0xff] }
 0x419   : > { %9758 = vst [vmem:[#allocation96_spill] sm:$0xff] %v7706_v33  ;;  %v7708_v42 = vpop.f32.mrf.mxu2  ;;  %v7710_v25 = vpop.f32.mrf.mxu3  ;;  %v2355_v7 = vadd.f32 %v9815_v0, %v9695_v60  ;;  %v2284_v0 = vadd.f32 %v7475_v22, %v9686_v24  ;;  %v2278_v22 = vadd.f32 %v7445_v26, %v9690_v52  ;;  %v7972_v26 = vld [vmem:[%s9454_s7 + $0x20] sm:$0xff] }
 0x41a   : > { %9759 = vst [vmem:[#allocation97_spill] sm:$0xff] %v7708_v42 }
 0x41b   : > { %9760 = vst [vmem:[#allocation98_spill] sm:$0xff] %v7710_v25  ;;  %5041 = vmatmul.msk.f32.gmra.mxu0 %vm595_vm0, %v5300_v43  ;;  %v5301_v25 = vld [vmem:[%s9452_s5 + $0xd8] sm:$0xff]  ;;  %v3095_v60 = vmax.f32 %v2355_v7, 0.0 }
 0x41c   : > { %5081 = vmatmul.msk.f32.gmra.mxu1 %vm595_vm0, %v5300_v43 }
 0x41f   : > { %5120 = vmatmul.msk.f32.gmra.mxu2 %vm595_vm0, %v5299_v27 }
 0x420   : > { %5160 = vmatmul.msk.f32.gmra.mxu3 %vm595_vm0, %v5299_v27  ;;  %v7719_v6 = vpop.f32.mrf.mxu0 }
 0x421   : > { %9761 = vst [vmem:[#allocation99_spill] sm:$0xff] %v7719_v6  ;;  %v7721_v19 = vpop.f32.mrf.mxu1 }
 0x422   : > { %9762 = vst [vmem:[#allocation100_spill] sm:$0xff] %v7721_v19  ;;  %v7723_v39 = vpop.f32.mrf.mxu2  ;;  %v7725_v42 = vpop.f32.mrf.mxu3 }
 0x423   : > { %9763 = vst [vmem:[#allocation101_spill] sm:$0xff] %v7723_v39  ;;  %5042 = vmatmul.msk.f32.gmra.mxu0 %vm595_vm0, %v5301_v25 }
 0x424   : > { %9764 = vst [vmem:[#allocation102_spill] sm:$0xff] %v7725_v42  ;;  %5082 = vmatmul.msk.f32.gmra.mxu1 %vm595_vm0, %v5301_v25  ;;  %v5302_v42 = vld [vmem:[%s9452_s5 + $0xe0] sm:$0xff] }
 0x427   : > { %5121 = vmatmul.msk.f32.gmra.mxu2 %vm595_vm0, %v5300_v43 }
 0x428   : > { %5161 = vmatmul.msk.f32.gmra.mxu3 %vm595_vm0, %v5300_v43  ;;  %v7734_v27 = vpop.f32.mrf.mxu0 }
 0x429   : > { %9765 = vst [vmem:[#allocation103_spill] sm:$0xff] %v7734_v27  ;;  %v7736_v33 = vpop.f32.mrf.mxu1  ;;  %v9818_v27 = vld [vmem:[#allocation44_spill] sm:$0xff] }
 0x42a   : > { %9766 = vst [vmem:[#allocation104_spill] sm:$0xff] %v7736_v33  ;;  %v7738_v19 = vpop.f32.mrf.mxu2 }
 0x42b   : > { %9767 = vst [vmem:[#allocation105_spill] sm:$0xff] %v7738_v19  ;;  %v7740_v39 = vpop.f32.mrf.mxu3  ;;  %5043 = vmatmul.msk.f32.gmra.mxu0 %vm595_vm0, %v5302_v42 }
 0x42c   : > { %9768 = vst [vmem:[#allocation106_spill] sm:$0xff] %v7740_v39  ;;  %5083 = vmatmul.msk.f32.gmra.mxu1 %vm595_vm0, %v5302_v42  ;;  %v5303_v39 = vld [vmem:[%s9452_s5 + $0xe8] sm:$0xff] }
 0x42f   : > { %5122 = vmatmul.msk.f32.gmra.mxu2 %vm595_vm0, %v5301_v25 }
 0x430   : > { %5162 = vmatmul.msk.f32.gmra.mxu3 %vm595_vm0, %v5301_v25  ;;  %v7749_v43 = vpop.f32.mrf.mxu0 }
 0x431   : > { %9769 = vst [vmem:[#allocation107_spill] sm:$0xff] %v7749_v43  ;;  %v7751_v53 = vpop.f32.mrf.mxu1  ;;  %v2352_v43 = vadd.f32 %v9818_v27, %v9697_v62  ;;  %v2281_v27 = vadd.f32 %v7464_v18, %v9687_v51  ;;  %v7963_v18 = vld [vmem:[%s9454_s7 + $0x18] sm:$0xff] }
 0x432   : > { %9770 = vst [vmem:[#allocation108_spill] sm:$0xff] %v7751_v53  ;;  %v7753_v33 = vpop.f32.mrf.mxu2 }
 0x433   : > { %9771 = vst [vmem:[#allocation109_spill] sm:$0xff] %v7753_v33  ;;  %v7755_v19 = vpop.f32.mrf.mxu3  ;;  %5044 = vmatmul.msk.f32.gmra.mxu0 %vm595_vm0, %v5303_v39  ;;  %v3087_v62 = vmax.f32 %v2352_v43, 0.0  ;;  %v3262_v7 = vmax.f32 %v2281_v27, 0.0  ;;  %v2430_v27 = vadd.f32 %v7547_v56, %v9684_v35  ;;  %v2427_v56 = vadd.f32 %v7520_v13, %v9683_v21 }
 0x434   : > { %9772 = vst [vmem:[#allocation110_spill] sm:$0xff] %v7755_v19  ;;  %5084 = vmatmul.msk.f32.gmra.mxu1 %vm595_vm0, %v5303_v39  ;;  %v5304_v19 = vld [vmem:[%s9452_s5 + $0xf0] sm:$0xff] }
 0x437   : > { %5123 = vmatmul.msk.f32.gmra.mxu2 %vm595_vm0, %v5302_v42 }
 0x438   : > { %5163 = vmatmul.msk.f32.gmra.mxu3 %vm595_vm0, %v5302_v42  ;;  %v7764_v25 = vpop.f32.mrf.mxu0 }
 0x439   : > { %9773 = vst [vmem:[#allocation111_spill] sm:$0xff] %v7764_v25  ;;  %v7766_v1 = vpop.f32.mrf.mxu1 }
 0x43a   : > { %9774 = vst [vmem:[#allocation112_spill] sm:$0xff] %v7766_v1  ;;  %v7768_v53 = vpop.f32.mrf.mxu2 }
 0x43b   : > { %9775 = vst [vmem:[#allocation113_spill] sm:$0xff] %v7768_v53  ;;  %v7770_v33 = vpop.f32.mrf.mxu3  ;;  %5045 = vmatmul.msk.f32.gmra.mxu0 %vm595_vm0, %v5304_v19 }
 0x43c   : > { %9776 = vst [vmem:[#allocation114_spill] sm:$0xff] %v7770_v33  ;;  %5085 = vmatmul.msk.f32.gmra.mxu1 %vm595_vm0, %v5304_v19  ;;  %v5305_v33 = vld [vmem:[%s9452_s5 + $0xf8] sm:$0xff] }
 0x43f   : > { %5124 = vmatmul.msk.f32.gmra.mxu2 %vm595_vm0, %v5303_v39 }
 0x440   : > { %5164 = vmatmul.msk.f32.gmra.mxu3 %vm595_vm0, %v5303_v39  ;;  %v7779_v42 = vpop.f32.mrf.mxu0 }
 0x441   : > { %9777 = vst [vmem:[#allocation115_spill] sm:$0xff] %v7779_v42  ;;  %v7781_v58 = vpop.f32.mrf.mxu1 }
 0x442   : > { %9778 = vst [vmem:[#allocation116_spill] sm:$0xff] %v7781_v58  ;;  %v7783_v1 = vpop.f32.mrf.mxu2 }
 0x443   : > { %9779 = vst [vmem:[#allocation117_spill] sm:$0xff] %v7783_v1  ;;  %v7785_v53 = vpop.f32.mrf.mxu3  ;;  %5046 = vmatmul.msk.f32.gmra.mxu0 %vm595_vm0, %v5305_v33 }
 0x444   : > { %9780 = vst [vmem:[#allocation118_spill] sm:$0xff] %v7785_v53  ;;  %5086 = vmatmul.msk.f32.gmra.mxu1 %vm595_vm0, %v5305_v33  ;;  %v5306_v53 = vld [vmem:[%s9452_s5 + $0x100] sm:$0xff] }
 0x447   : > { %5125 = vmatmul.msk.f32.gmra.mxu2 %vm595_vm0, %v5304_v19 }
 0x448   : > { %5165 = vmatmul.msk.f32.gmra.mxu3 %vm595_vm0, %v5304_v19  ;;  %v7794_v39 = vpop.f32.mrf.mxu0 }
 0x449   : > { %9781 = vst [vmem:[#allocation119_spill] sm:$0xff] %v7794_v39  ;;  %v7796_v41 = vpop.f32.mrf.mxu1 }
 0x44a   : > { %9782 = vst [vmem:[#allocation120_spill] sm:$0xff] %v7796_v41  ;;  %v7798_v58 = vpop.f32.mrf.mxu2 }
 0x44b   : > { %9783 = vst [vmem:[#allocation121_spill] sm:$0xff] %v7798_v58  ;;  %v7800_v1 = vpop.f32.mrf.mxu3  ;;  %5047 = vmatmul.msk.f32.gmra.mxu0 %vm595_vm0, %v5306_v53 }
 0x44c   : > { %9784 = vst [vmem:[#allocation122_spill] sm:$0xff] %v7800_v1  ;;  %5087 = vmatmul.msk.f32.gmra.mxu1 %vm595_vm0, %v5306_v53  ;;  %v5307_v1 = vld [vmem:[%s9452_s5 + $0x108] sm:$0xff] }
 0x44f   : > { %5126 = vmatmul.msk.f32.gmra.mxu2 %vm595_vm0, %v5305_v33 }
 0x450   : > { %5166 = vmatmul.msk.f32.gmra.mxu3 %vm595_vm0, %v5305_v33  ;;  %v7809_v19 = vpop.f32.mrf.mxu0 }
 0x451   : > { %9785 = vst [vmem:[#allocation123_spill] sm:$0xff] %v7809_v19  ;;  %v7811_v39 = vpop.f32.mrf.mxu1 }
 0x452   : > { %9786 = vst [vmem:[#allocation124_spill] sm:$0xff] %v7811_v39  ;;  %v7813_v41 = vpop.f32.mrf.mxu2 }
 0x453   : > { %9787 = vst [vmem:[#allocation125_spill] sm:$0xff] %v7813_v41  ;;  %v7815_v58 = vpop.f32.mrf.mxu3  ;;  %5048 = vmatmul.msk.f32.gmra.mxu0 %vm595_vm0, %v5307_v1 }
 0x454   : > { %9788 = vst [vmem:[#allocation126_spill] sm:$0xff] %v7815_v58  ;;  %5088 = vmatmul.msk.f32.gmra.mxu1 %vm595_vm0, %v5307_v1  ;;  %v5308_v58 = vld [vmem:[%s9452_s5 + $0x110] sm:$0xff] }
 0x457   : > { %5127 = vmatmul.msk.f32.gmra.mxu2 %vm595_vm0, %v5306_v53 }
 0x458   : > { %5167 = vmatmul.msk.f32.gmra.mxu3 %vm595_vm0, %v5306_v53  ;;  %v7824_v33 = vpop.f32.mrf.mxu0 }
 0x459   : > { %9789 = vst [vmem:[#allocation127_spill] sm:$0xff] %v7824_v33  ;;  %v7826_v19 = vpop.f32.mrf.mxu1 }
 0x45a   : > { %9790 = vst [vmem:[#allocation128_spill] sm:$0xff] %v7826_v19  ;;  %v7828_v39 = vpop.f32.mrf.mxu2 }
 0x45b   : > { %9791 = vst [vmem:[#allocation129_spill] sm:$0xff] %v7828_v39  ;;  %v7830_v41 = vpop.f32.mrf.mxu3  ;;  %5049 = vmatmul.msk.f32.gmra.mxu0 %vm595_vm0, %v5308_v58 }
 0x45c   : > { %9792 = vst [vmem:[#allocation130_spill] sm:$0xff] %v7830_v41  ;;  %5089 = vmatmul.msk.f32.gmra.mxu1 %vm595_vm0, %v5308_v58  ;;  %v5309_v41 = vld [vmem:[%s9452_s5 + $0x118] sm:$0xff] }
 0x45f   : > { %5128 = vmatmul.msk.f32.gmra.mxu2 %vm595_vm0, %v5307_v1 }
 0x460   : > { %5168 = vmatmul.msk.f32.gmra.mxu3 %vm595_vm0, %v5307_v1  ;;  %v7839_v53 = vpop.f32.mrf.mxu0 }
 0x461   : > { %9793 = vst [vmem:[#allocation131_spill] sm:$0xff] %v7839_v53  ;;  %v7841_v33 = vpop.f32.mrf.mxu1 }
 0x462   : > { %9794 = vst [vmem:[#allocation132_spill] sm:$0xff] %v7841_v33  ;;  %v7843_v19 = vpop.f32.mrf.mxu2 }
 0x463   : > { %9795 = vst [vmem:[#allocation133_spill] sm:$0xff] %v7843_v19  ;;  %v7845_v39 = vpop.f32.mrf.mxu3  ;;  %5050 = vmatmul.msk.f32.gmra.mxu0 %vm595_vm0, %v5309_v41 }
 0x464   : > { %9796 = vst [vmem:[#allocation134_spill] sm:$0xff] %v7845_v39  ;;  %5090 = vmatmul.msk.f32.gmra.mxu1 %vm595_vm0, %v5309_v41  ;;  %v5310_v39 = vld [vmem:[%s9452_s5 + $0x120] sm:$0xff] }
 0x467   : > { %5129 = vmatmul.msk.f32.gmra.mxu2 %vm595_vm0, %v5308_v58 }
 0x468   : > { %5169 = vmatmul.msk.f32.gmra.mxu3 %vm595_vm0, %v5308_v58  ;;  %v7854_v1 = vpop.f32.mrf.mxu0 }
 0x469   : > { %9797 = vst [vmem:[#allocation135_spill] sm:$0xff] %v7854_v1  ;;  %v7856_v53 = vpop.f32.mrf.mxu1 }
 0x46a   : > { %9798 = vst [vmem:[#allocation136_spill] sm:$0xff] %v7856_v53  ;;  %v7858_v33 = vpop.f32.mrf.mxu2 }
 0x46b   : > { %9799 = vst [vmem:[#allocation137_spill] sm:$0xff] %v7858_v33  ;;  %v7860_v19 = vpop.f32.mrf.mxu3  ;;  %5051 = vmatmul.msk.f32.gmra.mxu0 %vm595_vm0, %v5310_v39 }
 0x46c   : > { %9800 = vst [vmem:[#allocation138_spill] sm:$0xff] %v7860_v19  ;;  %5091 = vmatmul.msk.f32.gmra.mxu1 %vm595_vm0, %v5310_v39  ;;  %v5311_v19 = vld [vmem:[%s9452_s5 + $0x128] sm:$0xff] }
 0x46f   : > { %5130 = vmatmul.msk.f32.gmra.mxu2 %vm595_vm0, %v5309_v41 }
 0x470   : > { %5170 = vmatmul.msk.f32.gmra.mxu3 %vm595_vm0, %v5309_v41  ;;  %v7869_v58 = vpop.f32.mrf.mxu0 }
 0x471   : > { %9801 = vst [vmem:[#allocation139_spill] sm:$0xff] %v7869_v58  ;;  %v7871_v1 = vpop.f32.mrf.mxu1 }
 0x472   : > { %9802 = vst [vmem:[#allocation140_spill] sm:$0xff] %v7871_v1  ;;  %v7873_v53 = vpop.f32.mrf.mxu2 }
 0x473   : > { %9803 = vst [vmem:[#allocation141_spill] sm:$0xff] %v7873_v53  ;;  %v7875_v33 = vpop.f32.mrf.mxu3  ;;  %5052 = vmatmul.msk.f32.gmra.mxu0 %vm595_vm0, %v5311_v19 }
 0x474   : > { %9804 = vst [vmem:[#allocation142_spill] sm:$0xff] %v7875_v33  ;;  %5092 = vmatmul.msk.f32.gmra.mxu1 %vm595_vm0, %v5311_v19  ;;  %v5312_v33 = vld [vmem:[%s9452_s5 + $0x130] sm:$0xff] }
 0x477   : > { %5131 = vmatmul.msk.f32.gmra.mxu2 %vm595_vm0, %v5310_v39 }
 0x478   : > { %5171 = vmatmul.msk.f32.gmra.mxu3 %vm595_vm0, %v5310_v39  ;;  %v7884_v41 = vpop.f32.mrf.mxu0 }
 0x479   : > { %9805 = vst [vmem:[#allocation143_spill] sm:$0xff] %v7884_v41  ;;  %v7886_v58 = vpop.f32.mrf.mxu1 }
 0x47a   : > { %9806 = vst [vmem:[#allocation144_spill] sm:$0xff] %v7886_v58  ;;  %v7888_v1 = vpop.f32.mrf.mxu2 }
 0x47b   : > { %9807 = vst [vmem:[#allocation145_spill] sm:$0xff] %v7888_v1  ;;  %v7890_v53 = vpop.f32.mrf.mxu3  ;;  %5053 = vmatmul.msk.f32.gmra.mxu0 %vm595_vm0, %v5312_v33 }
 0x47c   : > { %9808 = vst [vmem:[#allocation146_spill] sm:$0xff] %v7890_v53  ;;  %5093 = vmatmul.msk.f32.gmra.mxu1 %vm595_vm0, %v5312_v33  ;;  %v5313_v53 = vld [vmem:[%s9452_s5 + $0x138] sm:$0xff] }
 0x47f   : > { %5132 = vmatmul.msk.f32.gmra.mxu2 %vm595_vm0, %v5311_v19 }
 0x480   : > { %5172 = vmatmul.msk.f32.gmra.mxu3 %vm595_vm0, %v5311_v19  ;;  %v7899_v39 = vpop.f32.mrf.mxu0  ;;  %v9813_v19 = vld [vmem:[#allocation51_spill] sm:$0xff] }
 0x481   : > { %9809 = vst [vmem:[#allocation147_spill] sm:$0xff] %v7899_v39  ;;  %v7901_v41 = vpop.f32.mrf.mxu1  ;;  %v2358_v39 = vadd.f32 %v9813_v19, %v9691_v36  ;;  %v7934_v19 = vld [vmem:[%s9454_s7 + $0x8] sm:$0xff] }
 0x482   : > { %9810 = vst [vmem:[#allocation148_spill] sm:$0xff] %v7901_v41  ;;  %v7903_v58 = vpop.f32.mrf.mxu2  ;;  %v7925_v41 = vld [vmem:[%s9454_s7] sm:$0xff] }
 0x483   : > { %9811 = vst [vmem:[#allocation149_spill] sm:$0xff] %v7903_v58  ;;  %v7905_v1 = vpop.f32.mrf.mxu3  ;;  %5054 = vmatmul.msk.f32.gmra.mxu0 %vm595_vm0, %v5313_v53  ;;  %v2290_v58 = vadd.f32 %v7518_v5, %v9683_v21  ;;  %v2287_v5 = vadd.f32 %v7490_v63, %v9685_v46  ;;  %v3103_v25 = vmax.f32 %v2358_v39, 0.0  ;;  %v9820_v63 = vld [vmem:[#allocation41_spill] sm:$0xff] }
 0x484   : > { %9812 = vst [vmem:[#allocation150_spill] sm:$0xff] %v7905_v1  ;;  %5094 = vmatmul.msk.f32.gmra.mxu1 %vm595_vm0, %v5313_v53 }
 0x485   : > { %v3278_v39 = vmax.f32 %v2287_v5, 0.0 }
 0x487   : > { %5133 = vmatmul.msk.f32.gmra.mxu2 %vm595_vm0, %v5312_v33 }
 0x488   : > { %5173 = vmatmul.msk.f32.gmra.mxu3 %vm595_vm0, %v5312_v33  ;;  %v7920_v1 = vpop.f32.mrf.mxu0  ;;  %v3294_v33 = vmax.f32 %v2293_v57, 0.0  ;;  %v2349_v57 = vadd.f32 %v9820_v63, %v9699_v28 }
 0x489   : > { %9814 = vst [vmem:[#allocation51_spill] sm:$0xff] %v7920_v1  ;;  %v7929_v6 = vpop.f32.mrf.mxu1 }
 0x48a   : > { %9816 = vst [vmem:[#allocation48_spill] sm:$0xff] %v7929_v6  ;;  %v7938_v1 = vpop.f32.mrf.mxu2  ;;  %v3286_v6 = vmax.f32 %v2290_v58, 0.0  ;;  %v3270_v58 = vmax.f32 %v2284_v0, 0.0 }
 0x48b   : > { %9817 = vst [vmem:[#allocation151_spill] sm:$0xff] %v7938_v1  ;;  %v7942_v42 = vpop.f32.mrf.mxu3  ;;  %3412 = vmatmul.f32.vlgmr.msra.gmra.mxu0 %v7925_v41 }
 0x48c   : > { %9819 = vst [vmem:[#allocation44_spill] sm:$0xff] %v7942_v42  ;;  %3453 = vmatmul.f32.vlgmr.msra.gmra.mxu1 %v7934_v19  ;;  %3732 = vmatpush.msra.mxu0 %v3294_v33  ;;  %v9821_v42 = vld [vmem:[#allocation36_spill] sm:$0xff]  ;;  %v9825_v33 = vld [vmem:[#allocation29_spill] sm:$0xff] }
 0x48d   : > { %3765 = vmatpush.msra.mxu1 %v3103_v25  ;;  %v2346_v1 = vadd.f32 %v9821_v42, %v9701_v61  ;;  %v2340_v0 = vadd.f32 %v9825_v33, %v9709_v14 }
 0x48e   : > { %3733 = vmatpush.msra.mxu0 %v3286_v6  ;;  %v9822_v6 = vld [vmem:[#allocation31_spill] sm:$0xff] }
 0x48f   : > { %3766 = vmatpush.msra.mxu1 %v3095_v60  ;;  %5134 = vmatmul.msk.f32.gmra.mxu2 %vm595_vm0, %v5313_v53  ;;  %v2343_v43 = vadd.f32 %v9822_v6, %v9705_v17  ;;  %v3079_v60 = vmax.f32 %v2349_v57, 0.0  ;;  %v3071_v63 = vmax.f32 %v2346_v1, 0.0  ;;  %v7993_v1 = vld [vmem:[%s9454_s7 + $0x10] sm:$0xff] }
 0x490   : > { %5174 = vmatmul.msk.f32.gmra.mxu3 %vm595_vm0, %v5313_v53  ;;  %3734 = vmatpush.msra.mxu0 %v3278_v39  ;;  %v7958_v25 = vpop.f32.mrf.mxu0  ;;  %v2275_v53 = vadd.f32 %v7424_v50, %v7309_v10  ;;  %v2272_v39 = vadd.f32 %v7383_v38, %v7358_v49  ;;  %v3254_v50 = vmax.f32 %v2278_v22, 0.0  ;;  %9827 = vst [vmem:[#allocation29_spill] sm:$0xff] %v7993_v1  ;;  %v3055_v22 = vmax.f32 %v2340_v0, 0.0 }
 0x491   : > { %3767 = vmatpush.msra.mxu1 %v3087_v62  ;;  %v7967_v42 = vpop.f32.mrf.mxu1  ;;  %v2406_v62 = vadd.f32 %v7346_v54, %v6926_v9  ;;  %v9828_v54 = vld [vmem:[#allocation26_spill] sm:$0xff]  ;;  %v3063_v6 = vmax.f32 %v2343_v43, 0.0  ;;  %v9830_v43 = vld [vmem:[#allocation23_spill] sm:$0xff] }
 0x492   : > { %9823 = vst [vmem:[#allocation41_spill] sm:$0xff] %v7967_v42  ;;  %3735 = vmatpush.msra.mxu0 %v3270_v58  ;;  %v7976_v5 = vpop.f32.mrf.mxu2  ;;  %v2337_v58 = vadd.f32 %v9828_v54, %v9711_v30  ;;  %v3246_v38 = vmax.f32 %v2275_v53, 0.0  ;;  %v2334_v54 = vadd.f32 %v9830_v43, %v9713_v23  ;;  %v3295_v53 = vmax.f32 %v2430_v27, 0.0  ;;  %v9836_v43 = vld [vmem:[#allocation18_spill] sm:$0xff]  ;;  %v9851_v42 = vld [vmem:[#allocation68_spill] sm:$0xff] }
 0x493   : > { %9824 = vst [vmem:[#allocation36_spill] sm:$0xff] %v7976_v5  ;;  %3768 = vmatpush.msra.mxu1 %v3079_v60  ;;  %v7982_v57 = vpop.f32.mrf.mxu3  ;;  %3415 = vmatmul.f32.gmra.mxu0 %v7963_v18  ;;  %v2403_v60 = vadd.f32 %v7315_v12, %v6798_v31  ;;  %v3238_v5 = vmax.f32 %v2272_v39, 0.0  ;;  %v2424_v12 = vadd.f32 %v7492_v20, %v9685_v46  ;;  %v8019_v39 = vld [vmem:[%s9454_s7 + $0x30] sm:$0xff]  ;;  %v9833_v20 = vld [vmem:[#allocation20_spill] sm:$0xff] }
 0x494   : > { %9826 = vst [vmem:[#allocation31_spill] sm:$0xff] %v7982_v57  ;;  %3456 = vmatmul.f32.gmra.mxu1 %v7972_v26  ;;  %3736 = vmatpush.msra.mxu0 %v3262_v7  ;;  %v9829_v7 = vld [vmem:[#allocation83_spill] sm:$0xff]  ;;  %v3231_v57 = vmax.f32 %v2406_v62, 0.0  ;;  %v3047_v0 = vmax.f32 %v2337_v58, 0.0  ;;  %v2331_v27 = vadd.f32 %v9833_v20, %v9717_v34  ;;  %v3287_v58 = vmax.f32 %v2427_v56, 0.0  ;;  %v8210_v46 = vld [vmem:[%s9454_s7 + $0xb0] sm:$0xff] }
 0x495   : > { %3769 = vmatpush.msra.mxu1 %v3071_v63  ;;  %v2400_v33 = vadd.f32 %v9829_v7, %v6956_v29  ;;  %v9831_v63 = vld [vmem:[#allocation80_spill] sm:$0xff]  ;;  %v3039_v20 = vmax.f32 %v2334_v54, 0.0  ;;  %v9839_v54 = vld [vmem:[#allocation75_spill] sm:$0xff]  ;;  %9887 = vst [vmem:[#allocation155_spill] sm:$0xff] %v8210_v46 }
 0x496   : > { %3737 = vmatpush.msra.mxu0 %v3254_v50  ;;  %v2397_v62 = vadd.f32 %v9831_v63, %v6965_v4  ;;  %v3223_v50 = vmax.f32 %v2403_v60, 0.0  ;;  %v2328_v63 = vadd.f32 %v9836_v43, %v9721_v44  ;;  %v2391_v43 = vadd.f32 %v9839_v54, %v7157_v15 }
 0x497   : > { %3770 = vmatpush.msra.mxu1 %v3063_v6  ;;  %5175 = vmatmul.msk.f32.vlgmr.msra.gmra.mxu2 %vm595_vm0, %v7993_v1  ;;  %v3215_v60 = vmax.f32 %v2400_v33, 0.0  ;;  %v9838_v33 = vld [vmem:[#allocation15_spill] sm:$0xff] }
 0x498   : > { %3535 = vmatmul.f32.vlgmr.msra.gmra.mxu3 %v7925_v41  ;;  %3738 = vmatpush.msra.mxu0 %v3246_v38  ;;  %v8010_v13 = vpop.f32.mrf.mxu0  ;;  %v2421_v38 = vadd.f32 %v7477_v3, %v9686_v24  ;;  %v9837_v3 = vld [vmem:[#allocation77_spill] sm:$0xff] }
 0x499   : > { %3771 = vmatpush.msra.mxu1 %v3055_v22  ;;  %3806 = vmatpush.msra.mxu2 %v3231_v57  ;;  %v8014_v6 = vpop.f32.mrf.mxu1  ;;  %v8030_v57 = vld [vmem:[%s9454_s7 + $0x38] sm:$0xff]  ;;  %v2394_v56 = vadd.f32 %v9837_v3, %v6841_v45 }
 0x49a   : > { %9832 = vst [vmem:[#allocation26_spill] sm:$0xff] %v8014_v6  ;;  %3855 = vmatpush.msra.mxu3 %v3295_v53  ;;  %3739 = vmatpush.msra.mxu0 %v3238_v5  ;;  %v8025_v7 = vpop.f32.mrf.mxu2  ;;  %v3279_v5 = vmax.f32 %v2424_v12, 0.0  ;;  %v3207_v53 = vmax.f32 %v2397_v62, 0.0  ;;  %v8049_v12 = vld [vmem:[%s9454_s7 + $0x28] sm:$0xff]  ;;  %v3023_v62 = vmax.f32 %v2328_v63, 0.0 }
 0x49b   : > { %9834 = vst [vmem:[#allocation83_spill] sm:$0xff] %v8025_v7  ;;  %3772 = vmatpush.msra.mxu1 %v3047_v0  ;;  %3807 = vmatpush.msra.mxu2 %v3223_v50  ;;  %v8032_v22 = vpop.f32.mrf.mxu3  ;;  %v2418_v7 = vadd.f32 %v7466_v16, %v9687_v51  ;;  %v2325_v0 = vadd.f32 %v9838_v33, %v9723_v55  ;;  %v3031_v50 = vmax.f32 %v2331_v27, 0.0  ;;  %v3199_v27 = vmax.f32 %v2394_v56, 0.0  ;;  %v9844_v56 = vld [vmem:[#allocation70_spill] sm:$0xff] }
 0x49c   : > { %9835 = vst [vmem:[#allocation23_spill] sm:$0xff] %v8032_v22  ;;  %3856 = vmatpush.msra.mxu3 %v3287_v58  ;;  %3418 = vmatmul.f32.gmra.mxu0 %v8019_v39  ;;  %v3271_v22 = vmax.f32 %v2421_v38, 0.0  ;;  %v2415_v16 = vadd.f32 %v7447_v8, %v9690_v52  ;;  %v9841_v58 = vld [vmem:[#allocation73_spill] sm:$0xff] }
 0x49d   : > { %3459 = vmatmul.f32.gmra.mxu1 %v8030_v57  ;;  %3808 = vmatpush.msra.mxu2 %v3215_v60  ;;  %9840 = vst [vmem:[#allocation80_spill] sm:$0xff] %v8049_v12  ;;  %v2388_v60 = vadd.f32 %v9841_v58, %v7171_v11  ;;  %v9842_v38 = vld [vmem:[#allocation13_spill] sm:$0xff]  ;;  %v3263_v33 = vmax.f32 %v2418_v7, 0.0  ;;  %v3015_v63 = vmax.f32 %v2325_v0, 0.0  ;;  %v9847_v7 = vld [vmem:[#allocation10_spill] sm:$0xff]  ;;  %v2409_v58 = vadd.f32 %v7385_v59, %v7358_v49 }
 0x49e   : > { %3773 = vmatpush.msra.mxu1 %v3039_v20  ;;  %3857 = vmatpush.msra.mxu3 %v3279_v5  ;;  %v2322_v20 = vadd.f32 %v9842_v38, %v9725_v48  ;;  %v2412_v5 = vadd.f32 %v7426_v32, %v7309_v10  ;;  %v8073_v32 = vld [vmem:[%s9454_s7 + $0x48] sm:$0xff]  ;;  %v2319_v54 = vadd.f32 %v9847_v7, %v9729_v37  ;;  %v3255_v0 = vmax.f32 %v2415_v16, 0.0  ;;  %v9850_v7 = vld [vmem:[#allocation71_spill] sm:$0xff]  ;;  %v9867_v10 = vld [vmem:[#allocation88_spill] sm:$0xff] }
 0x49f   : > { %3809 = vmatpush.msra.mxu2 %v3207_v53  ;;  %v3191_v53 = vmax.f32 %v2391_v43, 0.0  ;;  %9846 = vst [vmem:[#allocation77_spill] sm:$0xff] %v8073_v32  ;;  %v8084_v43 = vld [vmem:[%s9454_s7 + $0x50] sm:$0xff]  ;;  %v2382_v6 = vadd.f32 %v9851_v42, %v9850_v7  ;;  %v8099_v42 = vld [vmem:[%s9454_s7 + $0x40] sm:$0xff] }
 0x4a0   : > { %3774 = vmatpush.msra.mxu1 %v3031_v50  ;;  %3858 = vmatpush.msra.mxu3 %v3271_v22  ;;  %v8055_v3 = vpop.f32.mrf.mxu0  ;;  %v2385_v22 = vadd.f32 %v9844_v56, %v7195_v40  ;;  %v3247_v59 = vmax.f32 %v2412_v5, 0.0 }
 0x4a1   : > { %5176 = vmatmul.msk.f32.gmra.mxu2 %vm595_vm0, %v8049_v12  ;;  %3538 = vmatmul.f32.gmra.mxu3 %v7963_v18  ;;  %v8064_v8 = vpop.f32.mrf.mxu1 }
 0x4a2   : > { %9843 = vst [vmem:[#allocation20_spill] sm:$0xff] %v8064_v8  ;;  %3775 = vmatpush.msra.mxu1 %v3023_v62  ;;  %3810 = vmatpush.msra.mxu2 %v3199_v27  ;;  %v8068_v50 = vpop.f32.mrf.mxu2  ;;  %v3183_v62 = vmax.f32 %v2388_v60, 0.0  ;;  %v9849_v27 = vld [vmem:[#allocation7_spill] sm:$0xff]  ;;  %v3175_v16 = vmax.f32 %v2385_v22, 0.0  ;;  %v9855_v22 = vld [vmem:[#allocation78_spill] sm:$0xff] }
 0x4a3   : > { %9845 = vst [vmem:[#allocation18_spill] sm:$0xff] %v8068_v50  ;;  %3859 = vmatpush.msra.mxu3 %v3263_v33  ;;  %v8079_v38 = vpop.f32.mrf.mxu3  ;;  %v2316_v56 = vadd.f32 %v9849_v27, %v9733_v47  ;;  %v3007_v50 = vmax.f32 %v2322_v20, 0.0  ;;  %v9852_v33 = vld [vmem:[#allocation5_spill] sm:$0xff]  ;;  %v3239_v27 = vmax.f32 %v2409_v58, 0.0 }
 0x4a4   : > { %9848 = vst [vmem:[#allocation15_spill] sm:$0xff] %v8079_v38  ;;  %3776 = vmatpush.msra.mxu1 %v3015_v63  ;;  %3811 = vmatpush.msra.mxu2 %v3191_v53  ;;  %v2313_v60 = vadd.f32 %v9852_v33, %v9735_v2  ;;  %v2999_v63 = vmax.f32 %v2319_v54, 0.0  ;;  %v9853_v53 = vld [vmem:[#allocation74_spill] sm:$0xff]  ;;  %v9854_v38 = vld [vmem:[#allocation65_spill] sm:$0xff]  ;;  %v3167_v33 = vmax.f32 %v2382_v6, 0.0  ;;  %v8119_v6 = vld [vmem:[%s9454_s7 + $0x60] sm:$0xff] }
 0x4a5   : > { %3860 = vmatpush.msra.mxu3 %v3255_v0  ;;  %3421 = vmatmul.f32.gmra.mxu0 %v8073_v32  ;;  %v2379_v8 = vadd.f32 %v9854_v38, %v9853_v53  ;;  %v2991_v5 = vmax.f32 %v2316_v56, 0.0  ;;  %v9856_v0 = vld [vmem:[#allocation63_spill] sm:$0xff]  ;;  %v9859_v38 = vld [vmem:[#allocation81_spill] sm:$0xff]  ;;  %9862 = vst [vmem:[#allocation70_spill] sm:$0xff] %v8119_v6 }
 0x4a6   : > { %3462 = vmatmul.f32.gmra.mxu1 %v8084_v43  ;;  %3812 = vmatpush.msra.mxu2 %v3183_v62  ;;  %v2376_v62 = vadd.f32 %v9856_v0, %v9855_v22  ;;  %v2983_v58 = vmax.f32 %v2313_v60, 0.0  ;;  %v9864_v60 = vld [vmem:[#allocation61_spill] sm:$0xff] }
 0x4a7   : > { %3777 = vmatpush.msra.mxu1 %v3007_v50  ;;  %3861 = vmatpush.msra.mxu3 %v3247_v59  ;;  %v9860_v59 = vld [vmem:[#allocation62_spill] sm:$0xff]  ;;  %v3159_v56 = vmax.f32 %v2379_v8, 0.0 }
 0x4a8   : > { %3813 = vmatpush.msra.mxu2 %v3175_v16  ;;  %v8101_v20 = vpop.f32.mrf.mxu0  ;;  %v2373_v16 = vadd.f32 %v9860_v59, %v9859_v38  ;;  %v9865_v8 = vld [vmem:[#allocation86_spill] sm:$0xff] }
 0x4a9   : > { %3778 = vmatpush.msra.mxu1 %v2999_v63  ;;  %3862 = vmatpush.msra.mxu3 %v3239_v27  ;;  %v8105_v54 = vpop.f32.mrf.mxu1  ;;  %v8124_v63 = vld [vmem:[%s9454_s7 + $0x68] sm:$0xff]  ;;  %v9863_v27 = vld [vmem:[#allocation84_spill] sm:$0xff] }
 0x4aa   : > { %9857 = vst [vmem:[#allocation75_spill] sm:$0xff] %v8105_v54  ;;  %5177 = vmatmul.msk.f32.gmra.mxu2 %vm595_vm0, %v8099_v42  ;;  %3541 = vmatmul.f32.gmra.mxu3 %v8019_v39  ;;  %v8110_v50 = vpop.f32.mrf.mxu2  ;;  %v3151_v54 = vmax.f32 %v2376_v62, 0.0  ;;  %v3143_v59 = vmax.f32 %v2373_v16, 0.0 }
 0x4ab   : > { %9858 = vst [vmem:[#allocation73_spill] sm:$0xff] %v8110_v50  ;;  %3779 = vmatpush.msra.mxu1 %v2991_v5  ;;  %3814 = vmatpush.msra.mxu2 %v3167_v33  ;;  %v8114_v0 = vpop.f32.mrf.mxu3  ;;  %v2370_v50 = vadd.f32 %v9864_v60, %v9863_v27  ;;  %v9866_v5 = vld [vmem:[#allocation59_spill] sm:$0xff]  ;;  %v9868_v60 = vld [vmem:[#allocation57_spill] sm:$0xff] }
 0x4ac   : > { %9861 = vst [vmem:[#allocation13_spill] sm:$0xff] %v8114_v0  ;;  %v2367_v33 = vadd.f32 %v9866_v5, %v9865_v8  ;;  %v8135_v0 = vld [vmem:[%s9454_s7 + $0x58] sm:$0xff]  ;;  %v2364_v62 = vadd.f32 %v9868_v60, %v9867_v10  ;;  %v9872_v5 = vld [vmem:[#allocation54_spill] sm:$0xff] }
 0x4ad   : > { %3780 = vmatpush.msra.mxu1 %v2983_v58  ;;  %3815 = vmatpush.msra.mxu2 %v3159_v56  ;;  %v3135_v58 = vmax.f32 %v2370_v50, 0.0  ;;  %v8153_v50 = vld [vmem:[%s9454_s7 + $0x78] sm:$0xff] }
 0x4ae   : > { %3424 = vmatmul.f32.gmra.mxu0 %v8119_v6  ;;  %3465 = vmatmul.f32.gmra.mxu1 %v8124_v63  ;;  %v3127_v51 = vmax.f32 %v2367_v33, 0.0  ;;  %9874 = vst [vmem:[#allocation5_spill] sm:$0xff] %v8153_v50  ;;  %v3119_v60 = vmax.f32 %v2364_v62, 0.0 }
 0x4af   : > { %3816 = vmatpush.msra.mxu2 %v3151_v54  ;;  %v9871_v54 = vld [vmem:[#allocation89_spill] sm:$0xff] }
 0x4b0   : > { %v2536_v49 = vpop.f32.mrf.mxu0  ;;  %v2361_v52 = vadd.f32 %v9872_v5, %v9871_v54 }
 0x4b1   : > { %3817 = vmatpush.msra.mxu2 %v3143_v59  ;;  %v8139_v56 = vpop.f32.mrf.mxu1  ;;  %v8158_v59 = vld [vmem:[%s9454_s7 + $0x80] sm:$0xff] }
 0x4b2   : > { %9869 = vst [vmem:[#allocation10_spill] sm:$0xff] %v8139_v56  ;;  %5178 = vmatmul.msk.f32.gmra.mxu2 %vm595_vm0, %v8135_v0  ;;  %3544 = vmatmul.f32.gmra.mxu3 %v8073_v32  ;;  %v8144_v16 = vpop.f32.mrf.mxu2  ;;  %v3111_v33 = vmax.f32 %v2361_v52, 0.0  ;;  %v8179_v52 = vld [vmem:[%s9454_s7 + $0x90] sm:$0xff]  ;;  %v9896_v32 = vld [vmem:[#allocation37_spill] sm:$0xff] }
 0x4b3   : > { %9870 = vst [vmem:[#allocation7_spill] sm:$0xff] %v8144_v16  ;;  %3818 = vmatpush.msra.mxu2 %v3135_v58  ;;  %v8148_v24 = vpop.f32.mrf.mxu3  ;;  %v8165_v58 = vld [vmem:[%s9454_s7 + $0x70] sm:$0xff] }
 0x4b4   : > { %9873 = vst [vmem:[#allocation68_spill] sm:$0xff] %v8148_v24 }
 0x4b5   : > { %9875 = vst [vmem:[#allocation65_spill] sm:$0xff] %v8158_v59  ;;  %3819 = vmatpush.msra.mxu2 %v3127_v51 }
 0x4b6   : > { %3427 = vmatmul.f32.gmra.mxu0 %v8153_v50  ;;  %3468 = vmatmul.f32.gmra.mxu1 %v8158_v59  ;;  %9876 = vst [vmem:[#allocation63_spill] sm:$0xff] %v8165_v58 }
 0x4b7   : > { %3820 = vmatpush.msra.mxu2 %v3119_v60  ;;  %9880 = vst [vmem:[#allocation88_spill] sm:$0xff] %v8179_v52  ;;  %v8184_v60 = vld [vmem:[%s9454_s7 + $0x98] sm:$0xff] }
 0x4b8   : > { %v2539_v5 = vpop.f32.mrf.mxu0  ;;  %9881 = vst [vmem:[#allocation57_spill] sm:$0xff] %v8184_v60 }
 0x4b9   : > { %3821 = vmatpush.msra.mxu2 %v3111_v33  ;;  %v8167_v24 = vpop.f32.mrf.mxu1  ;;  %v8191_v33 = vld [vmem:[%s9454_s7 + $0x88] sm:$0xff]  ;;  %v2540_v59 = vadd.f32 %v2539_v5, %v6798_v31  ;;  %v2534_v5 = vadd.f32 %v8101_v20, %v6965_v4 }
 0x4ba   : > { %9877 = vst [vmem:[#allocation62_spill] sm:$0xff] %v8167_v24  ;;  %5179 = vmatmul.msk.f32.gmra.mxu2 %vm595_vm0, %v8165_v58  ;;  %3547 = vmatmul.f32.gmra.mxu3 %v8119_v6  ;;  %v8172_v51 = vpop.f32.mrf.mxu2  ;;  %v8205_v24 = vld [vmem:[%s9454_s7 + $0xa8] sm:$0xff]  ;;  %v9894_v6 = vld [vmem:[#allocation111_spill] sm:$0xff] }
 0x4bb   : > { %9878 = vst [vmem:[#allocation61_spill] sm:$0xff] %v8172_v51  ;;  %v8174_v62 = vpop.f32.mrf.mxu3 }
 0x4bc   : > { %9879 = vst [vmem:[#allocation59_spill] sm:$0xff] %v8174_v62 }
 0x4bd   : > { %9882 = vst [vmem:[#allocation89_spill] sm:$0xff] %v8191_v33 }
 0x4be   : > { %3430 = vmatmul.f32.gmra.mxu0 %v8179_v52  ;;  %3471 = vmatmul.f32.gmra.mxu1 %v8184_v60  ;;  %9886 = vst [vmem:[#allocation154_spill] sm:$0xff] %v8205_v24  ;;  %v9893_v60 = vld [vmem:[#allocation8_spill] sm:$0xff] }
 0x4c0   : > { %v2542_v62 = vpop.f32.mrf.mxu0 }
 0x4c1   : > { %v8193_v16 = vpop.f32.mrf.mxu1  ;;  %v2543_v35 = vadd.f32 %v2542_v62, %v6926_v9 }
 0x4c2   : > { %9883 = vst [vmem:[#allocation54_spill] sm:$0xff] %v8193_v16  ;;  %5180 = vmatmul.msk.f32.gmra.mxu2 %vm595_vm0, %v8191_v33  ;;  %3550 = vmatmul.f32.gmra.mxu3 %v8153_v50  ;;  %v8198_v51 = vpop.f32.mrf.mxu2  ;;  %v9890_v16 = vld [vmem:[#allocation115_spill] sm:$0xff]  ;;  %v2492_v33 = vadd.f32 %v9894_v6, %v9893_v60 }
 0x4c3   : > { %9884 = vst [vmem:[#allocation152_spill] sm:$0xff] %v8198_v51  ;;  %v8200_v56 = vpop.f32.mrf.mxu3  ;;  %v8217_v51 = vld [vmem:[%s9454_s7 + $0xa0] sm:$0xff]  ;;  %v2495_v50 = vadd.f32 %v9890_v16, %v9691_v36  ;;  %v9897_v16 = vld [vmem:[#allocation107_spill] sm:$0xff]  ;;  %v3232_v9 = vmax.f32 %v2543_v35, 0.0 }
 0x4c4   : > { %9885 = vst [vmem:[#allocation153_spill] sm:$0xff] %v8200_v56  ;;  %v2489_v58 = vadd.f32 %v9897_v16, %v9896_v32  ;;  %v3096_v6 = vmax.f32 %v2492_v33, 0.0 }
 0x4c5   : > { %9888 = vst [vmem:[#allocation156_spill] sm:$0xff] %v8217_v51  ;;  %v3104_v62 = vmax.f32 %v2495_v50, 0.0  ;;  %v9900_v50 = vld [vmem:[#allocation99_spill] sm:$0xff] }
 0x4c6   : > { %3433 = vmatmul.f32.gmra.mxu0 %v8205_v24  ;;  %3474 = vmatmul.f32.gmra.mxu1 %v8210_v46  ;;  %v2483_v16 = vadd.f32 %v9900_v50, %v9701_v61 }
 0x4c8   : > { %v8219_v56 = vpop.f32.mrf.mxu0 }
 0x4c9   : > { %9889 = vst [vmem:[#allocation157_spill] sm:$0xff] %v8219_v56  ;;  %v8224_v21 = vpop.f32.mrf.mxu1 }
 0x4ca   : > { %9891 = vst [vmem:[#allocation115_spill] sm:$0xff] %v8224_v21  ;;  %5181 = vmatmul.msk.f32.gmra.mxu2 %vm595_vm0, %v8217_v51  ;;  %3553 = vmatmul.f32.gmra.mxu3 %v8179_v52  ;;  %v8229_v46 = vpop.f32.mrf.mxu2  ;;  %v2537_v21 = vadd.f32 %v2536_v49, %v6956_v29  ;;  %v8249_v49 = vld [vmem:[%s9454_s7 + $0xb8] sm:$0xff] }
 0x4cb   : > { %9892 = vst [vmem:[#allocation158_spill] sm:$0xff] %v8229_v46  ;;  %v8234_v56 = vpop.f32.mrf.mxu3  ;;  %v9898_v46 = vld [vmem:[#allocation103_spill] sm:$0xff] }
 0x4cc   : > { %9895 = vst [vmem:[#allocation8_spill] sm:$0xff] %v8234_v56  ;;  %v2486_v52 = vadd.f32 %v9898_v46, %v9699_v28  ;;  %v3224_v56 = vmax.f32 %v2540_v59, 0.0  ;;  %v2531_v46 = vadd.f32 %v8055_v3, %v6841_v45  ;;  %v3216_v33 = vmax.f32 %v2537_v21, 0.0  ;;  %v9903_v59 = vld [vmem:[#allocation95_spill] sm:$0xff] }
 0x4cd   : > { %9899 = vst [vmem:[#allocation111_spill] sm:$0xff] %v8249_v49  ;;  %v3208_v3 = vmax.f32 %v2534_v5, 0.0 }
 0x4ce   : > { %3576 = vmatmul.f32.vlgmr.msrb.gmra.mxu0 %v7934_v19  ;;  %5183 = vmatmul.msk.f32.vlgmr.msrb.gmra.mxu1 %vm595_vm0, %v7993_v1  ;;  %v3088_v1 = vmax.f32 %v2489_v58, 0.0  ;;  %v3080_v50 = vmax.f32 %v2486_v52, 0.0  ;;  %v2528_v58 = vadd.f32 %v8010_v13, %v7157_v15  ;;  %v9906_v52 = vld [vmem:[#allocation116_spill] sm:$0xff] }
 0x4cf   : > { %3888 = vmatpush.msrb.mxu0 %v3104_v62  ;;  %3929 = vmatpush.msrb.mxu1 %v3232_v9  ;;  %v2480_v62 = vadd.f32 %v9903_v59, %v9705_v17  ;;  %v2632_v59 = vadd.f32 %v9906_v52, %v9691_v36 }
 0x4d0   : > { %v8251_v35 = vpop.f32.mrf.mxu0 }
 0x4d1   : > { %3889 = vmatpush.msrb.mxu0 %v3096_v6  ;;  %3930 = vmatpush.msrb.mxu1 %v3224_v56  ;;  %v8257_v20 = vpop.f32.mrf.mxu1  ;;  %v9905_v56 = vld [vmem:[#allocation91_spill] sm:$0xff]  ;;  %v3064_v5 = vmax.f32 %v2480_v62, 0.0  ;;  %v9911_v62 = vld [vmem:[#allocation108_spill] sm:$0xff] }
 0x4d2   : > { %9901 = vst [vmem:[#allocation107_spill] sm:$0xff] %v8257_v20  ;;  %5182 = vmatmul.msk.f32.gmra.mxu2 %vm595_vm0, %v8249_v49  ;;  %3556 = vmatmul.f32.gmra.mxu3 %v8205_v24  ;;  %v8262_v9 = vpop.f32.mrf.mxu2  ;;  %v2477_v6 = vadd.f32 %v9905_v56, %v9709_v14  ;;  %v3072_v20 = vmax.f32 %v2483_v16, 0.0  ;;  %v2525_v24 = vadd.f32 %v7958_v25, %v7171_v11  ;;  %v9908_v16 = vld [vmem:[#allocation51_spill] sm:$0xff]  ;;  %v3192_v56 = vmax.f32 %v2528_v58, 0.0  ;;  %v9909_v25 = vld [vmem:[#allocation112_spill] sm:$0xff] }
 0x4d3   : > { %9902 = vst [vmem:[#allocation103_spill] sm:$0xff] %v8262_v9  ;;  %3890 = vmatpush.msrb.mxu0 %v3088_v1  ;;  %3931 = vmatpush.msrb.mxu1 %v3216_v33  ;;  %v8268_v21 = vpop.f32.mrf.mxu3  ;;  %v3200_v9 = vmax.f32 %v2531_v46, 0.0  ;;  %v9907_v1 = vld [vmem:[#allocation9_spill] sm:$0xff]  ;;  %v2522_v33 = vadd.f32 %v9908_v16, %v7195_v40  ;;  %v2629_v46 = vadd.f32 %v9909_v25, %v9893_v60  ;;  %v3105_v58 = vmax.f32 %v2632_v59, 0.0  ;;  %v9916_v59 = vld [vmem:[#allocation104_spill] sm:$0xff] }
 0x4d4   : > { %9904 = vst [vmem:[#allocation99_spill] sm:$0xff] %v8268_v21  ;;  %v2474_v13 = vadd.f32 %v9907_v1, %v9711_v30  ;;  %v3056_v21 = vmax.f32 %v2477_v6, 0.0  ;;  %v2626_v16 = vadd.f32 %v9911_v62, %v9896_v32  ;;  %v9914_v6 = vld [vmem:[#allocation27_spill] sm:$0xff]  ;;  %v2623_v62 = vadd.f32 %v9916_v59, %v9699_v28 }
 0x4d5   : > { %3891 = vmatpush.msrb.mxu0 %v3080_v50  ;;  %3932 = vmatpush.msrb.mxu1 %v3208_v3  ;;  %v9910_v3 = vld [vmem:[#allocation38_spill] sm:$0xff]  ;;  %v3097_v32 = vmax.f32 %v2629_v46, 0.0  ;;  %v9920_v46 = vld [vmem:[#allocation100_spill] sm:$0xff] }
 0x4d6   : > { %3579 = vmatmul.f32.gmra.mxu0 %v7972_v26  ;;  %5184 = vmatmul.msk.f32.gmra.mxu1 %vm595_vm0, %v8049_v12  ;;  %v2471_v52 = vadd.f32 %v9910_v3, %v9713_v23  ;;  %v3184_v12 = vmax.f32 %v2525_v24, 0.0  ;;  %v2468_v24 = vadd.f32 %v9914_v6, %v9717_v34 }
 0x4d7   : > { %3892 = vmatpush.msrb.mxu0 %v3072_v20  ;;  %3933 = vmatpush.msrb.mxu1 %v3200_v9  ;;  %v9912_v20 = vld [vmem:[#allocation147_spill] sm:$0xff] }
 0x4d8   : > { %v8285_v50 = vpop.f32.mrf.mxu0  ;;  %v2519_v9 = vadd.f32 %v9912_v20, %v9850_v7  ;;  %v9917_v20 = vld [vmem:[#allocation143_spill] sm:$0xff]  ;;  %v3032_v59 = vmax.f32 %v2468_v24, 0.0 }
 0x4d9   : > { %3893 = vmatpush.msrb.mxu0 %v3064_v5  ;;  %3934 = vmatpush.msrb.mxu1 %v3192_v56  ;;  %v8289_v1 = vpop.f32.mrf.mxu1  ;;  %v3048_v5 = vmax.f32 %v2474_v13, 0.0  ;;  %v3176_v56 = vmax.f32 %v2522_v33, 0.0  ;;  %v2516_v7 = vadd.f32 %v9917_v20, %v9853_v53  ;;  %v3089_v13 = vmax.f32 %v2626_v16, 0.0  ;;  %v9922_v16 = vld [vmem:[#allocation135_spill] sm:$0xff] }
 0x4da   : > { %3658 = vmatmul.f32.vlgmr.msrb.gmra.mxu2 %v7925_v41  ;;  %3699 = vmatmul.f32.vlgmr.msrb.gmra.mxu3 %v7934_v19  ;;  %v8297_v25 = vpop.f32.mrf.mxu2  ;;  %v3040_v19 = vmax.f32 %v2471_v52, 0.0  ;;  %v3168_v33 = vmax.f32 %v2519_v9, 0.0  ;;  %v9921_v52 = vld [vmem:[#allocation45_spill] sm:$0xff]  ;;  %v9923_v9 = vld [vmem:[#allocation96_spill] sm:$0xff] }
 0x4db   : > { %9913 = vst [vmem:[#allocation95_spill] sm:$0xff] %v8297_v25  ;;  %3894 = vmatpush.msrb.mxu0 %v3056_v21  ;;  %3935 = vmatpush.msrb.mxu1 %v3184_v12  ;;  %v8301_v3 = vpop.f32.mrf.mxu3  ;;  %v9918_v25 = vld [vmem:[#allocation21_spill] sm:$0xff]  ;;  %v9919_v21 = vld [vmem:[#allocation139_spill] sm:$0xff]  ;;  %v2617_v24 = vadd.f32 %v9923_v9, %v9705_v17  ;;  %v9930_v9 = vld [vmem:[#allocation6_spill] sm:$0xff] }
 0x4dc   : > { %9915 = vst [vmem:[#allocation91_spill] sm:$0xff] %v8301_v3  ;;  %4011 = vmatpush.msrb.mxu3 %v3105_v58  ;;  %v2465_v6 = vadd.f32 %v9918_v25, %v9721_v44  ;;  %v2513_v12 = vadd.f32 %v9919_v21, %v9855_v22  ;;  %v2620_v3 = vadd.f32 %v9920_v46, %v9701_v61  ;;  %v3081_v25 = vmax.f32 %v2623_v62, 0.0 }
 0x4dd   : > { %3895 = vmatpush.msrb.mxu0 %v3048_v5  ;;  %3936 = vmatpush.msrb.mxu1 %v3176_v56  ;;  %v2462_v58 = vadd.f32 %v9921_v52, %v9723_v55  ;;  %v2510_v5 = vadd.f32 %v9922_v16, %v9859_v38  ;;  %v3160_v56 = vmax.f32 %v2516_v7, 0.0  ;;  %v9926_v7 = vld [vmem:[#allocation92_spill] sm:$0xff]  ;;  %v9927_v16 = vld [vmem:[#allocation131_spill] sm:$0xff] }
 0x4de   : > { %4012 = vmatpush.msrb.mxu3 %v3097_v32  ;;  %3582 = vmatmul.f32.gmra.mxu0 %v8030_v57  ;;  %v3024_v46 = vmax.f32 %v2465_v6, 0.0  ;;  %v3152_v52 = vmax.f32 %v2513_v12, 0.0  ;;  %v2507_v38 = vadd.f32 %v9927_v16, %v9863_v27  ;;  %v9929_v6 = vld [vmem:[#allocation32_spill] sm:$0xff] }
 0x4df   : > { %5185 = vmatmul.msk.f32.gmra.mxu1 %vm595_vm0, %v8099_v42  ;;  %3896 = vmatpush.msrb.mxu0 %v3040_v19  ;;  %v9924_v19 = vld [vmem:[#allocation39_spill] sm:$0xff]  ;;  %v2456_v12 = vadd.f32 %v9929_v6, %v9729_v37 }
 0x4e0   : > { %3937 = vmatpush.msrb.mxu1 %v3168_v33  ;;  %4013 = vmatpush.msrb.mxu3 %v3089_v13  ;;  %v8320_v32 = vpop.f32.mrf.mxu0  ;;  %v2459_v21 = vadd.f32 %v9924_v19, %v9725_v48  ;;  %v2614_v13 = vadd.f32 %v9926_v7, %v9709_v14  ;;  %v3073_v33 = vmax.f32 %v2620_v3, 0.0  ;;  %v2611_v19 = vadd.f32 %v9930_v9, %v9711_v30  ;;  %v9931_v7 = vld [vmem:[#allocation127_spill] sm:$0xff] }
 0x4e1   : > { %3897 = vmatpush.msrb.mxu0 %v3032_v59  ;;  %v8324_v20 = vpop.f32.mrf.mxu1  ;;  %v3065_v3 = vmax.f32 %v2617_v24, 0.0  ;;  %v2504_v16 = vadd.f32 %v9931_v7, %v9865_v8  ;;  %v9934_v24 = vld [vmem:[#allocation14_spill] sm:$0xff] }
 0x4e2   : > { %3938 = vmatpush.msrb.mxu1 %v3160_v56  ;;  %4014 = vmatpush.msrb.mxu3 %v3081_v25  ;;  %v8328_v62 = vpop.f32.mrf.mxu2  ;;  %v3016_v56 = vmax.f32 %v2462_v58, 0.0  ;;  %v3144_v25 = vmax.f32 %v2510_v5, 0.0  ;;  %v3057_v27 = vmax.f32 %v2614_v13, 0.0  ;;  %v9933_v58 = vld [vmem:[#allocation123_spill] sm:$0xff]  ;;  %v2608_v6 = vadd.f32 %v9934_v24, %v9713_v23 }
 0x4e3   : > { %9925 = vst [vmem:[#allocation116_spill] sm:$0xff] %v8328_v62  ;;  %3661 = vmatmul.f32.gmra.mxu2 %v7963_v18  ;;  %3702 = vmatmul.f32.gmra.mxu3 %v7972_v26  ;;  %v8336_v59 = vpop.f32.mrf.mxu3  ;;  %v3008_v62 = vmax.f32 %v2459_v21, 0.0  ;;  %v9932_v26 = vld [vmem:[#allocation56_spill] sm:$0xff]  ;;  %v2501_v5 = vadd.f32 %v9933_v58, %v9867_v10  ;;  %v3128_v9 = vmax.f32 %v2504_v16, 0.0 }
 0x4e4   : > { %9928 = vst [vmem:[#allocation9_spill] sm:$0xff] %v8336_v59  ;;  %3898 = vmatpush.msrb.mxu0 %v3024_v46  ;;  %3939 = vmatpush.msrb.mxu1 %v3152_v52  ;;  %v2453_v59 = vadd.f32 %v9932_v26, %v9733_v47  ;;  %v3136_v46 = vmax.f32 %v2507_v38, 0.0  ;;  %v3000_v52 = vmax.f32 %v2456_v12, 0.0  ;;  %v3041_v16 = vmax.f32 %v2608_v6, 0.0 }
 0x4e5   : > { %4015 = vmatpush.msrb.mxu3 %v3073_v33  ;;  %v9935_v33 = vld [vmem:[#allocation60_spill] sm:$0xff]  ;;  %v3120_v58 = vmax.f32 %v2501_v5, 0.0 }
 0x4e6   : > { %3899 = vmatpush.msrb.mxu0 %v3016_v56  ;;  %3940 = vmatpush.msrb.mxu1 %v3144_v25  ;;  %v2450_v13 = vadd.f32 %v9935_v33, %v9735_v2  ;;  %v3049_v56 = vmax.f32 %v2611_v19, 0.0  ;;  %v9936_v25 = vld [vmem:[#allocation119_spill] sm:$0xff]  ;;  %v9940_v19 = vld [vmem:[#allocation25_spill] sm:$0xff] }
 0x4e7   : > { %4016 = vmatpush.msrb.mxu3 %v3065_v3  ;;  %3585 = vmatmul.f32.gmra.mxu0 %v8084_v43  ;;  %v2498_v38 = vadd.f32 %v9936_v25, %v9871_v54  ;;  %v9937_v3 = vld [vmem:[#allocation19_spill] sm:$0xff]  ;;  %v2602_v33 = vadd.f32 %v9940_v19, %v9721_v44  ;;  %v9947_v19 = vld [vmem:[#allocation53_spill] sm:$0xff] }
 0x4e8   : > { %5186 = vmatmul.msk.f32.gmra.mxu1 %vm595_vm0, %v8135_v0  ;;  %3900 = vmatpush.msrb.mxu0 %v3008_v62  ;;  %v8353_v21 = vpop.f32.mrf.mxu0  ;;  %v2605_v7 = vadd.f32 %v9937_v3, %v9717_v34  ;;  %v2992_v62 = vmax.f32 %v2453_v59, 0.0 }
 0x4e9   : > { %3941 = vmatpush.msrb.mxu1 %v3136_v46  ;;  %4017 = vmatpush.msrb.mxu3 %v3057_v27  ;;  %v8359_v12 = vpop.f32.mrf.mxu1  ;;  %v2984_v27 = vmax.f32 %v2450_v13, 0.0  ;;  %v3112_v46 = vmax.f32 %v2498_v38, 0.0  ;;  %v9944_v38 = vld [vmem:[#allocation50_spill] sm:$0xff] }
 0x4ea   : > { %3901 = vmatpush.msrb.mxu0 %v3000_v52  ;;  %v8363_v26 = vpop.f32.mrf.mxu2  ;;  %v9941_v52 = vld [vmem:[#allocation30_spill] sm:$0xff]  ;;  %v3033_v5 = vmax.f32 %v2605_v7, 0.0  ;;  %v2593_v3 = vadd.f32 %v9944_v38, %v9729_v37  ;;  %v9951_v38 = vld [vmem:[#allocation89_spill] sm:$0xff] }
 0x4eb   : > { %9938 = vst [vmem:[#allocation51_spill] sm:$0xff] %v8363_v26  ;;  %3942 = vmatpush.msrb.mxu1 %v3128_v9  ;;  %4018 = vmatpush.msrb.mxu3 %v3049_v56  ;;  %v8365_v24 = vpop.f32.mrf.mxu3  ;;  %v2599_v59 = vadd.f32 %v9941_v52, %v9723_v55  ;;  %v9942_v56 = vld [vmem:[#allocation40_spill] sm:$0xff]  ;;  %v3025_v9 = vmax.f32 %v2602_v33, 0.0  ;;  %v2590_v33 = vadd.f32 %v9947_v19, %v9733_v47 }
 0x4ec   : > { %9939 = vst [vmem:[#allocation112_spill] sm:$0xff] %v8365_v24  ;;  %3664 = vmatmul.f32.gmra.mxu2 %v8019_v39  ;;  %3705 = vmatmul.f32.gmra.mxu3 %v8030_v57  ;;  %v2596_v25 = vadd.f32 %v9942_v56, %v9725_v48  ;;  %v9943_v57 = vld [vmem:[#allocation63_spill] sm:$0xff]  ;;  %v9950_v56 = vld [vmem:[#allocation65_spill] sm:$0xff]  ;;  %v9959_v26 = vld [vmem:[#allocation72_spill] sm:$0xff] }
 0x4ed   : > { %3902 = vmatpush.msrb.mxu0 %v2992_v62  ;;  %3943 = vmatpush.msrb.mxu1 %v3120_v58  ;;  %v3017_v7 = vmax.f32 %v2599_v59, 0.0  ;;  %v2993_v59 = vmax.f32 %v2590_v33, 0.0 }
 0x4ee   : > { %4019 = vmatpush.msrb.mxu3 %v3041_v16  ;;  %v3009_v16 = vmax.f32 %v2596_v25, 0.0 }
 0x4ef   : > { %3903 = vmatpush.msrb.mxu0 %v2984_v27  ;;  %3944 = vmatpush.msrb.mxu1 %v3112_v46  ;;  %v9948_v27 = vld [vmem:[#allocation77_spill] sm:$0xff]  ;;  %v9949_v46 = vld [vmem:[#allocation58_spill] sm:$0xff] }
 0x4f0   : > { %4020 = vmatpush.msrb.mxu3 %v3033_v5  ;;  %3588 = vmatmul.f32.gmra.mxu0 %v8124_v63  ;;  %v2560_v6 = vpop.f32.mrf.mxu0  ;;  %v2587_v52 = vadd.f32 %v9949_v46, %v9735_v2  ;;  %v3001_v5 = vmax.f32 %v2593_v3, 0.0  ;;  %v9955_v3 = vld [vmem:[#allocation57_spill] sm:$0xff] }
 0x4f1   : > { %5187 = vmatmul.msk.f32.gmra.mxu1 %vm595_vm0, %v9943_v57  ;;  %v8378_v13 = vpop.f32.mrf.mxu1 }
 0x4f2   : > { %4021 = vmatpush.msrb.mxu3 %v3025_v9  ;;  %v8382_v62 = vpop.f32.mrf.mxu2  ;;  %v2985_v25 = vmax.f32 %v2587_v52, 0.0 }
 0x4f3   : > { %9945 = vst [vmem:[#allocation38_spill] sm:$0xff] %v8382_v62  ;;  %v8384_v58 = vpop.f32.mrf.mxu3 }
 0x4f4   : > { %9946 = vst [vmem:[#allocation108_spill] sm:$0xff] %v8384_v58  ;;  %4022 = vmatpush.msrb.mxu3 %v3017_v7  ;;  %3667 = vmatmul.f32.gmra.mxu2 %v9948_v27 }
 0x4f5   : > { %3708 = vmatmul.f32.gmra.mxu3 %v8084_v43  ;;  %v9954_v43 = vld [vmem:[#allocation70_spill] sm:$0xff] }
 0x4f6   : > { %4023 = vmatpush.msrb.mxu3 %v3009_v16  ;;  %v9956_v16 = vld [vmem:[#allocation69_spill] sm:$0xff] }
 0x4f8   : > { %4024 = vmatpush.msrb.mxu3 %v3001_v5  ;;  %3591 = vmatmul.f32.gmra.mxu0 %v9950_v56  ;;  %v2563_v9 = vpop.f32.mrf.mxu0  ;;  %v9957_v5 = vld [vmem:[#allocation67_spill] sm:$0xff] }
 0x4f9   : > { %5188 = vmatmul.msk.f32.gmra.mxu1 %vm595_vm0, %v9951_v38  ;;  %v2700_v19 = vpop.f32.mrf.mxu1  ;;  %v2564_v46 = vadd.f32 %v2563_v9, %v9956_v16  ;;  %v9963_v9 = vld [vmem:[#allocation79_spill] sm:$0xff] }
 0x4fa   : > { %4025 = vmatpush.msrb.mxu3 %v2993_v59  ;;  %v8395_v7 = vpop.f32.mrf.mxu2 }
 0x4fb   : > { %9952 = vst [vmem:[#allocation147_spill] sm:$0xff] %v8395_v7  ;;  %v8397_v24 = vpop.f32.mrf.mxu3  ;;  %v9961_v7 = vld [vmem:[#allocation5_spill] sm:$0xff]  ;;  %v3288_v2 = vmax.f32 %v2564_v46, 0.0  ;;  %v9967_v46 = vld [vmem:[#allocation34_spill] sm:$0xff] }
 0x4fc   : > { %9953 = vst [vmem:[#allocation27_spill] sm:$0xff] %v8397_v24  ;;  %4026 = vmatpush.msrb.mxu3 %v2985_v25  ;;  %3670 = vmatmul.f32.gmra.mxu2 %v9954_v43  ;;  %v2561_v24 = vadd.f32 %v2560_v6, %v9959_v26 }
 0x4fd   : > { %3711 = vmatmul.f32.gmra.mxu3 %v8124_v63  ;;  %v9962_v63 = vld [vmem:[#allocation76_spill] sm:$0xff] }
 0x4fe   : > { %v2558_v38 = vadd.f32 %v8353_v21, %v9962_v63 }
 0x500   : > { %3594 = vmatmul.f32.gmra.mxu0 %v9955_v3  ;;  %v2566_v33 = vpop.f32.mrf.mxu0  ;;  %v3272_v47 = vmax.f32 %v2558_v38, 0.0  ;;  %v9971_v38 = vld [vmem:[#allocation88_spill] sm:$0xff] }
 0x501   : > { %5189 = vmatmul.msk.f32.gmra.mxu1 %vm595_vm0, %v8217_v51  ;;  %v2567_v52 = vadd.f32 %v2566_v33, %v9957_v5  ;;  %v2703_v59 = vpop.f32.mrf.mxu1  ;;  %v2555_v33 = vadd.f32 %v8320_v32, %v9963_v9  ;;  %v3280_v51 = vmax.f32 %v2561_v24, 0.0 }
 0x502   : > { %v8406_v58 = vpop.f32.mrf.mxu2 }
 0x503   : > { %9958 = vst [vmem:[#allocation104_spill] sm:$0xff] %v8406_v58  ;;  %v3296_v25 = vmax.f32 %v2567_v52, 0.0  ;;  %v8409_v62 = vpop.f32.mrf.mxu3  ;;  %v9964_v58 = vld [vmem:[#allocation155_spill] sm:$0xff]  ;;  %v9965_v52 = vld [vmem:[#allocation82_spill] sm:$0xff]  ;;  %v3264_v24 = vmax.f32 %v2555_v33, 0.0 }
 0x504   : > { %9960 = vst [vmem:[#allocation143_spill] sm:$0xff] %v8409_v62  ;;  %3673 = vmatmul.f32.gmra.mxu2 %v9961_v7  ;;  %v2552_v62 = vadd.f32 %v8285_v50, %v9965_v52  ;;  %v9970_v7 = vld [vmem:[#allocation85_spill] sm:$0xff]  ;;  %v2704_v50 = vadd.f32 %v2703_v59, %v9957_v5  ;;  %v9973_v33 = vld [vmem:[#allocation10_spill] sm:$0xff]  ;;  %v2698_v5 = vadd.f32 %v8378_v13, %v9959_v26 }
 0x505   : > { %3714 = vmatmul.f32.gmra.mxu3 %v9950_v56  ;;  %3978 = vmatpush.msrb.mxu2 %v3296_v25  ;;  %v9968_v25 = vld [vmem:[#allocation54_spill] sm:$0xff]  ;;  %v2549_v43 = vadd.f32 %v8251_v35, %v9970_v7  ;;  %v9975_v35 = vld [vmem:[#allocation157_spill] sm:$0xff] }
 0x506   : > { %v2680_v32 = vadd.f32 %v9968_v25, %v9967_v46  ;;  %v2701_v25 = vadd.f32 %v2700_v19, %v9956_v16  ;;  %v9977_v19 = vld [vmem:[#allocation75_spill] sm:$0xff]  ;;  %v3281_v26 = vmax.f32 %v2698_v5, 0.0 }
 0x507   : > { %3979 = vmatpush.msrb.mxu2 %v3288_v2  ;;  %v3248_v59 = vmax.f32 %v2549_v43, 0.0  ;;  %v2695_v43 = vadd.f32 %v8359_v12, %v9962_v63  ;;  %v9981_v12 = vld [vmem:[#allocation154_spill] sm:$0xff] }
 0x508   : > { %3597 = vmatmul.f32.gmra.mxu0 %v9964_v58  ;;  %v3413_v6 = vpop.f32.mrf.mxu0 }
 0x509   : > { %5190 = vmatmul.msk.f32.gmra.mxu1 %vm595_vm0, %v8249_v49  ;;  %v8422_v21 = vpop.f32.mrf.mxu1  ;;  %3980 = vmatpush.msrb.mxu2 %v3280_v51  ;;  %v9972_v49 = vld [vmem:[#allocation62_spill] sm:$0xff]  ;;  %v3256_v51 = vmax.f32 %v2552_v62, 0.0 }
 0x50a   : > { %v8424_v56 = vpop.f32.mrf.mxu2  ;;  %v2677_v57 = vadd.f32 %v9972_v49, %v6798_v31  ;;  %v9976_v49 = vld [vmem:[#allocation29_spill] sm:$0xff] }
 0x50b   : > { %9966 = vst [vmem:[#allocation21_spill] sm:$0xff] %v8424_v56  ;;  %v8428_v2 = vpop.f32.mrf.mxu3  ;;  %3981 = vmatpush.msrb.mxu2 %v3272_v47  ;;  %v3233_v47 = vmax.f32 %v2680_v32, 0.0  ;;  %v9974_v56 = vld [vmem:[#allocation87_spill] sm:$0xff] }
 0x50c   : > { %9969 = vst [vmem:[#allocation139_spill] sm:$0xff] %v8428_v2  ;;  %3676 = vmatmul.f32.gmra.mxu2 %v9971_v38  ;;  %v2674_v2 = vadd.f32 %v9973_v33, %v6956_v29  ;;  %v2546_v37 = vadd.f32 %v9975_v35, %v9974_v56  ;;  %v3297_v38 = vmax.f32 %v2704_v50, 0.0  ;;  %v9978_v50 = vld [vmem:[#allocation20_spill] sm:$0xff] }
 0x50d   : > { %3717 = vmatmul.f32.gmra.mxu3 %v9955_v3  ;;  %3982 = vmatpush.msrb.mxu2 %v3264_v24  ;;  %v2671_v3 = vadd.f32 %v9977_v19, %v6965_v4  ;;  %v3225_v24 = vmax.f32 %v2677_v57, 0.0  ;;  %v2668_v33 = vadd.f32 %v9978_v50, %v6841_v45  ;;  %v8461_v57 = vpop.permute.xlu2 %3334 }
 0x50e   : > { %v3217_v35 = vmax.f32 %v2674_v2, 0.0  ;;  %9980 = vst [vmem:[#allocation45_spill] sm:$0xff] %v8461_v57  ;;  %v3414_v50 = vadd.f32 %v3413_v6, %v8461_v57  ;;  %v2689_v2 = vadd.f32 %v8289_v1, %v9965_v52  ;;  %v9987_v1 = vld [vmem:[#allocation48_spill] sm:$0xff] }
 0x50f   : > { %3983 = vmatpush.msrb.mxu2 %v3256_v51  ;;  %v3289_v51 = vmax.f32 %v2701_v25, 0.0 }
 0x510   : > { %5191 = vmatmul.msk.f32.vlgmr.msra.gmra.mxu0 %vm595_vm0, %v9976_v49  ;;  %v8446_v62 = vpop.f32.mrf.mxu0 }
 0x511   : > { %3781 = vmatmul.f32.vlgmr.msra.gmra.mxu1 %v7925_v41  ;;  %4052 = vmatpush.msra.mxu0 %v3233_v47  ;;  %v8451_v32 = vpop.f32.mrf.mxu1  ;;  %v3240_v41 = vmax.f32 %v2546_v37, 0.0  ;;  %v2692_v47 = vadd.f32 %v8324_v20, %v9963_v9  ;;  %v3273_v37 = vmax.f32 %v2695_v43, 0.0  ;;  %v9983_v20 = vld [vmem:[#allocation41_spill] sm:$0xff]  ;;  %v9994_v9 = vld [vmem:[#allocation71_spill] sm:$0xff] }
 0x512   : > { %4101 = vmatpush.msra.mxu1 %v3297_v38  ;;  %3984 = vmatpush.msrb.mxu2 %v3248_v59  ;;  %v8455_v13 = vpop.f32.mrf.mxu2  ;;  %v9982_v38 = vld [vmem:[#allocation26_spill] sm:$0xff]  ;;  %v3209_v59 = vmax.f32 %v2671_v3, 0.0  ;;  %v2662_v5 = vadd.f32 %v9983_v20, %v7171_v11  ;;  %v9985_v3 = vld [vmem:[#allocation107_spill] sm:$0xff] }
 0x513   : > { %4053 = vmatpush.msra.mxu0 %v3225_v24  ;;  %v8459_v19 = vpop.f32.mrf.mxu3  ;;  %v2665_v25 = vadd.f32 %v9982_v38, %v7157_v15  ;;  %v3201_v24 = vmax.f32 %v2668_v33, 0.0  ;;  %v2686_v6 = vadd.f32 %v9985_v3, %v9970_v7  ;;  %v3455_v33 = vadd.f32 %v8422_v21, %v3414_v50  ;;  %v9990_v20 = vld [vmem:[#allocation115_spill] sm:$0xff] }
 0x514   : > { %9979 = vst [vmem:[#allocation100_spill] sm:$0xff] %v8459_v19  ;;  %4102 = vmatpush.msra.mxu1 %v3289_v51  ;;  %3679 = vmatmul.f32.gmra.mxu2 %v9981_v12  ;;  %v9984_v51 = vld [vmem:[#allocation125_spill] sm:$0xff]  ;;  %v3265_v19 = vmax.f32 %v2692_v47, 0.0  ;;  %v3257_v3 = vmax.f32 %v2689_v2, 0.0  ;;  %v3185_v7 = vmax.f32 %v2662_v5, 0.0 }
 0x515   : > { %3720 = vmatmul.f32.gmra.mxu3 %v9964_v58  ;;  %4054 = vmatpush.msra.mxu0 %v3217_v35  ;;  %v2769_v38 = vadd.f32 %v9984_v51, %v9691_v36  ;;  %v9986_v58 = vld [vmem:[#allocation80_spill] sm:$0xff]  ;;  %v3193_v43 = vmax.f32 %v2665_v25, 0.0  ;;  %v9988_v35 = vld [vmem:[#allocation103_spill] sm:$0xff]  ;;  %v9989_v47 = vld [vmem:[#allocation121_spill] sm:$0xff]  ;;  %v2683_v51 = vadd.f32 %v9990_v20, %v9974_v56 }
 0x516   : > { %4103 = vmatpush.msra.mxu1 %v3281_v26  ;;  %3985 = vmatpush.msrb.mxu2 %v3240_v41  ;;  %v2659_v26 = vadd.f32 %v9987_v1, %v7195_v40  ;;  %v2817_v41 = vadd.f32 %v9988_v35, %v9967_v46  ;;  %v9991_v35 = vld [vmem:[#allocation158_spill] sm:$0xff]  ;;  %v9993_v46 = vld [vmem:[#allocation117_spill] sm:$0xff]  ;;  %v9995_v20 = vld [vmem:[#allocation148_spill] sm:$0xff] }
 0x517   : > { %4055 = vmatpush.msra.mxu0 %v3209_v59  ;;  %v2814_v21 = vadd.f32 %v9991_v35, %v6798_v31  ;;  %v3106_v52 = vmax.f32 %v2769_v38, 0.0  ;;  %v2656_v2 = vadd.f32 %v9995_v20, %v9994_v9  ;;  %v8505_v5 = vld [vmem:[%s9454_s7 + $0x8] sm:$0xff]  ;;  %v10000_v31 = vld [vmem:[#allocation144_spill] sm:$0xff]  ;;  %v3241_v63 = vmax.f32 %v2683_v51, 0.0 }
 0x518   : > { %4104 = vmatpush.msra.mxu1 %v3273_v37  ;;  %5192 = vmatmul.msk.f32.gmra.mxu0 %vm595_vm0, %v9986_v58  ;;  %v2766_v37 = vadd.f32 %v9989_v47, %v9893_v60  ;;  %9996 = vst [vmem:[#allocation135_spill] sm:$0xff] %v8505_v5  ;;  %v3234_v35 = vmax.f32 %v2817_v41, 0.0  ;;  %v10001_v41 = vld [vmem:[#allocation61_spill] sm:$0xff] }
 0x519   : > { %3784 = vmatmul.f32.gmra.mxu1 %v7963_v18  ;;  %4056 = vmatpush.msra.mxu0 %v3201_v24  ;;  %v8486_v59 = vpop.f32.mrf.mxu0  ;;  %v9992_v24 = vld [vmem:[#allocation37_spill] sm:$0xff] }
 0x51a   : > { %4105 = vmatpush.msra.mxu1 %v3265_v19  ;;  %v8492_v1 = vpop.f32.mrf.mxu1  ;;  %v3495_v25 = vpop.f32.mrf.mxu2  ;;  %v2763_v47 = vadd.f32 %v9993_v46, %v9992_v24  ;;  %v3249_v19 = vmax.f32 %v2686_v6, 0.0  ;;  %v5315_v46 = vld [vmem:[%s5668_s19] sm:$0xff]  ;;  %v3098_v56 = vmax.f32 %v2766_v37, 0.0 }
 0x51b   : > { %4057 = vmatpush.msra.mxu0 %v3193_v43  ;;  %v3496_v18 = vadd.f32 %v3495_v25, %v3455_v33  ;;  %v8496_v50 = vpop.f32.mrf.mxu3  ;;  %v3177_v43 = vmax.f32 %v2659_v26, 0.0  ;;  %v9997_v33 = vld [vmem:[#allocation152_spill] sm:$0xff]  ;;  %v8513_v6 = vpop.permute.xlu0 %3339  ;;  %v2653_v26 = vadd.f32 %v10000_v31, %v9853_v53  ;;  %v3169_v31 = vmax.f32 %v2656_v2, 0.0 }
 0x51c   : > { %4106 = vmatpush.msra.mxu1 %v3257_v3  ;;  %3822 = vmatmul.f32.vlgmr.msra.gmra.mxu2 %v8505_v5  ;;  %v2811_v25 = vadd.f32 %v9997_v33, %v6956_v29  ;;  %9998 = vst [vmem:[#allocation96_spill] sm:$0xff] %v8513_v6  ;;  %v9999_v3 = vld [vmem:[#allocation113_spill] sm:$0xff]  ;;  %v2808_v33 = vadd.f32 %v10001_v41, %v6965_v4  ;;  %v10002_v37 = vld [vmem:[#allocation140_spill] sm:$0xff] }
 0x51d   : > { %5199 = vmatmul.msk.f32.vlgmr.msra.gmra.mxu3 %vm595_vm0, %v9976_v49  ;;  %4058 = vmatpush.msra.mxu0 %v3185_v7  ;;  %v4380_v38 = vadd.f32 %v5315_v46, %v3496_v18  ;;  %v2760_v20 = vadd.f32 %v9999_v3, %v9699_v28  ;;  %v3226_v49 = vmax.f32 %v2814_v21, 0.0  ;;  %v3417_v7 = vadd.f32 %v8446_v62, %v8513_v6  ;;  %v10004_v21 = vld [vmem:[#allocation7_spill] sm:$0xff]  ;;  %v10007_v3 = vld [vmem:[#allocation136_spill] sm:$0xff]  ;;  %v10008_v41 = vld [vmem:[#allocation73_spill] sm:$0xff] }
 0x51e   : > { %4107 = vmatpush.msra.mxu1 %v3249_v19  ;;  %4134 = vmatpush.msra.mxu2 %v3106_v52  ;;  %v2650_v18 = vadd.f32 %v10002_v37, %v9855_v22  ;;  %v10003_v52 = vld [vmem:[#allocation109_spill] sm:$0xff]  ;;  %v3090_v19 = vmax.f32 %v2763_v47, 0.0  ;;  %v2805_v46 = vadd.f32 %v10004_v21, %v6841_v45  ;;  %v3218_v62 = vmax.f32 %v2811_v25, 0.0 }
 0x51f   : > { %4175 = vmatpush.msra.mxu3 %v3234_v35  ;;  %4059 = vmatpush.msra.mxu0 %v3177_v43  ;;  %4444 = vst [vmem:[%s8524_s30] sm:$0xff] %v4380_v38  ;;  %v2757_v51 = vadd.f32 %v10003_v52, %v9701_v61  ;;  %v10005_v43 = vld [vmem:[#allocation105_spill] sm:$0xff]  ;;  %v3082_v47 = vmax.f32 %v2760_v20, 0.0  ;;  %v2802_v25 = vadd.f32 %v10008_v41, %v7157_v15 }
 0x520   : > { %4108 = vmatpush.msra.mxu1 %v3241_v63  ;;  %4135 = vmatpush.msra.mxu2 %v3098_v56  ;;  %v2754_v35 = vadd.f32 %v10005_v43, %v9705_v17  ;;  %v10006_v38 = vld [vmem:[#allocation81_spill] sm:$0xff]  ;;  %v3161_v63 = vmax.f32 %v2653_v26, 0.0  ;;  %v3458_v37 = vadd.f32 %v8451_v32, %v3417_v7  ;;  %v3153_v26 = vmax.f32 %v2650_v18, 0.0  ;;  %v10010_v7 = vld [vmem:[#allocation84_spill] sm:$0xff] }
 0x521   : > { %4176 = vmatpush.msra.mxu3 %v3226_v49  ;;  %5193 = vmatmul.msk.f32.gmra.mxu0 %vm595_vm0, %v8099_v42  ;;  %v2647_v2 = vadd.f32 %v10007_v3, %v10006_v38  ;;  %v3210_v49 = vmax.f32 %v2808_v33, 0.0  ;;  %v10009_v21 = vld [vmem:[#allocation101_spill] sm:$0xff]  ;;  %v3074_v32 = vmax.f32 %v2757_v51, 0.0  ;;  %v8565_v51 = vpop.permute.xlu1 %3344 }
 0x522   : > { %3787 = vmatmul.f32.gmra.mxu1 %v8019_v39  ;;  %4060 = vmatpush.msra.mxu0 %v3169_v31  ;;  %v8540_v56 = vpop.f32.mrf.mxu0  ;;  %v2751_v43 = vadd.f32 %v10009_v21, %v9709_v14  ;;  %v8552_v39 = vld [vmem:[%s9454_s7 + $0x20] sm:$0xff]  ;;  %v10012_v3 = vld [vmem:[#allocation97_spill] sm:$0xff]  ;;  %v10013_v21 = vld [vmem:[#allocation18_spill] sm:$0xff] }
 0x523   : > { %4136 = vmatpush.msra.mxu2 %v3090_v19  ;;  %4177 = vmatpush.msra.mxu3 %v3218_v62  ;;  %v8545_v52 = vpop.f32.mrf.mxu1  ;;  %v10011_v31 = vld [vmem:[#allocation132_spill] sm:$0xff]  ;;  %v3202_v62 = vmax.f32 %v2805_v46, 0.0  ;;  %v3145_v41 = vmax.f32 %v2647_v2, 0.0  ;;  %v2799_v15 = vadd.f32 %v10013_v21, %v7171_v11  ;;  %v10015_v2 = vld [vmem:[#allocation83_spill] sm:$0xff]  ;;  %v3420_v21 = vadd.f32 %v8486_v59, %v8565_v51 }
 0x524   : > { %4061 = vmatpush.msra.mxu0 %v3161_v63  ;;  %3825 = vmatmul.f32.gmra.mxu2 %v8552_v39  ;;  %v3498_v20 = vpop.f32.mrf.mxu2  ;;  %v8555_v33 = vpop.f32.mrf.mxu3  ;;  %v2644_v19 = vadd.f32 %v10011_v31, %v10010_v7  ;;  %v2748_v63 = vadd.f32 %v10012_v3, %v9711_v30  ;;  %v3066_v31 = vmax.f32 %v2754_v35, 0.0  ;;  %v10014_v46 = vld [vmem:[#allocation128_spill] sm:$0xff]  ;;  %v2796_v3 = vadd.f32 %v10015_v2, %v7195_v40 }
 0x525   : > { %4137 = vmatpush.msra.mxu2 %v3082_v47  ;;  %4178 = vmatpush.msra.mxu3 %v3210_v49  ;;  %v3499_v18 = vadd.f32 %v3498_v20, %v3458_v37  ;;  %v2641_v47 = vadd.f32 %v10014_v46, %v9865_v8  ;;  %v3194_v49 = vmax.f32 %v2802_v25, 0.0  ;;  %v5317_v37 = vld [vmem:[%s5668_s19 + $0x40] sm:$0xff]  ;;  %v10017_v25 = vld [vmem:[#allocation93_spill] sm:$0xff]  ;;  %v3186_v46 = vmax.f32 %v2799_v15, 0.0  ;;  %v10021_v15 = vld [vmem:[#allocation151_spill] sm:$0xff] }
 0x526   : > { %5200 = vmatmul.msk.f32.gmra.mxu3 %vm595_vm0, %v9986_v58  ;;  %4062 = vmatpush.msra.mxu0 %v3153_v26  ;;  %v3058_v58 = vmax.f32 %v2751_v43, 0.0  ;;  %v10016_v26 = vld [vmem:[#allocation124_spill] sm:$0xff]  ;;  %v3137_v35 = vmax.f32 %v2644_v19, 0.0  ;;  %v2790_v2 = vadd.f32 %v10021_v15, %v9853_v53  ;;  %v10024_v15 = vld [vmem:[#allocation33_spill] sm:$0xff] }
 0x527   : > { %4138 = vmatpush.msra.mxu2 %v3074_v32  ;;  %4179 = vmatpush.msra.mxu3 %v3202_v62  ;;  %v4388_v20 = vadd.f32 %v5317_v37, %v3499_v18  ;;  %v2638_v11 = vadd.f32 %v10016_v26, %v9867_v10  ;;  %v2745_v32 = vadd.f32 %v10017_v25, %v9713_v23  ;;  %v10018_v62 = vld [vmem:[#allocation36_spill] sm:$0xff]  ;;  %v3178_v26 = vmax.f32 %v2796_v3, 0.0 }
 0x528   : > { %4063 = vmatpush.msra.mxu0 %v3145_v41  ;;  %v2793_v18 = vadd.f32 %v10018_v62, %v9994_v9  ;;  %v10019_v59 = vld [vmem:[#allocation4_spill] sm:$0xff]  ;;  %v3050_v41 = vmax.f32 %v2748_v63, 0.0  ;;  %v8598_v63 = vld [vmem:[%s9454_s7 + $0x38] sm:$0xff]  ;;  %v2736_v53 = vadd.f32 %v10024_v15, %v9723_v55  ;;  %v10029_v15 = vld [vmem:[#allocation49_spill] sm:$0xff] }
 0x529   : > { %4139 = vmatpush.msra.mxu2 %v3066_v31  ;;  %4180 = vmatpush.msra.mxu3 %v3194_v49  ;;  %4452 = vst [vmem:[%s8524_s30 + $0x40] sm:$0xff] %v4388_v20  ;;  %v2742_v43 = vadd.f32 %v10019_v59, %v9717_v34  ;;  %v10020_v19 = vld [vmem:[#allocation120_spill] sm:$0xff]  ;;  %v3129_v49 = vmax.f32 %v2641_v47, 0.0  ;;  %v10022_v47 = vld [vmem:[#allocation42_spill] sm:$0xff]  ;;  %v3042_v3 = vmax.f32 %v2745_v32, 0.0  ;;  %v10025_v32 = vld [vmem:[#allocation145_spill] sm:$0xff] }
 0x52a   : > { %5194 = vmatmul.msk.f32.gmra.mxu0 %vm595_vm0, %v8135_v0  ;;  %3790 = vmatmul.f32.gmra.mxu1 %v9948_v27  ;;  %v2635_v31 = vadd.f32 %v10020_v19, %v9871_v54  ;;  %v3461_v27 = vadd.f32 %v8492_v1, %v3420_v21  ;;  %v10023_v1 = vld [vmem:[#allocation149_spill] sm:$0xff]  ;;  %v8607_v19 = vpop.permute.xlu2 %3349 }
 0x52b   : > { %4064 = vmatpush.msra.mxu0 %v3137_v35  ;;  %4140 = vmatpush.msra.mxu2 %v3058_v58  ;;  %v8588_v37 = vpop.f32.mrf.mxu0  ;;  %v8590_v20 = vpop.f32.mrf.mxu1  ;;  %v2739_v58 = vadd.f32 %v10022_v47, %v9721_v44  ;;  %v3121_v35 = vmax.f32 %v2638_v11, 0.0  ;;  %v2787_v21 = vadd.f32 %v10023_v1, %v9855_v22  ;;  %v3034_v47 = vmax.f32 %v2742_v43, 0.0  ;;  %v10026_v43 = vld [vmem:[#allocation24_spill] sm:$0xff] }
 0x52c   : > { %4181 = vmatpush.msra.mxu3 %v3186_v46  ;;  %3828 = vmatmul.f32.gmra.mxu2 %v8598_v63  ;;  %v3170_v46 = vmax.f32 %v2793_v18, 0.0  ;;  %v3113_v11 = vmax.f32 %v2635_v31, 0.0  ;;  %v3423_v18 = vadd.f32 %v8540_v56, %v8607_v19  ;;  %v2733_v31 = vadd.f32 %v10026_v43, %v9725_v48  ;;  %v10030_v56 = vld [vmem:[#allocation63_spill] sm:$0xff] }
 0x52d   : > { %4065 = vmatpush.msra.mxu0 %v3129_v49  ;;  %4141 = vmatpush.msra.mxu2 %v3050_v41  ;;  %v3501_v25 = vpop.f32.mrf.mxu2  ;;  %v8603_v62 = vpop.f32.mrf.mxu3  ;;  %v2784_v41 = vadd.f32 %v10025_v32, %v10006_v38  ;;  %v3162_v49 = vmax.f32 %v2790_v2, 0.0  ;;  %v10028_v2 = vld [vmem:[#allocation46_spill] sm:$0xff]  ;;  %v10038_v38 = vld [vmem:[#allocation129_spill] sm:$0xff] }
 0x52e   : > { %4182 = vmatpush.msra.mxu3 %v3178_v26  ;;  %v3502_v59 = vadd.f32 %v3501_v25, %v3461_v27  ;;  %v5319_v26 = vld [vmem:[%s5668_s19 + $0x80] sm:$0xff]  ;;  %v3026_v25 = vmax.f32 %v2739_v58, 0.0  ;;  %v2730_v32 = vadd.f32 %v10029_v15, %v10028_v2  ;;  %v10032_v58 = vld [vmem:[#allocation137_spill] sm:$0xff] }
 0x52f   : > { %5201 = vmatmul.msk.f32.gmra.mxu3 %vm595_vm0, %v8099_v42  ;;  %4066 = vmatpush.msra.mxu0 %v3121_v35  ;;  %v10027_v42 = vld [vmem:[#allocation141_spill] sm:$0xff]  ;;  %v3154_v35 = vmax.f32 %v2787_v21, 0.0  ;;  %v3146_v43 = vmax.f32 %v2784_v41, 0.0  ;;  %v3464_v21 = vadd.f32 %v8545_v52, %v3423_v18 }
 0x530   : > { %4142 = vmatpush.msra.mxu2 %v3042_v3  ;;  %4183 = vmatpush.msra.mxu3 %v3170_v46  ;;  %v4396_v27 = vadd.f32 %v5319_v26, %v3502_v59  ;;  %v2781_v1 = vadd.f32 %v10027_v42, %v10010_v7  ;;  %v10031_v3 = vld [vmem:[#allocation70_spill] sm:$0xff]  ;;  %v2778_v26 = vadd.f32 %v10032_v58, %v9865_v8  ;;  %v10035_v41 = vld [vmem:[#allocation133_spill] sm:$0xff]  ;;  %v10036_v58 = vld [vmem:[#allocation55_spill] sm:$0xff]  ;;  %v3002_v7 = vmax.f32 %v2730_v32, 0.0 }
 0x531   : > { %4067 = vmatpush.msra.mxu0 %v3113_v11  ;;  %v3018_v11 = vmax.f32 %v2736_v53, 0.0  ;;  %v8636_v42 = vld [vmem:[%s9454_s7 + $0x50] sm:$0xff]  ;;  %v2775_v52 = vadd.f32 %v10035_v41, %v9867_v10  ;;  %v10039_v32 = vld [vmem:[#allocation89_spill] sm:$0xff] }
 0x532   : > { %4143 = vmatpush.msra.mxu2 %v3034_v47  ;;  %4184 = vmatpush.msra.mxu3 %v3162_v49  ;;  %4460 = vst [vmem:[%s8524_s30 + $0x80] sm:$0xff] %v4396_v27  ;;  %v10033_v47 = vld [vmem:[#allocation52_spill] sm:$0xff]  ;;  %v3138_v18 = vmax.f32 %v2781_v1, 0.0  ;;  %v3130_v22 = vmax.f32 %v2778_v26, 0.0 }
 0x533   : > { %5195 = vmatmul.msk.f32.gmra.mxu0 %vm595_vm0, %v10030_v56  ;;  %3793 = vmatmul.f32.gmra.mxu1 %v10031_v3  ;;  %v3428_v46 = vpop.f32.mrf.mxu0  ;;  %v3469_v59 = vpop.f32.mrf.mxu1  ;;  %v10034_v49 = vld [vmem:[#allocation16_spill] sm:$0xff]  ;;  %v3010_v3 = vmax.f32 %v2733_v31, 0.0  ;;  %v2772_v31 = vadd.f32 %v10038_v38, %v9871_v54 }
 0x534   : > { %4144 = vmatpush.msra.mxu2 %v3026_v25  ;;  %4185 = vmatpush.msra.mxu3 %v3154_v35  ;;  %v2727_v27 = vadd.f32 %v10034_v49, %v10033_v47  ;;  %v8643_v35 = vpop.permute.xlu0 %3354  ;;  %v10037_v49 = vld [vmem:[#allocation47_spill] sm:$0xff] }
 0x535   : > { %3831 = vmatmul.f32.gmra.mxu2 %v8636_v42  ;;  %v3504_v15 = vpop.f32.mrf.mxu2  ;;  %v8639_v53 = vpop.f32.mrf.mxu3  ;;  %v2724_v8 = vadd.f32 %v10037_v49, %v10036_v58  ;;  %v3426_v1 = vadd.f32 %v8588_v37, %v8643_v35  ;;  %v3114_v49 = vmax.f32 %v2772_v31, 0.0  ;;  %v10042_v31 = vld [vmem:[#allocation88_spill] sm:$0xff] }
 0x536   : > { %4145 = vmatpush.msra.mxu2 %v3018_v11  ;;  %4186 = vmatpush.msra.mxu3 %v3146_v43  ;;  %v3505_v25 = vadd.f32 %v3504_v15, %v3464_v21  ;;  %v5321_v11 = vld [vmem:[%s5668_s19 + $0xc0] sm:$0xff]  ;;  %v2994_v21 = vmax.f32 %v2727_v27, 0.0  ;;  %v3122_v15 = vmax.f32 %v2775_v52, 0.0 }
 0x537   : > { %5202 = vmatmul.msk.f32.gmra.mxu3 %vm595_vm0, %v8135_v0  ;;  %v10040_v0 = vld [vmem:[#allocation5_spill] sm:$0xff]  ;;  %v2986_v26 = vmax.f32 %v2724_v8, 0.0  ;;  %v3467_v37 = vadd.f32 %v8590_v20, %v3426_v1  ;;  %v8667_v8 = vpop.permute.xlu1 %3359  ;;  %v5323_v52 = vld [vmem:[%s5668_s19 + $0x100] sm:$0xff] }
 0x538   : > { %4146 = vmatpush.msra.mxu2 %v3010_v3  ;;  %4187 = vmatpush.msra.mxu3 %v3138_v18  ;;  %v4404_v43 = vadd.f32 %v5321_v11, %v3505_v25  ;;  %v3429_v20 = vadd.f32 %v3428_v46, %v8667_v8  ;;  %v10041_v25 = vld [vmem:[#allocation156_spill] sm:$0xff] }
 0x53a   : > { %4147 = vmatpush.msra.mxu2 %v3002_v7  ;;  %4188 = vmatpush.msra.mxu3 %v3130_v22  ;;  %4468 = vst [vmem:[%s8524_s30 + $0xc0] sm:$0xff] %v4404_v43  ;;  %v8662_v22 = vld [vmem:[%s9454_s7 + $0x68] sm:$0xff]  ;;  %v3470_v43 = vadd.f32 %v3469_v59, %v3429_v20 }
 0x53b   : > { %5196 = vmatmul.msk.f32.gmra.mxu0 %vm595_vm0, %v10039_v32  ;;  %3796 = vmatmul.f32.gmra.mxu1 %v10040_v0  ;;  %v3431_v41 = vpop.f32.mrf.mxu0  ;;  %v3472_v38 = vpop.f32.mrf.mxu1 }
 0x53c   : > { %4148 = vmatpush.msra.mxu2 %v2994_v21  ;;  %4189 = vmatpush.msra.mxu3 %v3122_v15  ;;  %v8680_v21 = vld [vmem:[%s9454_s7 + $0x80] sm:$0xff]  ;;  %v8685_v0 = vpop.permute.xlu2 %3364 }
 0x53d   : > { %3834 = vmatmul.f32.gmra.mxu2 %v8662_v22  ;;  %v3507_v7 = vpop.f32.mrf.mxu2  ;;  %v8665_v27 = vpop.f32.mrf.mxu3  ;;  %10043 = vst [vmem:[#allocation39_spill] sm:$0xff] %v8680_v21 }
 0x53e   : > { %4149 = vmatpush.msra.mxu2 %v2986_v26  ;;  %4190 = vmatpush.msra.mxu3 %v3114_v49  ;;  %v3508_v3 = vadd.f32 %v3507_v7, %v3467_v37  ;;  %v3432_v26 = vadd.f32 %v3431_v41, %v8685_v0  ;;  %v5325_v49 = vld [vmem:[%s5668_s19 + $0x140] sm:$0xff]  ;;  %v3537_v37 = vadd.f32 %v8496_v50, %v8461_v57  ;;  %v10044_v7 = vld [vmem:[#allocation111_spill] sm:$0xff] }
 0x53f   : > { %5203 = vmatmul.msk.f32.gmra.mxu3 %vm595_vm0, %v10030_v56 }
 0x540   : > { %v4412_v18 = vadd.f32 %v5323_v52, %v3508_v3  ;;  %v3473_v52 = vadd.f32 %v3472_v38, %v3432_v26  ;;  %v10049_v26 = vld [vmem:[#allocation122_spill] sm:$0xff] }
 0x542   : > { %4476 = vst [vmem:[%s8524_s30 + $0x100] sm:$0xff] %v4412_v18 }
 0x543   : > { %5197 = vmatmul.msk.f32.gmra.mxu0 %vm595_vm0, %v10041_v25  ;;  %3799 = vmatmul.f32.gmra.mxu1 %v10042_v31  ;;  %v3434_v1 = vpop.f32.mrf.mxu0  ;;  %v3475_v11 = vpop.f32.mrf.mxu1  ;;  %v10046_v25 = vld [vmem:[#allocation126_spill] sm:$0xff] }
 0x544   : > { %v2906_v31 = vadd.f32 %v10046_v25, %v9691_v36  ;;  %v10051_v36 = vld [vmem:[#allocation21_spill] sm:$0xff]  ;;  %v10053_v25 = vld [vmem:[#allocation72_spill] sm:$0xff] }
 0x545   : > { %3837 = vmatmul.f32.gmra.mxu2 %v8680_v21  ;;  %v3510_v56 = vpop.f32.mrf.mxu2  ;;  %v8683_v46 = vpop.f32.mrf.mxu3 }
 0x546   : > { %v3511_v15 = vadd.f32 %v3510_v56, %v3470_v43 }
 0x547   : > { %5204 = vmatmul.msk.f32.gmra.mxu3 %vm595_vm0, %v10039_v32  ;;  %v8700_v32 = vld [vmem:[%s9454_s7 + $0x98] sm:$0xff] }
 0x548   : > { %v4420_v59 = vadd.f32 %v5325_v49, %v3511_v15  ;;  %10045 = vst [vmem:[#allocation92_spill] sm:$0xff] %v8700_v32  ;;  %v8709_v15 = vpop.permute.xlu0 %3369  ;;  %v2903_v49 = vadd.f32 %v10049_v26, %v9893_v60  ;;  %v10052_v60 = vld [vmem:[#allocation118_spill] sm:$0xff]  ;;  %v10054_v26 = vld [vmem:[#allocation104_spill] sm:$0xff] }
 0x549   : > { %10048 = vst [vmem:[#allocation131_spill] sm:$0xff] %v8709_v15  ;;  %v2835_v57 = vadd.f32 %v10054_v26, %v10053_v25 }
 0x54a   : > { %4484 = vst [vmem:[%s8524_s30 + $0x140] sm:$0xff] %v4420_v59  ;;  %v8716_v59 = vld [vmem:[%s9454_s7 + $0xa0] sm:$0xff] }
 0x54b   : > { %5198 = vmatmul.msk.f32.gmra.mxu0 %vm595_vm0, %v10044_v7  ;;  %3802 = vmatmul.f32.gmra.mxu1 %v9981_v12  ;;  %v3577_v3 = vpop.f32.mrf.mxu0  ;;  %v3618_v20 = vpop.f32.mrf.mxu1  ;;  %v10047_v12 = vld [vmem:[#allocation67_spill] sm:$0xff]  ;;  %10050 = vst [vmem:[#allocation32_spill] sm:$0xff] %v8716_v59  ;;  %v5328_v7 = vld [vmem:[%s5668_s19 + $0x8] sm:$0xff] }
 0x54c   : > { %v3578_v18 = vadd.f32 %v3577_v3, %v3537_v37  ;;  %v2841_v43 = vadd.f32 %v8455_v13, %v10047_v12  ;;  %v2838_v13 = vadd.f32 %v10051_v36, %v9956_v16  ;;  %v3435_v37 = vadd.f32 %v3434_v1, %v8709_v15  ;;  %v10055_v36 = vld [vmem:[#allocation114_spill] sm:$0xff] }
 0x54d   : > { %3840 = vmatmul.f32.gmra.mxu2 %v8700_v32  ;;  %v3513_v50 = vpop.f32.mrf.mxu2  ;;  %v8703_v41 = vpop.f32.mrf.mxu3  ;;  %v2897_v21 = vadd.f32 %v10055_v36, %v9699_v28  ;;  %v3099_v1 = vmax.f32 %v2903_v49, 0.0  ;;  %v10058_v49 = vld [vmem:[#allocation110_spill] sm:$0xff] }
 0x54e   : > { %v3619_v38 = vadd.f32 %v3618_v20, %v3578_v18  ;;  %v3514_v56 = vadd.f32 %v3513_v50, %v3473_v52  ;;  %v5329_v20 = vld [vmem:[%s5668_s19 + $0x180] sm:$0xff]  ;;  %v2900_v18 = vadd.f32 %v10052_v60, %v9992_v24  ;;  %v3107_v50 = vmax.f32 %v2906_v31, 0.0  ;;  %v8749_v60 = vld [vmem:[%s9454_s7 + $0xb0] sm:$0xff] }
 0x54f   : > { %5205 = vmatmul.msk.f32.gmra.mxu3 %vm595_vm0, %v8716_v59  ;;  %v3298_v32 = vmax.f32 %v2841_v43, 0.0  ;;  %v3540_v59 = vadd.f32 %v8555_v33, %v8513_v6  ;;  %v10056_v43 = vld [vmem:[#allocation76_spill] sm:$0xff]  ;;  %10059 = vst [vmem:[#allocation6_spill] sm:$0xff] %v8749_v60 }
 0x550   : > { %v4381_v3 = vadd.f32 %v5328_v7, %v3619_v38  ;;  %v4428_v52 = vadd.f32 %v5329_v20, %v3514_v56  ;;  %v8738_v38 = vld [vmem:[%s9454_s7] sm:$0xff]  ;;  %v10057_v56 = vld [vmem:[#allocation147_spill] sm:$0xff]  ;;  %v3290_v7 = vmax.f32 %v2838_v13, 0.0  ;;  %v2894_v20 = vadd.f32 %v10058_v49, %v9701_v61  ;;  %v10065_v49 = vld [vmem:[#allocation82_spill] sm:$0xff] }
 0x551   : > { %v2832_v33 = vadd.f32 %v10057_v56, %v10056_v43  ;;  %v10061_v13 = vld [vmem:[#allocation79_spill] sm:$0xff] }
 0x552   : > { %4445 = vst [vmem:[%s8524_s30 + $0x8] sm:$0xff] %v4381_v3  ;;  %v3476_v3 = vadd.f32 %v3475_v11, %v3435_v37  ;;  %v10062_v11 = vld [vmem:[#allocation38_spill] sm:$0xff]  ;;  %v8761_v56 = vld [vmem:[%s9454_s7 + $0xb8] sm:$0xff]  ;;  %v3075_v6 = vmax.f32 %v2894_v20, 0.0 }
 0x553   : > { %4492 = vst [vmem:[%s8524_s30 + $0x180] sm:$0xff] %v4428_v52  ;;  %3904 = vmatmul.f32.vlgmr.msrb.gmra.mxu0 %v8738_v38  ;;  %3945 = vmatmul.f32.vlgmr.msrb.gmra.mxu1 %v8505_v5  ;;  %v3580_v24 = vpop.f32.mrf.mxu0  ;;  %v3621_v31 = vpop.f32.mrf.mxu1  ;;  %v3091_v52 = vmax.f32 %v2900_v18, 0.0  ;;  %v10063_v18 = vld [vmem:[#allocation106_spill] sm:$0xff]  ;;  %v8788_v20 = vld [vmem:[%s9454_s7 + $0x18] sm:$0xff] }
 0x554   : > { %4224 = vmatpush.msrb.mxu0 %v3298_v32  ;;  %4257 = vmatpush.msrb.mxu1 %v3107_v50  ;;  %v3581_v28 = vadd.f32 %v3580_v24, %v3540_v59  ;;  %v2829_v32 = vadd.f32 %v10062_v11, %v10061_v13  ;;  %v3282_v59 = vmax.f32 %v2835_v57, 0.0  ;;  %v2891_v50 = vadd.f32 %v10063_v18, %v9705_v17  ;;  %v10066_v11 = vld [vmem:[#allocation51_spill] sm:$0xff]  ;;  %v5334_v17 = vld [vmem:[%s5668_s19 + $0x1c0] sm:$0xff] }
 0x555   : > { %3843 = vmatmul.f32.gmra.mxu2 %v8749_v60  ;;  %v3516_v26 = vpop.f32.mrf.mxu2  ;;  %v8752_v36 = vpop.f32.mrf.mxu3  ;;  %v3083_v24 = vmax.f32 %v2897_v21, 0.0  ;;  %10064 = vst [vmem:[#allocation56_spill] sm:$0xff] %v8761_v56  ;;  %v2826_v57 = vadd.f32 %v10066_v11, %v10065_v49  ;;  %v10069_v18 = vld [vmem:[#allocation99_spill] sm:$0xff]  ;;  %v10070_v60 = vld [vmem:[#allocation85_spill] sm:$0xff]  ;;  %v10075_v11 = vld [vmem:[#allocation100_spill] sm:$0xff] }
 0x556   : > { %10060 = vst [vmem:[#allocation127_spill] sm:$0xff] %v8752_v36  ;;  %4225 = vmatpush.msrb.mxu0 %v3290_v7  ;;  %4258 = vmatpush.msrb.mxu1 %v3099_v1  ;;  %v3622_v61 = vadd.f32 %v3621_v31, %v3581_v28  ;;  %v3517_v37 = vadd.f32 %v3516_v26, %v3476_v3  ;;  %v3274_v7 = vmax.f32 %v2832_v33, 0.0  ;;  %v5333_v1 = vld [vmem:[%s5668_s19 + $0x48] sm:$0xff]  ;;  %v10067_v3 = vld [vmem:[#allocation102_spill] sm:$0xff]  ;;  %v3266_v15 = vmax.f32 %v2829_v32, 0.0 }
 0x557   : > { %5206 = vmatmul.msk.f32.gmra.mxu3 %vm595_vm0, %v8761_v56  ;;  %v2888_v28 = vadd.f32 %v10067_v3, %v9709_v14  ;;  %v10068_v26 = vld [vmem:[#allocation34_spill] sm:$0xff]  ;;  %v10071_v56 = vld [vmem:[#allocation116_spill] sm:$0xff]  ;;  %v3543_v33 = vadd.f32 %v8603_v62, %v8565_v51  ;;  %v3067_v32 = vmax.f32 %v2891_v50, 0.0 }
 0x558   : > { %4226 = vmatpush.msrb.mxu0 %v3282_v59  ;;  %4259 = vmatpush.msrb.mxu1 %v3091_v52  ;;  %v4389_v31 = vadd.f32 %v5333_v1, %v3622_v61  ;;  %v4436_v21 = vadd.f32 %v5334_v17, %v3517_v37  ;;  %v2954_v5 = vadd.f32 %v10069_v18, %v10068_v26  ;;  %v10072_v52 = vld [vmem:[#allocation98_spill] sm:$0xff]  ;;  %v10073_v61 = vld [vmem:[#allocation11_spill] sm:$0xff]  ;;  %v10074_v37 = vld [vmem:[#allocation8_spill] sm:$0xff] }
 0x559   : > { %v2823_v36 = vadd.f32 %v10071_v56, %v10070_v60  ;;  %v2885_v59 = vadd.f32 %v10072_v52, %v9711_v30  ;;  %v2951_v14 = vadd.f32 %v10074_v37, %v10073_v61  ;;  %v2978_v1 = vadd.f32 %v10075_v11, %v10047_v12  ;;  %v10077_v30 = vld [vmem:[#allocation95_spill] sm:$0xff]  ;;  %v8799_v26 = vld [vmem:[%s9454_s7 + $0x10] sm:$0xff] }
 0x55a   : > { %4453 = vst [vmem:[%s8524_s30 + $0x48] sm:$0xff] %v4389_v31  ;;  %4227 = vmatpush.msrb.mxu0 %v3274_v7  ;;  %4260 = vmatpush.msrb.mxu1 %v3083_v24  ;;  %v10076_v24 = vld [vmem:[#allocation87_spill] sm:$0xff]  ;;  %v3258_v7 = vmax.f32 %v2826_v57, 0.0  ;;  %v3235_v17 = vmax.f32 %v2954_v5, 0.0 }
 0x55b   : > { %4500 = vst [vmem:[%s8524_s30 + $0x1c0] sm:$0xff] %v4436_v21  ;;  %3907 = vmatmul.f32.gmra.mxu0 %v8788_v20  ;;  %3948 = vmatmul.f32.gmra.mxu1 %v8552_v39  ;;  %v3583_v62 = vpop.f32.mrf.mxu0  ;;  %v2820_v56 = vadd.f32 %v10077_v30, %v10076_v24  ;;  %v10078_v21 = vld [vmem:[#allocation139_spill] sm:$0xff]  ;;  %v3250_v5 = vmax.f32 %v2823_v36, 0.0  ;;  %v3227_v61 = vmax.f32 %v2951_v14, 0.0 }
 0x55c   : > { %4228 = vmatpush.msrb.mxu0 %v3266_v15  ;;  %4261 = vmatpush.msrb.mxu1 %v3075_v6  ;;  %v3584_v31 = vadd.f32 %v3583_v62, %v3543_v33  ;;  %v3624_v12 = vpop.f32.mrf.mxu1  ;;  %v2975_v3 = vadd.f32 %v10078_v21, %v9956_v16  ;;  %v3059_v15 = vmax.f32 %v2888_v28, 0.0  ;;  %v10079_v6 = vld [vmem:[#allocation153_spill] sm:$0xff]  ;;  %v10080_v33 = vld [vmem:[#allocation94_spill] sm:$0xff]  ;;  %v10081_v37 = vld [vmem:[#allocation143_spill] sm:$0xff]  ;;  %v3299_v62 = vmax.f32 %v2978_v1, 0.0 }
 0x55d   : > { %5207 = vmatmul.msk.f32.vlgmr.msrb.gmra.mxu2 %vm595_vm0, %v8799_v26  ;;  %v8803_v50 = vpop.f32.mrf.mxu2  ;;  %v8805_v18 = vpop.f32.mrf.mxu3  ;;  %v2948_v57 = vadd.f32 %v10079_v6, %v6956_v29  ;;  %v2882_v52 = vadd.f32 %v10080_v33, %v9713_v23  ;;  %v2972_v11 = vadd.f32 %v10081_v37, %v10053_v25  ;;  %v3051_v28 = vmax.f32 %v2885_v59, 0.0  ;;  %v10082_v29 = vld [vmem:[#allocation59_spill] sm:$0xff]  ;;  %v10083_v23 = vld [vmem:[#allocation90_spill] sm:$0xff]  ;;  %v10090_v33 = vld [vmem:[#allocation13_spill] sm:$0xff] }
 0x55e   : > { %4229 = vmatpush.msrb.mxu0 %v3258_v7  ;;  %4262 = vmatpush.msrb.mxu1 %v3067_v32  ;;  %v3625_v16 = vadd.f32 %v3624_v12, %v3584_v31  ;;  %v2945_v30 = vadd.f32 %v10082_v29, %v6965_v4  ;;  %v3242_v36 = vmax.f32 %v2820_v56, 0.0  ;;  %v5337_v32 = vld [vmem:[%s5668_s19 + $0x88] sm:$0xff]  ;;  %v2879_v14 = vadd.f32 %v10083_v23, %v9717_v34  ;;  %v10084_v31 = vld [vmem:[#allocation27_spill] sm:$0xff]  ;;  %v10085_v12 = vld [vmem:[#allocation12_spill] sm:$0xff] }
 0x55f   : > { %4027 = vmatmul.f32.vlgmr.msrb.gmra.mxu3 %v8738_v38  ;;  %4298 = vmatpush.msrb.mxu2 %v3235_v17  ;;  %v2969_v25 = vadd.f32 %v10084_v31, %v10056_v43  ;;  %v3291_v1 = vmax.f32 %v2975_v3, 0.0  ;;  %v2876_v59 = vadd.f32 %v10085_v12, %v9721_v44  ;;  %v3219_v17 = vmax.f32 %v2948_v57, 0.0  ;;  %v10086_v56 = vld [vmem:[#allocation68_spill] sm:$0xff]  ;;  %v8831_v43 = vld [vmem:[%s9454_s7 + $0x30] sm:$0xff]  ;;  %v10087_v44 = vld [vmem:[#allocation17_spill] sm:$0xff] }
 0x560   : > { %4230 = vmatpush.msrb.mxu0 %v3250_v5  ;;  %4263 = vmatpush.msrb.mxu1 %v3059_v15  ;;  %v4397_v7 = vadd.f32 %v5337_v32, %v3625_v16  ;;  %v3043_v4 = vmax.f32 %v2882_v52, 0.0  ;;  %v2942_v21 = vadd.f32 %v10086_v56, %v6841_v45  ;;  %v3283_v15 = vmax.f32 %v2972_v11, 0.0  ;;  %v10088_v57 = vld [vmem:[#allocation108_spill] sm:$0xff]  ;;  %v8856_v12 = vld [vmem:[%s9454_s7 + $0x28] sm:$0xff] }
 0x561   : > { %4347 = vmatpush.msrb.mxu3 %v3299_v62  ;;  %4299 = vmatpush.msrb.mxu2 %v3227_v61  ;;  %v3546_v34 = vadd.f32 %v8639_v53, %v8607_v19  ;;  %v2873_v3 = vadd.f32 %v10087_v44, %v9723_v55  ;;  %v3211_v6 = vmax.f32 %v2945_v30, 0.0  ;;  %v2966_v5 = vadd.f32 %v10088_v57, %v10061_v13  ;;  %v10089_v16 = vld [vmem:[#allocation64_spill] sm:$0xff]  ;;  %v10092_v30 = vld [vmem:[#allocation66_spill] sm:$0xff]  ;;  %v10099_v57 = vld [vmem:[#allocation35_spill] sm:$0xff] }
 0x562   : > { %4461 = vst [vmem:[%s8524_s30 + $0x88] sm:$0xff] %v4397_v7  ;;  %4231 = vmatpush.msrb.mxu0 %v3242_v36  ;;  %4264 = vmatpush.msrb.mxu1 %v3051_v28  ;;  %v3035_v53 = vmax.f32 %v2879_v14, 0.0  ;;  %v2939_v52 = vadd.f32 %v10090_v33, %v10089_v16  ;;  %v3275_v61 = vmax.f32 %v2969_v25, 0.0  ;;  %v10091_v62 = vld [vmem:[#allocation112_spill] sm:$0xff]  ;;  %v3027_v29 = vmax.f32 %v2876_v59, 0.0  ;;  %v10093_v36 = vld [vmem:[#allocation15_spill] sm:$0xff] }
 0x563   : > { %4348 = vmatpush.msrb.mxu3 %v3291_v1  ;;  %3910 = vmatmul.f32.gmra.mxu0 %v8831_v43  ;;  %v2963_v55 = vadd.f32 %v10091_v62, %v10065_v49  ;;  %v2936_v32 = vadd.f32 %v10093_v36, %v10092_v30  ;;  %v3203_v7 = vmax.f32 %v2942_v21, 0.0  ;;  %v10094_v14 = vld [vmem:[#allocation22_spill] sm:$0xff]  ;;  %v10095_v25 = vld [vmem:[#allocation9_spill] sm:$0xff]  ;;  %v3267_v1 = vmax.f32 %v2966_v5, 0.0  ;;  %v10097_v21 = vld [vmem:[#allocation28_spill] sm:$0xff] }
 0x564   : > { %3951 = vmatmul.f32.gmra.mxu1 %v8598_v63  ;;  %4300 = vmatpush.msrb.mxu2 %v3219_v17  ;;  %v3586_v45 = vpop.f32.mrf.mxu0  ;;  %v2870_v31 = vadd.f32 %v10094_v14, %v9725_v48  ;;  %v2960_v49 = vadd.f32 %v10095_v25, %v10070_v60  ;;  %v3019_v59 = vmax.f32 %v2873_v3, 0.0  ;;  %v10096_v17 = vld [vmem:[#allocation23_spill] sm:$0xff]  ;;  %v3195_v48 = vmax.f32 %v2939_v52, 0.0  ;;  %v5340_v60 = vld [vmem:[%s5668_s19 + $0xc8] sm:$0xff]  ;;  %v8895_v25 = vld [vmem:[%s9454_s7 + $0x40] sm:$0xff] }
 0x565   : > { %4265 = vmatpush.msrb.mxu1 %v3043_v4  ;;  %4349 = vmatpush.msrb.mxu3 %v3283_v15  ;;  %v3587_v37 = vadd.f32 %v3586_v45, %v3546_v34  ;;  %v3627_v11 = vpop.f32.mrf.mxu1  ;;  %v2933_v4 = vadd.f32 %v10096_v17, %v7195_v40  ;;  %v2867_v15 = vadd.f32 %v10097_v21, %v10028_v2  ;;  %v10098_v34 = vld [vmem:[#allocation91_spill] sm:$0xff]  ;;  %v3187_v3 = vmax.f32 %v2936_v32, 0.0  ;;  %v10104_v32 = vld [vmem:[#allocation78_spill] sm:$0xff] }
 0x566   : > { %4301 = vmatpush.msrb.mxu2 %v3211_v6  ;;  %v8843_v28 = vpop.f32.mrf.mxu2  ;;  %v8845_v13 = vpop.f32.mrf.mxu3  ;;  %v2957_v44 = vadd.f32 %v10098_v34, %v10076_v24  ;;  %v3259_v6 = vmax.f32 %v2963_v55, 0.0  ;;  %v2864_v5 = vadd.f32 %v10099_v57, %v10033_v47  ;;  %v3011_v40 = vmax.f32 %v2870_v31, 0.0  ;;  %v10100_v45 = vld [vmem:[#allocation31_spill] sm:$0xff]  ;;  %v8878_v24 = vld [vmem:[%s9454_s7 + $0x48] sm:$0xff]  ;;  %v10109_v21 = vld [vmem:[#allocation142_spill] sm:$0xff] }
 0x567   : > { %4266 = vmatpush.msrb.mxu1 %v3035_v53  ;;  %4350 = vmatpush.msrb.mxu3 %v3275_v61  ;;  %v3628_v23 = vadd.f32 %v3627_v11, %v3587_v37  ;;  %v2930_v53 = vadd.f32 %v10100_v45, %v9994_v9  ;;  %v3251_v16 = vmax.f32 %v2960_v49, 0.0  ;;  %v3549_v2 = vadd.f32 %v8665_v27, %v8643_v35  ;;  %v10101_v47 = vld [vmem:[#allocation43_spill] sm:$0xff]  ;;  %v10102_v37 = vld [vmem:[#allocation74_spill] sm:$0xff]  ;;  %v10103_v11 = vld [vmem:[#allocation44_spill] sm:$0xff] }
 0x568   : > { %5208 = vmatmul.msk.f32.gmra.mxu2 %vm595_vm0, %v8856_v12  ;;  %4030 = vmatmul.f32.gmra.mxu3 %v8788_v20  ;;  %v2861_v33 = vadd.f32 %v10101_v47, %v10036_v58  ;;  %v3179_v52 = vmax.f32 %v2933_v4, 0.0  ;;  %v3003_v61 = vmax.f32 %v2867_v15, 0.0  ;;  %v2927_v27 = vadd.f32 %v10103_v11, %v10102_v37  ;;  %v10113_v37 = vld [vmem:[#allocation130_spill] sm:$0xff] }
 0x569   : > { %4267 = vmatpush.msrb.mxu1 %v3027_v29  ;;  %4302 = vmatpush.msrb.mxu2 %v3203_v7  ;;  %v4405_v56 = vadd.f32 %v5340_v60, %v3628_v23  ;;  %v3243_v62 = vmax.f32 %v2957_v44, 0.0  ;;  %v2995_v58 = vmax.f32 %v2864_v5, 0.0  ;;  %v10105_v7 = vld [vmem:[#allocation150_spill] sm:$0xff]  ;;  %v3171_v14 = vmax.f32 %v2930_v53, 0.0 }
 0x56a   : > { %4351 = vmatpush.msrb.mxu3 %v3267_v1  ;;  %v2924_v23 = vadd.f32 %v10105_v7, %v10104_v32  ;;  %v2987_v49 = vmax.f32 %v2861_v33, 0.0  ;;  %v10106_v1 = vld [vmem:[#allocation81_spill] sm:$0xff]  ;;  %v3163_v4 = vmax.f32 %v2927_v27, 0.0  ;;  %v3552_v44 = vadd.f32 %v8683_v46, %v8667_v8  ;;  %v10110_v5 = vld [vmem:[#allocation86_spill] sm:$0xff]  ;;  %v10114_v32 = vld [vmem:[#allocation39_spill] sm:$0xff] }
 0x56b   : > { %4469 = vst [vmem:[%s8524_s30 + $0xc8] sm:$0xff] %v4405_v56  ;;  %4268 = vmatpush.msrb.mxu1 %v3019_v59  ;;  %4303 = vmatpush.msrb.mxu2 %v3195_v48  ;;  %v10107_v59 = vld [vmem:[#allocation146_spill] sm:$0xff]  ;;  %v5343_v48 = vld [vmem:[%s5668_s19 + $0x108] sm:$0xff]  ;;  %v10108_v56 = vld [vmem:[#allocation84_spill] sm:$0xff]  ;;  %v2909_v11 = vadd.f32 %v10113_v37, %v9871_v54 }
 0x56c   : > { %4352 = vmatpush.msrb.mxu3 %v3259_v6  ;;  %3913 = vmatmul.f32.gmra.mxu0 %v8878_v24  ;;  %v2921_v17 = vadd.f32 %v10107_v59, %v10106_v1  ;;  %v2918_v15 = vadd.f32 %v10109_v21, %v10108_v56  ;;  %v3155_v34 = vmax.f32 %v2924_v23, 0.0  ;;  %v8911_v6 = vld [vmem:[%s9454_s7 + $0x60] sm:$0xff]  ;;  %v8951_v1 = vld [vmem:[%s9454_s7 + $0x70] sm:$0xff]  ;;  %v5349_v59 = vld [vmem:[%s5668_s19 + $0x188] sm:$0xff] }
 0x56d   : > { %3954 = vmatmul.f32.gmra.mxu1 %v8636_v42  ;;  %4304 = vmatpush.msrb.mxu2 %v3187_v3  ;;  %v3589_v9 = vpop.f32.mrf.mxu0  ;;  %v10111_v3 = vld [vmem:[#allocation138_spill] sm:$0xff]  ;;  %v3115_v7 = vmax.f32 %v2909_v11, 0.0  ;;  %v10117_v21 = vld [vmem:[#allocation92_spill] sm:$0xff] }
 0x56e   : > { %4269 = vmatpush.msrb.mxu1 %v3011_v40  ;;  %4353 = vmatpush.msrb.mxu3 %v3251_v16  ;;  %v3590_v55 = vadd.f32 %v3589_v9, %v3549_v2  ;;  %v3630_v29 = vpop.f32.mrf.mxu1  ;;  %v2915_v40 = vadd.f32 %v10111_v3, %v10110_v5  ;;  %v3147_v45 = vmax.f32 %v2921_v17, 0.0  ;;  %v10112_v2 = vld [vmem:[#allocation134_spill] sm:$0xff]  ;;  %v3139_v33 = vmax.f32 %v2918_v15, 0.0  ;;  %v10118_v5 = vld [vmem:[#allocation45_spill] sm:$0xff] }
 0x56f   : > { %4305 = vmatpush.msrb.mxu2 %v3179_v52  ;;  %v8886_v30 = vpop.f32.mrf.mxu2  ;;  %v8888_v36 = vpop.f32.mrf.mxu3  ;;  %v2912_v47 = vadd.f32 %v10112_v2, %v9867_v10  ;;  %v5346_v10 = vld [vmem:[%s5668_s19 + $0x148] sm:$0xff]  ;;  %v8963_v56 = vld [vmem:[%s9454_s7 + $0x90] sm:$0xff]  ;;  %v3660_v3 = vadd.f32 %v8803_v50, %v10118_v5 }
 0x570   : > { %4270 = vmatpush.msrb.mxu1 %v3003_v61  ;;  %4354 = vmatpush.msrb.mxu3 %v3243_v62  ;;  %v3631_v31 = vadd.f32 %v3630_v29, %v3590_v55  ;;  %v8926_v61 = vld [vmem:[%s9454_s7 + $0x58] sm:$0xff]  ;;  %v3131_v27 = vmax.f32 %v2915_v40, 0.0  ;;  %v3555_v29 = vadd.f32 %v8703_v41, %v8685_v0  ;;  %v8987_v50 = vld [vmem:[%s9454_s7 + $0xa8] sm:$0xff] }
 0x571   : > { %5209 = vmatmul.msk.f32.gmra.mxu2 %vm595_vm0, %v8895_v25  ;;  %4033 = vmatmul.f32.gmra.mxu3 %v8831_v43  ;;  %v3123_v55 = vmax.f32 %v2912_v47, 0.0  ;;  %v3701_v47 = vadd.f32 %v8805_v18, %v3660_v3  ;;  %v5354_v18 = vld [vmem:[%s5668_s19 + $0x10] sm:$0xff] }
 0x572   : > { %4271 = vmatpush.msrb.mxu1 %v2995_v58  ;;  %4306 = vmatpush.msrb.mxu2 %v3171_v14  ;;  %v4413_v60 = vadd.f32 %v5343_v48, %v3631_v31  ;;  %v8940_v58 = vld [vmem:[%s9454_s7 + $0x78] sm:$0xff] }
 0x573   : > { %v10116_v48 = vld [vmem:[#allocation127_spill] sm:$0xff] }
 0x574   : > { %4477 = vst [vmem:[%s8524_s30 + $0x108] sm:$0xff] %v4413_v60  ;;  %4272 = vmatpush.msrb.mxu1 %v2987_v49  ;;  %4307 = vmatpush.msrb.mxu2 %v3163_v4  ;;  %v10115_v4 = vld [vmem:[#allocation131_spill] sm:$0xff] }
 0x575   : > { %3916 = vmatmul.f32.gmra.mxu0 %v8911_v6  ;;  %3957 = vmatmul.f32.gmra.mxu1 %v8662_v22  ;;  %v3592_v57 = vpop.f32.mrf.mxu0  ;;  %v3558_v60 = vadd.f32 %v10116_v48, %v10115_v4 }
 0x576   : > { %4308 = vmatpush.msrb.mxu2 %v3155_v34  ;;  %v3593_v46 = vadd.f32 %v3592_v57, %v3552_v44  ;;  %v3633_v53 = vpop.f32.mrf.mxu1 }
 0x577   : > { %v8917_v16 = vpop.f32.mrf.mxu2 }
 0x578   : > { %4309 = vmatpush.msrb.mxu2 %v3147_v45  ;;  %v3634_v52 = vadd.f32 %v3633_v53, %v3593_v46  ;;  %v8921_v9 = vpop.f32.mrf.mxu3  ;;  %v8976_v46 = vld [vmem:[%s9454_s7 + $0x88] sm:$0xff] }
 0x579   : > { %5210 = vmatmul.msk.f32.gmra.mxu2 %vm595_vm0, %v8926_v61  ;;  %4036 = vmatmul.f32.gmra.mxu3 %v8878_v24  ;;  %v5352_v53 = vld [vmem:[%s5668_s19 + $0x1c8] sm:$0xff] }
 0x57a   : > { %4310 = vmatpush.msrb.mxu2 %v3139_v33  ;;  %v4421_v62 = vadd.f32 %v5346_v10, %v3634_v52  ;;  %v10119_v33 = vld [vmem:[#allocation6_spill] sm:$0xff]  ;;  %v10120_v10 = vld [vmem:[#allocation96_spill] sm:$0xff] }
 0x57c   : > { %4485 = vst [vmem:[%s8524_s30 + $0x148] sm:$0xff] %v4421_v62  ;;  %4311 = vmatpush.msrb.mxu2 %v3131_v27  ;;  %v3663_v62 = vadd.f32 %v8843_v28, %v10120_v10 }
 0x57d   : > { %3919 = vmatmul.f32.gmra.mxu0 %v8940_v58  ;;  %3960 = vmatmul.f32.gmra.mxu1 %v10114_v32  ;;  %v3595_v54 = vpop.f32.mrf.mxu0 }
 0x57e   : > { %4312 = vmatpush.msrb.mxu2 %v3123_v55  ;;  %v3596_v23 = vadd.f32 %v3595_v54, %v3555_v29  ;;  %v3636_v14 = vpop.f32.mrf.mxu1  ;;  %v10121_v54 = vld [vmem:[#allocation32_spill] sm:$0xff] }
 0x57f   : > { %v8944_v31 = vpop.f32.mrf.mxu2 }
 0x580   : > { %4313 = vmatpush.msrb.mxu2 %v3115_v7  ;;  %v3637_v41 = vadd.f32 %v3636_v14, %v3596_v23  ;;  %v8946_v49 = vpop.f32.mrf.mxu3  ;;  %v3704_v7 = vadd.f32 %v8845_v13, %v3663_v62  ;;  %v10122_v23 = vld [vmem:[#allocation135_spill] sm:$0xff] }
 0x581   : > { %5211 = vmatmul.msk.f32.gmra.mxu2 %vm595_vm0, %v8951_v1  ;;  %4039 = vmatmul.f32.gmra.mxu3 %v8911_v6 }
 0x582   : > { %v4429_v17 = vadd.f32 %v5349_v59, %v3637_v41 }
 0x584   : > { %4493 = vst [vmem:[%s8524_s30 + $0x188] sm:$0xff] %v4429_v17  ;;  %v5355_v17 = vld [vmem:[%s5668_s19 + $0x50] sm:$0xff] }
 0x585   : > { %3922 = vmatmul.f32.gmra.mxu0 %v8963_v56  ;;  %3963 = vmatmul.f32.gmra.mxu1 %v10117_v21  ;;  %v3598_v15 = vpop.f32.mrf.mxu0 }
 0x586   : > { %v3599_v34 = vadd.f32 %v3598_v15, %v3558_v60  ;;  %v3639_v44 = vpop.f32.mrf.mxu1  ;;  %v3666_v15 = vadd.f32 %v8886_v30, %v8565_v51 }
 0x587   : > { %v8967_v57 = vpop.f32.mrf.mxu2 }
 0x588   : > { %v3640_v40 = vadd.f32 %v3639_v44, %v3599_v34  ;;  %v8971_v45 = vpop.f32.mrf.mxu3  ;;  %v10123_v34 = vld [vmem:[#allocation56_spill] sm:$0xff]  ;;  %v3707_v13 = vadd.f32 %v8888_v36, %v3666_v15  ;;  %v5358_v15 = vld [vmem:[%s5668_s19 + $0xd0] sm:$0xff] }
 0x589   : > { %5212 = vmatmul.msk.f32.gmra.mxu2 %vm595_vm0, %v8976_v46  ;;  %4042 = vmatmul.f32.gmra.mxu3 %v8940_v58 }
 0x58a   : > { %v4437_v2 = vadd.f32 %v5352_v53, %v3640_v40 }
 0x58c   : > { %4501 = vst [vmem:[%s8524_s30 + $0x1c8] sm:$0xff] %v4437_v2 }
 0x58d   : > { %3925 = vmatmul.f32.gmra.mxu0 %v8987_v50  ;;  %3966 = vmatmul.f32.gmra.mxu1 %v10119_v33  ;;  %v3741_v52 = vpop.f32.mrf.mxu0 }
 0x58e   : > { %v3742_v37 = vadd.f32 %v3741_v52, %v3701_v47  ;;  %v3782_v11 = vpop.f32.mrf.mxu1  ;;  %v5356_v52 = vld [vmem:[%s5668_s19 + $0x90] sm:$0xff] }
 0x58f   : > { %v8991_v27 = vpop.f32.mrf.mxu2  ;;  %v3783_v44 = vadd.f32 %v3782_v11, %v10118_v5  ;;  %v5357_v11 = vld [vmem:[%s5668_s19 + $0x18] sm:$0xff] }
 0x590   : > { %v4382_v55 = vadd.f32 %v5354_v18, %v3742_v37  ;;  %v8996_v29 = vpop.f32.mrf.mxu3  ;;  %v3669_v37 = vadd.f32 %v8917_v16, %v8607_v19 }
 0x591   : > { %5213 = vmatmul.msk.f32.gmra.mxu2 %vm595_vm0, %v10121_v54  ;;  %4045 = vmatmul.f32.gmra.mxu3 %v8963_v56 }
 0x592   : > { %4446 = vst [vmem:[%s8524_s30 + $0x10] sm:$0xff] %v4382_v55  ;;  %v3710_v55 = vadd.f32 %v8921_v9, %v3669_v37  ;;  %v3672_v9 = vadd.f32 %v8944_v31, %v8643_v35  ;;  %v3675_v37 = vadd.f32 %v8967_v57, %v8667_v8 }
 0x595   : > { %4068 = vmatmul.f32.vlgmr.msra.gmra.mxu0 %v10122_v23  ;;  %5215 = vmatmul.msk.f32.vlgmr.msra.gmra.mxu1 %vm595_vm0, %v8799_v26  ;;  %v3744_v14 = vpop.f32.mrf.mxu0 }
 0x596   : > { %v3745_v28 = vadd.f32 %v3744_v14, %v3704_v7  ;;  %v3785_v41 = vpop.f32.mrf.mxu1 }
 0x597   : > { %v9006_v59 = vpop.f32.mrf.mxu2  ;;  %v3786_v7 = vadd.f32 %v3785_v41, %v10120_v10 }
 0x598   : > { %v4390_v48 = vadd.f32 %v5355_v17, %v3745_v28  ;;  %v9009_v60 = vpop.f32.mrf.mxu3 }
 0x599   : > { %5214 = vmatmul.msk.f32.gmra.mxu2 %vm595_vm0, %v10123_v34  ;;  %4048 = vmatmul.f32.gmra.mxu3 %v8987_v50 }
 0x59a   : > { %4454 = vst [vmem:[%s8524_s30 + $0x50] sm:$0xff] %v4390_v48 }
 0x59d   : > { %4071 = vmatmul.f32.gmra.mxu0 %v8552_v39  ;;  %5216 = vmatmul.msk.f32.gmra.mxu1 %vm595_vm0, %v8856_v12 }
 0x59e   : > { %v3747_v3 = vpop.f32.mrf.mxu0 }
 0x59f   : > { %v3748_v40 = vadd.f32 %v3747_v3, %v3707_v13  ;;  %v3788_v30 = vpop.f32.mrf.mxu1  ;;  %v3823_v53 = vpop.f32.mrf.mxu2  ;;  %v5359_v3 = vld [vmem:[%s5668_s19 + $0x58] sm:$0xff] }
 0x5a0   : > { %v3824_v2 = vadd.f32 %v3823_v53, %v3783_v44  ;;  %v3864_v47 = vpop.f32.mrf.mxu3 }
 0x5a1   : > { %4150 = vmatmul.f32.vlgmr.msra.gmra.mxu2 %v8738_v38  ;;  %v4398_v36 = vadd.f32 %v5356_v52, %v3748_v40  ;;  %4191 = vmatmul.f32.vlgmr.msra.gmra.mxu3 %v10122_v23  ;;  %v3789_v40 = vadd.f32 %v3788_v30, %v8565_v51  ;;  %v5361_v30 = vld [vmem:[%s5668_s19 + $0x98] sm:$0xff] }
 0x5a2   : > { %v3865_v62 = vadd.f32 %v3864_v47, %v3824_v2 }
 0x5a3   : > { %4462 = vst [vmem:[%s8524_s30 + $0x90] sm:$0xff] %v4398_v36 }
 0x5a4   : > { %v4383_v18 = vadd.f32 %v5357_v11, %v3865_v62  ;;  %v5360_v62 = vld [vmem:[%s5668_s19 + $0x110] sm:$0xff] }
 0x5a5   : > { %4074 = vmatmul.f32.gmra.mxu0 %v8598_v63  ;;  %5217 = vmatmul.msk.f32.gmra.mxu1 %vm595_vm0, %v8895_v25 }
 0x5a6   : > { %4447 = vst [vmem:[%s8524_s30 + $0x18] sm:$0xff] %v4383_v18 }
 0x5a7   : > { %v3750_v23 = vpop.f32.mrf.mxu0  ;;  %v3791_v14 = vpop.f32.mrf.mxu1 }
 0x5a8   : > { %v3751_v16 = vadd.f32 %v3750_v23, %v3710_v55  ;;  %v3826_v28 = vpop.f32.mrf.mxu2  ;;  %v3792_v55 = vadd.f32 %v3791_v14, %v8607_v19  ;;  %v5363_v14 = vld [vmem:[%s5668_s19 + $0xd8] sm:$0xff] }
 0x5a9   : > { %4153 = vmatmul.f32.gmra.mxu2 %v8788_v20  ;;  %4194 = vmatmul.f32.gmra.mxu3 %v8552_v39  ;;  %v3827_v17 = vadd.f32 %v3826_v28, %v3786_v7  ;;  %v3867_v48 = vpop.f32.mrf.mxu3  ;;  %v3713_v39 = vadd.f32 %v8946_v49, %v3672_v9 }
 0x5aa   : > { %v4406_v13 = vadd.f32 %v5358_v15, %v3751_v16  ;;  %v5362_v15 = vld [vmem:[%s5668_s19 + $0x150] sm:$0xff] }
 0x5ab   : > { %v3868_v44 = vadd.f32 %v3867_v48, %v3827_v17  ;;  %v3678_v48 = vadd.f32 %v8991_v27, %v8685_v0 }
 0x5ac   : > { %4470 = vst [vmem:[%s8524_s30 + $0xd0] sm:$0xff] %v4406_v13 }
 0x5ad   : > { %v4391_v41 = vadd.f32 %v5359_v3, %v3868_v44  ;;  %4077 = vmatmul.f32.gmra.mxu0 %v8636_v42  ;;  %5218 = vmatmul.msk.f32.gmra.mxu1 %vm595_vm0, %v8926_v61 }
 0x5af   : > { %4455 = vst [vmem:[%s8524_s30 + $0x58] sm:$0xff] %v4391_v41 }
 0x5b0   : > { %v3753_v53 = vpop.f32.mrf.mxu0  ;;  %v3794_v2 = vpop.f32.mrf.mxu1 }
 0x5b1   : > { %4156 = vmatmul.f32.gmra.mxu2 %v8831_v43  ;;  %v3754_v31 = vadd.f32 %v3753_v53, %v3713_v39  ;;  %4197 = vmatmul.f32.gmra.mxu3 %v8598_v63  ;;  %v3829_v47 = vpop.f32.mrf.mxu2  ;;  %v3716_v63 = vadd.f32 %v8971_v45, %v3675_v37  ;;  %v3795_v44 = vadd.f32 %v3794_v2, %v8643_v35  ;;  %v5365_v2 = vld [vmem:[%s5668_s19 + $0x118] sm:$0xff] }
 0x5b2   : > { %v3830_v52 = vadd.f32 %v3829_v47, %v3789_v40  ;;  %v3870_v36 = vpop.f32.mrf.mxu3  ;;  %v5364_v47 = vld [vmem:[%s5668_s19 + $0x190] sm:$0xff] }
 0x5b3   : > { %v4414_v49 = vadd.f32 %v5360_v62, %v3754_v31  ;;  %v3681_v31 = vadd.f32 %v9006_v59, %v10115_v4 }
 0x5b4   : > { %v3871_v11 = vadd.f32 %v3870_v36, %v3830_v52 }
 0x5b5   : > { %4478 = vst [vmem:[%s8524_s30 + $0x110] sm:$0xff] %v4414_v49  ;;  %4080 = vmatmul.f32.gmra.mxu0 %v8662_v22  ;;  %5219 = vmatmul.msk.f32.gmra.mxu1 %vm595_vm0, %v8951_v1  ;;  %v3722_v37 = vadd.f32 %v9009_v60, %v3681_v31  ;;  %v5367_v60 = vld [vmem:[%s5668_s19 + $0x158] sm:$0xff] }
 0x5b6   : > { %v4399_v18 = vadd.f32 %v5361_v30, %v3871_v11 }
 0x5b8   : > { %4463 = vst [vmem:[%s8524_s30 + $0x98] sm:$0xff] %v4399_v18  ;;  %v3756_v57 = vpop.f32.mrf.mxu0  ;;  %v3797_v7 = vpop.f32.mrf.mxu1 }
 0x5b9   : > { %4159 = vmatmul.f32.gmra.mxu2 %v8878_v24  ;;  %v3757_v23 = vadd.f32 %v3756_v57, %v3716_v63  ;;  %4200 = vmatmul.f32.gmra.mxu3 %v8636_v42  ;;  %v3832_v16 = vpop.f32.mrf.mxu2  ;;  %v3719_v42 = vadd.f32 %v8996_v29, %v3678_v48  ;;  %v3798_v62 = vadd.f32 %v3797_v7, %v8667_v8 }
 0x5ba   : > { %v3833_v28 = vadd.f32 %v3832_v16, %v3792_v55  ;;  %v3873_v17 = vpop.f32.mrf.mxu3  ;;  %v5366_v55 = vld [vmem:[%s5668_s19 + $0x1d0] sm:$0xff] }
 0x5bb   : > { %v4422_v45 = vadd.f32 %v5362_v15, %v3757_v23 }
 0x5bc   : > { %v3874_v13 = vadd.f32 %v3873_v17, %v3833_v28 }
 0x5bd   : > { %4486 = vst [vmem:[%s8524_s30 + $0x150] sm:$0xff] %v4422_v45  ;;  %4083 = vmatmul.f32.gmra.mxu0 %v10114_v32  ;;  %5220 = vmatmul.msk.f32.gmra.mxu1 %vm595_vm0, %v8976_v46 }
 0x5be   : > { %v4407_v9 = vadd.f32 %v5363_v14, %v3874_v13  ;;  %v5368_v14 = vld [vmem:[%s5668_s19 + $0x198] sm:$0xff] }
 0x5c0   : > { %4471 = vst [vmem:[%s8524_s30 + $0xd8] sm:$0xff] %v4407_v9  ;;  %v3759_v27 = vpop.f32.mrf.mxu0  ;;  %v3800_v3 = vpop.f32.mrf.mxu1 }
 0x5c1   : > { %4162 = vmatmul.f32.gmra.mxu2 %v8911_v6  ;;  %v3760_v41 = vadd.f32 %v3759_v27, %v3719_v42  ;;  %4203 = vmatmul.f32.gmra.mxu3 %v8662_v22  ;;  %v3835_v39 = vpop.f32.mrf.mxu2  ;;  %v3801_v16 = vadd.f32 %v3800_v3, %v8685_v0 }
 0x5c2   : > { %v3836_v40 = vadd.f32 %v3835_v39, %v3795_v44  ;;  %v3876_v53 = vpop.f32.mrf.mxu3 }
 0x5c3   : > { %v4430_v29 = vadd.f32 %v5364_v47, %v3760_v41 }
 0x5c4   : > { %v3877_v52 = vadd.f32 %v3876_v53, %v3836_v40  ;;  %v5369_v53 = vld [vmem:[%s5668_s19 + $0x1d8] sm:$0xff] }
 0x5c5   : > { %4494 = vst [vmem:[%s8524_s30 + $0x190] sm:$0xff] %v4430_v29  ;;  %4086 = vmatmul.f32.gmra.mxu0 %v10117_v21  ;;  %5221 = vmatmul.msk.f32.gmra.mxu1 %vm595_vm0, %v10121_v54 }
 0x5c6   : > { %v4415_v36 = vadd.f32 %v5365_v2, %v3877_v52  ;;  %v5370_v52 = vld [vmem:[%s9454_s7 + $0x8] sm:$0xff] }
 0x5c8   : > { %4479 = vst [vmem:[%s8524_s30 + $0x118] sm:$0xff] %v4415_v36  ;;  %v3762_v59 = vpop.f32.mrf.mxu0  ;;  %v3803_v49 = vpop.f32.mrf.mxu1 }
 0x5c9   : > { %4165 = vmatmul.f32.gmra.mxu2 %v8940_v58  ;;  %v3763_v11 = vadd.f32 %v3762_v59, %v3722_v37  ;;  %4206 = vmatmul.f32.gmra.mxu3 %v10114_v32  ;;  %v3838_v30 = vpop.f32.mrf.mxu2  ;;  %v3804_v42 = vadd.f32 %v3803_v49, %v10115_v4 }
 0x5ca   : > { %v3839_v18 = vadd.f32 %v3838_v30, %v3798_v62  ;;  %v3879_v63 = vpop.f32.mrf.mxu3 }
 0x5cb   : > { %v4438_v57 = vadd.f32 %v5366_v55, %v3763_v11 }
 0x5cc   : > { %v3880_v23 = vadd.f32 %v3879_v63, %v3839_v18 }
 0x5cd   : > { %4502 = vst [vmem:[%s8524_s30 + $0x1d0] sm:$0xff] %v4438_v57  ;;  %4089 = vmatmul.f32.gmra.mxu0 %v10119_v33  ;;  %5222 = vmatmul.msk.f32.gmra.mxu1 %vm595_vm0, %v10123_v34 }
 0x5ce   : > { %v4423_v7 = vadd.f32 %v5367_v60, %v3880_v23 }
 0x5d0   : > { %4487 = vst [vmem:[%s8524_s30 + $0x158] sm:$0xff] %v4423_v7  ;;  %v3905_v28 = vpop.f32.mrf.mxu0  ;;  %v3946_v17 = vpop.f32.mrf.mxu1 }
 0x5d1   : > { %4168 = vmatmul.f32.gmra.mxu2 %v8963_v56  ;;  %4209 = vmatmul.f32.gmra.mxu3 %v10117_v21  ;;  %v3841_v48 = vpop.f32.mrf.mxu2  ;;  %v3906_v40 = vadd.f32 %v3905_v28, %v10118_v5 }
 0x5d2   : > { %v3842_v15 = vadd.f32 %v3841_v48, %v3801_v16  ;;  %v3882_v45 = vpop.f32.mrf.mxu3 }
 0x5d3   : > { %v3947_v47 = vadd.f32 %v3946_v17, %v3906_v40 }
 0x5d4   : > { %v3883_v13 = vadd.f32 %v3882_v45, %v3842_v15  ;;  %v5375_v45 = vld [vmem:[%s5668_s19 + $0xa0] sm:$0xff] }
 0x5d5   : > { %5223 = vmatmul.msk.f32.vlgmr.msrb.gmra.mxu0 %vm595_vm0, %v8799_v26  ;;  %4273 = vmatmul.f32.vlgmr.msrb.gmra.mxu1 %v8738_v38 }
 0x5d6   : > { %v4431_v9 = vadd.f32 %v5368_v14, %v3883_v13 }
 0x5d8   : > { %4495 = vst [vmem:[%s8524_s30 + $0x198] sm:$0xff] %v4431_v9  ;;  %v3908_v44 = vpop.f32.mrf.mxu0  ;;  %v3949_v27 = vpop.f32.mrf.mxu1 }
 0x5d9   : > { %4171 = vmatmul.f32.gmra.mxu2 %v8987_v50  ;;  %4212 = vmatmul.f32.gmra.mxu3 %v10119_v33  ;;  %v3844_v3 = vpop.f32.mrf.mxu2  ;;  %v3909_v49 = vadd.f32 %v3908_v44, %v10120_v10 }
 0x5da   : > { %v3845_v41 = vadd.f32 %v3844_v3, %v3804_v42  ;;  %v3885_v39 = vpop.f32.mrf.mxu3 }
 0x5db   : > { %v3950_v30 = vadd.f32 %v3949_v27, %v3909_v49 }
 0x5dc   : > { %v3886_v38 = vadd.f32 %v3885_v39, %v3845_v41  ;;  %v5377_v41 = vld [vmem:[%s5668_s19 + $0xe0] sm:$0xff] }
 0x5dd   : > { %5224 = vmatmul.msk.f32.gmra.mxu0 %vm595_vm0, %v8856_v12  ;;  %4276 = vmatmul.f32.gmra.mxu1 %v8788_v20  ;;  %v5371_v20 = vld [vmem:[%s5668_s19 + $0x20] sm:$0xff] }
 0x5de   : > { %v4439_v31 = vadd.f32 %v5369_v53, %v3886_v38 }
 0x5e0   : > { %4503 = vst [vmem:[%s8524_s30 + $0x1d8] sm:$0xff] %v4439_v31  ;;  %v3911_v29 = vpop.f32.mrf.mxu0 }
 0x5e1   : > { %4314 = vmatmul.f32.vlgmr.msrb.gmra.mxu2 %v5370_v52  ;;  %v3952_v2 = vpop.f32.mrf.mxu1  ;;  %5231 = vmatmul.msk.f32.vlgmr.msrb.gmra.mxu3 %vm595_vm0, %v8799_v26  ;;  %v3987_v36 = vpop.f32.mrf.mxu2  ;;  %v5372_v26 = vld [vmem:[%s9454_s7 + $0x20] sm:$0xff]  ;;  %v3912_v60 = vadd.f32 %v3911_v29, %v8565_v51 }
 0x5e2   : > { %v3988_v37 = vadd.f32 %v3987_v36, %v3947_v47  ;;  %v9118_v62 = vpop.f32.mrf.mxu3  ;;  %v5378_v29 = vld [vmem:[%s5668_s19 + $0x120] sm:$0xff] }
 0x5e3   : > { %v3953_v28 = vadd.f32 %v3952_v2, %v3912_v60 }
 0x5e4   : > { %v4384_v59 = vadd.f32 %v5371_v20, %v3988_v37 }
 0x5e5   : > { %5225 = vmatmul.msk.f32.gmra.mxu0 %vm595_vm0, %v8895_v25  ;;  %4279 = vmatmul.f32.gmra.mxu1 %v8831_v43  ;;  %v5373_v43 = vld [vmem:[%s5668_s19 + $0x60] sm:$0xff] }
 0x5e6   : > { %4448 = vst [vmem:[%s8524_s30 + $0x20] sm:$0xff] %v4384_v59  ;;  %v5379_v59 = vld [vmem:[%s5668_s19 + $0x160] sm:$0xff] }
 0x5e9   : > { %4317 = vmatmul.f32.gmra.mxu2 %v5372_v26  ;;  %v3914_v11 = vpop.f32.mrf.mxu0  ;;  %5232 = vmatmul.msk.f32.gmra.mxu3 %vm595_vm0, %v8856_v12  ;;  %v5374_v12 = vld [vmem:[%s9454_s7 + $0x38] sm:$0xff] }
 0x5ea   : > { %v3955_v18 = vpop.f32.mrf.mxu1  ;;  %v3915_v15 = vadd.f32 %v3914_v11, %v8607_v19 }
 0x5eb   : > { %v3990_v63 = vpop.f32.mrf.mxu2  ;;  %v9131_v55 = vpop.f32.mrf.mxu3 }
 0x5ec   : > { %v3991_v57 = vadd.f32 %v3990_v63, %v3950_v30  ;;  %v3956_v42 = vadd.f32 %v3955_v18, %v3915_v15 }
 0x5ed   : > { %5226 = vmatmul.msk.f32.gmra.mxu0 %vm595_vm0, %v8926_v61  ;;  %4282 = vmatmul.f32.gmra.mxu1 %v8878_v24 }
 0x5ee   : > { %v4392_v23 = vadd.f32 %v5373_v43, %v3991_v57 }
 0x5f0   : > { %4456 = vst [vmem:[%s8524_s30 + $0x60] sm:$0xff] %v4392_v23 }
 0x5f1   : > { %4320 = vmatmul.f32.gmra.mxu2 %v5374_v12  ;;  %5233 = vmatmul.msk.f32.gmra.mxu3 %vm595_vm0, %v8895_v25  ;;  %v5376_v25 = vld [vmem:[%s9454_s7 + $0x50] sm:$0xff] }
 0x5f2   : > { %v3917_v7 = vpop.f32.mrf.mxu0  ;;  %v3958_v16 = vpop.f32.mrf.mxu1 }
 0x5f3   : > { %v3918_v3 = vadd.f32 %v3917_v7, %v8643_v35 }
 0x5f4   : > { %v3993_v17 = vpop.f32.mrf.mxu2  ;;  %v9144_v24 = vpop.f32.mrf.mxu3 }
 0x5f5   : > { %v3994_v48 = vadd.f32 %v3993_v17, %v3953_v28  ;;  %5227 = vmatmul.msk.f32.gmra.mxu0 %vm595_vm0, %v8951_v1  ;;  %4285 = vmatmul.f32.gmra.mxu1 %v8911_v6  ;;  %v3959_v38 = vadd.f32 %v3958_v16, %v3918_v3 }
 0x5f7   : > { %v4400_v13 = vadd.f32 %v5375_v45, %v3994_v48 }
 0x5f9   : > { %4464 = vst [vmem:[%s8524_s30 + $0xa0] sm:$0xff] %v4400_v13  ;;  %4323 = vmatmul.f32.gmra.mxu2 %v5376_v25  ;;  %5234 = vmatmul.msk.f32.gmra.mxu3 %vm595_vm0, %v8926_v61  ;;  %v5382_v13 = vld [vmem:[%s5668_s19 + $0x68] sm:$0xff]  ;;  %v5383_v25 = vld [vmem:[%s5668_s19 + $0x1e0] sm:$0xff] }
 0x5fa   : > { %v3920_v14 = vpop.f32.mrf.mxu0  ;;  %v3961_v9 = vpop.f32.mrf.mxu1 }
 0x5fc   : > { %v3996_v44 = vpop.f32.mrf.mxu2  ;;  %v9157_v6 = vpop.f32.mrf.mxu3 }
 0x5fd   : > { %v3997_v27 = vadd.f32 %v3996_v44, %v3956_v42  ;;  %5228 = vmatmul.msk.f32.gmra.mxu0 %vm595_vm0, %v8976_v46  ;;  %4288 = vmatmul.f32.gmra.mxu1 %v8940_v58  ;;  %v3921_v58 = vadd.f32 %v3920_v14, %v8667_v8  ;;  %v4035_v14 = vadd.f32 %v9144_v24, %v8565_v51 }
 0x5ff   : > { %v4408_v39 = vadd.f32 %v5377_v41, %v3997_v27  ;;  %v3962_v2 = vadd.f32 %v3961_v9, %v3921_v58  ;;  %v5384_v41 = vld [vmem:[%s5668_s19 + $0xa8] sm:$0xff] }
 0x601   : > { %4472 = vst [vmem:[%s8524_s30 + $0xe0] sm:$0xff] %v4408_v39  ;;  %4326 = vmatmul.f32.gmra.mxu2 %v8662_v22  ;;  %5235 = vmatmul.msk.f32.gmra.mxu3 %vm595_vm0, %v8951_v1 }
 0x602   : > { %v3923_v61 = vpop.f32.mrf.mxu0  ;;  %v3964_v40 = vpop.f32.mrf.mxu1 }
 0x604   : > { %v3999_v53 = vpop.f32.mrf.mxu2  ;;  %v9168_v31 = vpop.f32.mrf.mxu3 }
 0x605   : > { %v4000_v47 = vadd.f32 %v3999_v53, %v3959_v38  ;;  %5229 = vmatmul.msk.f32.gmra.mxu0 %vm595_vm0, %v10121_v54  ;;  %4291 = vmatmul.f32.gmra.mxu1 %v8963_v56  ;;  %v3924_v56 = vadd.f32 %v3923_v61, %v8685_v0  ;;  %v4038_v61 = vadd.f32 %v9157_v6, %v8607_v19 }
 0x607   : > { %v4416_v22 = vadd.f32 %v5378_v29, %v4000_v47  ;;  %v5385_v29 = vld [vmem:[%s5668_s19 + $0xe8] sm:$0xff] }
 0x609   : > { %4480 = vst [vmem:[%s8524_s30 + $0x120] sm:$0xff] %v4416_v22  ;;  %4329 = vmatmul.f32.gmra.mxu2 %v10114_v32  ;;  %5236 = vmatmul.msk.f32.gmra.mxu3 %vm595_vm0, %v8976_v46  ;;  %v4029_v46 = vadd.f32 %v9118_v62, %v10118_v5  ;;  %v5380_v62 = vld [vmem:[%s5668_s19 + $0x28] sm:$0xff] }
 0x60a   : > { %v3926_v1 = vpop.f32.mrf.mxu0  ;;  %v3967_v52 = vpop.f32.mrf.mxu1 }
 0x60b   : > { %v3927_v43 = vadd.f32 %v3926_v1, %v10115_v4  ;;  %v4041_v1 = vadd.f32 %v9168_v31, %v8643_v35 }
 0x60c   : > { %v4002_v36 = vpop.f32.mrf.mxu2  ;;  %v9179_v37 = vpop.f32.mrf.mxu3 }
 0x60d   : > { %v4003_v20 = vadd.f32 %v4002_v36, %v3962_v2  ;;  %5230 = vmatmul.msk.f32.gmra.mxu0 %vm595_vm0, %v10123_v34  ;;  %4294 = vmatmul.f32.gmra.mxu1 %v8987_v50  ;;  %v3965_v50 = vadd.f32 %v3964_v40, %v3924_v56  ;;  %v3968_v16 = vadd.f32 %v3967_v52, %v3927_v43 }
 0x60f   : > { %v4424_v32 = vadd.f32 %v5379_v59, %v4003_v20  ;;  %v5386_v59 = vld [vmem:[%s5668_s19 + $0x128] sm:$0xff] }
 0x611   : > { %4488 = vst [vmem:[%s8524_s30 + $0x160] sm:$0xff] %v4424_v32  ;;  %4332 = vmatmul.f32.gmra.mxu2 %v10117_v21  ;;  %5237 = vmatmul.msk.f32.gmra.mxu3 %vm595_vm0, %v10121_v54  ;;  %v5381_v21 = vld [vmem:[%s5668_s19 + $0x1a0] sm:$0xff]  ;;  %v4032_v54 = vadd.f32 %v9131_v55, %v10120_v10 }
 0x612   : > { %v4069_v49 = vpop.f32.mrf.mxu0  ;;  %v4110_v26 = vpop.f32.mrf.mxu1 }
 0x613   : > { %v4070_v11 = vadd.f32 %v4069_v49, %v4029_v46  ;;  %v4044_v46 = vadd.f32 %v9179_v37, %v8667_v8 }
 0x614   : > { %v4005_v30 = vpop.f32.mrf.mxu2  ;;  %v9192_v18 = vpop.f32.mrf.mxu3 }
 0x615   : > { %v4111_v63 = vadd.f32 %v4110_v26, %v4070_v11  ;;  %v4006_v57 = vadd.f32 %v4005_v30, %v3965_v50  ;;  %v4047_v43 = vadd.f32 %v9192_v18, %v8685_v0 }
 0x617   : > { %v4385_v23 = vadd.f32 %v5380_v62, %v4111_v63  ;;  %v4432_v60 = vadd.f32 %v5381_v21, %v4006_v57  ;;  %v5387_v63 = vld [vmem:[%s5668_s19 + $0x168] sm:$0xff] }
 0x619   : > { %4449 = vst [vmem:[%s8524_s30 + $0x28] sm:$0xff] %v4385_v23  ;;  %4335 = vmatmul.f32.gmra.mxu2 %v10119_v33  ;;  %5238 = vmatmul.msk.f32.gmra.mxu3 %vm595_vm0, %v10123_v34 }
 0x61a   : > { %4496 = vst [vmem:[%s8524_s30 + $0x1a0] sm:$0xff] %v4432_v60  ;;  %v4072_v12 = vpop.f32.mrf.mxu0  ;;  %v4113_v7 = vpop.f32.mrf.mxu1 }
 0x61b   : > { %v4073_v28 = vadd.f32 %v4072_v12, %v4032_v54  ;;  %v5388_v12 = vld [vmem:[%s5668_s19 + $0x1a8] sm:$0xff] }
 0x61c   : > { %v4008_v17 = vpop.f32.mrf.mxu2  ;;  %v4049_v48 = vpop.f32.mrf.mxu3 }
 0x61d   : > { %v4114_v15 = vadd.f32 %v4113_v7, %v4073_v28  ;;  %v4009_v45 = vadd.f32 %v4008_v17, %v3968_v16  ;;  %v4050_v16 = vadd.f32 %v4049_v48, %v10115_v4 }
 0x61f   : > { %v4393_v55 = vadd.f32 %v5382_v13, %v4114_v15  ;;  %v4440_v33 = vadd.f32 %v5383_v25, %v4009_v45  ;;  %v5389_v25 = vld [vmem:[%s5668_s19 + $0x1e8] sm:$0xff] }
 0x621   : > { %4457 = vst [vmem:[%s8524_s30 + $0x68] sm:$0xff] %v4393_v55 }
 0x622   : > { %4504 = vst [vmem:[%s8524_s30 + $0x1e0] sm:$0xff] %v4440_v33  ;;  %v4075_v34 = vpop.f32.mrf.mxu0  ;;  %v4116_v9 = vpop.f32.mrf.mxu1 }
 0x623   : > { %v4076_v42 = vadd.f32 %v4075_v34, %v4035_v14 }
 0x624   : > { %v4151_v44 = vpop.f32.mrf.mxu2  ;;  %v4192_v27 = vpop.f32.mrf.mxu3 }
 0x625   : > { %v4117_v3 = vadd.f32 %v4116_v9, %v4076_v42  ;;  %v4152_v13 = vadd.f32 %v4151_v44, %v10118_v5 }
 0x627   : > { %v4401_v39 = vadd.f32 %v5384_v41, %v4117_v3  ;;  %v4193_v14 = vadd.f32 %v4192_v27, %v4152_v13 }
 0x629   : > { %4465 = vst [vmem:[%s8524_s30 + $0xa8] sm:$0xff] %v4401_v39  ;;  %v5390_v39 = vld [vmem:[%s5668_s19 + $0x30] sm:$0xff] }
 0x62a   : > { %v4078_v40 = vpop.f32.mrf.mxu0  ;;  %v4119_v38 = vpop.f32.mrf.mxu1 }
 0x62b   : > { %v4079_v24 = vadd.f32 %v4078_v40, %v4038_v61 }
 0x62c   : > { %v4154_v53 = vpop.f32.mrf.mxu2  ;;  %v4195_v47 = vpop.f32.mrf.mxu3 }
 0x62d   : > { %v4120_v58 = vadd.f32 %v4119_v38, %v4079_v24  ;;  %v4155_v41 = vadd.f32 %v4154_v53, %v10120_v10 }
 0x62f   : > { %v4409_v22 = vadd.f32 %v5385_v29, %v4120_v58  ;;  %v4196_v44 = vadd.f32 %v4195_v47, %v4155_v41 }
 0x631   : > { %4473 = vst [vmem:[%s8524_s30 + $0xe8] sm:$0xff] %v4409_v22  ;;  %v5391_v22 = vld [vmem:[%s5668_s19 + $0x70] sm:$0xff] }
 0x632   : > { %v4081_v52 = vpop.f32.mrf.mxu0  ;;  %v4122_v2 = vpop.f32.mrf.mxu1 }
 0x633   : > { %v4082_v36 = vadd.f32 %v4081_v52, %v4041_v1 }
 0x634   : > { %v4157_v6 = vpop.f32.mrf.mxu2  ;;  %v4198_v20 = vpop.f32.mrf.mxu3 }
 0x635   : > { %v4123_v56 = vadd.f32 %v4122_v2, %v4082_v36  ;;  %v4158_v29 = vadd.f32 %v4157_v6, %v8565_v51 }
 0x637   : > { %v4417_v32 = vadd.f32 %v5386_v59, %v4123_v56  ;;  %v4199_v53 = vadd.f32 %v4198_v20, %v4158_v29 }
 0x639   : > { %4481 = vst [vmem:[%s8524_s30 + $0x128] sm:$0xff] %v4417_v32  ;;  %v5392_v32 = vld [vmem:[%s5668_s19 + $0xb0] sm:$0xff] }
 0x63a   : > { %v4084_v49 = vpop.f32.mrf.mxu0  ;;  %v4125_v26 = vpop.f32.mrf.mxu1 }
 0x63b   : > { %v4085_v50 = vadd.f32 %v4084_v49, %v4044_v46 }
 0x63c   : > { %v4160_v31 = vpop.f32.mrf.mxu2  ;;  %v4201_v11 = vpop.f32.mrf.mxu3 }
 0x63d   : > { %v4126_v30 = vadd.f32 %v4125_v26, %v4085_v50  ;;  %v4161_v59 = vadd.f32 %v4160_v31, %v8607_v19 }
 0x63f   : > { %v4425_v57 = vadd.f32 %v5387_v63, %v4126_v30  ;;  %v4202_v50 = vadd.f32 %v4201_v11, %v4161_v59  ;;  %v5393_v30 = vld [vmem:[%s5668_s19 + $0x38] sm:$0xff]  ;;  %v5400_v59 = vld [vmem:[%s5668_s19 + $0x1b0] sm:$0xff] }
 0x641   : > { %4489 = vst [vmem:[%s8524_s30 + $0x168] sm:$0xff] %v4425_v57 }
 0x642   : > { %v4087_v62 = vpop.f32.mrf.mxu0  ;;  %v4128_v23 = vpop.f32.mrf.mxu1 }
 0x643   : > { %v4088_v21 = vadd.f32 %v4087_v62, %v4047_v43 }
 0x644   : > { %v4163_v37 = vpop.f32.mrf.mxu2  ;;  %v9226_v60 = vpop.f32.mrf.mxu3 }
 0x645   : > { %v4129_v54 = vadd.f32 %v4128_v23, %v4088_v21  ;;  %v4164_v62 = vadd.f32 %v4163_v37, %v8643_v35  ;;  %v5394_v23 = vld [vmem:[%s5668_s19 + $0xf0] sm:$0xff] }
 0x647   : > { %v4433_v7 = vadd.f32 %v5388_v12, %v4129_v54 }
 0x649   : > { %4497 = vst [vmem:[%s8524_s30 + $0x1a8] sm:$0xff] %v4433_v7  ;;  %v4205_v7 = vadd.f32 %v9226_v60, %v4164_v62  ;;  %v5403_v62 = vld [vmem:[%s5668_s19 + $0x178] sm:$0xff] }
 0x64a   : > { %v4090_v28 = vpop.f32.mrf.mxu0  ;;  %v4131_v17 = vpop.f32.mrf.mxu1 }
 0x64b   : > { %v4091_v15 = vadd.f32 %v4090_v28, %v4050_v16  ;;  %v5395_v16 = vld [vmem:[%s5668_s19 + $0x78] sm:$0xff] }
 0x64c   : > { %v9231_v18 = vpop.f32.mrf.mxu2  ;;  %v9233_v45 = vpop.f32.mrf.mxu3 }
 0x64d   : > { %v4132_v55 = vadd.f32 %v4131_v17, %v4091_v15 }
 0x64f   : > { %v4441_v33 = vadd.f32 %v5389_v25, %v4132_v55  ;;  %v4167_v55 = vadd.f32 %v9231_v18, %v8667_v8  ;;  %v5396_v25 = vld [vmem:[%s5668_s19 + $0x130] sm:$0xff] }
 0x651   : > { %4505 = vst [vmem:[%s8524_s30 + $0x1e8] sm:$0xff] %v4441_v33 }
 0x652   : > { %v4233_v34 = vpop.f32.mrf.mxu0  ;;  %v4274_v48 = vpop.f32.mrf.mxu1 }
 0x653   : > { %v4234_v9 = vadd.f32 %v4233_v34, %v4193_v14  ;;  %v4275_v2 = vadd.f32 %v4274_v48, %v10118_v5  ;;  %v4208_v34 = vadd.f32 %v9233_v45, %v4167_v55 }
 0x654   : > { %v9238_v42 = vpop.f32.mrf.mxu2  ;;  %v9240_v3 = vpop.f32.mrf.mxu3 }
 0x655   : > { %v4386_v61 = vadd.f32 %v5390_v39, %v4234_v9 }
 0x657   : > { %4450 = vst [vmem:[%s8524_s30 + $0x30] sm:$0xff] %v4386_v61 }
 0x65a   : > { %v4236_v40 = vpop.f32.mrf.mxu0  ;;  %v4277_v27 = vpop.f32.mrf.mxu1 }
 0x65b   : > { %v4237_v38 = vadd.f32 %v4236_v40, %v4196_v44  ;;  %v4278_v5 = vadd.f32 %v4277_v27, %v10120_v10  ;;  %v4170_v40 = vadd.f32 %v9238_v42, %v8685_v0 }
 0x65c   : > { %v9245_v24 = vpop.f32.mrf.mxu2  ;;  %v9247_v58 = vpop.f32.mrf.mxu3 }
 0x65d   : > { %v4394_v1 = vadd.f32 %v5391_v22, %v4237_v38  ;;  %v5398_v38 = vld [vmem:[%s5668_s19 + $0x170] sm:$0xff]  ;;  %v4211_v22 = vadd.f32 %v9240_v3, %v4170_v40 }
 0x65f   : > { %4458 = vst [vmem:[%s8524_s30 + $0x70] sm:$0xff] %v4394_v1  ;;  %v5399_v1 = vld [vmem:[%s5668_s19 + $0xf8] sm:$0xff] }
 0x662   : > { %v4239_v52 = vpop.f32.mrf.mxu0  ;;  %v4280_v49 = vpop.f32.mrf.mxu1 }
 0x663   : > { %v4240_v47 = vadd.f32 %v4239_v52, %v4199_v53  ;;  %v4281_v17 = vadd.f32 %v4280_v49, %v8565_v51  ;;  %v5397_v51 = vld [vmem:[%s5668_s19 + $0xb8] sm:$0xff] }
 0x664   : > { %v4315_v36 = vpop.f32.mrf.mxu2  ;;  %v4356_v56 = vpop.f32.mrf.mxu3 }
 0x665   : > { %v4402_v46 = vadd.f32 %v5392_v32, %v4240_v47  ;;  %v4316_v26 = vadd.f32 %v4315_v36, %v4275_v2 }
 0x667   : > { %4466 = vst [vmem:[%s8524_s30 + $0xb0] sm:$0xff] %v4402_v46  ;;  %v4357_v6 = vadd.f32 %v4356_v56, %v4316_v26  ;;  %v4173_v56 = vadd.f32 %v9245_v24, %v10115_v4  ;;  %v5402_v24 = vld [vmem:[%s5668_s19 + $0x1f0] sm:$0xff] }
 0x669   : > { %v4387_v20 = vadd.f32 %v5393_v30, %v4357_v6  ;;  %v4214_v49 = vadd.f32 %v9247_v58, %v4173_v56  ;;  %v4588_v56 = vld [vmem:[%s8524_s30 + $0xe8] sm:$0xff] (%p5511_p5) }
 0x66a   : > { %v4242_v63 = vpop.f32.mrf.mxu0  ;;  %v4283_v11 = vpop.f32.mrf.mxu1  ;;  %4589 = vst [vmem:[%s9309_s17 + $0x1a8] sm:$0xff] (%p5511_p5), %v4588_v56 }
 0x66b   : > { %4451 = vst [vmem:[%s8524_s30 + $0x38] sm:$0xff] %v4387_v20  ;;  %v4243_v57 = vadd.f32 %v4242_v63, %v4202_v50  ;;  %v4284_v39 = vadd.f32 %v4283_v11, %v8607_v19 }
 0x66c   : > { %v4318_v43 = vpop.f32.mrf.mxu2  ;;  %v4359_v31 = vpop.f32.mrf.mxu3 }
 0x66d   : > { %v4410_v21 = vadd.f32 %v5394_v23, %v4243_v57  ;;  %v4319_v54 = vadd.f32 %v4318_v43, %v4278_v5 }
 0x66f   : > { %4474 = vst [vmem:[%s8524_s30 + $0xf0] sm:$0xff] %v4410_v21  ;;  %v4360_v12 = vadd.f32 %v4359_v31, %v4319_v54 }
 0x671   : > { %v4395_v10 = vadd.f32 %v5395_v16, %v4360_v12 }
 0x672   : > { %v4245_v28 = vpop.f32.mrf.mxu0  ;;  %v4286_v48 = vpop.f32.mrf.mxu1 }
 0x673   : > { %4459 = vst [vmem:[%s8524_s30 + $0x78] sm:$0xff] %v4395_v10  ;;  %v4246_v15 = vadd.f32 %v4245_v28, %v4205_v7  ;;  %v4287_v52 = vadd.f32 %v4286_v48, %v8643_v35  ;;  %v5401_v35 = vld [vmem:[%s5668_s19 + $0x138] sm:$0xff] }
 0x674   : > { %v4321_v37 = vpop.f32.mrf.mxu2  ;;  %v4362_v13 = vpop.f32.mrf.mxu3  ;;  %v5404_v7 = vld [vmem:[%s5668_s19 + $0x1b8] sm:$0xff] }
 0x675   : > { %v4418_v33 = vadd.f32 %v5396_v25, %v4246_v15  ;;  %v4322_v14 = vadd.f32 %v4321_v37, %v4281_v17  ;;  %v4534_v25 = vld [vmem:[%s8524_s30 + $0x10] sm:$0xff] (%p5511_p5)  ;;  %v4544_v48 = vld [vmem:[%s8524_s30 + $0x38] sm:$0xff] (%p5511_p5) }
 0x676   : > { %4535 = vst [vmem:[%s9309_s17 + $0x10] sm:$0xff] (%p5511_p5), %v4534_v25 }
 0x677   : > { %4482 = vst [vmem:[%s8524_s30 + $0x130] sm:$0xff] %v4418_v33  ;;  %v4363_v60 = vadd.f32 %v4362_v13, %v4322_v14  ;;  %v5405_v13 = vld [vmem:[%s5668_s19 + $0x1f8] sm:$0xff]  ;;  %v4538_v14 = vld [vmem:[%s8524_s30 + $0x20] sm:$0xff] (%p5511_p5) }
 0x678   : > { %v4536_v33 = vld [vmem:[%s8524_s30 + $0x18] sm:$0xff] (%p5511_p5)  ;;  %4539 = vst [vmem:[%s9309_s17 + $0x20] sm:$0xff] (%p5511_p5), %v4538_v14 }
 0x679   : > { %v4403_v9 = vadd.f32 %v5397_v51, %v4363_v60  ;;  %v4540_v60 = vld [vmem:[%s8524_s30 + $0x28] sm:$0xff] (%p5511_p5)  ;;  %4537 = vst [vmem:[%s9309_s17 + $0x18] sm:$0xff] (%p5511_p5), %v4536_v33  ;;  %v4546_v51 = vld [vmem:[%s8524_s30 + $0x40] sm:$0xff] (%p5511_p5) }
 0x67a   : > { %v4248_v41 = vpop.f32.mrf.mxu0  ;;  %v4289_v2 = vpop.f32.mrf.mxu1  ;;  %4541 = vst [vmem:[%s9309_s17 + $0x28] sm:$0xff] (%p5511_p5), %v4540_v60  ;;  %v4560_v40 = vld [vmem:[%s8524_s30 + $0x78] sm:$0xff] (%p5511_p5) }
 0x67b   : > { %4467 = vst [vmem:[%s8524_s30 + $0xb8] sm:$0xff] %v4403_v9  ;;  %v4249_v61 = vadd.f32 %v4248_v41, %v4208_v34  ;;  %v4290_v50 = vadd.f32 %v4289_v2, %v8667_v8  ;;  %v4542_v34 = vld [vmem:[%s8524_s30 + $0x30] sm:$0xff] (%p5511_p5)  ;;  %v4548_v9 = vld [vmem:[%s8524_s30 + $0x48] sm:$0xff] (%p5511_p5) }
 0x67c   : > { %v4324_v18 = vpop.f32.mrf.mxu2  ;;  %v4365_v44 = vpop.f32.mrf.mxu3  ;;  %4543 = vst [vmem:[%s9309_s17 + $0x30] sm:$0xff] (%p5511_p5), %v4542_v34  ;;  %v4550_v41 = vld [vmem:[%s8524_s30 + $0x50] sm:$0xff] (%p5511_p5)  ;;  %v4580_v2 = vld [vmem:[%s8524_s30 + $0xc8] sm:$0xff] (%p5511_p5) }
 0x67d   : > { %v4426_v27 = vadd.f32 %v5398_v38, %v4249_v61  ;;  %v4325_v29 = vadd.f32 %v4324_v18, %v4284_v39  ;;  %4545 = vst [vmem:[%s9309_s17 + $0x38] sm:$0xff] (%p5511_p5), %v4544_v48  ;;  %v4552_v39 = vld [vmem:[%s8524_s30 + $0x58] sm:$0xff] (%p5511_p5)  ;;  %v4554_v61 = vld [vmem:[%s8524_s30 + $0x60] sm:$0xff] (%p5511_p5)  ;;  %v4556_v18 = vld [vmem:[%s8524_s30 + $0x68] sm:$0xff] (%p5511_p5) }
 0x67e   : > { %4547 = vst [vmem:[%s9309_s17 + $0x80] sm:$0xff] (%p5511_p5), %v4546_v51  ;;  %v4562_v38 = vld [vmem:[%s8524_s30 + $0x80] sm:$0xff] (%p5511_p5) }
 0x67f   : > { %4490 = vst [vmem:[%s8524_s30 + $0x170] sm:$0xff] %v4426_v27  ;;  %v4366_v45 = vadd.f32 %v4365_v44, %v4325_v29  ;;  %v4558_v44 = vld [vmem:[%s8524_s30 + $0x70] sm:$0xff] (%p5511_p5)  ;;  %v4564_v27 = vld [vmem:[%s8524_s30 + $0x88] sm:$0xff] (%p5511_p5) }
 0x680   : > { %4549 = vst [vmem:[%s9309_s17 + $0x88] sm:$0xff] (%p5511_p5), %v4548_v9  ;;  %v4566_v29 = vld [vmem:[%s8524_s30 + $0x90] sm:$0xff] (%p5511_p5) }
 0x681   : > { %v4411_v19 = vadd.f32 %v5399_v1, %v4366_v45  ;;  %4551 = vst [vmem:[%s9309_s17 + $0x90] sm:$0xff] (%p5511_p5), %v4550_v41  ;;  %v4568_v45 = vld [vmem:[%s8524_s30 + $0x98] sm:$0xff] (%p5511_p5)  ;;  %v4572_v1 = vld [vmem:[%s8524_s30 + $0xa8] sm:$0xff] (%p5511_p5) }
 0x682   : > { %v4251_v53 = vpop.f32.mrf.mxu0  ;;  %v4292_v43 = vpop.f32.mrf.mxu1  ;;  %4553 = vst [vmem:[%s9309_s17 + $0x98] sm:$0xff] (%p5511_p5), %v4552_v39 }
 0x683   : > { %4475 = vst [vmem:[%s8524_s30 + $0xf8] sm:$0xff] %v4411_v19  ;;  %v4252_v47 = vadd.f32 %v4251_v53, %v4211_v22  ;;  %v4293_v23 = vadd.f32 %v4292_v43, %v8685_v0  ;;  %v4530_v0 = vld [vmem:[%s8524_s30] sm:$0xff] (%p5511_p5)  ;;  %v4574_v19 = vld [vmem:[%s8524_s30 + $0xb0] sm:$0xff] (%p5511_p5)  ;;  %v4576_v53 = vld [vmem:[%s8524_s30 + $0xb8] sm:$0xff] (%p5511_p5) }
 0x684   : > { %v4327_v42 = vpop.f32.mrf.mxu2  ;;  %v4368_v36 = vpop.f32.mrf.mxu3  ;;  %4531 = vst [vmem:[%s9309_s17] sm:$0xff] (%p5511_p5), %v4530_v0  ;;  %v4570_v22 = vld [vmem:[%s8524_s30 + $0xa0] sm:$0xff] (%p5511_p5)  ;;  %v4620_v43 = vld [vmem:[%s8524_s30 + $0x168] sm:$0xff] (%p5511_p5) }
 0x685   : > { %v4434_v32 = vadd.f32 %v5400_v59, %v4252_v47  ;;  %v4328_v46 = vadd.f32 %v4327_v42, %v4287_v52  ;;  %4555 = vst [vmem:[%s9309_s17 + $0xa0] sm:$0xff] (%p5511_p5), %v4554_v61  ;;  %v4578_v52 = vld [vmem:[%s8524_s30 + $0xc0] sm:$0xff] (%p5511_p5)  ;;  %v4582_v47 = vld [vmem:[%s8524_s30 + $0xd0] sm:$0xff] (%p5511_p5)  ;;  %v4584_v42 = vld [vmem:[%s8524_s30 + $0xd8] sm:$0xff] (%p5511_p5) }
 0x686   : > { %4557 = vst [vmem:[%s9309_s17 + $0xa8] sm:$0xff] (%p5511_p5), %v4556_v18  ;;  %v4590_v59 = vld [vmem:[%s8524_s30 + $0xf0] sm:$0xff] (%p5511_p5) }
 0x687   : > { %4498 = vst [vmem:[%s8524_s30 + $0x1b0] sm:$0xff] %v4434_v32  ;;  %v4369_v3 = vadd.f32 %v4368_v36, %v4328_v46  ;;  %v4586_v36 = vld [vmem:[%s8524_s30 + $0xe0] sm:$0xff] (%p5511_p5) }
 0x688   : > { %4559 = vst [vmem:[%s9309_s17 + $0xb0] sm:$0xff] (%p5511_p5), %v4558_v44  ;;  %v4594_v46 = vld [vmem:[%s8524_s30 + $0x100] sm:$0xff] (%p5511_p5) }
 0x689   : > { %v4419_v26 = vadd.f32 %v5401_v35, %v4369_v3  ;;  %4561 = vst [vmem:[%s9309_s17 + $0xb8] sm:$0xff] (%p5511_p5), %v4560_v40  ;;  %v4596_v3 = vld [vmem:[%s8524_s30 + $0x108] sm:$0xff] (%p5511_p5)  ;;  %v4600_v35 = vld [vmem:[%s8524_s30 + $0x118] sm:$0xff] (%p5511_p5) }
 0x68a   : > { %v4254_v6 = vpop.f32.mrf.mxu0  ;;  %v4295_v12 = vpop.f32.mrf.mxu1  ;;  %4563 = vst [vmem:[%s9309_s17 + $0x100] sm:$0xff] (%p5511_p5), %v4562_v38  ;;  %v4592_v32 = vld [vmem:[%s8524_s30 + $0xf8] sm:$0xff] (%p5511_p5) }
 0x68b   : > { %4483 = vst [vmem:[%s8524_s30 + $0x138] sm:$0xff] %v4419_v26  ;;  %v4255_v30 = vadd.f32 %v4254_v6, %v4214_v49  ;;  %v4296_v10 = vadd.f32 %v4295_v12, %v10115_v4  ;;  %v4532_v4 = vld [vmem:[%s8524_s30 + $0x8] sm:$0xff] (%p5511_p5)  ;;  %v4598_v49 = vld [vmem:[%s8524_s30 + $0x110] sm:$0xff] (%p5511_p5)  ;;  %v4602_v26 = vld [vmem:[%s8524_s30 + $0x120] sm:$0xff] (%p5511_p5) }
 0x68c   : > { %v4330_v20 = vpop.f32.mrf.mxu2  ;;  %v4371_v63 = vpop.f32.mrf.mxu3  ;;  %4533 = vst [vmem:[%s9309_s17 + $0x8] sm:$0xff] (%p5511_p5), %v4532_v4  ;;  %v4604_v6 = vld [vmem:[%s8524_s30 + $0x128] sm:$0xff] (%p5511_p5) }
 0x68d   : > { %v4442_v5 = vadd.f32 %v5402_v24, %v4255_v30  ;;  %v4331_v57 = vadd.f32 %v4330_v20, %v4290_v50  ;;  %4565 = vst [vmem:[%s9309_s17 + $0x108] sm:$0xff] (%p5511_p5), %v4564_v27  ;;  %v4606_v50 = vld [vmem:[%s8524_s30 + $0x130] sm:$0xff] (%p5511_p5)  ;;  %v4610_v20 = vld [vmem:[%s8524_s30 + $0x140] sm:$0xff] (%p5511_p5) }
 0x68e   : > { %4567 = vst [vmem:[%s9309_s17 + $0x110] sm:$0xff] (%p5511_p5), %v4566_v29  ;;  %v4614_v24 = vld [vmem:[%s8524_s30 + $0x150] sm:$0xff] (%p5511_p5) }
 0x68f   : > { %4506 = vst [vmem:[%s8524_s30 + $0x1f0] sm:$0xff] %v4442_v5  ;;  %v4372_v31 = vadd.f32 %v4371_v63, %v4331_v57  ;;  %v4612_v63 = vld [vmem:[%s8524_s30 + $0x148] sm:$0xff] (%p5511_p5)  ;;  %v4616_v5 = vld [vmem:[%s8524_s30 + $0x158] sm:$0xff] (%p5511_p5)  ;;  %v4618_v57 = vld [vmem:[%s8524_s30 + $0x160] sm:$0xff] (%p5511_p5) }
 0x690   : > { %4569 = vst [vmem:[%s9309_s17 + $0x118] sm:$0xff] (%p5511_p5), %v4568_v45  ;;  %v4638_v12 = vld [vmem:[%s8524_s30 + $0x1b0] sm:$0xff] (%p5511_p5) }
 0x691   : > { %v4427_v58 = vadd.f32 %v5403_v62, %v4372_v31  ;;  %4571 = vst [vmem:[%s9309_s17 + $0x120] sm:$0xff] (%p5511_p5), %v4570_v22  ;;  %v4622_v31 = vld [vmem:[%s8524_s30 + $0x170] sm:$0xff] (%p5511_p5) }
 0x692   : > { %4573 = vst [vmem:[%s9309_s17 + $0x128] sm:$0xff] (%p5511_p5), %v4572_v1  ;;  %v4608_v30 = vld [vmem:[%s8524_s30 + $0x138] sm:$0xff] (%p5511_p5) }
 0x693   : > { %4491 = vst [vmem:[%s8524_s30 + $0x178] sm:$0xff] %v4427_v58  ;;  %v4626_v58 = vld [vmem:[%s8524_s30 + $0x180] sm:$0xff] (%p5511_p5) }
 0x694   : > { %v4333_v8 = vpop.f32.mrf.mxu2  ;;  %v4374_v21 = vpop.f32.mrf.mxu3  ;;  %4575 = vst [vmem:[%s9309_s17 + $0x130] sm:$0xff] (%p5511_p5), %v4574_v19 }
 0x695   : > { %v4334_v54 = vadd.f32 %v4333_v8, %v4293_v23  ;;  %4577 = vst [vmem:[%s9309_s17 + $0x138] sm:$0xff] (%p5511_p5), %v4576_v53  ;;  %v4628_v23 = vld [vmem:[%s8524_s30 + $0x188] sm:$0xff] (%p5511_p5)  ;;  %v4630_v8 = vld [vmem:[%s8524_s30 + $0x190] sm:$0xff] (%p5511_p5) }
 0x696   : > { %4579 = vst [vmem:[%s9309_s17 + $0x180] sm:$0xff] (%p5511_p5), %v4578_v52 }
 0x697   : > { %v4375_v11 = vadd.f32 %v4374_v21, %v4334_v54  ;;  %4581 = vst [vmem:[%s9309_s17 + $0x188] sm:$0xff] (%p5511_p5), %v4580_v2  ;;  %v4632_v21 = vld [vmem:[%s8524_s30 + $0x198] sm:$0xff] (%p5511_p5)  ;;  %v4634_v54 = vld [vmem:[%s8524_s30 + $0x1a0] sm:$0xff] (%p5511_p5) }
 0x698   : > { %4583 = vst [vmem:[%s9309_s17 + $0x190] sm:$0xff] (%p5511_p5), %v4582_v47 }
 0x699   : > { %v4435_v16 = vadd.f32 %v5404_v7, %v4375_v11  ;;  %4585 = vst [vmem:[%s9309_s17 + $0x198] sm:$0xff] (%p5511_p5), %v4584_v42  ;;  %v4636_v11 = vld [vmem:[%s8524_s30 + $0x1a8] sm:$0xff] (%p5511_p5) }
 0x69a   : > { %4587 = vst [vmem:[%s9309_s17 + $0x1a0] sm:$0xff] (%p5511_p5), %v4586_v36  ;;  %v4624_v62 = vld [vmem:[%s8524_s30 + $0x178] sm:$0xff] (%p5511_p5) }
 0x69b   : > { %4499 = vst [vmem:[%s8524_s30 + $0x1b8] sm:$0xff] %v4435_v16  ;;  %v4642_v16 = vld [vmem:[%s8524_s30 + $0x1c0] sm:$0xff] (%p5511_p5) }
 0x69c   : > { %v4336_v28 = vpop.f32.mrf.mxu2  ;;  %v4377_v17 = vpop.f32.mrf.mxu3  ;;  %4591 = vst [vmem:[%s9309_s17 + $0x1b0] sm:$0xff] (%p5511_p5), %v4590_v59 }
 0x69d   : > { %v4337_v15 = vadd.f32 %v4336_v28, %v4296_v10  ;;  %4593 = vst [vmem:[%s9309_s17 + $0x1b8] sm:$0xff] (%p5511_p5), %v4592_v32  ;;  %v4644_v10 = vld [vmem:[%s8524_s30 + $0x1c8] sm:$0xff] (%p5511_p5)  ;;  %v4646_v28 = vld [vmem:[%s8524_s30 + $0x1d0] sm:$0xff] (%p5511_p5) }
 0x69e   : > { %4595 = vst [vmem:[%s9309_s17 + $0x200] sm:$0xff] (%p5511_p5), %v4594_v46 }
 0x69f   : > { %v4378_v37 = vadd.f32 %v4377_v17, %v4337_v15  ;;  %4514 = sbr.rel (!%p5511_p5) target bundleno = 1727 (0x6bf), region = 83  ;;  %4597 = vst [vmem:[%s9309_s17 + $0x208] sm:$0xff] (%p5511_p5), %v4596_v3  ;;  %v4648_v17 = vld [vmem:[%s8524_s30 + $0x1d8] sm:$0xff] (%p5511_p5)  ;;  %v4650_v15 = vld [vmem:[%s8524_s30 + $0x1e0] sm:$0xff] (%p5511_p5) }
 0x6a0   : > { %4599 = vst [vmem:[%s9309_s17 + $0x210] sm:$0xff] (%p5511_p5), %v4598_v49 }
 0x6a1   : > { %v4443_v55 = vadd.f32 %v5405_v13, %v4378_v37  ;;  %4601 = vst [vmem:[%s9309_s17 + $0x218] sm:$0xff] (%p5511_p5), %v4600_v35  ;;  %v4652_v37 = vld [vmem:[%s8524_s30 + $0x1e8] sm:$0xff] (%p5511_p5)  ;;  %v4654_v13 = vld [vmem:[%s8524_s30 + $0x1f0] sm:$0xff] (%p5511_p5) }
 0x6a2   : > { %4603 = vst [vmem:[%s9309_s17 + $0x220] sm:$0xff] (%p5511_p5), %v4602_v26  ;;  %v4640_v7 = vld [vmem:[%s8524_s30 + $0x1b8] sm:$0xff] (%p5511_p5) }
 0x6a3   : > { %4507 = vst [vmem:[%s8524_s30 + $0x1f8] sm:$0xff] %v4443_v55 }
 0x6a4   : > { %4605 = vst [vmem:[%s9309_s17 + $0x228] sm:$0xff] %v4604_v6 }
 0x6a5   : > { %4607 = vst [vmem:[%s9309_s17 + $0x230] sm:$0xff] %v4606_v50 }
 0x6a6   : > { %4609 = vst [vmem:[%s9309_s17 + $0x238] sm:$0xff] %v4608_v30 }
 0x6a7   : > { %4611 = vst [vmem:[%s9309_s17 + $0x280] sm:$0xff] %v4610_v20 }
 0x6a8   : > { %4613 = vst [vmem:[%s9309_s17 + $0x288] sm:$0xff] %v4612_v63 }
 0x6a9   : > { %4615 = vst [vmem:[%s9309_s17 + $0x290] sm:$0xff] %v4614_v24 }
 0x6aa   : > { %4617 = vst [vmem:[%s9309_s17 + $0x298] sm:$0xff] %v4616_v5  ;;  %v4656_v55 = vld [vmem:[%s8524_s30 + $0x1f8] sm:$0xff] }
 0x6ab   : > { %4619 = vst [vmem:[%s9309_s17 + $0x2a0] sm:$0xff] %v4618_v57 }
 0x6ac   : > { %4621 = vst [vmem:[%s9309_s17 + $0x2a8] sm:$0xff] %v4620_v43 }
 0x6ad   : > { %4623 = vst [vmem:[%s9309_s17 + $0x2b0] sm:$0xff] %v4622_v31 }
 0x6ae   : > { %4625 = vst [vmem:[%s9309_s17 + $0x2b8] sm:$0xff] %v4624_v62 }
 0x6af   : > { %4627 = vst [vmem:[%s9309_s17 + $0x300] sm:$0xff] %v4626_v58 }
 0x6b0   : > { %4629 = vst [vmem:[%s9309_s17 + $0x308] sm:$0xff] %v4628_v23 }
 0x6b1   : > { %4631 = vst [vmem:[%s9309_s17 + $0x310] sm:$0xff] %v4630_v8 }
 0x6b2   : > { %4633 = vst [vmem:[%s9309_s17 + $0x318] sm:$0xff] %v4632_v21 }
 0x6b3   : > { %4635 = vst [vmem:[%s9309_s17 + $0x320] sm:$0xff] %v4634_v54 }
 0x6b4   : > { %4637 = vst [vmem:[%s9309_s17 + $0x328] sm:$0xff] %v4636_v11 }
 0x6b5   : > { %4639 = vst [vmem:[%s9309_s17 + $0x330] sm:$0xff] %v4638_v12 }
 0x6b6   : > { %4641 = vst [vmem:[%s9309_s17 + $0x338] sm:$0xff] %v4640_v7 }
 0x6b7   : > { %4643 = vst [vmem:[%s9309_s17 + $0x380] sm:$0xff] %v4642_v16 }
 0x6b8   : > { %4645 = vst [vmem:[%s9309_s17 + $0x388] sm:$0xff] %v4644_v10 }
 0x6b9   : > { %4647 = vst [vmem:[%s9309_s17 + $0x390] sm:$0xff] %v4646_v28 }
 0x6ba   : > { %4649 = vst [vmem:[%s9309_s17 + $0x398] sm:$0xff] %v4648_v17 }
 0x6bb   : > { %4651 = vst [vmem:[%s9309_s17 + $0x3a0] sm:$0xff] %v4650_v15 }
 0x6bc   : > { %4653 = vst [vmem:[%s9309_s17 + $0x3a8] sm:$0xff] %v4652_v37 }
 0x6bd   : > { %4655 = vst [vmem:[%s9309_s17 + $0x3b0] sm:$0xff] %v4654_v13 }
 0x6be   : > { %4657 = vst [vmem:[%s9309_s17 + $0x3b8] sm:$0xff] %v4656_v55 }
 0x6bf PF: > { %p16_p10 = scmp.ge.s32.totalorder %s5498_s13, 4   ;;  %s10124_s30 = smov %s5424_s10 }
 0x6c0   : > { %s10125_s10 = smov %s5509_s16  ;;  %s10126_s11 = smov %s5498_s13 }
 0x6c1   :  { %18 = sbr.rel (!%p16_p10) target bundleno = 2 (0x2), region = 137 }

</bundles_post_ra>
